<compile_context>
chip_gen: v7x
topology: tpu7x:2x2x1
jax: 0.10.0
libtpu: 0.0.40
codegen_flags: <defaults>
</compile_context>

<pallas_src>
import functools

import jax
import jax.numpy as jnp
from jax.experimental import pallas as pl
from jax.experimental.pallas import tpu as pltpu


def _round_up(x, m):
    return (x + m - 1) // m * m


def _pick_m_tiling(m, target=512):
    """M tile (multiple of 8, <= target) and padded M.

    Prefers >= 2 blocks on the (parallel) M axis so both v7x TensorCores get
    work; falls back to a single small block for tiny M.
    """
    m8 = _round_up(max(m, 8), 8)
    if m8 >= 2 * target:
        tm = target
    elif m8 >= 16:
        tm = _round_up((m8 + 1) // 2, 8)
    else:
        tm = m8
    return tm, _round_up(m8, tm)


_MM_PARAMS = pltpu.CompilerParams(
    dimension_semantics=("parallel",),
    vmem_limit_bytes=32 * 1024 * 1024,
)
_VMEM = pl.BlockSpec(memory_space=pltpu.MemorySpace.VMEM)


# ----------------------------------------------------------------------------
# Pallas kernels
# ----------------------------------------------------------------------------

def _mm_bn_kernel(p_ref, w_ref, b_ref, o_ref, *, relu):
    """im2col-matmul (BN scale pre-folded into w) + shift + optional ReLU."""
    y = jnp.dot(p_ref[...], w_ref[...], preferred_element_type=jnp.float32)
    y = y + b_ref[...]
    if relu:
        y = jnp.maximum(y, 0.0)
    o_ref[...] = y.astype(o_ref.dtype)


def _conv3_taps(xa_ref, xb_ref, w_ref):
    """Accumulate the three k=3 taps from tile + 8-row halo (f32 accumulator)."""
    tm = xa_ref.shape[0]
    x2 = jnp.concatenate([xa_ref[...], xb_ref[...]], axis=0)      # (tm+8, Cin)
    acc = jnp.dot(x2[0:tm], w_ref[0], preferred_element_type=jnp.float32)
    acc += jnp.dot(x2[1:tm + 1], w_ref[1], preferred_element_type=jnp.float32)
    acc += jnp.dot(x2[2:tm + 2], w_ref[2], preferred_element_type=jnp.float32)
    return acc


def _conv3_bn_kernel(xa_ref, xb_ref, w_ref, b_ref, o_ref, *, relu):
    y = _conv3_taps(xa_ref, xb_ref, w_ref) + b_ref[...]
    if relu:
        y = jnp.maximum(y, 0.0)
    o_ref[...] = y.astype(o_ref.dtype)


def _conv3_bn_add_relu_kernel(xa_ref, xb_ref, w_ref, b_ref, r_ref, o_ref):
    y = _conv3_taps(xa_ref, xb_ref, w_ref) + b_ref[...]
    y = y + r_ref[...].astype(jnp.float32)
    o_ref[...] = jnp.maximum(y, 0.0).astype(o_ref.dtype)


def _conv3_bn_ds_add_relu_kernel(xa_ref, xb_ref, w_ref, b_ref,
                                 xd_ref, wd_ref, bd_ref, o_ref):
    y = _conv3_taps(xa_ref, xb_ref, w_ref) + b_ref[...]
    yd = jnp.dot(xd_ref[...], wd_ref[...], preferred_element_type=jnp.float32)
    yd = yd + bd_ref[...]
    o_ref[...] = jnp.maximum(y + yd, 0.0).astype(o_ref.dtype)


def _maxpool_kernel(x_ref, o_ref, *, l_out, c):
    """MaxPool1d(k=3, s=2, p=1) for one batch element; bf16 (max is exact).

    x_ref: (1, half, 2*C) where row h holds padded positions 2h and 2h+1.
    """
    x = x_ref[...]
    a = x[:, 0:l_out, 0:c]          # padded position 2j
    b = x[:, 0:l_out, c:2 * c]      # padded position 2j + 1
    d = x[:, 1:1 + l_out, 0:c]      # padded position 2j + 2
    o_ref[...] = jnp.maximum(jnp.maximum(a, b), d)


def _head_kernel(x_ref, w_ref, b_ref, o_ref):
    """AdaptiveAvgPool1d(1) + Linear, fused; lane-padded output."""
    pooled = jnp.mean(x_ref[...].astype(jnp.float32), axis=1)       # (N, C)
    o_ref[...] = (jnp.dot(pooled.astype(jnp.bfloat16), w_ref[...],
                          preferred_element_type=jnp.float32)
                  + b_ref[...])


# ----------------------------------------------------------------------------
# Wrappers (glue: padding, BN folding, tiling, BlockSpecs)
# ----------------------------------------------------------------------------

def _fold_bn(bn, cout, eps=1e-5):
    gamma, beta, mean, var = bn
    scale = gamma / jnp.sqrt(var + eps)
    shift = beta - mean * scale
    return (scale.reshape(1, cout).astype(jnp.float32),
            shift.reshape(1, cout).astype(jnp.float32))


def _im2col(x, k, stride, padding):
    """x: (N, L, C) -> patches (N*L_out, K*C), matching conv weight order."""
    n, l, c = x.shape
    l_out = (l + 2 * padding - k) // stride + 1
    xp = jnp.pad(x, ((0, 0), (padding, padding), (0, 0)))
    stop = stride * (l_out - 1) + 1
    cols = [xp[:, t:t + stop:stride, :] for t in range(k)]          # (N, L_out, C)
    patches = jnp.stack(cols, axis=2)                               # (N, L_out, K, C)
    return patches.reshape(n * l_out, k * c), l_out


def conv_bn_im2col(x, w, bn, *, stride, padding, relu=True):
    """General Conv1d + BN (+ ReLU) via im2col.  Used only for the stem
    (k=7, s=2) and the three stride-2 block convs."""
    x = x.astype(jnp.bfloat16)
    n, _, cin = x.shape
    cout, _, k = w.shape
    assert cout % 128 == 0, "Cout must be a multiple of 128 for lane-dense tiles"

    patches, l_out = _im2col(x, k, stride, padding)                 # (m, K*Cin) bf16
    m = n * l_out
    kdim = k * cin
    kdim_pad = _round_up(kdim, 16)      # minimal sublane pad (bf16 packs 16 rows)

    scale, shift = _fold_bn(bn, cout)
    wmat = (jnp.transpose(w, (2, 1, 0)).reshape(kdim, cout) * scale)
    wmat = wmat.astype(jnp.bfloat16)
    if kdim_pad != kdim:                                            # stem only (7*23=161)
        patches = jnp.pad(patches, ((0, 0), (0, kdim_pad - kdim)))
        wmat = jnp.pad(wmat, ((0, kdim_pad - kdim), (0, 0)))

    tm, m_pad = _pick_m_tiling(m)
    if m_pad != m:
        patches = jnp.pad(patches, ((0, m_pad - m), (0, 0)))

    out = pl.pallas_call(
        functools.partial(_mm_bn_kernel, relu=relu),
        out_shape=jax.ShapeDtypeStruct((m_pad, cout), jnp.bfloat16),
        grid=(m_pad // tm,),
        in_specs=[
            pl.BlockSpec((tm, kdim_pad), lambda i: (i, 0)),
            pl.BlockSpec((kdim_pad, cout), lambda i: (0, 0)),       # VMEM-resident
            pl.BlockSpec((1, cout), lambda i: (0, 0)),              # VMEM-resident
        ],
        out_specs=pl.BlockSpec((tm, cout), lambda i: (i, 0)),
        compiler_params=_MM_PARAMS,
    )(patches, wmat, shift)
    return out[:m].reshape(n, l_out, cout)


def conv3_bn(x, w, bn, *, relu=True, residual=None, downsample=None):
    """Conv1d(k=3, s=1, p=1) + BN [+ residual | fused 1x1-downsample] [+ ReLU].

    No im2col: the padded activation is flattened per batch element (length
    L+2 so tap offsets are a pure row shift), and the kernel accumulates the
    three tap matmuls from the M tile plus an 8-row halo block, so each
    activation byte is read from HBM once.

    x: (N, L, Cin);  w: (Cout, Cin, 3);  bn: (gamma, beta, mean, var).
    residual:   (N, L, Cout) identity to add before the final ReLU.
    downsample: (x_ds, down_w, down_bn) -- 1x1 conv + BN residual, fused.
    """
    x = x.astype(jnp.bfloat16)
    n, l, cin = x.shape
    cout = w.shape[0]
    assert cin % 128 == 0 and cout % 128 == 0

    lp = l + 2                          # per-batch padded length
    mv = n * lp                         # flat rows (incl. 2 trailing garbage/batch)
    tm, m_pad = _pick_m_tiling(mv)
    rows = m_pad + tm                   # slack so the i+1 halo block is in range

    xflat = jnp.pad(x, ((0, 0), (1, 1), (0, 0))).reshape(mv, cin)
    xflat = jnp.pad(xflat, ((0, rows - mv), (0, 0)))

    scale, shift = _fold_bn(bn, cout)
    w3 = (jnp.transpose(w, (2, 1, 0)) * scale[None]).astype(jnp.bfloat16)  # (3,Cin,Cout)

    hb = tm // 8
    in_specs = [
        pl.BlockSpec((tm, cin), lambda i: (i, 0)),
        pl.BlockSpec((8, cin), lambda i: ((i + 1) * hb, 0)),        # 8-row halo
        pl.BlockSpec((3, cin, cout), lambda i: (0, 0, 0)),          # VMEM-resident
        pl.BlockSpec((1, cout), lambda i: (0, 0)),                  # VMEM-resident
    ]
    args = [xflat, xflat, w3, shift]

    if downsample is not None:
        x_ds, dw, dbn = downsample
        cd = x_ds.shape[-1]
        assert cd % 128 == 0
        xd = jnp.pad(x_ds.astype(jnp.bfloat16), ((0, 0), (0, 2), (0, 0)))
        xd = xd.reshape(mv, cd)
        xd = jnp.pad(xd, ((0, m_pad - mv), (0, 0)))
        dscale, dshift = _fold_bn(dbn, cout)
        dwmat = (jnp.transpose(dw, (2, 1, 0)).reshape(cd, cout) * dscale)
        dwmat = dwmat.astype(jnp.bfloat16)
        in_specs += [
            pl.BlockSpec((tm, cd), lambda i: (i, 0)),
            pl.BlockSpec((cd, cout), lambda i: (0, 0)),             # VMEM-resident
            pl.BlockSpec((1, cout), lambda i: (0, 0)),
        ]
        args += [xd, dwmat, dshift]
        kernel = _conv3_bn_ds_add_relu_kernel
    elif residual is not None:
        res = jnp.pad(residual.astype(jnp.bfloat16), ((0, 0), (0, 2), (0, 0)))
        res = res.reshape(mv, cout)
        res = jnp.pad(res, ((0, m_pad - mv), (0, 0)))
        in_specs.append(pl.BlockSpec((tm, cout), lambda i: (i, 0)))
        args.append(res)
        kernel = _conv3_bn_add_relu_kernel
    else:
        kernel = functools.partial(_conv3_bn_kernel, relu=relu)

    out = pl.pallas_call(
        kernel,
        out_shape=jax.ShapeDtypeStruct((m_pad, cout), jnp.bfloat16),
        grid=(m_pad // tm,),
        in_specs=in_specs,
        out_specs=pl.BlockSpec((tm, cout), lambda i: (i, 0)),
        compiler_params=_MM_PARAMS,
    )(*args)
    return out[:mv].reshape(n, lp, cout)[:, :l, :]


def maxpool1d_k3_s2_p1(x):
    """MaxPool1d(kernel_size=3, stride=2, padding=1).  x: (N, L, C) NLC.

    Note: pads with dtype-min; safe here (and exact in bf16) since the input
    is post-ReLU / any real data, and max needs no upcast.
    """
    n, l, c = x.shape
    l_out = (l - 1) // 2 + 1
    neg = float(jnp.finfo(x.dtype).min)
    pad_tail = 1 if l % 2 == 0 else 2           # make padded length even
    xp = jnp.pad(x, ((0, 0), (1, pad_tail), (0, 0)), constant_values=neg)
    half = (l + 1 + pad_tail) // 2
    xr = xp.reshape(n, half, 2 * c)             # free row-major reshape in HBM
    return pl.pallas_call(
        functools.partial(_maxpool_kernel, l_out=l_out, c=c),
        out_shape=jax.ShapeDtypeStruct((n, l_out, c), x.dtype),
        grid=(n,),
        in_specs=[pl.BlockSpec((1, half, 2 * c), lambda i: (i, 0, 0))],
        out_specs=pl.BlockSpec((1, l_out, c), lambda i: (i, 0, 0)),
        compiler_params=pltpu.CompilerParams(dimension_semantics=("parallel",)),
    )(xr)


def head(x, fc_w, fc_b):
    """AdaptiveAvgPool1d(1) + flatten + Linear.  x: (N, L, C)."""
    n, _, c = x.shape
    a = fc_w.shape[0]
    a_pad = _round_up(a, 128)                   # lane-dense output, slice outside
    w = jnp.zeros((c, a_pad), jnp.bfloat16).at[:, :a].set(
        fc_w.T.astype(jnp.bfloat16))
    b = jnp.zeros((1, a_pad), jnp.float32).at[:, :a].set(
        fc_b.astype(jnp.float32))
    out = pl.pallas_call(
        _head_kernel,
        out_shape=jax.ShapeDtypeStruct((n, a_pad), jnp.float32),
        in_specs=[_VMEM, _VMEM, _VMEM],
        out_specs=_VMEM,
    )(x.astype(jnp.bfloat16), w, b)
    return out[:, :a]


# ----------------------------------------------------------------------------
# Parameter init (deterministic, synthetic)
# ----------------------------------------------------------------------------

def _init_conv(key, cout, cin, k):
    fan_in = cin * k
    return (jax.random.normal(key, (cout, cin, k), jnp.float32)
            / jnp.sqrt(jnp.float32(fan_in)))


def _init_bn(key, c):
    k1, k2, k3, k4 = jax.random.split(key, 4)
    gamma = 1.0 + 0.1 * jax.random.normal(k1, (c,), jnp.float32)
    beta = 0.1 * jax.random.normal(k2, (c,), jnp.float32)
    mean = 0.1 * jax.random.normal(k3, (c,), jnp.float32)
    var = 1.0 + 0.1 * jnp.abs(jax.random.normal(k4, (c,), jnp.float32))
    return (gamma, beta, mean, var)


def init_resnet(key, inchannel=23, activity_num=55, layers=(1, 1, 1, 1)):
    keys = iter(jax.random.split(key, 128))
    params = {
        "conv1_w": _init_conv(next(keys), 128, inchannel, 7),
        "bn1": _init_bn(next(keys), 128),
    }
    inplanes = 128
    plan = [(128, layers[0], 1), (128, layers[1], 2),
            (256, layers[2], 2), (512, layers[3], 2)]
    all_layers = []
    for planes, blocks, stride in plan:
        layer_blocks = []
        for b in range(blocks):
            s = stride if b == 0 else 1
            bp = {
                "stride": s,
                "conv1_w": _init_conv(next(keys), planes, inplanes, 3),
                "bn1": _init_bn(next(keys), planes),
                "conv2_w": _init_conv(next(keys), planes, planes, 3),
                "bn2": _init_bn(next(keys), planes),
            }
            if s != 1 or inplanes != planes:       # downsample: conv1x1 + BN
                bp["down_w"] = _init_conv(next(keys), planes, inplanes, 1)
                bp["down_bn"] = _init_bn(next(keys), planes)
            inplanes = planes
            layer_blocks.append(bp)
        all_layers.append(layer_blocks)
    params["layers"] = all_layers
    params["fc_w"] = (jax.random.normal(next(keys), (activity_num, 512), jnp.float32)
                      / jnp.sqrt(jnp.float32(512)))
    params["fc_b"] = 0.01 * jax.random.normal(next(keys), (activity_num,), jnp.float32)
    return params


# ----------------------------------------------------------------------------
# Forward pass
# ----------------------------------------------------------------------------

def basic_block_forward(x, bp):
    s = bp["stride"]
    if s == 1:
        out = conv3_bn(x, bp["conv1_w"], bp["bn1"], relu=True)
    else:
        out = conv_bn_im2col(x, bp["conv1_w"], bp["bn1"],
                             stride=s, padding=1, relu=True)
    if "down_w" in bp:
        # Fuse the 1x1 downsample conv + BN into the block-tail kernel.
        x_ds = x[:, ::s, :]
        out = conv3_bn(out, bp["conv2_w"], bp["bn2"],
                       downsample=(x_ds, bp["down_w"], bp["down_bn"]))
    else:
        out = conv3_bn(out, bp["conv2_w"], bp["bn2"], residual=x)
    return out


def resnet_forward(params, x_ncl):
    x = jnp.transpose(x_ncl, (0, 2, 1))                        # NCL -> NLC
    x = conv_bn_im2col(x, params["conv1_w"], params["bn1"],
                       stride=2, padding=3, relu=True)         # conv1 + bn1 + relu
    x = maxpool1d_k3_s2_p1(x)                                  # maxpool
    for layer in params["layers"]:                             # layer1..layer4
        for bp in layer:
            x = basic_block_forward(x, bp)
    return head(x, params["fc_w"], params["fc_b"])             # avgpool + fc (logits)


# ----------------------------------------------------------------------------
# Main
# ----------------------------------------------------------------------------

if __name__ == "__main__":
    key = jax.random.PRNGKey(0)
    k_param, k_input = jax.random.split(key)

    params = init_resnet(k_param, inchannel=23, activity_num=55,
                         layers=(1, 1, 1, 1))

    # Small but shape-consistent input: (batch=2, channels=23, length=64), NCL.
    x = jax.random.normal(k_input, (2, 23, 64), jnp.float32)

    # Close over params (strides stay static; weight repacking constant-folds).
    fwd = jax.jit(functools.partial(resnet_forward, params))
    out = jax.block_until_ready(fwd(x))

    assert out.shape == (2, 55), out.shape
    assert bool(jnp.all(jnp.isfinite(out)))
    print("KERNEL_OK")
</pallas_src>

<mosaic_0001>
module attributes {stable_mosaic.version = 11 : i64} {
  func.func @_mm_bn_kernel(%arg0: i32, %arg1: memref<32x176xbf16, #tpu.memory_space<vmem>>, %arg2: memref<176x128xbf16, #tpu.memory_space<vmem>>, %arg3: memref<1x128xf32, #tpu.memory_space<vmem>>, %arg4: memref<32x128xbf16, #tpu.memory_space<vmem>>) attributes {dimension_semantics = [#tpu.dimension_semantics<parallel>], iteration_bounds = array<i64: 2>, scalar_prefetch = 0 : i64, scratch_operands = 0 : i64, tpu.core_type = #tpu.core_type<tc>, window_params = [{transform_indices = @transform_0, window_bounds = array<i64: 32, 176>}, {pipeline_mode = #tpu.pipeline_mode<synchronous>, transform_indices = @transform_1, window_bounds = array<i64: 176, 128>}, {pipeline_mode = #tpu.pipeline_mode<synchronous>, transform_indices = @transform_2, window_bounds = array<i64: 1, 128>}, {transform_indices = @transform_3, window_bounds = array<i64: 32, 128>}]} {
    %c0 = arith.constant 0 : index
    %c0_0 = arith.constant 0 : index
    %0 = vector.load %arg1[%c0, %c0_0] : memref<32x176xbf16, #tpu.memory_space<vmem>>, vector<32x176xbf16>
    %c0_1 = arith.constant 0 : index
    %c0_2 = arith.constant 0 : index
    %1 = vector.load %arg2[%c0_1, %c0_2] : memref<176x128xbf16, #tpu.memory_space<vmem>>, vector<176x128xbf16>
    %cst = arith.constant dense<0.000000e+00> : vector<32x128xf32>
    %2 = tpu.matmul %0, %1, %cst {dimension_numbers = #tpu.dot_dimension_numbers<[1], [0], [0], [1], [0, 0, 1, 1], [], []>} : vector<32x176xbf16>, vector<176x128xbf16>, vector<32x128xf32> -> vector<32x128xf32>
    %c0_3 = arith.constant 0 : index
    %c0_4 = arith.constant 0 : index
    %3 = vector.load %arg3[%c0_3, %c0_4] : memref<1x128xf32, #tpu.memory_space<vmem>>, vector<1x128xf32>
    %4 = vector.broadcast %3 : vector<1x128xf32> to vector<32x128xf32>
    %5 = arith.addf %2, %4 : vector<32x128xf32>
    %cst_5 = arith.constant 0.000000e+00 : f32
    %6 = vector.broadcast %cst_5 : f32 to vector<32x128xf32>
    %7 = arith.maximumf %5, %6 : vector<32x128xf32>
    %8 = arith.truncf %7 : vector<32x128xf32> to vector<32x128xbf16>
    %c0_6 = arith.constant 0 : index
    %c0_7 = arith.constant 0 : index
    %9 = vector.load %arg4[%c0_6, %c0_7] : memref<32x128xbf16, #tpu.memory_space<vmem>>, vector<32x128xbf16>
    tpu.vector_store %arg4[%c0_6, %c0_7], %8 {strides = array<i32>} : memref<32x128xbf16, #tpu.memory_space<vmem>>, vector<32x128xbf16>,
    return
  }
  func.func @transform_0(%arg0: i32) -> (i32, i32) {
    %c0_i32 = arith.constant 0 : i32
    %c0_i32_0 = arith.constant 0 : i32
    return %arg0, %c0_i32 : i32, i32
  }
  func.func @transform_1(%arg0: i32) -> (i32, i32) {
    %c0_i32 = arith.constant 0 : i32
    %c0_i32_0 = arith.constant 0 : i32
    %c0_i32_1 = arith.constant 0 : i32
    return %c0_i32, %c0_i32_0 : i32, i32
  }
  func.func @transform_2(%arg0: i32) -> (i32, i32) {
    %c0_i32 = arith.constant 0 : i32
    %c0_i32_0 = arith.constant 0 : i32
    %c0_i32_1 = arith.constant 0 : i32
    return %c0_i32, %c0_i32_0 : i32, i32
  }
  func.func @transform_3(%arg0: i32) -> (i32, i32) {
    %c0_i32 = arith.constant 0 : i32
    %c0_i32_0 = arith.constant 0 : i32
    return %arg0, %c0_i32 : i32, i32
  }
}

module attributes {stable_mosaic.version = 11 : i64} {
  func.func @_maxpool_kernel(%arg0: i32, %arg1: memref<1x17x256xbf16, #tpu.memory_space<vmem>>, %arg2: memref<1x16x128xbf16, #tpu.memory_space<vmem>>) attributes {dimension_semantics = [#tpu.dimension_semantics<parallel>], iteration_bounds = array<i64: 2>, scalar_prefetch = 0 : i64, scratch_operands = 0 : i64, tpu.core_type = #tpu.core_type<tc>, window_params = [{transform_indices = @transform_0, window_bounds = array<i64: 1, 17, 256>}, {transform_indices = @transform_1, window_bounds = array<i64: 1, 16, 128>}]} {
    %c0 = arith.constant 0 : index
    %c0_0 = arith.constant 0 : index
    %c0_1 = arith.constant 0 : index
    %0 = vector.load %arg1[%c0, %c0_0, %c0_1] : memref<1x17x256xbf16, #tpu.memory_space<vmem>>, vector<1x17x256xbf16>
    %1 = vector.extract_strided_slice %0 {offsets = [0, 0, 0], sizes = [1, 16, 128], strides = [1, 1, 1]} : vector<1x17x256xbf16> to vector<1x16x128xbf16>
    %2 = vector.extract_strided_slice %0 {offsets = [0, 0, 128], sizes = [1, 16, 128], strides = [1, 1, 1]} : vector<1x17x256xbf16> to vector<1x16x128xbf16>
    %3 = vector.extract_strided_slice %0 {offsets = [0, 1, 0], sizes = [1, 16, 128], strides = [1, 1, 1]} : vector<1x17x256xbf16> to vector<1x16x128xbf16>
    %4 = arith.maximumf %1, %2 : vector<1x16x128xbf16>
    %5 = arith.maximumf %4, %3 : vector<1x16x128xbf16>
    %c0_2 = arith.constant 0 : index
    %c0_3 = arith.constant 0 : index
    %c0_4 = arith.constant 0 : index
    %6 = vector.load %arg2[%c0_2, %c0_3, %c0_4] : memref<1x16x128xbf16, #tpu.memory_space<vmem>>, vector<1x16x128xbf16>
    tpu.vector_store %arg2[%c0_2, %c0_3, %c0_4], %5 {strides = array<i32>} : memref<1x16x128xbf16, #tpu.memory_space<vmem>>, vector<1x16x128xbf16>,
    return
  }
  func.func @transform_0(%arg0: i32) -> (i32, i32, i32) {
    %c0_i32 = arith.constant 0 : i32
    %c0_i32_0 = arith.constant 0 : i32
    %c0_i32_1 = arith.constant 0 : i32
    return %arg0, %c0_i32, %c0_i32_0 : i32, i32, i32
  }
  func.func @transform_1(%arg0: i32) -> (i32, i32, i32) {
    %c0_i32 = arith.constant 0 : i32
    %c0_i32_0 = arith.constant 0 : i32
    %c0_i32_1 = arith.constant 0 : i32
    return %arg0, %c0_i32, %c0_i32_0 : i32, i32, i32
  }
}

module attributes {stable_mosaic.version = 11 : i64} {
  func.func @_conv3_bn_kernel(%arg0: i32, %arg1: memref<24x128xbf16, #tpu.memory_space<vmem>>, %arg2: memref<8x128xbf16, #tpu.memory_space<vmem>>, %arg3: memref<3x128x128xbf16, #tpu.memory_space<vmem>>, %arg4: memref<1x128xf32, #tpu.memory_space<vmem>>, %arg5: memref<24x128xbf16, #tpu.memory_space<vmem>>) attributes {dimension_semantics = [#tpu.dimension_semantics<parallel>], iteration_bounds = array<i64: 2>, scalar_prefetch = 0 : i64, scratch_operands = 0 : i64, tpu.core_type = #tpu.core_type<tc>, window_params = [{transform_indices = @transform_0, window_bounds = array<i64: 24, 128>}, {transform_indices = @transform_1, window_bounds = array<i64: 8, 128>}, {pipeline_mode = #tpu.pipeline_mode<synchronous>, transform_indices = @transform_2, window_bounds = array<i64: 3, 128, 128>}, {pipeline_mode = #tpu.pipeline_mode<synchronous>, transform_indices = @transform_3, window_bounds = array<i64: 1, 128>}, {transform_indices = @transform_4, window_bounds = array<i64: 24, 128>}]} {
    %c0 = arith.constant 0 : index
    %c0_0 = arith.constant 0 : index
    %0 = vector.load %arg1[%c0, %c0_0] : memref<24x128xbf16, #tpu.memory_space<vmem>>, vector<24x128xbf16>
    %c0_1 = arith.constant 0 : index
    %c0_2 = arith.constant 0 : index
    %1 = vector.load %arg2[%c0_1, %c0_2] : memref<8x128xbf16, #tpu.memory_space<vmem>>, vector<8x128xbf16>
    %2 = tpu.concatenate %0, %1 in 0 : vector<24x128xbf16>, vector<8x128xbf16> -> vector<32x128xbf16>
    %3 = vector.extract_strided_slice %2 {offsets = [0, 0], sizes = [24, 128], strides = [1, 1]} : vector<32x128xbf16> to vector<24x128xbf16>
    %c0_3 = arith.constant 0 : index
    %c0_4 = arith.constant 0 : index
    %c0_5 = arith.constant 0 : index
    %4 = vector.load %arg3[%c0_3, %c0_4, %c0_5] : memref<3x128x128xbf16, #tpu.memory_space<vmem>>, vector<1x128x128xbf16>
    %5 = vector.shape_cast %4 : vector<1x128x128xbf16> to vector<128x128xbf16>
    %cst = arith.constant dense<0.000000e+00> : vector<24x128xf32>
    %6 = tpu.matmul %3, %5, %cst {dimension_numbers = #tpu.dot_dimension_numbers<[1], [0], [0], [1], [0, 0, 1, 1], [], []>} : vector<24x128xbf16>, vector<128x128xbf16>, vector<24x128xf32> -> vector<24x128xf32>
    %7 = vector.extract_strided_slice %2 {offsets = [1, 0], sizes = [24, 128], strides = [1, 1]} : vector<32x128xbf16> to vector<24x128xbf16>
    %c1 = arith.constant 1 : index
    %c0_6 = arith.constant 0 : index
    %c0_7 = arith.constant 0 : index
    %8 = vector.load %arg3[%c1, %c0_6, %c0_7] : memref<3x128x128xbf16, #tpu.memory_space<vmem>>, vector<1x128x128xbf16>
    %9 = vector.shape_cast %8 : vector<1x128x128xbf16> to vector<128x128xbf16>
    %cst_8 = arith.constant dense<0.000000e+00> : vector<24x128xf32>
    %10 = tpu.matmul %7, %9, %cst_8 {dimension_numbers = #tpu.dot_dimension_numbers<[1], [0], [0], [1], [0, 0, 1, 1], [], []>} : vector<24x128xbf16>, vector<128x128xbf16>, vector<24x128xf32> -> vector<24x128xf32>
    %11 = arith.addf %6, %10 : vector<24x128xf32>
    %12 = vector.extract_strided_slice %2 {offsets = [2, 0], sizes = [24, 128], strides = [1, 1]} : vector<32x128xbf16> to vector<24x128xbf16>
    %c2 = arith.constant 2 : index
    %c0_9 = arith.constant 0 : index
    %c0_10 = arith.constant 0 : index
    %13 = vector.load %arg3[%c2, %c0_9, %c0_10] : memref<3x128x128xbf16, #tpu.memory_space<vmem>>, vector<1x128x128xbf16>
    %14 = vector.shape_cast %13 : vector<1x128x128xbf16> to vector<128x128xbf16>
    %cst_11 = arith.constant dense<0.000000e+00> : vector<24x128xf32>
    %15 = tpu.matmul %12, %14, %cst_11 {dimension_numbers = #tpu.dot_dimension_numbers<[1], [0], [0], [1], [0, 0, 1, 1], [], []>} : vector<24x128xbf16>, vector<128x128xbf16>, vector<24x128xf32> -> vector<24x128xf32>
    %16 = arith.addf %11, %15 : vector<24x128xf32>
    %c0_12 = arith.constant 0 : index
    %c0_13 = arith.constant 0 : index
    %17 = vector.load %arg4[%c0_12, %c0_13] : memref<1x128xf32, #tpu.memory_space<vmem>>, vector<1x128xf32>
    %18 = vector.broadcast %17 : vector<1x128xf32> to vector<24x128xf32>
    %19 = arith.addf %16, %18 : vector<24x128xf32>
    %cst_14 = arith.constant 0.000000e+00 : f32
    %20 = vector.broadcast %cst_14 : f32 to vector<24x128xf32>
    %21 = arith.maximumf %19, %20 : vector<24x128xf32>
    %22 = arith.truncf %21 : vector<24x128xf32> to vector<24x128xbf16>
    %c0_15 = arith.constant 0 : index
    %c0_16 = arith.constant 0 : index
    %23 = vector.load %arg5[%c0_15, %c0_16] : memref<24x128xbf16, #tpu.memory_space<vmem>>, vector<24x128xbf16>
    tpu.vector_store %arg5[%c0_15, %c0_16], %22 {strides = array<i32>} : memref<24x128xbf16, #tpu.memory_space<vmem>>, vector<24x128xbf16>,
    return
  }
  func.func @transform_0(%arg0: i32) -> (i32, i32) {
    %c0_i32 = arith.constant 0 : i32
    %c0_i32_0 = arith.constant 0 : i32
    return %arg0, %c0_i32 : i32, i32
  }
  func.func @transform_1(%arg0: i32) -> (i32, i32) {
    %c1_i32 = arith.constant 1 : i32
    %0 = arith.addi %arg0, %c1_i32 : i32
    %c3_i32 = arith.constant 3 : i32
    %1 = arith.muli %0, %c3_i32 : i32
    %c0_i32 = arith.constant 0 : i32
    %c0_i32_0 = arith.constant 0 : i32
    return %1, %c0_i32 : i32, i32
  }
  func.func @transform_2(%arg0: i32) -> (i32, i32, i32) {
    %c0_i32 = arith.constant 0 : i32
    %c0_i32_0 = arith.constant 0 : i32
    %c0_i32_1 = arith.constant 0 : i32
    %c0_i32_2 = arith.constant 0 : i32
    return %c0_i32, %c0_i32_0, %c0_i32_1 : i32, i32, i32
  }
  func.func @transform_3(%arg0: i32) -> (i32, i32) {
    %c0_i32 = arith.constant 0 : i32
    %c0_i32_0 = arith.constant 0 : i32
    %c0_i32_1 = arith.constant 0 : i32
    return %c0_i32, %c0_i32_0 : i32, i32
  }
  func.func @transform_4(%arg0: i32) -> (i32, i32) {
    %c0_i32 = arith.constant 0 : i32
    %c0_i32_0 = arith.constant 0 : i32
    return %arg0, %c0_i32 : i32, i32
  }
}

module attributes {stable_mosaic.version = 11 : i64} {
  func.func @_mm_bn_kernel(%arg0: i32, %arg1: memref<8x384xbf16, #tpu.memory_space<vmem>>, %arg2: memref<384x128xbf16, #tpu.memory_space<vmem>>, %arg3: memref<1x128xf32, #tpu.memory_space<vmem>>, %arg4: memref<8x128xbf16, #tpu.memory_space<vmem>>) attributes {dimension_semantics = [#tpu.dimension_semantics<parallel>], iteration_bounds = array<i64: 2>, scalar_prefetch = 0 : i64, scratch_operands = 0 : i64, tpu.core_type = #tpu.core_type<tc>, window_params = [{transform_indices = @transform_0, window_bounds = array<i64: 8, 384>}, {pipeline_mode = #tpu.pipeline_mode<synchronous>, transform_indices = @transform_1, window_bounds = array<i64: 384, 128>}, {pipeline_mode = #tpu.pipeline_mode<synchronous>, transform_indices = @transform_2, window_bounds = array<i64: 1, 128>}, {transform_indices = @transform_3, window_bounds = array<i64: 8, 128>}]} {
    %c0 = arith.constant 0 : index
    %c0_0 = arith.constant 0 : index
    %0 = vector.load %arg1[%c0, %c0_0] : memref<8x384xbf16, #tpu.memory_space<vmem>>, vector<8x384xbf16>
    %c0_1 = arith.constant 0 : index
    %c0_2 = arith.constant 0 : index
    %1 = vector.load %arg2[%c0_1, %c0_2] : memref<384x128xbf16, #tpu.memory_space<vmem>>, vector<384x128xbf16>
    %cst = arith.constant dense<0.000000e+00> : vector<8x128xf32>
    %2 = tpu.matmul %0, %1, %cst {dimension_numbers = #tpu.dot_dimension_numbers<[1], [0], [0], [1], [0, 0, 1, 1], [], []>} : vector<8x384xbf16>, vector<384x128xbf16>, vector<8x128xf32> -> vector<8x128xf32>
    %c0_3 = arith.constant 0 : index
    %c0_4 = arith.constant 0 : index
    %3 = vector.load %arg3[%c0_3, %c0_4] : memref<1x128xf32, #tpu.memory_space<vmem>>, vector<1x128xf32>
    %4 = vector.broadcast %3 : vector<1x128xf32> to vector<8x128xf32>
    %5 = arith.addf %2, %4 : vector<8x128xf32>
    %cst_5 = arith.constant 0.000000e+00 : f32
    %6 = vector.broadcast %cst_5 : f32 to vector<8x128xf32>
    %7 = arith.maximumf %5, %6 : vector<8x128xf32>
    %8 = arith.truncf %7 : vector<8x128xf32> to vector<8x128xbf16>
    %c0_6 = arith.constant 0 : index
    %c0_7 = arith.constant 0 : index
    %9 = vector.load %arg4[%c0_6, %c0_7] : memref<8x128xbf16, #tpu.memory_space<vmem>>, vector<8x128xbf16>
    tpu.vector_store %arg4[%c0_6, %c0_7], %8 {strides = array<i32>} : memref<8x128xbf16, #tpu.memory_space<vmem>>, vector<8x128xbf16>,
    return
  }
  func.func @transform_0(%arg0: i32) -> (i32, i32) {
    %c0_i32 = arith.constant 0 : i32
    %c0_i32_0 = arith.constant 0 : i32
    return %arg0, %c0_i32 : i32, i32
  }
  func.func @transform_1(%arg0: i32) -> (i32, i32) {
    %c0_i32 = arith.constant 0 : i32
    %c0_i32_0 = arith.constant 0 : i32
    %c0_i32_1 = arith.constant 0 : i32
    return %c0_i32, %c0_i32_0 : i32, i32
  }
  func.func @transform_2(%arg0: i32) -> (i32, i32) {
    %c0_i32 = arith.constant 0 : i32
    %c0_i32_0 = arith.constant 0 : i32
    %c0_i32_1 = arith.constant 0 : i32
    return %c0_i32, %c0_i32_0 : i32, i32
  }
  func.func @transform_3(%arg0: i32) -> (i32, i32) {
    %c0_i32 = arith.constant 0 : i32
    %c0_i32_0 = arith.constant 0 : i32
    return %arg0, %c0_i32 : i32, i32
  }
}

module attributes {stable_mosaic.version = 11 : i64} {
  func.func @_conv3_bn_add_relu_kernel(%arg0: i32, %arg1: memref<24x128xbf16, #tpu.memory_space<vmem>>, %arg2: memref<8x128xbf16, #tpu.memory_space<vmem>>, %arg3: memref<3x128x128xbf16, #tpu.memory_space<vmem>>, %arg4: memref<1x128xf32, #tpu.memory_space<vmem>>, %arg5: memref<24x128xbf16, #tpu.memory_space<vmem>>, %arg6: memref<24x128xbf16, #tpu.memory_space<vmem>>) attributes {dimension_semantics = [#tpu.dimension_semantics<parallel>], iteration_bounds = array<i64: 2>, scalar_prefetch = 0 : i64, scratch_operands = 0 : i64, tpu.core_type = #tpu.core_type<tc>, window_params = [{transform_indices = @transform_0, window_bounds = array<i64: 24, 128>}, {transform_indices = @transform_1, window_bounds = array<i64: 8, 128>}, {pipeline_mode = #tpu.pipeline_mode<synchronous>, transform_indices = @transform_2, window_bounds = array<i64: 3, 128, 128>}, {pipeline_mode = #tpu.pipeline_mode<synchronous>, transform_indices = @transform_3, window_bounds = array<i64: 1, 128>}, {transform_indices = @transform_4, window_bounds = array<i64: 24, 128>}, {transform_indices = @transform_5, window_bounds = array<i64: 24, 128>}]} {
    %c0 = arith.constant 0 : index
    %c0_0 = arith.constant 0 : index
    %0 = vector.load %arg1[%c0, %c0_0] : memref<24x128xbf16, #tpu.memory_space<vmem>>, vector<24x128xbf16>
    %c0_1 = arith.constant 0 : index
    %c0_2 = arith.constant 0 : index
    %1 = vector.load %arg2[%c0_1, %c0_2] : memref<8x128xbf16, #tpu.memory_space<vmem>>, vector<8x128xbf16>
    %2 = tpu.concatenate %0, %1 in 0 : vector<24x128xbf16>, vector<8x128xbf16> -> vector<32x128xbf16>
    %3 = vector.extract_strided_slice %2 {offsets = [0, 0], sizes = [24, 128], strides = [1, 1]} : vector<32x128xbf16> to vector<24x128xbf16>
    %c0_3 = arith.constant 0 : index
    %c0_4 = arith.constant 0 : index
    %c0_5 = arith.constant 0 : index
    %4 = vector.load %arg3[%c0_3, %c0_4, %c0_5] : memref<3x128x128xbf16, #tpu.memory_space<vmem>>, vector<1x128x128xbf16>
    %5 = vector.shape_cast %4 : vector<1x128x128xbf16> to vector<128x128xbf16>
    %cst = arith.constant dense<0.000000e+00> : vector<24x128xf32>
    %6 = tpu.matmul %3, %5, %cst {dimension_numbers = #tpu.dot_dimension_numbers<[1], [0], [0], [1], [0, 0, 1, 1], [], []>} : vector<24x128xbf16>, vector<128x128xbf16>, vector<24x128xf32> -> vector<24x128xf32>
    %7 = vector.extract_strided_slice %2 {offsets = [1, 0], sizes = [24, 128], strides = [1, 1]} : vector<32x128xbf16> to vector<24x128xbf16>
    %c1 = arith.constant 1 : index
    %c0_6 = arith.constant 0 : index
    %c0_7 = arith.constant 0 : index
    %8 = vector.load %arg3[%c1, %c0_6, %c0_7] : memref<3x128x128xbf16, #tpu.memory_space<vmem>>, vector<1x128x128xbf16>
    %9 = vector.shape_cast %8 : vector<1x128x128xbf16> to vector<128x128xbf16>
    %cst_8 = arith.constant dense<0.000000e+00> : vector<24x128xf32>
    %10 = tpu.matmul %7, %9, %cst_8 {dimension_numbers = #tpu.dot_dimension_numbers<[1], [0], [0], [1], [0, 0, 1, 1], [], []>} : vector<24x128xbf16>, vector<128x128xbf16>, vector<24x128xf32> -> vector<24x128xf32>
    %11 = arith.addf %6, %10 : vector<24x128xf32>
    %12 = vector.extract_strided_slice %2 {offsets = [2, 0], sizes = [24, 128], strides = [1, 1]} : vector<32x128xbf16> to vector<24x128xbf16>
    %c2 = arith.constant 2 : index
    %c0_9 = arith.constant 0 : index
    %c0_10 = arith.constant 0 : index
    %13 = vector.load %arg3[%c2, %c0_9, %c0_10] : memref<3x128x128xbf16, #tpu.memory_space<vmem>>, vector<1x128x128xbf16>
    %14 = vector.shape_cast %13 : vector<1x128x128xbf16> to vector<128x128xbf16>
    %cst_11 = arith.constant dense<0.000000e+00> : vector<24x128xf32>
    %15 = tpu.matmul %12, %14, %cst_11 {dimension_numbers = #tpu.dot_dimension_numbers<[1], [0], [0], [1], [0, 0, 1, 1], [], []>} : vector<24x128xbf16>, vector<128x128xbf16>, vector<24x128xf32> -> vector<24x128xf32>
    %16 = arith.addf %11, %15 : vector<24x128xf32>
    %c0_12 = arith.constant 0 : index
    %c0_13 = arith.constant 0 : index
    %17 = vector.load %arg4[%c0_12, %c0_13] : memref<1x128xf32, #tpu.memory_space<vmem>>, vector<1x128xf32>
    %18 = vector.broadcast %17 : vector<1x128xf32> to vector<24x128xf32>
    %19 = arith.addf %16, %18 : vector<24x128xf32>
    %c0_14 = arith.constant 0 : index
    %c0_15 = arith.constant 0 : index
    %20 = vector.load %arg5[%c0_14, %c0_15] : memref<24x128xbf16, #tpu.memory_space<vmem>>, vector<24x128xbf16>
    %21 = arith.extf %20 : vector<24x128xbf16> to vector<24x128xf32>
    %22 = arith.addf %19, %21 : vector<24x128xf32>
    %cst_16 = arith.constant 0.000000e+00 : f32
    %23 = vector.broadcast %cst_16 : f32 to vector<24x128xf32>
    %24 = arith.maximumf %22, %23 : vector<24x128xf32>
    %25 = arith.truncf %24 : vector<24x128xf32> to vector<24x128xbf16>
    %c0_17 = arith.constant 0 : index
    %c0_18 = arith.constant 0 : index
    %26 = vector.load %arg6[%c0_17, %c0_18] : memref<24x128xbf16, #tpu.memory_space<vmem>>, vector<24x128xbf16>
    tpu.vector_store %arg6[%c0_17, %c0_18], %25 {strides = array<i32>} : memref<24x128xbf16, #tpu.memory_space<vmem>>, vector<24x128xbf16>,
    return
  }
  func.func @transform_0(%arg0: i32) -> (i32, i32) {
    %c0_i32 = arith.constant 0 : i32
    %c0_i32_0 = arith.constant 0 : i32
    return %arg0, %c0_i32 : i32, i32
  }
  func.func @transform_1(%arg0: i32) -> (i32, i32) {
    %c1_i32 = arith.constant 1 : i32
    %0 = arith.addi %arg0, %c1_i32 : i32
    %c3_i32 = arith.constant 3 : i32
    %1 = arith.muli %0, %c3_i32 : i32
    %c0_i32 = arith.constant 0 : i32
    %c0_i32_0 = arith.constant 0 : i32
    return %1, %c0_i32 : i32, i32
  }
  func.func @transform_2(%arg0: i32) -> (i32, i32, i32) {
    %c0_i32 = arith.constant 0 : i32
    %c0_i32_0 = arith.constant 0 : i32
    %c0_i32_1 = arith.constant 0 : i32
    %c0_i32_2 = arith.constant 0 : i32
    return %c0_i32, %c0_i32_0, %c0_i32_1 : i32, i32, i32
  }
  func.func @transform_3(%arg0: i32) -> (i32, i32) {
    %c0_i32 = arith.constant 0 : i32
    %c0_i32_0 = arith.constant 0 : i32
    %c0_i32_1 = arith.constant 0 : i32
    return %c0_i32, %c0_i32_0 : i32, i32
  }
  func.func @transform_4(%arg0: i32) -> (i32, i32) {
    %c0_i32 = arith.constant 0 : i32
    %c0_i32_0 = arith.constant 0 : i32
    return %arg0, %c0_i32 : i32, i32
  }
  func.func @transform_5(%arg0: i32) -> (i32, i32) {
    %c0_i32 = arith.constant 0 : i32
    %c0_i32_0 = arith.constant 0 : i32
    return %arg0, %c0_i32 : i32, i32
  }
}

module attributes {stable_mosaic.version = 11 : i64} {
  func.func @_conv3_bn_ds_add_relu_kernel(%arg0: i32, %arg1: memref<16x128xbf16, #tpu.memory_space<vmem>>, %arg2: memref<8x128xbf16, #tpu.memory_space<vmem>>, %arg3: memref<3x128x128xbf16, #tpu.memory_space<vmem>>, %arg4: memref<1x128xf32, #tpu.memory_space<vmem>>, %arg5: memref<16x128xbf16, #tpu.memory_space<vmem>>, %arg6: memref<128x128xbf16, #tpu.memory_space<vmem>>, %arg7: memref<1x128xf32, #tpu.memory_space<vmem>>, %arg8: memref<16x128xbf16, #tpu.memory_space<vmem>>) attributes {dimension_semantics = [#tpu.dimension_semantics<parallel>], iteration_bounds = array<i64: 2>, scalar_prefetch = 0 : i64, scratch_operands = 0 : i64, tpu.core_type = #tpu.core_type<tc>, window_params = [{transform_indices = @transform_0, window_bounds = array<i64: 16, 128>}, {transform_indices = @transform_1, window_bounds = array<i64: 8, 128>}, {pipeline_mode = #tpu.pipeline_mode<synchronous>, transform_indices = @transform_2, window_bounds = array<i64: 3, 128, 128>}, {pipeline_mode = #tpu.pipeline_mode<synchronous>, transform_indices = @transform_3, window_bounds = array<i64: 1, 128>}, {transform_indices = @transform_4, window_bounds = array<i64: 16, 128>}, {pipeline_mode = #tpu.pipeline_mode<synchronous>, transform_indices = @transform_5, window_bounds = array<i64: 128, 128>}, {pipeline_mode = #tpu.pipeline_mode<synchronous>, transform_indices = @transform_6, window_bounds = array<i64: 1, 128>}, {transform_indices = @transform_7, window_bounds = array<i64: 16, 128>}]} {
    %c0 = arith.constant 0 : index
    %c0_0 = arith.constant 0 : index
    %0 = vector.load %arg1[%c0, %c0_0] : memref<16x128xbf16, #tpu.memory_space<vmem>>, vector<16x128xbf16>
    %c0_1 = arith.constant 0 : index
    %c0_2 = arith.constant 0 : index
    %1 = vector.load %arg2[%c0_1, %c0_2] : memref<8x128xbf16, #tpu.memory_space<vmem>>, vector<8x128xbf16>
    %2 = tpu.concatenate %0, %1 in 0 : vector<16x128xbf16>, vector<8x128xbf16> -> vector<24x128xbf16>
    %3 = vector.extract_strided_slice %2 {offsets = [0, 0], sizes = [16, 128], strides = [1, 1]} : vector<24x128xbf16> to vector<16x128xbf16>
    %c0_3 = arith.constant 0 : index
    %c0_4 = arith.constant 0 : index
    %c0_5 = arith.constant 0 : index
    %4 = vector.load %arg3[%c0_3, %c0_4, %c0_5] : memref<3x128x128xbf16, #tpu.memory_space<vmem>>, vector<1x128x128xbf16>
    %5 = vector.shape_cast %4 : vector<1x128x128xbf16> to vector<128x128xbf16>
    %cst = arith.constant dense<0.000000e+00> : vector<16x128xf32>
    %6 = tpu.matmul %3, %5, %cst {dimension_numbers = #tpu.dot_dimension_numbers<[1], [0], [0], [1], [0, 0, 1, 1], [], []>} : vector<16x128xbf16>, vector<128x128xbf16>, vector<16x128xf32> -> vector<16x128xf32>
    %7 = vector.extract_strided_slice %2 {offsets = [1, 0], sizes = [16, 128], strides = [1, 1]} : vector<24x128xbf16> to vector<16x128xbf16>
    %c1 = arith.constant 1 : index
    %c0_6 = arith.constant 0 : index
    %c0_7 = arith.constant 0 : index
    %8 = vector.load %arg3[%c1, %c0_6, %c0_7] : memref<3x128x128xbf16, #tpu.memory_space<vmem>>, vector<1x128x128xbf16>
    %9 = vector.shape_cast %8 : vector<1x128x128xbf16> to vector<128x128xbf16>
    %cst_8 = arith.constant dense<0.000000e+00> : vector<16x128xf32>
    %10 = tpu.matmul %7, %9, %cst_8 {dimension_numbers = #tpu.dot_dimension_numbers<[1], [0], [0], [1], [0, 0, 1, 1], [], []>} : vector<16x128xbf16>, vector<128x128xbf16>, vector<16x128xf32> -> vector<16x128xf32>
    %11 = arith.addf %6, %10 : vector<16x128xf32>
    %12 = vector.extract_strided_slice %2 {offsets = [2, 0], sizes = [16, 128], strides = [1, 1]} : vector<24x128xbf16> to vector<16x128xbf16>
    %c2 = arith.constant 2 : index
    %c0_9 = arith.constant 0 : index
    %c0_10 = arith.constant 0 : index
    %13 = vector.load %arg3[%c2, %c0_9, %c0_10] : memref<3x128x128xbf16, #tpu.memory_space<vmem>>, vector<1x128x128xbf16>
    %14 = vector.shape_cast %13 : vector<1x128x128xbf16> to vector<128x128xbf16>
    %cst_11 = arith.constant dense<0.000000e+00> : vector<16x128xf32>
    %15 = tpu.matmul %12, %14, %cst_11 {dimension_numbers = #tpu.dot_dimension_numbers<[1], [0], [0], [1], [0, 0, 1, 1], [], []>} : vector<16x128xbf16>, vector<128x128xbf16>, vector<16x128xf32> -> vector<16x128xf32>
    %16 = arith.addf %11, %15 : vector<16x128xf32>
    %c0_12 = arith.constant 0 : index
    %c0_13 = arith.constant 0 : index
    %17 = vector.load %arg4[%c0_12, %c0_13] : memref<1x128xf32, #tpu.memory_space<vmem>>, vector<1x128xf32>
    %18 = vector.broadcast %17 : vector<1x128xf32> to vector<16x128xf32>
    %19 = arith.addf %16, %18 : vector<16x128xf32>
    %c0_14 = arith.constant 0 : index
    %c0_15 = arith.constant 0 : index
    %20 = vector.load %arg5[%c0_14, %c0_15] : memref<16x128xbf16, #tpu.memory_space<vmem>>, vector<16x128xbf16>
    %c0_16 = arith.constant 0 : index
    %c0_17 = arith.constant 0 : index
    %21 = vector.load %arg6[%c0_16, %c0_17] : memref<128x128xbf16, #tpu.memory_space<vmem>>, vector<128x128xbf16>
    %cst_18 = arith.constant dense<0.000000e+00> : vector<16x128xf32>
    %22 = tpu.matmul %20, %21, %cst_18 {dimension_numbers = #tpu.dot_dimension_numbers<[1], [0], [0], [1], [0, 0, 1, 1], [], []>} : vector<16x128xbf16>, vector<128x128xbf16>, vector<16x128xf32> -> vector<16x128xf32>
    %c0_19 = arith.constant 0 : index
    %c0_20 = arith.constant 0 : index
    %23 = vector.load %arg7[%c0_19, %c0_20] : memref<1x128xf32, #tpu.memory_space<vmem>>, vector<1x128xf32>
    %24 = vector.broadcast %23 : vector<1x128xf32> to vector<16x128xf32>
    %25 = arith.addf %22, %24 : vector<16x128xf32>
    %26 = arith.addf %19, %25 : vector<16x128xf32>
    %cst_21 = arith.constant 0.000000e+00 : f32
    %27 = vector.broadcast %cst_21 : f32 to vector<16x128xf32>
    %28 = arith.maximumf %26, %27 : vector<16x128xf32>
    %29 = arith.truncf %28 : vector<16x128xf32> to vector<16x128xbf16>
    %c0_22 = arith.constant 0 : index
    %c0_23 = arith.constant 0 : index
    %30 = vector.load %arg8[%c0_22, %c0_23] : memref<16x128xbf16, #tpu.memory_space<vmem>>, vector<16x128xbf16>
    tpu.vector_store %arg8[%c0_22, %c0_23], %29 {strides = array<i32>} : memref<16x128xbf16, #tpu.memory_space<vmem>>, vector<16x128xbf16>,
    return
  }
  func.func @transform_0(%arg0: i32) -> (i32, i32) {
    %c0_i32 = arith.constant 0 : i32
    %c0_i32_0 = arith.constant 0 : i32
    return %arg0, %c0_i32 : i32, i32
  }
  func.func @transform_1(%arg0: i32) -> (i32, i32) {
    %c1_i32 = arith.constant 1 : i32
    %0 = arith.addi %arg0, %c1_i32 : i32
    %c2_i32 = arith.constant 2 : i32
    %1 = arith.muli %0, %c2_i32 : i32
    %c0_i32 = arith.constant 0 : i32
    %c0_i32_0 = arith.constant 0 : i32
    return %1, %c0_i32 : i32, i32
  }
  func.func @transform_2(%arg0: i32) -> (i32, i32, i32) {
    %c0_i32 = arith.constant 0 : i32
    %c0_i32_0 = arith.constant 0 : i32
    %c0_i32_1 = arith.constant 0 : i32
    %c0_i32_2 = arith.constant 0 : i32
    return %c0_i32, %c0_i32_0, %c0_i32_1 : i32, i32, i32
  }
  func.func @transform_3(%arg0: i32) -> (i32, i32) {
    %c0_i32 = arith.constant 0 : i32
    %c0_i32_0 = arith.constant 0 : i32
    %c0_i32_1 = arith.constant 0 : i32
    return %c0_i32, %c0_i32_0 : i32, i32
  }
  func.func @transform_4(%arg0: i32) -> (i32, i32) {
    %c0_i32 = arith.constant 0 : i32
    %c0_i32_0 = arith.constant 0 : i32
    return %arg0, %c0_i32 : i32, i32
  }
  func.func @transform_5(%arg0: i32) -> (i32, i32) {
    %c0_i32 = arith.constant 0 : i32
    %c0_i32_0 = arith.constant 0 : i32
    %c0_i32_1 = arith.constant 0 : i32
    return %c0_i32, %c0_i32_0 : i32, i32
  }
  func.func @transform_6(%arg0: i32) -> (i32, i32) {
    %c0_i32 = arith.constant 0 : i32
    %c0_i32_0 = arith.constant 0 : i32
    %c0_i32_1 = arith.constant 0 : i32
    return %c0_i32, %c0_i32_0 : i32, i32
  }
  func.func @transform_7(%arg0: i32) -> (i32, i32) {
    %c0_i32 = arith.constant 0 : i32
    %c0_i32_0 = arith.constant 0 : i32
    return %arg0, %c0_i32 : i32, i32
  }
}

module attributes {stable_mosaic.version = 11 : i64} {
  func.func @_mm_bn_kernel(%arg0: i32, %arg1: memref<8x384xbf16, #tpu.memory_space<vmem>>, %arg2: memref<384x256xbf16, #tpu.memory_space<vmem>>, %arg3: memref<1x256xf32, #tpu.memory_space<vmem>>, %arg4: memref<8x256xbf16, #tpu.memory_space<vmem>>) attributes {dimension_semantics = [#tpu.dimension_semantics<parallel>], iteration_bounds = array<i64: 1>, scalar_prefetch = 0 : i64, scratch_operands = 0 : i64, tpu.core_type = #tpu.core_type<tc>, window_params = [{transform_indices = @transform_0, window_bounds = array<i64: 8, 384>}, {pipeline_mode = #tpu.pipeline_mode<synchronous>, transform_indices = @transform_1, window_bounds = array<i64: 384, 256>}, {pipeline_mode = #tpu.pipeline_mode<synchronous>, transform_indices = @transform_2, window_bounds = array<i64: 1, 256>}, {transform_indices = @transform_3, window_bounds = array<i64: 8, 256>}]} {
    %c0 = arith.constant 0 : index
    %c0_0 = arith.constant 0 : index
    %0 = vector.load %arg1[%c0, %c0_0] : memref<8x384xbf16, #tpu.memory_space<vmem>>, vector<8x384xbf16>
    %c0_1 = arith.constant 0 : index
    %c0_2 = arith.constant 0 : index
    %1 = vector.load %arg2[%c0_1, %c0_2] : memref<384x256xbf16, #tpu.memory_space<vmem>>, vector<384x256xbf16>
    %cst = arith.constant dense<0.000000e+00> : vector<8x256xf32>
    %2 = tpu.matmul %0, %1, %cst {dimension_numbers = #tpu.dot_dimension_numbers<[1], [0], [0], [1], [0, 0, 1, 1], [], []>} : vector<8x384xbf16>, vector<384x256xbf16>, vector<8x256xf32> -> vector<8x256xf32>
    %c0_3 = arith.constant 0 : index
    %c0_4 = arith.constant 0 : index
    %3 = vector.load %arg3[%c0_3, %c0_4] : memref<1x256xf32, #tpu.memory_space<vmem>>, vector<1x256xf32>
    %4 = vector.broadcast %3 : vector<1x256xf32> to vector<8x256xf32>
    %5 = arith.addf %2, %4 : vector<8x256xf32>
    %cst_5 = arith.constant 0.000000e+00 : f32
    %6 = vector.broadcast %cst_5 : f32 to vector<8x256xf32>
    %7 = arith.maximumf %5, %6 : vector<8x256xf32>
    %8 = arith.truncf %7 : vector<8x256xf32> to vector<8x256xbf16>
    %c0_6 = arith.constant 0 : index
    %c0_7 = arith.constant 0 : index
    %9 = vector.load %arg4[%c0_6, %c0_7] : memref<8x256xbf16, #tpu.memory_space<vmem>>, vector<8x256xbf16>
    tpu.vector_store %arg4[%c0_6, %c0_7], %8 {strides = array<i32>} : memref<8x256xbf16, #tpu.memory_space<vmem>>, vector<8x256xbf16>,
    return
  }
  func.func @transform_0(%arg0: i32) -> (i32, i32) {
    %c0_i32 = arith.constant 0 : i32
    %c0_i32_0 = arith.constant 0 : i32
    return %arg0, %c0_i32 : i32, i32
  }
  func.func @transform_1(%arg0: i32) -> (i32, i32) {
    %c0_i32 = arith.constant 0 : i32
    %c0_i32_0 = arith.constant 0 : i32
    %c0_i32_1 = arith.constant 0 : i32
    return %c0_i32, %c0_i32_0 : i32, i32
  }
  func.func @transform_2(%arg0: i32) -> (i32, i32) {
    %c0_i32 = arith.constant 0 : i32
    %c0_i32_0 = arith.constant 0 : i32
    %c0_i32_1 = arith.constant 0 : i32
    return %c0_i32, %c0_i32_0 : i32, i32
  }
  func.func @transform_3(%arg0: i32) -> (i32, i32) {
    %c0_i32 = arith.constant 0 : i32
    %c0_i32_0 = arith.constant 0 : i32
    return %arg0, %c0_i32 : i32, i32
  }
}

module attributes {stable_mosaic.version = 11 : i64} {
  func.func @_conv3_bn_ds_add_relu_kernel(%arg0: i32, %arg1: memref<8x256xbf16, #tpu.memory_space<vmem>>, %arg2: memref<8x256xbf16, #tpu.memory_space<vmem>>, %arg3: memref<3x256x256xbf16, #tpu.memory_space<vmem>>, %arg4: memref<1x256xf32, #tpu.memory_space<vmem>>, %arg5: memref<8x128xbf16, #tpu.memory_space<vmem>>, %arg6: memref<128x256xbf16, #tpu.memory_space<vmem>>, %arg7: memref<1x256xf32, #tpu.memory_space<vmem>>, %arg8: memref<8x256xbf16, #tpu.memory_space<vmem>>) attributes {dimension_semantics = [#tpu.dimension_semantics<parallel>], iteration_bounds = array<i64: 2>, scalar_prefetch = 0 : i64, scratch_operands = 0 : i64, tpu.core_type = #tpu.core_type<tc>, window_params = [{transform_indices = @transform_0, window_bounds = array<i64: 8, 256>}, {transform_indices = @transform_1, window_bounds = array<i64: 8, 256>}, {pipeline_mode = #tpu.pipeline_mode<synchronous>, transform_indices = @transform_2, window_bounds = array<i64: 3, 256, 256>}, {pipeline_mode = #tpu.pipeline_mode<synchronous>, transform_indices = @transform_3, window_bounds = array<i64: 1, 256>}, {transform_indices = @transform_4, window_bounds = array<i64: 8, 128>}, {pipeline_mode = #tpu.pipeline_mode<synchronous>, transform_indices = @transform_5, window_bounds = array<i64: 128, 256>}, {pipeline_mode = #tpu.pipeline_mode<synchronous>, transform_indices = @transform_6, window_bounds = array<i64: 1, 256>}, {transform_indices = @transform_7, window_bounds = array<i64: 8, 256>}]} {
    %c0 = arith.constant 0 : index
    %c0_0 = arith.constant 0 : index
    %0 = vector.load %arg1[%c0, %c0_0] : memref<8x256xbf16, #tpu.memory_space<vmem>>, vector<8x256xbf16>
    %c0_1 = arith.constant 0 : index
    %c0_2 = arith.constant 0 : index
    %1 = vector.load %arg2[%c0_1, %c0_2] : memref<8x256xbf16, #tpu.memory_space<vmem>>, vector<8x256xbf16>
    %2 = tpu.concatenate %0, %1 in 0 : vector<8x256xbf16>, vector<8x256xbf16> -> vector<16x256xbf16>
    %3 = vector.extract_strided_slice %2 {offsets = [0, 0], sizes = [8, 256], strides = [1, 1]} : vector<16x256xbf16> to vector<8x256xbf16>
    %c0_3 = arith.constant 0 : index
    %c0_4 = arith.constant 0 : index
    %c0_5 = arith.constant 0 : index
    %4 = vector.load %arg3[%c0_3, %c0_4, %c0_5] : memref<3x256x256xbf16, #tpu.memory_space<vmem>>, vector<1x256x256xbf16>
    %5 = vector.shape_cast %4 : vector<1x256x256xbf16> to vector<256x256xbf16>
    %cst = arith.constant dense<0.000000e+00> : vector<8x256xf32>
    %6 = tpu.matmul %3, %5, %cst {dimension_numbers = #tpu.dot_dimension_numbers<[1], [0], [0], [1], [0, 0, 1, 1], [], []>} : vector<8x256xbf16>, vector<256x256xbf16>, vector<8x256xf32> -> vector<8x256xf32>
    %7 = vector.extract_strided_slice %2 {offsets = [1, 0], sizes = [8, 256], strides = [1, 1]} : vector<16x256xbf16> to vector<8x256xbf16>
    %c1 = arith.constant 1 : index
    %c0_6 = arith.constant 0 : index
    %c0_7 = arith.constant 0 : index
    %8 = vector.load %arg3[%c1, %c0_6, %c0_7] : memref<3x256x256xbf16, #tpu.memory_space<vmem>>, vector<1x256x256xbf16>
    %9 = vector.shape_cast %8 : vector<1x256x256xbf16> to vector<256x256xbf16>
    %cst_8 = arith.constant dense<0.000000e+00> : vector<8x256xf32>
    %10 = tpu.matmul %7, %9, %cst_8 {dimension_numbers = #tpu.dot_dimension_numbers<[1], [0], [0], [1], [0, 0, 1, 1], [], []>} : vector<8x256xbf16>, vector<256x256xbf16>, vector<8x256xf32> -> vector<8x256xf32>
    %11 = arith.addf %6, %10 : vector<8x256xf32>
    %12 = vector.extract_strided_slice %2 {offsets = [2, 0], sizes = [8, 256], strides = [1, 1]} : vector<16x256xbf16> to vector<8x256xbf16>
    %c2 = arith.constant 2 : index
    %c0_9 = arith.constant 0 : index
    %c0_10 = arith.constant 0 : index
    %13 = vector.load %arg3[%c2, %c0_9, %c0_10] : memref<3x256x256xbf16, #tpu.memory_space<vmem>>, vector<1x256x256xbf16>
    %14 = vector.shape_cast %13 : vector<1x256x256xbf16> to vector<256x256xbf16>
    %cst_11 = arith.constant dense<0.000000e+00> : vector<8x256xf32>
    %15 = tpu.matmul %12, %14, %cst_11 {dimension_numbers = #tpu.dot_dimension_numbers<[1], [0], [0], [1], [0, 0, 1, 1], [], []>} : vector<8x256xbf16>, vector<256x256xbf16>, vector<8x256xf32> -> vector<8x256xf32>
    %16 = arith.addf %11, %15 : vector<8x256xf32>
    %c0_12 = arith.constant 0 : index
    %c0_13 = arith.constant 0 : index
    %17 = vector.load %arg4[%c0_12, %c0_13] : memref<1x256xf32, #tpu.memory_space<vmem>>, vector<1x256xf32>
    %18 = vector.broadcast %17 : vector<1x256xf32> to vector<8x256xf32>
    %19 = arith.addf %16, %18 : vector<8x256xf32>
    %c0_14 = arith.constant 0 : index
    %c0_15 = arith.constant 0 : index
    %20 = vector.load %arg5[%c0_14, %c0_15] : memref<8x128xbf16, #tpu.memory_space<vmem>>, vector<8x128xbf16>
    %c0_16 = arith.constant 0 : index
    %c0_17 = arith.constant 0 : index
    %21 = vector.load %arg6[%c0_16, %c0_17] : memref<128x256xbf16, #tpu.memory_space<vmem>>, vector<128x256xbf16>
    %cst_18 = arith.constant dense<0.000000e+00> : vector<8x256xf32>
    %22 = tpu.matmul %20, %21, %cst_18 {dimension_numbers = #tpu.dot_dimension_numbers<[1], [0], [0], [1], [0, 0, 1, 1], [], []>} : vector<8x128xbf16>, vector<128x256xbf16>, vector<8x256xf32> -> vector<8x256xf32>
    %c0_19 = arith.constant 0 : index
    %c0_20 = arith.constant 0 : index
    %23 = vector.load %arg7[%c0_19, %c0_20] : memref<1x256xf32, #tpu.memory_space<vmem>>, vector<1x256xf32>
    %24 = vector.broadcast %23 : vector<1x256xf32> to vector<8x256xf32>
    %25 = arith.addf %22, %24 : vector<8x256xf32>
    %26 = arith.addf %19, %25 : vector<8x256xf32>
    %cst_21 = arith.constant 0.000000e+00 : f32
    %27 = vector.broadcast %cst_21 : f32 to vector<8x256xf32>
    %28 = arith.maximumf %26, %27 : vector<8x256xf32>
    %29 = arith.truncf %28 : vector<8x256xf32> to vector<8x256xbf16>
    %c0_22 = arith.constant 0 : index
    %c0_23 = arith.constant 0 : index
    %30 = vector.load %arg8[%c0_22, %c0_23] : memref<8x256xbf16, #tpu.memory_space<vmem>>, vector<8x256xbf16>
    tpu.vector_store %arg8[%c0_22, %c0_23], %29 {strides = array<i32>} : memref<8x256xbf16, #tpu.memory_space<vmem>>, vector<8x256xbf16>,
    return
  }
  func.func @transform_0(%arg0: i32) -> (i32, i32) {
    %c0_i32 = arith.constant 0 : i32
    %c0_i32_0 = arith.constant 0 : i32
    return %arg0, %c0_i32 : i32, i32
  }
  func.func @transform_1(%arg0: i32) -> (i32, i32) {
    %c1_i32 = arith.constant 1 : i32
    %0 = arith.addi %arg0, %c1_i32 : i32
    %c1_i32_0 = arith.constant 1 : i32
    %1 = arith.muli %0, %c1_i32_0 : i32
    %c0_i32 = arith.constant 0 : i32
    %c0_i32_1 = arith.constant 0 : i32
    return %1, %c0_i32 : i32, i32
  }
  func.func @transform_2(%arg0: i32) -> (i32, i32, i32) {
    %c0_i32 = arith.constant 0 : i32
    %c0_i32_0 = arith.constant 0 : i32
    %c0_i32_1 = arith.constant 0 : i32
    %c0_i32_2 = arith.constant 0 : i32
    return %c0_i32, %c0_i32_0, %c0_i32_1 : i32, i32, i32
  }
  func.func @transform_3(%arg0: i32) -> (i32, i32) {
    %c0_i32 = arith.constant 0 : i32
    %c0_i32_0 = arith.constant 0 : i32
    %c0_i32_1 = arith.constant 0 : i32
    return %c0_i32, %c0_i32_0 : i32, i32
  }
  func.func @transform_4(%arg0: i32) -> (i32, i32) {
    %c0_i32 = arith.constant 0 : i32
    %c0_i32_0 = arith.constant 0 : i32
    return %arg0, %c0_i32 : i32, i32
  }
  func.func @transform_5(%arg0: i32) -> (i32, i32) {
    %c0_i32 = arith.constant 0 : i32
    %c0_i32_0 = arith.constant 0 : i32
    %c0_i32_1 = arith.constant 0 : i32
    return %c0_i32, %c0_i32_0 : i32, i32
  }
  func.func @transform_6(%arg0: i32) -> (i32, i32) {
    %c0_i32 = arith.constant 0 : i32
    %c0_i32_0 = arith.constant 0 : i32
    %c0_i32_1 = arith.constant 0 : i32
    return %c0_i32, %c0_i32_0 : i32, i32
  }
  func.func @transform_7(%arg0: i32) -> (i32, i32) {
    %c0_i32 = arith.constant 0 : i32
    %c0_i32_0 = arith.constant 0 : i32
    return %arg0, %c0_i32 : i32, i32
  }
}

module attributes {stable_mosaic.version = 11 : i64} {
  func.func @_mm_bn_kernel(%arg0: i32, %arg1: memref<8x768xbf16, #tpu.memory_space<vmem>>, %arg2: memref<768x512xbf16, #tpu.memory_space<vmem>>, %arg3: memref<1x512xf32, #tpu.memory_space<vmem>>, %arg4: memref<8x512xbf16, #tpu.memory_space<vmem>>) attributes {dimension_semantics = [#tpu.dimension_semantics<parallel>], iteration_bounds = array<i64: 1>, scalar_prefetch = 0 : i64, scratch_operands = 0 : i64, tpu.core_type = #tpu.core_type<tc>, window_params = [{transform_indices = @transform_0, window_bounds = array<i64: 8, 768>}, {pipeline_mode = #tpu.pipeline_mode<synchronous>, transform_indices = @transform_1, window_bounds = array<i64: 768, 512>}, {pipeline_mode = #tpu.pipeline_mode<synchronous>, transform_indices = @transform_2, window_bounds = array<i64: 1, 512>}, {transform_indices = @transform_3, window_bounds = array<i64: 8, 512>}]} {
    %c0 = arith.constant 0 : index
    %c0_0 = arith.constant 0 : index
    %0 = vector.load %arg1[%c0, %c0_0] : memref<8x768xbf16, #tpu.memory_space<vmem>>, vector<8x768xbf16>
    %c0_1 = arith.constant 0 : index
    %c0_2 = arith.constant 0 : index
    %1 = vector.load %arg2[%c0_1, %c0_2] : memref<768x512xbf16, #tpu.memory_space<vmem>>, vector<768x512xbf16>
    %cst = arith.constant dense<0.000000e+00> : vector<8x512xf32>
    %2 = tpu.matmul %0, %1, %cst {dimension_numbers = #tpu.dot_dimension_numbers<[1], [0], [0], [1], [0, 0, 1, 1], [], []>} : vector<8x768xbf16>, vector<768x512xbf16>, vector<8x512xf32> -> vector<8x512xf32>
    %c0_3 = arith.constant 0 : index
    %c0_4 = arith.constant 0 : index
    %3 = vector.load %arg3[%c0_3, %c0_4] : memref<1x512xf32, #tpu.memory_space<vmem>>, vector<1x512xf32>
    %4 = vector.broadcast %3 : vector<1x512xf32> to vector<8x512xf32>
    %5 = arith.addf %2, %4 : vector<8x512xf32>
    %cst_5 = arith.constant 0.000000e+00 : f32
    %6 = vector.broadcast %cst_5 : f32 to vector<8x512xf32>
    %7 = arith.maximumf %5, %6 : vector<8x512xf32>
    %8 = arith.truncf %7 : vector<8x512xf32> to vector<8x512xbf16>
    %c0_6 = arith.constant 0 : index
    %c0_7 = arith.constant 0 : index
    %9 = vector.load %arg4[%c0_6, %c0_7] : memref<8x512xbf16, #tpu.memory_space<vmem>>, vector<8x512xbf16>
    tpu.vector_store %arg4[%c0_6, %c0_7], %8 {strides = array<i32>} : memref<8x512xbf16, #tpu.memory_space<vmem>>, vector<8x512xbf16>,
    return
  }
  func.func @transform_0(%arg0: i32) -> (i32, i32) {
    %c0_i32 = arith.constant 0 : i32
    %c0_i32_0 = arith.constant 0 : i32
    return %arg0, %c0_i32 : i32, i32
  }
  func.func @transform_1(%arg0: i32) -> (i32, i32) {
    %c0_i32 = arith.constant 0 : i32
    %c0_i32_0 = arith.constant 0 : i32
    %c0_i32_1 = arith.constant 0 : i32
    return %c0_i32, %c0_i32_0 : i32, i32
  }
  func.func @transform_2(%arg0: i32) -> (i32, i32) {
    %c0_i32 = arith.constant 0 : i32
    %c0_i32_0 = arith.constant 0 : i32
    %c0_i32_1 = arith.constant 0 : i32
    return %c0_i32, %c0_i32_0 : i32, i32
  }
  func.func @transform_3(%arg0: i32) -> (i32, i32) {
    %c0_i32 = arith.constant 0 : i32
    %c0_i32_0 = arith.constant 0 : i32
    return %arg0, %c0_i32 : i32, i32
  }
}

module attributes {stable_mosaic.version = 11 : i64} {
  func.func @_conv3_bn_ds_add_relu_kernel(%arg0: i32, %arg1: memref<8x512xbf16, #tpu.memory_space<vmem>>, %arg2: memref<8x512xbf16, #tpu.memory_space<vmem>>, %arg3: memref<3x512x512xbf16, #tpu.memory_space<vmem>>, %arg4: memref<1x512xf32, #tpu.memory_space<vmem>>, %arg5: memref<8x256xbf16, #tpu.memory_space<vmem>>, %arg6: memref<256x512xbf16, #tpu.memory_space<vmem>>, %arg7: memref<1x512xf32, #tpu.memory_space<vmem>>, %arg8: memref<8x512xbf16, #tpu.memory_space<vmem>>) attributes {dimension_semantics = [#tpu.dimension_semantics<parallel>], iteration_bounds = array<i64: 1>, scalar_prefetch = 0 : i64, scratch_operands = 0 : i64, tpu.core_type = #tpu.core_type<tc>, window_params = [{transform_indices = @transform_0, window_bounds = array<i64: 8, 512>}, {transform_indices = @transform_1, window_bounds = array<i64: 8, 512>}, {pipeline_mode = #tpu.pipeline_mode<synchronous>, transform_indices = @transform_2, window_bounds = array<i64: 3, 512, 512>}, {pipeline_mode = #tpu.pipeline_mode<synchronous>, transform_indices = @transform_3, window_bounds = array<i64: 1, 512>}, {transform_indices = @transform_4, window_bounds = array<i64: 8, 256>}, {pipeline_mode = #tpu.pipeline_mode<synchronous>, transform_indices = @transform_5, window_bounds = array<i64: 256, 512>}, {pipeline_mode = #tpu.pipeline_mode<synchronous>, transform_indices = @transform_6, window_bounds = array<i64: 1, 512>}, {transform_indices = @transform_7, window_bounds = array<i64: 8, 512>}]} {
    %c0 = arith.constant 0 : index
    %c0_0 = arith.constant 0 : index
    %0 = vector.load %arg1[%c0, %c0_0] : memref<8x512xbf16, #tpu.memory_space<vmem>>, vector<8x512xbf16>
    %c0_1 = arith.constant 0 : index
    %c0_2 = arith.constant 0 : index
    %1 = vector.load %arg2[%c0_1, %c0_2] : memref<8x512xbf16, #tpu.memory_space<vmem>>, vector<8x512xbf16>
    %2 = tpu.concatenate %0, %1 in 0 : vector<8x512xbf16>, vector<8x512xbf16> -> vector<16x512xbf16>
    %3 = vector.extract_strided_slice %2 {offsets = [0, 0], sizes = [8, 512], strides = [1, 1]} : vector<16x512xbf16> to vector<8x512xbf16>
    %c0_3 = arith.constant 0 : index
    %c0_4 = arith.constant 0 : index
    %c0_5 = arith.constant 0 : index
    %4 = vector.load %arg3[%c0_3, %c0_4, %c0_5] : memref<3x512x512xbf16, #tpu.memory_space<vmem>>, vector<1x512x512xbf16>
    %5 = vector.shape_cast %4 : vector<1x512x512xbf16> to vector<512x512xbf16>
    %cst = arith.constant dense<0.000000e+00> : vector<8x512xf32>
    %6 = tpu.matmul %3, %5, %cst {dimension_numbers = #tpu.dot_dimension_numbers<[1], [0], [0], [1], [0, 0, 1, 1], [], []>} : vector<8x512xbf16>, vector<512x512xbf16>, vector<8x512xf32> -> vector<8x512xf32>
    %7 = vector.extract_strided_slice %2 {offsets = [1, 0], sizes = [8, 512], strides = [1, 1]} : vector<16x512xbf16> to vector<8x512xbf16>
    %c1 = arith.constant 1 : index
    %c0_6 = arith.constant 0 : index
    %c0_7 = arith.constant 0 : index
    %8 = vector.load %arg3[%c1, %c0_6, %c0_7] : memref<3x512x512xbf16, #tpu.memory_space<vmem>>, vector<1x512x512xbf16>
    %9 = vector.shape_cast %8 : vector<1x512x512xbf16> to vector<512x512xbf16>
    %cst_8 = arith.constant dense<0.000000e+00> : vector<8x512xf32>
    %10 = tpu.matmul %7, %9, %cst_8 {dimension_numbers = #tpu.dot_dimension_numbers<[1], [0], [0], [1], [0, 0, 1, 1], [], []>} : vector<8x512xbf16>, vector<512x512xbf16>, vector<8x512xf32> -> vector<8x512xf32>
    %11 = arith.addf %6, %10 : vector<8x512xf32>
    %12 = vector.extract_strided_slice %2 {offsets = [2, 0], sizes = [8, 512], strides = [1, 1]} : vector<16x512xbf16> to vector<8x512xbf16>
    %c2 = arith.constant 2 : index
    %c0_9 = arith.constant 0 : index
    %c0_10 = arith.constant 0 : index
    %13 = vector.load %arg3[%c2, %c0_9, %c0_10] : memref<3x512x512xbf16, #tpu.memory_space<vmem>>, vector<1x512x512xbf16>
    %14 = vector.shape_cast %13 : vector<1x512x512xbf16> to vector<512x512xbf16>
    %cst_11 = arith.constant dense<0.000000e+00> : vector<8x512xf32>
    %15 = tpu.matmul %12, %14, %cst_11 {dimension_numbers = #tpu.dot_dimension_numbers<[1], [0], [0], [1], [0, 0, 1, 1], [], []>} : vector<8x512xbf16>, vector<512x512xbf16>, vector<8x512xf32> -> vector<8x512xf32>
    %16 = arith.addf %11, %15 : vector<8x512xf32>
    %c0_12 = arith.constant 0 : index
    %c0_13 = arith.constant 0 : index
    %17 = vector.load %arg4[%c0_12, %c0_13] : memref<1x512xf32, #tpu.memory_space<vmem>>, vector<1x512xf32>
    %18 = vector.broadcast %17 : vector<1x512xf32> to vector<8x512xf32>
    %19 = arith.addf %16, %18 : vector<8x512xf32>
    %c0_14 = arith.constant 0 : index
    %c0_15 = arith.constant 0 : index
    %20 = vector.load %arg5[%c0_14, %c0_15] : memref<8x256xbf16, #tpu.memory_space<vmem>>, vector<8x256xbf16>
    %c0_16 = arith.constant 0 : index
    %c0_17 = arith.constant 0 : index
    %21 = vector.load %arg6[%c0_16, %c0_17] : memref<256x512xbf16, #tpu.memory_space<vmem>>, vector<256x512xbf16>
    %cst_18 = arith.constant dense<0.000000e+00> : vector<8x512xf32>
    %22 = tpu.matmul %20, %21, %cst_18 {dimension_numbers = #tpu.dot_dimension_numbers<[1], [0], [0], [1], [0, 0, 1, 1], [], []>} : vector<8x256xbf16>, vector<256x512xbf16>, vector<8x512xf32> -> vector<8x512xf32>
    %c0_19 = arith.constant 0 : index
    %c0_20 = arith.constant 0 : index
    %23 = vector.load %arg7[%c0_19, %c0_20] : memref<1x512xf32, #tpu.memory_space<vmem>>, vector<1x512xf32>
    %24 = vector.broadcast %23 : vector<1x512xf32> to vector<8x512xf32>
    %25 = arith.addf %22, %24 : vector<8x512xf32>
    %26 = arith.addf %19, %25 : vector<8x512xf32>
    %cst_21 = arith.constant 0.000000e+00 : f32
    %27 = vector.broadcast %cst_21 : f32 to vector<8x512xf32>
    %28 = arith.maximumf %26, %27 : vector<8x512xf32>
    %29 = arith.truncf %28 : vector<8x512xf32> to vector<8x512xbf16>
    %c0_22 = arith.constant 0 : index
    %c0_23 = arith.constant 0 : index
    %30 = vector.load %arg8[%c0_22, %c0_23] : memref<8x512xbf16, #tpu.memory_space<vmem>>, vector<8x512xbf16>
    tpu.vector_store %arg8[%c0_22, %c0_23], %29 {strides = array<i32>} : memref<8x512xbf16, #tpu.memory_space<vmem>>, vector<8x512xbf16>,
    return
  }
  func.func @transform_0(%arg0: i32) -> (i32, i32) {
    %c0_i32 = arith.constant 0 : i32
    %c0_i32_0 = arith.constant 0 : i32
    return %arg0, %c0_i32 : i32, i32
  }
  func.func @transform_1(%arg0: i32) -> (i32, i32) {
    %c1_i32 = arith.constant 1 : i32
    %0 = arith.addi %arg0, %c1_i32 : i32
    %c1_i32_0 = arith.constant 1 : i32
    %1 = arith.muli %0, %c1_i32_0 : i32
    %c0_i32 = arith.constant 0 : i32
    %c0_i32_1 = arith.constant 0 : i32
    return %1, %c0_i32 : i32, i32
  }
  func.func @transform_2(%arg0: i32) -> (i32, i32, i32) {
    %c0_i32 = arith.constant 0 : i32
    %c0_i32_0 = arith.constant 0 : i32
    %c0_i32_1 = arith.constant 0 : i32
    %c0_i32_2 = arith.constant 0 : i32
    return %c0_i32, %c0_i32_0, %c0_i32_1 : i32, i32, i32
  }
  func.func @transform_3(%arg0: i32) -> (i32, i32) {
    %c0_i32 = arith.constant 0 : i32
    %c0_i32_0 = arith.constant 0 : i32
    %c0_i32_1 = arith.constant 0 : i32
    return %c0_i32, %c0_i32_0 : i32, i32
  }
  func.func @transform_4(%arg0: i32) -> (i32, i32) {
    %c0_i32 = arith.constant 0 : i32
    %c0_i32_0 = arith.constant 0 : i32
    return %arg0, %c0_i32 : i32, i32
  }
  func.func @transform_5(%arg0: i32) -> (i32, i32) {
    %c0_i32 = arith.constant 0 : i32
    %c0_i32_0 = arith.constant 0 : i32
    %c0_i32_1 = arith.constant 0 : i32
    return %c0_i32, %c0_i32_0 : i32, i32
  }
  func.func @transform_6(%arg0: i32) -> (i32, i32) {
    %c0_i32 = arith.constant 0 : i32
    %c0_i32_0 = arith.constant 0 : i32
    %c0_i32_1 = arith.constant 0 : i32
    return %c0_i32, %c0_i32_0 : i32, i32
  }
  func.func @transform_7(%arg0: i32) -> (i32, i32) {
    %c0_i32 = arith.constant 0 : i32
    %c0_i32_0 = arith.constant 0 : i32
    return %arg0, %c0_i32 : i32, i32
  }
}

module attributes {stable_mosaic.version = 11 : i64} {
  func.func @_head_kernel(%arg0: memref<2x2x512xbf16, #tpu.memory_space<vmem>>, %arg1: memref<512x128xbf16, #tpu.memory_space<vmem>>, %arg2: memref<1x128xf32, #tpu.memory_space<vmem>>, %arg3: memref<2x128xf32, #tpu.memory_space<vmem>>) attributes {dimension_semantics = [], scalar_prefetch = 0 : i64, scratch_operands = 0 : i64, tpu.core_type = #tpu.core_type<tc>} {
    %c0 = arith.constant 0 : index
    %c0_0 = arith.constant 0 : index
    %c0_1 = arith.constant 0 : index
    %0 = vector.load %arg0[%c0, %c0_0, %c0_1] : memref<2x2x512xbf16, #tpu.memory_space<vmem>>, vector<2x2x512xbf16>
    %1 = arith.extf %0 : vector<2x2x512xbf16> to vector<2x2x512xf32>
    %cst = arith.constant dense<0.000000e+00> : vector<2x512xf32>
    %2 = vector.multi_reduction <add>, %1, %cst [1] : vector<2x2x512xf32> to vector<2x512xf32>
    %cst_2 = arith.constant 2.000000e+00 : f32
    %3 = vector.broadcast %cst_2 : f32 to vector<2x512xf32>
    %4 = arith.divf %2, %3 : vector<2x512xf32>
    %5 = arith.truncf %4 : vector<2x512xf32> to vector<2x512xbf16>
    %c0_3 = arith.constant 0 : index
    %c0_4 = arith.constant 0 : index
    %6 = vector.load %arg1[%c0_3, %c0_4] : memref<512x128xbf16, #tpu.memory_space<vmem>>, vector<512x128xbf16>
    %cst_5 = arith.constant dense<0.000000e+00> : vector<2x128xf32>
    %7 = tpu.matmul %5, %6, %cst_5 {dimension_numbers = #tpu.dot_dimension_numbers<[1], [0], [0], [1], [0, 0, 1, 1], [], []>} : vector<2x512xbf16>, vector<512x128xbf16>, vector<2x128xf32> -> vector<2x128xf32>
    %c0_6 = arith.constant 0 : index
    %c0_7 = arith.constant 0 : index
    %8 = vector.load %arg2[%c0_6, %c0_7] : memref<1x128xf32, #tpu.memory_space<vmem>>, vector<1x128xf32>
    %9 = vector.broadcast %8 : vector<1x128xf32> to vector<2x128xf32>
    %10 = arith.addf %7, %9 : vector<2x128xf32>
    %c0_8 = arith.constant 0 : index
    %c0_9 = arith.constant 0 : index
    %11 = vector.load %arg3[%c0_8, %c0_9] : memref<2x128xf32, #tpu.memory_space<vmem>>, vector<2x128xf32>
    tpu.vector_store %arg3[%c0_8, %c0_9], %10 {strides = array<i32>} : memref<2x128xf32, #tpu.memory_space<vmem>>, vector<2x128xf32>,
    return
  }
}

</mosaic_0001>

<bundles_post_ra>
// kernel: resnet_forward.12
= control target key start
LH: loop header
LB: loop body
LE: loop exit
PB: predicated region body
PF: predicated region fallthrough
CT: control target
= control target key end

     0   :  { %s260_s6 = smov 0   ;;  %s282_s0 = inlined_call_operand.vmem [shape: bf16[2,17,256], index: 0, kind: input, shape index: {}]   ;;  %s283_s1 = inlined_call_operand.vmem [shape: bf16[2,16,128], index: 1, kind: output, shape index: {}]  }
   0x1 LB: > { %s216_s7 = sadd.s32 4294967295, %s248_s6   ;;  %p220_p0 = scmp.ge.s32.totalorder %s248_s6, 1  ;;  %s248_s6 = sphi %s260_s6, %s11_s6  }
   0x2   : > { %p87_p1 = scmp.lt.s32.totalorder %s248_s6, 3 }
   0x4   : > { %p88_p2 = pnand %p220_p0, %p87_p1 }
   0x5   : > { %p107_p3 = scmp.lt.s32.totalorder (!%p88_p2), %s216_s7, 1  ;;  %vm128_vm0 = vsmask.f32 (!%p88_p2), 3328  ;;  %vm129_vm1 = vsmask.f32 (!%p88_p2), 7440 }
   0x6   : > { %91 = sbr.rel (%p88_p2) target bundleno = 33 (0x21), region = 24  ;;  %vm130_vm2 = vmor (!%p88_p2), %vm128_vm0, %vm129_vm1 }
   0xd   : > { %s285_s7 = smov (!%p107_p3, %s216_s7), 1 }
   0xe   : > { %s233_s8 = smul.u32 24, %s285_s7  ;;  %s226_s12 = sshll.u32 %s285_s7, 3 }
   0xf   : > { %s116_s15 = scalar_lea.vmem %s283_s1, %s226_s12 }
  0x10   : > { %s111_s11 = scalar_lea.vmem %s282_s0, %s233_s8 }
  0x11   : > { %v117_v0 = vld [vmem:[%s111_s11] sm:$0xff]  ;;  %v118_v1 = vld [vmem:[%s111_s11 + $0x8] sm:$0xff]  ;;  %v119_v2 = vld [vmem:[%s111_s11 + $0x10] sm:$0x11] }
  0x12   : > { %v132_v3 = vshrl.u32 %v117_v0, 16  ;;  %v135_v4 = vshll.u32 %v117_v0, 16  ;;  %v122_v5 = vrot.slane %v117_v0, 4  ;;  %v141_v6 = vshll.u32 %v118_v1, 16 }
  0x13   : > { %v145_v7 = vshrl.u32 %v118_v1, 16  ;;  %v151_v8 = vshll.u32 %v119_v2, 16  ;;  %v123_v9 = vrot.slane %v118_v1, 4 }
  0x14   : > { %v134_v10 = vrot.slane %v132_v3, 4  ;;  %v137_v11 = vrot.slane %v135_v4, 5  ;;  %v143_v12 = vrot.slane %v141_v6, 5  ;;  %v126_v15 = vmax.bf16 %v122_v5, %v117_v0 }
  0x15   : > { %v147_v13 = vrot.slane %v145_v7, 4  ;;  %v153_v17 = vrot.slane %v151_v8, 5  ;;  %v127_v18 = vmax.bf16 %v123_v9, %v118_v1 }
  0x16   : > { %v138_v14 = vor.u32 %v137_v11, %v134_v10 }
  0x17   : > { %v148_v16 = vor.u32 %v147_v13, %v143_v12 }
  0x18   : > { %v139_v19 = vrot.slane %v138_v14, 4 }
  0x19   : > { %v149_v20 = vrot.slane %v148_v16, 4 }
  0x1a   : > { %v144_v21 = vsel %vm130_vm2, %v139_v19, %v143_v12 }
  0x1b   : > { %v154_v22 = vsel %vm130_vm2, %v149_v20, %v153_v17  ;;  %v157_v23 = vmax.bf16 %v144_v21, %v126_v15 }
  0x1c   : > { %v158_v24 = vmax.bf16 %v154_v22, %v127_v18 }
  0x1e   : > { %v232_v25 = vcombine.low %v157_v23, %v158_v24 }
  0x20   : > { %231 = vst [vmem:[%s116_s15] sm:$0xff] %v232_v25  }
  0x21 PF: > { %s11_s6 = sadd.s32 1, %s248_s6  }
  0x22   : > { %p8_p4 = scmp.ge.s32.totalorder %s11_s6, 4  }
  0x24   :  { %10 = sbr.rel (!%p8_p4) target bundleno = 1 (0x1), region = 54 }

// kernel: resnet_forward.11
= control target key start
LH: loop header
LB: loop body
LE: loop exit
PB: predicated region body
PF: predicated region fallthrough
CT: control target
= control target key end

     0   :  { %8 = vsyncpa [#allocation3], 0  ;;  %s810_s0 = inlined_call_operand.vmem [shape: bf16[64,176], index: 0, kind: input, shape index: {}]   ;;  %s811_s1 = inlined_call_operand.hbm [shape: bf16[176,128], index: 1, kind: input, shape index: {}]   ;;  %s812_s2 = inlined_call_operand.hbm [shape: f32[1,128], index: 2, kind: input, shape index: {}]   ;;  %s813_s3 = inlined_call_operand.vmem [shape: bf16[64,128], index: 3, kind: output, shape index: {}]  }
   0x1   :  { %9 = vsyncpa [#allocation5], 0  ;;  %s703_s12 = smov 0  }
   0x2 LB: > { %s481_s13 = sadd.s32 4294967295, %s676_s12   ;;  %p483_p0 = scmp.ge.s32.totalorder %s676_s12, 1  ;;  %s676_s12 = sphi %s703_s12, %s15_s12  }
   0x3   : > { %p114_p1 = scmp.lt.s32.totalorder %s676_s12, 3  ;;  %s678_s14 = smov [#allocation2]  }
   0x4   : > { %s126_s15 = sshll.u32 %s678_s14, 4  ;;  %p717_p3 = scmp.eq.s32.totalorder %s481_s13, 0  ;;  %s127_s15 = int_to_ptr.vmem [resolvable:$true] %s126_s15 }
   0x5   : > { %p711_p2 = pnand %p483_p0, %p114_p1  ;;  %s679_s18 = smov [#allocation4]  }
   0x6   : > { %s818_s17 = scalar_select %p717_p3, 1, 0 }
   0x7   : > { %s817_s16 = scalar_select %p711_p2, 1, 0 }
   0x8   : > { %p565_p4 = pneg %p711_p2  ;;  %s140_s19 = sshll.u32 %s679_s18, 4  ;;  %s729_s19 = int_to_ptr.vmem [resolvable:$true] %s140_s19 }
   0x9   : > { %s606_s23 = scalar_lea.hbm %s811_s1, 1408 }
   0xa   : > { %p725_p5 = pnand %p717_p3, %p565_p4  ;;  %p607_p6 = scmp.ne.s32.totalorder %s811_s1, %s606_s23 }
   0xb   : > { %p613_p10 = scmp.lt.u32.totalorder %s606_s23, %s811_s1 }
   0xc   : > { %p608_p7 = pneg %p725_p5 }
   0xe   : > { %p609_p8 = pnand %p608_p7, %p607_p6 }
  0x10   : > { %p610_p9 = pneg %p609_p8 }
  0x12   : > { %p615_p11 = pnand %p613_p10, %p610_p9 }
  0x14   : > { %618 = shalt.err (!%p615_p11)
}
  0x15   : > { %s619_s28 = scalar_lea.vmem %s127_s15, 1408  ;;  %p627_p1 = scmp.lt.s32.totalorder %s127_s15, %s127_s15 }
  0x16   : > { %p620_p12 = scmp.ne.s32.totalorder %s127_s15, %s619_s28  ;;  %p628_p4 = scmp.lt.s32.totalorder %s619_s28, %s619_s28 }
  0x18   : > { %p622_p13 = pnand %p620_p12, %p608_p7  ;;  %p629_p3 = por %p628_p4, %p627_p1 }
  0x1a   : > { %p623_p0 = pneg %p622_p13 }
  0x1c   : > { %p630_p2 = pnand %p629_p3, %p623_p0 }
  0x1e   : > { %633 = shalt.err (!%p630_p2)
}
  0x1f   : > { %s680_s29 = smov 64   ;;  %s681_s30 = smov 4  }
  0x20   : > { %568 = dma.hbm_to_vmem [thread:$0]  (!%p725_p5), %s811_s1, 1408, %s127_s15, [#allocation3], %s680_s29, %s680_s29, %s681_s30  }
  0x21   : > { %s634_s8 = scalar_lea.hbm %s812_s2, 16 }
  0x22   : > { %p635_p6 = scmp.ne.s32.totalorder %s812_s2, %s634_s8  ;;  %p641_p8 = scmp.lt.u32.totalorder %s634_s8, %s812_s2 }
  0x24   : > { %p637_p2 = pnand %p635_p6, %p608_p7 }
  0x26   : > { %p638_p3 = pneg %p637_p2 }
  0x28   : > { %p643_p9 = pnand %p641_p8, %p638_p3 }
  0x2a   : > { %646 = shalt.err (!%p643_p9)
}
  0x2b   : > { %s647_s15 = scalar_lea.vmem %s729_s19, 16  ;;  %s654_s18 = scalar_lea.vmem %s729_s19, 32 }
  0x2c   : > { %p648_p10 = scmp.ne.s32.totalorder %s729_s19, %s647_s15  ;;  %p655_p13 = scmp.lt.s32.totalorder %s729_s19, %s729_s19 }
  0x2d   : > { %p656_p0 = scmp.lt.s32.totalorder %s654_s18, %s647_s15 }
  0x2e   : > { %p650_p11 = pnand %p648_p10, %p608_p7 }
  0x2f   : > { %p657_p1 = por %p656_p0, %p655_p13 }
  0x30   : > { %p651_p12 = pneg %p650_p11 }
  0x32   : > { %p658_p4 = pnand %p657_p1, %p651_p12 }
  0x34   : > { %661 = shalt.err (!%p658_p4)
}
  0x35   : > { %571 = dma.hbm_to_vmem [thread:$0]  (!%p725_p5), %s812_s2, 16, %s729_s19, [#allocation5]  }
  0x36   : > { %p820_p6 = scmp.ne.s32.totalorder %s817_s16, 0 }
  0x37   : > { %p821_p7 = scmp.ne.s32.totalorder (!%p820_p6), %s818_s17, 0 }
  0x38   : > { %163 = sbr.rel (%p820_p6) target bundleno = 332 (0x14c), region = 32 }
  0x3f   : > { %667 = dma.done.wait (%p821_p7), [#allocation3], 1408  }
  0x40   : > { %669 = vsyncadd (%p821_p7), [#allocation3], 4294965888 }
  0x41   : > { %671 = dma.done.wait (%p821_p7), [#allocation5], 16  }
  0x42   : > { %673 = vsyncadd (%p821_p7), [#allocation5], 4294967280  ;;  %v682_v0 = vmov 0   ;;  %s490_s19 = sshll.u32 %s481_s13, 2  ;;  %v589_v1 = vld [vmem:[#allocation2] sm:$0xff]   ;;  %v590_v2 = vld [vmem:[#allocation2 + $0x8] sm:$0xff]  }
  0x43   : > { %330 = vmatprep.subr.bf16.mxu0 %v682_v0  ;;  %535 = vmatprep.subr.bf16.mxu1 %v682_v0  ;;  %p193_p5 = scmp.lt.s32.totalorder %s490_s19, 7  ;;  %v591_v3 = vld [vmem:[#allocation2 + $0x10] sm:$0xff]   ;;  %v592_v4 = vld [vmem:[#allocation2 + $0x18] sm:$0xff]   ;;  %vm323_vm0 = vcmask 392192   ;;  %v593_v7 = vld [vmem:[#allocation2 + $0x20] sm:$0xff]  }
  0x44   : > { %331 = vmatpush1.bf16.msra.mxu0 %v589_v1  ;;  %546 = vmatpush1.bf16.msra.mxu1 %v589_v1  ;;  %v594_v8 = vld [vmem:[#allocation2 + $0x28] sm:$0xff]   ;;  %v595_v9 = vld [vmem:[#allocation2 + $0x30] sm:$0xff]   ;;  %v596_v10 = vld [vmem:[#allocation2 + $0x38] sm:$0xff]  }
  0x45   : > { %s823_s19 = smov (!%p193_p5, %s490_s19), 7  ;;  %332 = vmatprep.subr.bf16.mxu0 %v682_v0  ;;  %536 = vmatprep.subr.bf16.mxu1 %v682_v0  ;;  %v597_v11 = vld [vmem:[#allocation2 + $0x40] sm:$0xff]   ;;  %v598_v12 = vld [vmem:[#allocation2 + $0x48] sm:$0xff]   ;;  %v599_v13 = vld [vmem:[#allocation2 + $0x50] sm:$0xff]  }
  0x46   : > { %s519_s16 = sshll.u32 %s823_s19, 3  ;;  %v495_v16 = vld [vmem:[#allocation4] ss:$0 sm:$0xff]  ;;  %s494_s23 = sshll.u32 %s823_s19, 2 }
  0x47   : > { %s797_s13 = scalar_lea.vmem %s810_s0, %s519_s16  ;;  %s203_s26 = scalar_lea.vmem %s813_s3, %s494_s23 }
  0x48   : > { %333 = vmatpush1.bf16.msra.mxu0 %v590_v2  ;;  %547 = vmatpush1.bf16.msra.mxu1 %v590_v2  ;;  %v602_v5 = vld [vmem:[%s797_s13 + $0x4] ss:$8 sps:$4 sm:$0xff]   ;;  %v605_v6 = vld [vmem:[%s797_s13 + $0x14] ss:$8 sps:$4 sm:$0xff]   ;;  %v600_v14 = vld [vmem:[%s797_s13] ss:$8 sps:$4 sm:$0xff]  }
  0x49   : > { %334 = vmatprep.subr.bf16.mxu0 %v682_v0  ;;  %537 = vmatprep.subr.bf16.mxu1 %v682_v0  ;;  %v603_v15 = vld [vmem:[%s797_s13 + $0x10] ss:$8 sps:$4 sm:$0xff]  }
  0x4a   : > { %511 = vmatprep.mubr.msk.bf16.mxu0 %vm323_vm0, %v602_v5  ;;  %512 = vmatprep.mubr.msk.bf16.mxu1 %vm323_vm0, %v605_v6 }
  0x4c   : > { %335 = vmatpush1.bf16.msra.mxu0 %v591_v3  ;;  %548 = vmatpush1.bf16.msra.mxu1 %v591_v3 }
  0x4d   : > { %336 = vmatprep.subr.bf16.mxu0 %v682_v0  ;;  %538 = vmatprep.subr.bf16.mxu1 %v682_v0 }
  0x50   : > { %337 = vmatpush1.bf16.msra.mxu0 %v592_v4  ;;  %549 = vmatpush1.bf16.msra.mxu1 %v592_v4 }
  0x51   : > { %338 = vmatprep.subr.bf16.mxu0 %v682_v0  ;;  %539 = vmatprep.subr.bf16.mxu1 %v682_v0 }
  0x54   : > { %339 = vmatpush1.bf16.msra.mxu0 %v593_v7  ;;  %550 = vmatpush1.bf16.msra.mxu1 %v593_v7 }
  0x55   : > { %340 = vmatprep.subr.bf16.mxu0 %v682_v0  ;;  %540 = vmatprep.subr.bf16.mxu1 %v682_v0 }
  0x58   : > { %341 = vmatpush1.bf16.msra.mxu0 %v594_v8  ;;  %551 = vmatpush1.bf16.msra.mxu1 %v594_v8 }
  0x59   : > { %342 = vmatprep.subr.bf16.mxu0 %v682_v0  ;;  %541 = vmatprep.subr.bf16.mxu1 %v682_v0 }
  0x5c   : > { %343 = vmatpush1.bf16.msra.mxu0 %v595_v9  ;;  %552 = vmatpush1.bf16.msra.mxu1 %v595_v9 }
  0x5d   : > { %344 = vmatprep.subr.bf16.mxu0 %v682_v0  ;;  %542 = vmatprep.subr.bf16.mxu1 %v682_v0 }
  0x60   : > { %345 = vmatpush1.bf16.msra.mxu0 %v596_v10  ;;  %553 = vmatpush1.bf16.msra.mxu1 %v596_v10 }
  0x61   : > { %346 = vmatprep.subr.bf16.mxu0 %v682_v0  ;;  %543 = vmatprep.subr.bf16.mxu1 %v682_v0 }
  0x64   : > { %347 = vmatpush1.bf16.msra.mxu0 %v597_v11  ;;  %554 = vmatpush1.bf16.msra.mxu1 %v597_v11 }
  0x65   : > { %348 = vmatprep.subr.bf16.mxu0 %v682_v0  ;;  %544 = vmatprep.subr.bf16.mxu1 %v682_v0 }
  0x68   : > { %349 = vmatpush1.bf16.msra.mxu0 %v598_v12  ;;  %555 = vmatpush1.bf16.msra.mxu1 %v598_v12 }
  0x69   : > { %350 = vmatprep.subr.bf16.mxu0 %v682_v0  ;;  %545 = vmatprep.subr.bf16.mxu1 %v682_v0 }
  0x6c   : > { %351 = vmatpush1.bf16.msra.mxu0 %v599_v13  ;;  %556 = vmatpush1.bf16.msra.mxu1 %v599_v13 }
  0x6f   : > { %363 = vmatmul.mubr.bf16.vlgmr.msra.gmra.mrb[0].mxu0 %v600_v14  ;;  %371 = vmatmul.mubr.bf16.vlgmr.msra.gmra.mrb[0].mxu1 %v603_v15 }
 0x142   : > { %v364_v17 = vpop.f32.mrb[0].mxu0  ;;  %v372_v18 = vpop.f32.mrb[0].mxu1 }
 0x143   : > { %v365_v19 = vadd.f32 %v495_v16, %v364_v17  ;;  %v373_v20 = vadd.f32 %v495_v16, %v372_v18  ;;  %v366_v21 = vpop.f32.mrb[1].mxu0  ;;  %v374_v22 = vpop.f32.mrb[1].mxu1 }
 0x144   : > { %v367_v23 = vpop.f32.mrb[2].mxu0  ;;  %v375_v24 = vpop.f32.mrb[2].mxu1 }
 0x145   : > { %v381_v25 = vmax.f32 %v373_v20, 0.0  ;;  %v368_v26 = vadd.f32 %v495_v16, %v367_v23  ;;  %v376_v27 = vadd.f32 %v495_v16, %v375_v24  ;;  %v369_v28 = vpop.f32.mrb[3].mxu0  ;;  %v377_v29 = vpop.f32.mrb[3].mxu1  ;;  %v379_v30 = vmax.f32 %v365_v19, 0.0 }
 0x147   : > { %v380_v31 = vmax.f32 %v368_v26, 0.0  ;;  %v382_v32 = vmax.f32 %v376_v27, 0.0 }
 0x149   : > { %v527_v33 = vpack.c.bf16 %v380_v31, %v379_v30  ;;  %v532_v34 = vpack.c.bf16 %v382_v32, %v381_v25 }
 0x14b   : > { %528 = vst [vmem:[%s203_s26] sm:$0xff] %v527_v33   ;;  %534 = vst [vmem:[%s203_s26 + $0x8] sm:$0xff] %v532_v34  }
 0x14c PF: > { %s15_s12 = sadd.s32 1, %s676_s12  }
 0x14d   : > { %p12_p2 = scmp.ge.s32.totalorder %s15_s12, 4  }
 0x14f   :  { %14 = sbr.rel (!%p12_p2) target bundleno = 2 (0x2), region = 71 }
 0x156   :  { %425 = vsyncpa [#allocation3], 1 }
 0x157   :  { %427 = vsyncpa [#allocation3 + $0x1], 1 }
 0x158   :  { %428 = vsyncpa [#allocation5], 1 }

// kernel: resnet_forward.13
= control target key start
LH: loop header
LB: loop body
LE: loop exit
PB: predicated region body
PF: predicated region fallthrough
CT: control target
= control target key end

     0   :  { %9 = vsyncpa [#allocation3], 0  ;;  %s1171_s0 = inlined_call_operand.vmem [shape: bf16[72,128], index: 0, kind: input, shape index: {}, may-alias: {0,1}]   ;;  %s1172_s1 = inlined_call_operand.vmem [shape: bf16[72,128], index: 1, kind: input, shape index: {}, may-alias: {0,1}]   ;;  %s1173_s2 = inlined_call_operand.hbm [shape: bf16[3,128,128], index: 2, kind: input, shape index: {}]   ;;  %s1174_s3 = inlined_call_operand.hbm [shape: f32[1,128], index: 3, kind: input, shape index: {}]   ;;  %s1175_s4 = inlined_call_operand.vmem [shape: bf16[48,128], index: 4, kind: output, shape index: {}]  }
   0x1   :  { %10 = vsyncpa [#allocation5], 0  ;;  %s1068_s15 = smov 0  }
   0x2 LB: > { %s1074_s16 = sadd.s32 4294967295, %s1037_s15   ;;  %p768_p0 = scmp.ge.s32.totalorder %s1037_s15, 1  ;;  %s1037_s15 = sphi %s1068_s15, %s16_s15  }
   0x3   : > { %p145_p1 = scmp.lt.s32.totalorder %s1037_s15, 3  ;;  %s1039_s17 = smov [#allocation2]  }
   0x4   : > { %s157_s18 = sshll.u32 %s1039_s17, 4  ;;  %p1176_p3 = scmp.eq.s32.totalorder %s1074_s16, 0  ;;  %s158_s18 = int_to_ptr.vmem [resolvable:$true] %s157_s18 }
   0x5   : > { %p1078_p2 = pnand %p768_p0, %p145_p1  ;;  %s1040_s20 = smov [#allocation4]  }
   0x6   : > { %s171_s21 = sshll.u32 %s1040_s20, 4  ;;  %s967_s25 = scalar_lea.hbm %s1173_s2, 3072  ;;  %s1091_s21 = int_to_ptr.vmem [resolvable:$true] %s171_s21 }
   0x7   : > { %s1178_s19 = scalar_select %p1078_p2, 1, 0 }
   0x8   : > { %p917_p4 = pneg %p1078_p2  ;;  %p968_p6 = scmp.ne.s32.totalorder %s1173_s2, %s967_s25 }
   0x9   : > { %p974_p10 = scmp.lt.u32.totalorder %s967_s25, %s1173_s2 }
   0xa   : > { %p1087_p5 = pnand %p1176_p3, %p917_p4 }
   0xc   : > { %p969_p7 = pneg %p1087_p5 }
   0xe   : > { %p970_p8 = pnand %p969_p7, %p968_p6 }
  0x10   : > { %p971_p9 = pneg %p970_p8 }
  0x12   : > { %p976_p11 = pnand %p974_p10, %p971_p9 }
  0x14   : > { %979 = shalt.err (!%p976_p11)
}
  0x15   : > { %s980_s30 = scalar_lea.vmem %s158_s18, 3072  ;;  %p988_p1 = scmp.lt.s32.totalorder %s158_s18, %s158_s18 }
  0x16   : > { %p981_p12 = scmp.ne.s32.totalorder %s158_s18, %s980_s30  ;;  %p989_p4 = scmp.lt.s32.totalorder %s980_s30, %s980_s30 }
  0x18   : > { %p983_p13 = pnand %p981_p12, %p969_p7  ;;  %p990_p3 = por %p989_p4, %p988_p1 }
  0x1a   : > { %p984_p0 = pneg %p983_p13 }
  0x1c   : > { %p991_p2 = pnand %p990_p3, %p984_p0 }
  0x1e   : > { %994 = shalt.err (!%p991_p2)
}
  0x1f   : > { %s1041_s5 = smov 64   ;;  %s1042_s6 = smov 4  }
  0x20   : > { %920 = dma.hbm_to_vmem [thread:$0]  (!%p1087_p5), %s1173_s2, 3072, %s158_s18, [#allocation3], %s1041_s5, %s1041_s5, %s1042_s6  }
  0x21   : > { %s995_s11 = scalar_lea.hbm %s1174_s3, 16 }
  0x22   : > { %p996_p6 = scmp.ne.s32.totalorder %s1174_s3, %s995_s11  ;;  %p1002_p8 = scmp.lt.u32.totalorder %s995_s11, %s1174_s3 }
  0x24   : > { %p998_p2 = pnand %p996_p6, %p969_p7 }
  0x26   : > { %p999_p3 = pneg %p998_p2 }
  0x28   : > { %p1004_p9 = pnand %p1002_p8, %p999_p3 }
  0x2a   : > { %1007 = shalt.err (!%p1004_p9)
}
  0x2b   : > { %s1008_s18 = scalar_lea.vmem %s1091_s21, 16  ;;  %s1015_s20 = scalar_lea.vmem %s1091_s21, 32 }
  0x2c   : > { %p1009_p10 = scmp.ne.s32.totalorder %s1091_s21, %s1008_s18  ;;  %p1016_p13 = scmp.lt.s32.totalorder %s1091_s21, %s1091_s21 }
  0x2d   : > { %p1017_p0 = scmp.lt.s32.totalorder %s1015_s20, %s1008_s18 }
  0x2e   : > { %p1011_p11 = pnand %p1009_p10, %p969_p7 }
  0x2f   : > { %p1018_p1 = por %p1017_p0, %p1016_p13 }
  0x30   : > { %p1012_p12 = pneg %p1011_p11 }
  0x32   : > { %p1019_p4 = pnand %p1018_p1, %p1012_p12 }
  0x34   : > { %1022 = shalt.err (!%p1019_p4)
}
  0x35   : > { %923 = dma.hbm_to_vmem [thread:$0]  (!%p1087_p5), %s1174_s3, 16, %s1091_s21, [#allocation5]  }
  0x36   : > { %p1180_p6 = scmp.ne.s32.totalorder %s1178_s19, 0 }
  0x37   : > { %p1181_p7 = scmp.eq.s32.totalorder (!%p1180_p6), %s1074_s16, 0 }
  0x38   : > { %204 = sbr.rel (%p1180_p6) target bundleno = 357 (0x165), region = 36 }
  0x3f   : > { %1028 = dma.done.wait (%p1181_p7), [#allocation3], 3072   ;;  %p1182_p2 = pmov %p1181_p7 }
  0x41   : > { %1030 = vsyncadd (%p1182_p2), [#allocation3], 4294964224  ;;  %p1183_p3 = pmov %p1182_p2 }
  0x42   : > { %p1184_p8 = pmov %p1182_p2 }
  0x43   : > { %1032 = dma.done.wait (%p1183_p3), [#allocation5], 16  }
  0x44   : > { %1034 = vsyncadd (%p1184_p8), [#allocation5], 4294967280  ;;  %s246_s22 = sadd.s32 1, %s1074_s16  ;;  %s1153_s25 = smul.u32 3, %s1074_s16  ;;  %v940_v0 = vld [vmem:[#allocation2 + $0x40] sm:$0xff]   ;;  %v942_v2 = vld [vmem:[#allocation2 + $0x48] sm:$0xff]  }
  0x45   : > { %s247_s19 = smul.u32 3, %s246_s22  ;;  %v941_v1 = vld [vmem:[#allocation2] sm:$0xff]   ;;  %849 = vmatprep.subr.bf16.mxu0 %v940_v0  ;;  %v943_v3 = vld [vmem:[#allocation2 + $0x8] sm:$0xff]   ;;  %v944_v4 = vld [vmem:[#allocation2 + $0x50] sm:$0xff]   ;;  %vm277_vm0 = vcmask 1043456   ;;  %vm542_vm2 = vcmask 1046528  }
  0x46   : > { %869 = vmatprep.subr.bf16.mxu1 %v941_v1  ;;  %850 = vmatpush3.bf16.msra.mxu0 %v940_v0  ;;  %p241_p5 = scmp.lt.s32.totalorder %s1153_s25, 8  ;;  %v945_v5 = vld [vmem:[#allocation2 + $0x10] sm:$0xff]   ;;  %v946_v6 = vld [vmem:[#allocation2 + $0x58] sm:$0xff]   ;;  %v948_v8 = vld [vmem:[#allocation2 + $0x60] sm:$0xff]   ;;  %vm315_vm1 = vsmask.f32 7424 }
  0x47   : > { %870 = vmatpush3.bf16.msra.mxu1 %v941_v1  ;;  %851 = vmatprep.subr.bf16.mxu0 %v942_v2  ;;  %p248_p9 = scmp.lt.s32.totalorder %s247_s19, 8  ;;  %v947_v7 = vld [vmem:[#allocation2 + $0x18] sm:$0xff]   ;;  %v949_v9 = vld [vmem:[#allocation2 + $0x20] sm:$0xff]   ;;  %v950_v10 = vld [vmem:[#allocation2 + $0x68] sm:$0xff]   ;;  %p255_p10 = scmp.lt.s32.totalorder %s1153_s25, 5 }
  0x48   : > { %871 = vmatprep.subr.bf16.mxu1 %v943_v3  ;;  %s242_s16 = scalar_select %p241_p5, %s1153_s25, 8  ;;  %v951_v11 = vld [vmem:[#allocation2 + $0x28] sm:$0xff]   ;;  %v952_v15 = vld [vmem:[#allocation2 + $0x70] sm:$0xff]   ;;  %v954_v24 = vld [vmem:[#allocation2 + $0x78] sm:$0xff]  }
  0x49   : > { %s1186_s19 = smov (!%p248_p9, %s247_s19), 8  ;;  %v953_v19 = vld [vmem:[#allocation2 + $0x30] sm:$0xff]   ;;  %v955_v25 = vld [vmem:[#allocation2 + $0x38] sm:$0xff]   ;;  %v959_v28 = vld [vmem:[#allocation2 + $0x80] sm:$0xff]   ;;  %s1188_s25 = smov (!%p255_p10, %s1153_s25), 5 }
  0x4a   : > { %852 = vmatpush3.bf16.msra.mxu0 %v942_v2  ;;  %s775_s21 = sshll.u32 %s242_s16, 2  ;;  %s776_s26 = sshll.u32 %s1186_s19, 2  ;;  %v960_v32 = vld [vmem:[#allocation2 + $0x88] sm:$0xff]   ;;  %v961_v34 = vld [vmem:[#allocation2 + $0x90] sm:$0xff]   ;;  %v962_v35 = vld [vmem:[#allocation2 + $0x98] sm:$0xff]  }
  0x4b   : > { %872 = vmatpush3.bf16.msra.mxu1 %v943_v3  ;;  %853 = vmatprep.subr.bf16.mxu0 %v944_v4  ;;  %s244_s29 = scalar_lea.vmem %s1171_s0, %s775_s21  ;;  %s251_s6 = scalar_lea.vmem %s1172_s1, %s776_s26  ;;  %v963_v36 = vld [vmem:[#allocation2 + $0xa0] sm:$0xff]   ;;  %v964_v37 = vld [vmem:[#allocation2 + $0xa8] sm:$0xff]   ;;  %v965_v38 = vld [vmem:[#allocation2 + $0xb0] sm:$0xff]  }
  0x4c   : > { %873 = vmatprep.subr.bf16.mxu1 %v945_v5  ;;  %v956_v12 = vld [vmem:[%s244_s29] sm:$0xff]   ;;  %v957_v13 = vld [vmem:[%s244_s29 + $0x8] ss:$0 sps:$4 sm:$0xff]   ;;  %v966_v39 = vld [vmem:[#allocation2 + $0xb8] sm:$0xff]   ;;  %s777_s7 = sshll.u32 %s1188_s25, 2 }
  0x4d   : > { %v958_v14 = vld [vmem:[%s251_s6] ss:$0 sps:$4 sm:$0xff]   ;;  %v317_v16 = vshrl.u32 %v956_v12, 16  ;;  %v319_v17 = vshll.u32 %v956_v12, 16  ;;  %885 = vmatprep.mubr.bf16.mxu1 %v956_v12  ;;  %v543_v29 = vrot.slane %v956_v12, 1  ;;  %s258_s10 = scalar_lea.vmem %s1175_s4, %s777_s7 }
  0x4e   : > { %854 = vmatpush3.bf16.msra.mxu0 %v944_v4  ;;  %v280_v18 = vsel %vm277_vm0, %v957_v13, %v958_v14  ;;  %v805_v52 = vld [vmem:[#allocation4] ss:$0 sm:$0xff] }
  0x4f   : > { %874 = vmatpush3.bf16.msra.mxu1 %v945_v5  ;;  %855 = vmatprep.subr.bf16.mxu0 %v946_v6  ;;  %v321_v20 = vrot.slane %v319_v17, 1  ;;  %v323_v21 = vshll.u32 %v280_v18, 16  ;;  %v327_v27 = vshrl.u32 %v280_v18, 16  ;;  %v544_v30 = vrot.slane %v280_v18, 1 }
  0x50   : > { %875 = vmatprep.subr.bf16.mxu1 %v947_v7 }
  0x51   : > { %v322_v22 = vor.u32 %v321_v20, %v317_v16  ;;  %v325_v23 = vrot.slane %v323_v21, 1  ;;  %v545_v33 = vsel %vm542_vm2, %v543_v29, %v544_v30 }
  0x52   : > { %856 = vmatpush3.bf16.msra.mxu0 %v946_v6 }
  0x53   : > { %876 = vmatpush3.bf16.msra.mxu1 %v947_v7  ;;  %857 = vmatprep.subr.bf16.mxu0 %v948_v8  ;;  %v326_v26 = vsel %vm315_vm1, %v322_v22, %v325_v23  ;;  %v329_v31 = vor.u32 %v327_v27, %v325_v23 }
  0x54   : > { %877 = vmatprep.subr.bf16.mxu1 %v949_v9  ;;  %865 = vmatprep.mubr.bf16.mxu0 %v326_v26 }
  0x56   : > { %858 = vmatpush3.bf16.msra.mxu0 %v948_v8 }
  0x57   : > { %878 = vmatpush3.bf16.msra.mxu1 %v949_v9  ;;  %859 = vmatprep.subr.bf16.mxu0 %v950_v10 }
  0x58   : > { %879 = vmatprep.subr.bf16.mxu1 %v951_v11 }
  0x5a   : > { %860 = vmatpush3.bf16.msra.mxu0 %v950_v10 }
  0x5b   : > { %880 = vmatpush3.bf16.msra.mxu1 %v951_v11  ;;  %861 = vmatprep.subr.bf16.mxu0 %v952_v15 }
  0x5c   : > { %881 = vmatprep.subr.bf16.mxu1 %v953_v19 }
  0x5e   : > { %862 = vmatpush3.bf16.msra.mxu0 %v952_v15 }
  0x5f   : > { %882 = vmatpush3.bf16.msra.mxu1 %v953_v19  ;;  %863 = vmatprep.subr.bf16.mxu0 %v954_v24 }
  0x60   : > { %883 = vmatprep.subr.bf16.mxu1 %v955_v25 }
  0x62   : > { %864 = vmatpush3.bf16.msra.mxu0 %v954_v24 }
  0x63   : > { %884 = vmatpush3.bf16.msra.mxu1 %v955_v25  ;;  %889 = vmatprep.subr.bf16.mxu0 %v959_v28 }
  0x65   : > { %866 = vmatmul.mubr.bf16.vlgmr.msra.gmra.mrb[0].mxu0 %v329_v31 }
  0x66   : > { %886 = vmatmul.mubr.bf16.vlgmr.msra.gmra.mrb[0].mxu1 %v280_v18  ;;  %890 = vmatpush3.bf16.msra.mxu0 %v959_v28 }
  0x67   : > { %891 = vmatprep.subr.bf16.mxu0 %v960_v32  ;;  %905 = vmatprep.mubr.bf16.mxu0 %v545_v33 }
  0x6a   : > { %892 = vmatpush3.bf16.msra.mxu0 %v960_v32 }
  0x6b   : > { %893 = vmatprep.subr.bf16.mxu0 %v961_v34 }
  0x6e   : > { %894 = vmatpush3.bf16.msra.mxu0 %v961_v34 }
  0x6f   : > { %895 = vmatprep.subr.bf16.mxu0 %v962_v35 }
  0x72   : > { %896 = vmatpush3.bf16.msra.mxu0 %v962_v35 }
  0x73   : > { %897 = vmatprep.subr.bf16.mxu0 %v963_v36 }
  0x76   : > { %898 = vmatpush3.bf16.msra.mxu0 %v963_v36 }
  0x77   : > { %899 = vmatprep.subr.bf16.mxu0 %v964_v37 }
  0x7a   : > { %900 = vmatpush3.bf16.msra.mxu0 %v964_v37 }
  0x7b   : > { %901 = vmatprep.subr.bf16.mxu0 %v965_v38 }
  0x7e   : > { %902 = vmatpush3.bf16.msra.mxu0 %v965_v38 }
  0x7f   : > { %903 = vmatprep.subr.bf16.mxu0 %v966_v39 }
  0x82   : > { %904 = vmatpush3.bf16.msra.mxu0 %v966_v39 }
  0x85   : > { %906 = vmatmul.mubr.bf16.vlgmr.msra.gmra.mrb[4].mxu0 %v544_v30 }
 0x138   : > { %v867_v40 = vpop.f32.mrb[0].mxu0 }
 0x139   : > { %v887_v41 = vpop.f32.mrb[0].mxu1  ;;  %v414_v42 = vpop.f32.mrb[1].mxu0 }
 0x13a   : > { %v519_v43 = vadd.f32 %v887_v41, %v867_v40  ;;  %v510_v44 = vpop.f32.mrb[1].mxu1  ;;  %v868_v45 = vpop.f32.mrb[2].mxu0 }
 0x13b   : > { %v511_v46 = vadd.f32 %v510_v44, %v414_v42  ;;  %v888_v47 = vpop.f32.mrb[2].mxu1  ;;  %v417_v48 = vpop.f32.mrb[3].mxu0 }
 0x13c   : > { %v513_v49 = vpop.f32.mrb[3].mxu1 }
 0x13d   : > { %v514_v50 = vadd.f32 %v513_v49, %v417_v48 }
 0x158   : > { %v907_v51 = vpop.f32.mrb[4].mxu0 }
 0x159   : > { %v646_v53 = vadd.f32 %v907_v51, %v519_v43  ;;  %v630_v54 = vpop.f32.mrb[5].mxu0 }
 0x15a   : > { %v644_v55 = vadd.f32 %v630_v54, %v511_v46  ;;  %v908_v56 = vpop.f32.mrb[6].mxu0 }
 0x15b   : > { %v656_v57 = vadd.f32 %v805_v52, %v646_v53  ;;  %v633_v58 = vpop.f32.mrb[7].mxu0 }
 0x15c   : > { %v654_v59 = vadd.f32 %v805_v52, %v644_v55  ;;  %v645_v60 = vadd.f32 %v633_v58, %v514_v50 }
 0x15d   : > { %v659_v61 = vmax.f32 %v656_v57, 0.0 }
 0x15e   : > { %v655_v62 = vadd.f32 %v805_v52, %v645_v60  ;;  %v657_v0 = vmax.f32 %v654_v59, 0.0 }
 0x15f   : > { %v813_v63 = vpack.c.bf16 %v659_v61, %v659_v61 }
 0x160   : > { %v658_v1 = vmax.f32 %v655_v62, 0.0 }
 0x161   : > { %675 = vst [vmem:[%s258_s10 + $0x8] sm:$0xf] %v813_v63 }
 0x162   : > { %v817_v2 = vpack.c.bf16 %v658_v1, %v657_v0 }
 0x164   : > { %818 = vst [vmem:[%s258_s10] sm:$0xff] %v817_v2  }
 0x165 PF: > { %s16_s15 = sadd.s32 1, %s1037_s15  }
 0x166   : > { %p13_p11 = scmp.ge.s32.totalorder %s16_s15, 4  }
 0x168   :  { %15 = sbr.rel (!%p13_p11) target bundleno = 2 (0x2), region = 80 }
 0x16f   :  { %698 = vsyncpa [#allocation3], 1 }
 0x170   :  { %700 = vsyncpa [#allocation3 + $0x1], 1 }
 0x171   :  { %701 = vsyncpa [#allocation5], 1 }

// kernel: resnet_forward.15
= control target key start
LH: loop header
LB: loop body
LE: loop exit
PB: predicated region body
PF: predicated region fallthrough
CT: control target
= control target key end

     0   :  { %s674_s12 = smov 0   ;;  %s774_s0 = inlined_call_operand.vmem [shape: bf16[16,384], index: 0, kind: input, shape index: {}]   ;;  %s775_s1 = inlined_call_operand.vmem [shape: bf16[384,128], index: 1, kind: input, shape index: {}]   ;;  %s776_s2 = inlined_call_operand.vmem [shape: f32[1,128], index: 2, kind: input, shape index: {}]   ;;  %s777_s3 = inlined_call_operand.vmem [shape: bf16[16,128], index: 3, kind: output, shape index: {}]  }
   0x1 LB: > { %s518_s13 = sadd.s32 4294967295, %s650_s12   ;;  %p522_p0 = scmp.ge.s32.totalorder %s650_s12, 1  ;;  %s650_s12 = sphi %s674_s12, %s13_s12  }
   0x2   : > { %p137_p1 = scmp.lt.s32.totalorder %s650_s12, 3 }
   0x4   : > { %p138_p2 = pnand %p522_p0, %p137_p1 }
   0x5   : > { %v617_v0 = vld [vmem:[%s775_s1 + $0x40] sm:$0xff] (!%p138_p2)   ;;  %v652_v2 = vmov (!%p138_p2), 0.0   ;;  %v620_v4 = vld [vmem:[%s775_s1 + $0x48] sm:$0xff] (!%p138_p2)   ;;  %vm653_vm0 = vmmov (!%p138_p2), 0   ;;  %v623_v7 = vld [vmem:[%s775_s1 + $0x50] sm:$0xff] (!%p138_p2)   ;;  %p160_p3 = scmp.lt.s32.totalorder (!%p138_p2), %s518_s13, 1 }
   0x6   : > { %141 = sbr.rel (%p138_p2) target bundleno = 262 (0x106), region = 32  ;;  %v618_v1 = vld [vmem:[%s775_s1] sm:$0xff] (!%p138_p2)   ;;  %586 = vmatprep.subr.bf16.mxu1 (!%p138_p2), %v652_v2  ;;  %555 = vmatprep.subr.bf16.mxu0 (!%p138_p2), %v617_v0  ;;  %v621_v5 = vld [vmem:[%s775_s1 + $0x8] sm:$0xff] (!%p138_p2)   ;;  %v624_v8 = vld [vmem:[%s775_s1 + $0x10] sm:$0xff] (!%p138_p2)  }
   0x7   : > { %v619_v3 = vld [vmem:[%s775_s1 + $0x80] sm:$0xff] (!%p138_p2)   ;;  %556 = vmatpush3.bf16.msra.mxu0 (!%p138_p2), %v618_v1  ;;  %602 = vmatprep.mubr.msk.bf16.mxu1 (!%p138_p2), %vm653_vm0, %v652_v2  ;;  %v622_v6 = vld [vmem:[%s775_s1 + $0x88] sm:$0xff] (!%p138_p2)   ;;  %v625_v9 = vld [vmem:[%s775_s1 + $0x90] sm:$0xff] (!%p138_p2)  }
   0x8   : > { %587 = vmatpush3.bf16.msra.mxu1 (!%p138_p2), %v619_v3  ;;  %557 = vmatprep.subr.bf16.mxu0 (!%p138_p2), %v620_v4  ;;  %v626_v10 = vld [vmem:[%s775_s1 + $0x58] sm:$0xff] (!%p138_p2)   ;;  %v629_v13 = vld [vmem:[%s775_s1 + $0x60] sm:$0xff] (!%p138_p2)   ;;  %v632_v16 = vld [vmem:[%s775_s1 + $0x68] sm:$0xff] (!%p138_p2)  }
   0x9   : > { %588 = vmatprep.subr.bf16.mxu1 (!%p138_p2), %v652_v2  ;;  %v627_v11 = vld [vmem:[%s775_s1 + $0x18] sm:$0xff] (!%p138_p2)   ;;  %v630_v14 = vld [vmem:[%s775_s1 + $0x20] sm:$0xff] (!%p138_p2)   ;;  %v633_v17 = vld [vmem:[%s775_s1 + $0x28] sm:$0xff] (!%p138_p2)  }
   0xa   : > { %v628_v12 = vld [vmem:[%s775_s1 + $0x98] sm:$0xff] (!%p138_p2)   ;;  %v631_v15 = vld [vmem:[%s775_s1 + $0xa0] sm:$0xff] (!%p138_p2)   ;;  %v634_v18 = vld [vmem:[%s775_s1 + $0xa8] sm:$0xff] (!%p138_p2)  }
   0xb   : > { %558 = vmatpush3.bf16.msra.mxu0 (!%p138_p2), %v621_v5  ;;  %v635_v19 = vld [vmem:[%s775_s1 + $0x70] sm:$0xff] (!%p138_p2)   ;;  %v638_v23 = vld [vmem:[%s775_s1 + $0x78] sm:$0xff] (!%p138_p2)   ;;  %v525_v31 = vld [vmem:[%s776_s2] ss:$0 sm:$0xff] (!%p138_p2) }
   0xc   : > { %589 = vmatpush3.bf16.msra.mxu1 (!%p138_p2), %v622_v6  ;;  %559 = vmatprep.subr.bf16.mxu0 (!%p138_p2), %v623_v7  ;;  %v636_v20 = vld [vmem:[%s775_s1 + $0x30] sm:$0xff] (!%p138_p2)   ;;  %v639_v25 = vld [vmem:[%s775_s1 + $0x38] sm:$0xff] (!%p138_p2)  }
   0xd   : > { %590 = vmatprep.subr.bf16.mxu1 %v652_v2  ;;  %s779_s13 = smov (!%p160_p3, %s518_s13), 1  ;;  %v637_v21 = vld [vmem:[%s775_s1 + $0xb0] sm:$0xff]   ;;  %v643_v26 = vld [vmem:[%s775_s1 + $0xb8] sm:$0xff]  }
   0xe   : > { %s606_s21 = smul.u32 12, %s779_s13  ;;  %s524_s18 = sshll.u32 %s779_s13, 2 }
   0xf   : > { %560 = vmatpush3.bf16.msra.mxu0 %v624_v8 }
  0x10   : > { %591 = vmatpush3.bf16.msra.mxu1 %v625_v9  ;;  %561 = vmatprep.subr.bf16.mxu0 %v626_v10  ;;  %s164_s30 = scalar_lea.vmem %s774_s0, %s606_s21  ;;  %s168_s21 = scalar_lea.vmem %s777_s3, %s524_s18 }
  0x11   : > { %592 = vmatprep.subr.bf16.mxu1 %v652_v2  ;;  %v170_v22 = vld [vmem:[%s164_s30] sm:$0xff]  ;;  %v642_v28 = vld [vmem:[%s164_s30 + $0x8] ss:$0 sps:$4 sm:$0xff]  }
  0x12   : > { %v527_v24 = vcombine.high %v170_v22, %v170_v22  ;;  %v526_v27 = vcombine.low %v170_v22, %v170_v22 }
  0x13   : > { %562 = vmatpush3.bf16.msra.mxu0 %v627_v11 }
  0x14   : > { %593 = vmatpush3.bf16.msra.mxu1 %v628_v12  ;;  %563 = vmatprep.subr.bf16.mxu0 %v629_v13 }
  0x15   : > { %594 = vmatprep.subr.bf16.mxu1 %v652_v2  ;;  %414 = vmatprep.mubr.bf16.mxu0 %v527_v24 }
  0x17   : > { %564 = vmatpush3.bf16.msra.mxu0 %v630_v14 }
  0x18   : > { %595 = vmatpush3.bf16.msra.mxu1 %v631_v15  ;;  %565 = vmatprep.subr.bf16.mxu0 %v632_v16 }
  0x19   : > { %596 = vmatprep.subr.bf16.mxu1 %v652_v2 }
  0x1b   : > { %566 = vmatpush3.bf16.msra.mxu0 %v633_v17 }
  0x1c   : > { %597 = vmatpush3.bf16.msra.mxu1 %v634_v18  ;;  %567 = vmatprep.subr.bf16.mxu0 %v635_v19 }
  0x1d   : > { %598 = vmatprep.subr.bf16.mxu1 %v652_v2 }
  0x1f   : > { %568 = vmatpush3.bf16.msra.mxu0 %v636_v20 }
  0x20   : > { %599 = vmatpush3.bf16.msra.mxu1 %v637_v21  ;;  %569 = vmatprep.subr.bf16.mxu0 %v638_v23 }
  0x21   : > { %600 = vmatprep.subr.bf16.mxu1 %v652_v2 }
  0x23   : > { %570 = vmatpush3.bf16.msra.mxu0 %v639_v25 }
  0x24   : > { %601 = vmatpush3.bf16.msra.mxu1 %v643_v26 }
  0x26   : > { %415 = vmatmul.mubr.bf16.vlgmr.msra.gmra.mrb[0].mxu0 %v526_v27 }
  0x27   : > { %603 = vmatmul.mubr.bf16.vlgmr.msra.gmra.mrb[0].mxu1 %v642_v28 }
  0xf9   : > { %v571_v29 = vpop.f32.mrb[0].mxu0 }
  0xfa   : > { %v572_v30 = vpop.f32.mrb[1].mxu0  ;;  %v456_v32 = vpop.f32.mrb[0].mxu1 }
  0xfb   : > { %v573_v33 = vadd.f32 %v572_v30, %v571_v29  ;;  %v574_v34 = vpop.f32.mrb[2].mxu0  ;;  %v604_v35 = vpop.f32.mrb[1].mxu1 }
  0xfc   : > { %v575_v36 = vpop.f32.mrb[3].mxu0  ;;  %v459_v37 = vpop.f32.mrb[2].mxu1 }
  0xfd   : > { %v417_v38 = vadd.f32 %v573_v33, %v525_v31  ;;  %v605_v39 = vpop.f32.mrb[3].mxu1 }
  0xff   : > { %v457_v40 = vadd.f32 %v456_v32, %v417_v38 }
 0x101   : > { %v462_v41 = vmax.f32 %v457_v40, 0.0 }
 0x103   : > { %v463_v42 = vpack.c.bf16 %v462_v41, %v462_v41 }
 0x105   : > { %464 = vst [vmem:[%s168_s21] sm:$0xf] %v463_v42 }
 0x106 PF: > { %s13_s12 = sadd.s32 1, %s650_s12  }
 0x107   : > { %p10_p4 = scmp.ge.s32.totalorder %s13_s12, 4  }
 0x109   :  { %12 = sbr.rel (!%p10_p4) target bundleno = 1 (0x1), region = 62 }

// kernel: resnet_forward.14
= control target key start
LH: loop header
LB: loop body
LE: loop exit
PB: predicated region body
PF: predicated region fallthrough
CT: control target
= control target key end

     0   :  { %10 = vsyncpa [#allocation3], 0  ;;  %s1254_s0 = inlined_call_operand.vmem [shape: bf16[72,128], index: 0, kind: input, shape index: {}, may-alias: {0,1}]   ;;  %s1255_s1 = inlined_call_operand.vmem [shape: bf16[72,128], index: 1, kind: input, shape index: {}, may-alias: {0,1}]   ;;  %s1256_s2 = inlined_call_operand.hbm [shape: bf16[3,128,128], index: 2, kind: input, shape index: {}]   ;;  %s1257_s3 = inlined_call_operand.hbm [shape: f32[1,128], index: 3, kind: input, shape index: {}]   ;;  %s1258_s4 = inlined_call_operand.vmem [shape: bf16[48,128], index: 4, kind: input, shape index: {}]   ;;  %s1259_s5 = inlined_call_operand.vmem [shape: bf16[48,128], index: 5, kind: output, shape index: {}]  }
   0x1   :  { %11 = vsyncpa [#allocation5], 0  ;;  %s1148_s18 = smov 0  }
   0x2 LB: > { %s1154_s19 = sadd.s32 4294967295, %s1112_s18   ;;  %p838_p0 = scmp.ge.s32.totalorder %s1112_s18, 1  ;;  %s1112_s18 = sphi %s1148_s18, %s17_s18  }
   0x3   : > { %p172_p1 = scmp.lt.s32.totalorder %s1112_s18, 3  ;;  %s1114_s20 = smov [#allocation2]  }
   0x4   : > { %s184_s21 = sshll.u32 %s1114_s20, 4  ;;  %p1260_p3 = scmp.eq.s32.totalorder %s1154_s19, 0  ;;  %s185_s21 = int_to_ptr.vmem [resolvable:$true] %s184_s21 }
   0x5   : > { %p1158_p2 = pnand %p838_p0, %p172_p1  ;;  %s1115_s23 = smov [#allocation4]  }
   0x6   : > { %s198_s24 = sshll.u32 %s1115_s23, 4  ;;  %s1042_s28 = scalar_lea.hbm %s1256_s2, 3072  ;;  %s1171_s24 = int_to_ptr.vmem [resolvable:$true] %s198_s24 }
   0x7   : > { %s1262_s22 = scalar_select %p1158_p2, 1, 0 }
   0x8   : > { %p992_p4 = pneg %p1158_p2  ;;  %p1043_p6 = scmp.ne.s32.totalorder %s1256_s2, %s1042_s28 }
   0x9   : > { %p1049_p10 = scmp.lt.u32.totalorder %s1042_s28, %s1256_s2 }
   0xa   : > { %p1167_p5 = pnand %p1260_p3, %p992_p4 }
   0xc   : > { %p1044_p7 = pneg %p1167_p5 }
   0xe   : > { %p1045_p8 = pnand %p1044_p7, %p1043_p6 }
  0x10   : > { %p1046_p9 = pneg %p1045_p8 }
  0x12   : > { %p1051_p11 = pnand %p1049_p10, %p1046_p9 }
  0x14   : > { %1054 = shalt.err (!%p1051_p11)
}
  0x15   : > { %s1055_s8 = scalar_lea.vmem %s185_s21, 3072  ;;  %p1063_p1 = scmp.lt.s32.totalorder %s185_s21, %s185_s21 }
  0x16   : > { %p1056_p12 = scmp.ne.s32.totalorder %s185_s21, %s1055_s8  ;;  %p1064_p4 = scmp.lt.s32.totalorder %s1055_s8, %s1055_s8 }
  0x18   : > { %p1058_p13 = pnand %p1056_p12, %p1044_p7  ;;  %p1065_p3 = por %p1064_p4, %p1063_p1 }
  0x1a   : > { %p1059_p0 = pneg %p1058_p13 }
  0x1c   : > { %p1066_p2 = pnand %p1065_p3, %p1059_p0 }
  0x1e   : > { %1069 = shalt.err (!%p1066_p2)
}
  0x1f   : > { %s1116_s9 = smov 64   ;;  %s1117_s10 = smov 4  }
  0x20   : > { %995 = dma.hbm_to_vmem [thread:$0]  (!%p1167_p5), %s1256_s2, 3072, %s185_s21, [#allocation3], %s1116_s9, %s1116_s9, %s1117_s10  }
  0x21   : > { %s1070_s15 = scalar_lea.hbm %s1257_s3, 16 }
  0x22   : > { %p1071_p6 = scmp.ne.s32.totalorder %s1257_s3, %s1070_s15  ;;  %p1077_p8 = scmp.lt.u32.totalorder %s1070_s15, %s1257_s3 }
  0x24   : > { %p1073_p2 = pnand %p1071_p6, %p1044_p7 }
  0x26   : > { %p1074_p3 = pneg %p1073_p2 }
  0x28   : > { %p1079_p9 = pnand %p1077_p8, %p1074_p3 }
  0x2a   : > { %1082 = shalt.err (!%p1079_p9)
}
  0x2b   : > { %s1083_s21 = scalar_lea.vmem %s1171_s24, 16  ;;  %s1090_s26 = scalar_lea.vmem %s1171_s24, 32 }
  0x2c   : > { %p1084_p10 = scmp.ne.s32.totalorder %s1171_s24, %s1083_s21  ;;  %p1091_p13 = scmp.lt.s32.totalorder %s1171_s24, %s1171_s24 }
  0x2d   : > { %p1092_p0 = scmp.lt.s32.totalorder %s1090_s26, %s1083_s21 }
  0x2e   : > { %p1086_p11 = pnand %p1084_p10, %p1044_p7 }
  0x2f   : > { %p1093_p1 = por %p1092_p0, %p1091_p13 }
  0x30   : > { %p1087_p12 = pneg %p1086_p11 }
  0x32   : > { %p1094_p4 = pnand %p1093_p1, %p1087_p12 }
  0x34   : > { %1097 = shalt.err (!%p1094_p4)
}
  0x35   : > { %998 = dma.hbm_to_vmem [thread:$0]  (!%p1167_p5), %s1257_s3, 16, %s1171_s24, [#allocation5]  }
  0x36   : > { %p1264_p6 = scmp.ne.s32.totalorder %s1262_s22, 0 }
  0x37   : > { %p1265_p7 = scmp.eq.s32.totalorder (!%p1264_p6), %s1154_s19, 0 }
  0x38   : > { %240 = sbr.rel (%p1264_p6) target bundleno = 359 (0x167), region = 40 }
  0x3f   : > { %1103 = dma.done.wait (%p1265_p7), [#allocation3], 3072   ;;  %p1266_p2 = pmov %p1265_p7 }
  0x41   : > { %1105 = vsyncadd (%p1266_p2), [#allocation3], 4294964224  ;;  %p1267_p3 = pmov %p1266_p2 }
  0x42   : > { %p1268_p8 = pmov %p1266_p2 }
  0x43   : > { %1107 = dma.done.wait (%p1267_p3), [#allocation5], 16  }
  0x44   : > { %1109 = vsyncadd (%p1268_p8), [#allocation5], 4294967280  ;;  %s289_s25 = sadd.s32 1, %s1154_s19  ;;  %s1233_s29 = smul.u32 3, %s1154_s19  ;;  %v1015_v0 = vld [vmem:[#allocation2 + $0x40] sm:$0xff]   ;;  %v1017_v2 = vld [vmem:[#allocation2 + $0x48] sm:$0xff]  }
  0x45   : > { %s290_s22 = smul.u32 3, %s289_s25  ;;  %v1016_v1 = vld [vmem:[#allocation2] sm:$0xff]   ;;  %924 = vmatprep.subr.bf16.mxu0 %v1015_v0  ;;  %v1018_v3 = vld [vmem:[#allocation2 + $0x8] sm:$0xff]   ;;  %v1019_v4 = vld [vmem:[#allocation2 + $0x50] sm:$0xff]   ;;  %vm326_vm0 = vcmask 1043456   ;;  %vm591_vm2 = vcmask 1046528  }
  0x46   : > { %944 = vmatprep.subr.bf16.mxu1 %v1016_v1  ;;  %925 = vmatpush3.bf16.msra.mxu0 %v1015_v0  ;;  %p284_p5 = scmp.lt.s32.totalorder %s1233_s29, 8  ;;  %v1020_v5 = vld [vmem:[#allocation2 + $0x10] sm:$0xff]   ;;  %v1021_v6 = vld [vmem:[#allocation2 + $0x58] sm:$0xff]   ;;  %v1023_v8 = vld [vmem:[#allocation2 + $0x60] sm:$0xff]   ;;  %vm364_vm1 = vsmask.f32 7424 }
  0x47   : > { %945 = vmatpush3.bf16.msra.mxu1 %v1016_v1  ;;  %926 = vmatprep.subr.bf16.mxu0 %v1017_v2  ;;  %p291_p9 = scmp.lt.s32.totalorder %s290_s22, 8  ;;  %v1022_v7 = vld [vmem:[#allocation2 + $0x18] sm:$0xff]   ;;  %v1024_v9 = vld [vmem:[#allocation2 + $0x20] sm:$0xff]   ;;  %v1025_v10 = vld [vmem:[#allocation2 + $0x68] sm:$0xff]   ;;  %p298_p10 = scmp.lt.s32.totalorder %s1233_s29, 5 }
  0x48   : > { %946 = vmatprep.subr.bf16.mxu1 %v1018_v3  ;;  %s285_s19 = scalar_select %p284_p5, %s1233_s29, 8  ;;  %v1026_v11 = vld [vmem:[#allocation2 + $0x28] sm:$0xff]   ;;  %v1027_v15 = vld [vmem:[#allocation2 + $0x70] sm:$0xff]   ;;  %v1029_v24 = vld [vmem:[#allocation2 + $0x78] sm:$0xff]  }
  0x49   : > { %s1270_s22 = smov (!%p291_p9, %s290_s22), 8  ;;  %v1028_v19 = vld [vmem:[#allocation2 + $0x30] sm:$0xff]   ;;  %v1030_v25 = vld [vmem:[#allocation2 + $0x38] sm:$0xff]   ;;  %v1034_v28 = vld [vmem:[#allocation2 + $0x80] sm:$0xff]   ;;  %s1272_s29 = smov (!%p298_p10, %s1233_s29), 5 }
  0x4a   : > { %927 = vmatpush3.bf16.msra.mxu0 %v1017_v2  ;;  %s845_s24 = sshll.u32 %s285_s19, 2  ;;  %s846_s30 = sshll.u32 %s1270_s22, 2  ;;  %v1035_v32 = vld [vmem:[#allocation2 + $0x88] sm:$0xff]   ;;  %v1036_v34 = vld [vmem:[#allocation2 + $0x90] sm:$0xff]   ;;  %v1037_v35 = vld [vmem:[#allocation2 + $0x98] sm:$0xff]  }
  0x4b   : > { %947 = vmatpush3.bf16.msra.mxu1 %v1018_v3  ;;  %928 = vmatprep.subr.bf16.mxu0 %v1019_v4  ;;  %s287_s8 = scalar_lea.vmem %s1254_s0, %s845_s24  ;;  %s294_s11 = scalar_lea.vmem %s1255_s1, %s846_s30  ;;  %v1038_v36 = vld [vmem:[#allocation2 + $0xa0] sm:$0xff]   ;;  %v1039_v37 = vld [vmem:[#allocation2 + $0xa8] sm:$0xff]   ;;  %v1040_v38 = vld [vmem:[#allocation2 + $0xb0] sm:$0xff]  }
  0x4c   : > { %948 = vmatprep.subr.bf16.mxu1 %v1020_v5  ;;  %v1031_v12 = vld [vmem:[%s287_s8] sm:$0xff]   ;;  %v1032_v13 = vld [vmem:[%s287_s8 + $0x8] ss:$0 sps:$4 sm:$0xff]   ;;  %v1041_v39 = vld [vmem:[#allocation2 + $0xb8] sm:$0xff]   ;;  %s847_s12 = sshll.u32 %s1272_s29, 2 }
  0x4d   : > { %v1033_v14 = vld [vmem:[%s294_s11] ss:$0 sps:$4 sm:$0xff]   ;;  %v366_v16 = vshrl.u32 %v1031_v12, 16  ;;  %v368_v17 = vshll.u32 %v1031_v12, 16  ;;  %960 = vmatprep.mubr.bf16.mxu1 %v1031_v12  ;;  %v592_v29 = vrot.slane %v1031_v12, 1  ;;  %s301_s15 = scalar_lea.vmem %s1258_s4, %s847_s12  ;;  %s307_s20 = scalar_lea.vmem %s1259_s5, %s847_s12 }
  0x4e   : > { %929 = vmatpush3.bf16.msra.mxu0 %v1019_v4  ;;  %v329_v18 = vsel %vm326_vm0, %v1032_v13, %v1033_v14  ;;  %v708_v51 = vld [vmem:[%s301_s15 + $0x8] sm:$0xf]  ;;  %v886_v52 = vld [vmem:[%s301_s15] sm:$0xff]  }
  0x4f   : > { %949 = vmatpush3.bf16.msra.mxu1 %v1020_v5  ;;  %930 = vmatprep.subr.bf16.mxu0 %v1021_v6  ;;  %v370_v20 = vrot.slane %v368_v17, 1  ;;  %v372_v21 = vshll.u32 %v329_v18, 16  ;;  %v376_v27 = vshrl.u32 %v329_v18, 16  ;;  %v593_v30 = vrot.slane %v329_v18, 1  ;;  %v876_v54 = vld [vmem:[#allocation4] ss:$0 sm:$0xff] }
  0x50   : > { %950 = vmatprep.subr.bf16.mxu1 %v1022_v7  ;;  %v711_v56 = vunpack.c.l.bf16 %v708_v51  ;;  %v887_v59 = vunpack.c.l.bf16 %v886_v52  ;;  %v888_v1 = vunpack.c.h.bf16 %v886_v52 }
  0x51   : > { %v371_v22 = vor.u32 %v370_v20, %v366_v16  ;;  %v374_v23 = vrot.slane %v372_v21, 1  ;;  %v594_v33 = vsel %vm591_vm2, %v592_v29, %v593_v30 }
  0x52   : > { %931 = vmatpush3.bf16.msra.mxu0 %v1021_v6 }
  0x53   : > { %951 = vmatpush3.bf16.msra.mxu1 %v1022_v7  ;;  %932 = vmatprep.subr.bf16.mxu0 %v1023_v8  ;;  %v375_v26 = vsel %vm364_vm1, %v371_v22, %v374_v23  ;;  %v378_v31 = vor.u32 %v376_v27, %v374_v23 }
  0x54   : > { %952 = vmatprep.subr.bf16.mxu1 %v1024_v9  ;;  %940 = vmatprep.mubr.bf16.mxu0 %v375_v26 }
  0x56   : > { %933 = vmatpush3.bf16.msra.mxu0 %v1023_v8 }
  0x57   : > { %953 = vmatpush3.bf16.msra.mxu1 %v1024_v9  ;;  %934 = vmatprep.subr.bf16.mxu0 %v1025_v10 }
  0x58   : > { %954 = vmatprep.subr.bf16.mxu1 %v1026_v11 }
  0x5a   : > { %935 = vmatpush3.bf16.msra.mxu0 %v1025_v10 }
  0x5b   : > { %955 = vmatpush3.bf16.msra.mxu1 %v1026_v11  ;;  %936 = vmatprep.subr.bf16.mxu0 %v1027_v15 }
  0x5c   : > { %956 = vmatprep.subr.bf16.mxu1 %v1028_v19 }
  0x5e   : > { %937 = vmatpush3.bf16.msra.mxu0 %v1027_v15 }
  0x5f   : > { %957 = vmatpush3.bf16.msra.mxu1 %v1028_v19  ;;  %938 = vmatprep.subr.bf16.mxu0 %v1029_v24 }
  0x60   : > { %958 = vmatprep.subr.bf16.mxu1 %v1030_v25 }
  0x62   : > { %939 = vmatpush3.bf16.msra.mxu0 %v1029_v24 }
  0x63   : > { %959 = vmatpush3.bf16.msra.mxu1 %v1030_v25  ;;  %964 = vmatprep.subr.bf16.mxu0 %v1034_v28 }
  0x65   : > { %941 = vmatmul.mubr.bf16.vlgmr.msra.gmra.mrb[0].mxu0 %v378_v31 }
  0x66   : > { %961 = vmatmul.mubr.bf16.vlgmr.msra.gmra.mrb[0].mxu1 %v329_v18  ;;  %965 = vmatpush3.bf16.msra.mxu0 %v1034_v28 }
  0x67   : > { %966 = vmatprep.subr.bf16.mxu0 %v1035_v32  ;;  %980 = vmatprep.mubr.bf16.mxu0 %v594_v33 }
  0x6a   : > { %967 = vmatpush3.bf16.msra.mxu0 %v1035_v32 }
  0x6b   : > { %968 = vmatprep.subr.bf16.mxu0 %v1036_v34 }
  0x6e   : > { %969 = vmatpush3.bf16.msra.mxu0 %v1036_v34 }
  0x6f   : > { %970 = vmatprep.subr.bf16.mxu0 %v1037_v35 }
  0x72   : > { %971 = vmatpush3.bf16.msra.mxu0 %v1037_v35 }
  0x73   : > { %972 = vmatprep.subr.bf16.mxu0 %v1038_v36 }
  0x76   : > { %973 = vmatpush3.bf16.msra.mxu0 %v1038_v36 }
  0x77   : > { %974 = vmatprep.subr.bf16.mxu0 %v1039_v37 }
  0x7a   : > { %975 = vmatpush3.bf16.msra.mxu0 %v1039_v37 }
  0x7b   : > { %976 = vmatprep.subr.bf16.mxu0 %v1040_v38 }
  0x7e   : > { %977 = vmatpush3.bf16.msra.mxu0 %v1040_v38 }
  0x7f   : > { %978 = vmatprep.subr.bf16.mxu0 %v1041_v39 }
  0x82   : > { %979 = vmatpush3.bf16.msra.mxu0 %v1041_v39 }
  0x85   : > { %981 = vmatmul.mubr.bf16.vlgmr.msra.gmra.mrb[4].mxu0 %v593_v30 }
 0x138   : > { %v942_v40 = vpop.f32.mrb[0].mxu0 }
 0x139   : > { %v962_v41 = vpop.f32.mrb[0].mxu1  ;;  %v463_v42 = vpop.f32.mrb[1].mxu0 }
 0x13a   : > { %v568_v43 = vadd.f32 %v962_v41, %v942_v40  ;;  %v559_v44 = vpop.f32.mrb[1].mxu1  ;;  %v943_v45 = vpop.f32.mrb[2].mxu0 }
 0x13b   : > { %v560_v46 = vadd.f32 %v559_v44, %v463_v42  ;;  %v963_v47 = vpop.f32.mrb[2].mxu1  ;;  %v466_v48 = vpop.f32.mrb[3].mxu0 }
 0x13c   : > { %v562_v49 = vpop.f32.mrb[3].mxu1 }
 0x13d   : > { %v563_v50 = vadd.f32 %v562_v49, %v466_v48 }
 0x158   : > { %v982_v53 = vpop.f32.mrb[4].mxu0 }
 0x159   : > { %v695_v55 = vadd.f32 %v982_v53, %v568_v43  ;;  %v679_v57 = vpop.f32.mrb[5].mxu0 }
 0x15a   : > { %v693_v58 = vadd.f32 %v679_v57, %v560_v46  ;;  %v983_v60 = vpop.f32.mrb[6].mxu0 }
 0x15b   : > { %v705_v61 = vadd.f32 %v876_v54, %v695_v55  ;;  %v682_v62 = vpop.f32.mrb[7].mxu0 }
 0x15c   : > { %v703_v63 = vadd.f32 %v876_v54, %v693_v58  ;;  %v694_v0 = vadd.f32 %v682_v62, %v563_v50 }
 0x15d   : > { %v714_v2 = vadd.f32 %v711_v56, %v705_v61 }
 0x15e   : > { %v712_v3 = vadd.f32 %v887_v59, %v703_v63  ;;  %v704_v4 = vadd.f32 %v876_v54, %v694_v0 }
 0x15f   : > { %v717_v5 = vmax.f32 %v714_v2, 0.0 }
 0x160   : > { %v713_v6 = vadd.f32 %v888_v1, %v704_v4  ;;  %v715_v8 = vmax.f32 %v712_v3, 0.0 }
 0x161   : > { %v884_v7 = vpack.c.bf16 %v717_v5, %v717_v5 }
 0x162   : > { %v716_v9 = vmax.f32 %v713_v6, 0.0 }
 0x163   : > { %733 = vst [vmem:[%s307_s20 + $0x8] sm:$0xf] %v884_v7 }
 0x164   : > { %v892_v10 = vpack.c.bf16 %v716_v9, %v715_v8 }
 0x166   : > { %893 = vst [vmem:[%s307_s20] sm:$0xff] %v892_v10  }
 0x167 PF: > { %s17_s18 = sadd.s32 1, %s1112_s18  }
 0x168   : > { %p14_p11 = scmp.ge.s32.totalorder %s17_s18, 4  }
 0x16a   :  { %16 = sbr.rel (!%p14_p11) target bundleno = 2 (0x2), region = 87 }
 0x171   :  { %756 = vsyncpa [#allocation3], 1 }
 0x172   :  { %758 = vsyncpa [#allocation3 + $0x1], 1 }
 0x173   :  { %759 = vsyncpa [#allocation5], 1 }

// kernel: resnet_forward.16
= control target key start
LH: loop header
LB: loop body
LE: loop exit
PB: predicated region body
PF: predicated region fallthrough
CT: control target
= control target key end

     0   :  { %s1231_s24 = smov 0   ;;  %s1419_s0 = inlined_call_operand.vmem [shape: bf16[48,128], index: 0, kind: input, shape index: {}, may-alias: {0,1}]   ;;  %s1420_s1 = inlined_call_operand.vmem [shape: bf16[48,128], index: 1, kind: input, shape index: {}, may-alias: {0,1}]   ;;  %s1421_s2 = inlined_call_operand.vmem [shape: bf16[3,128,128], index: 2, kind: input, shape index: {}]   ;;  %s1422_s3 = inlined_call_operand.vmem [shape: f32[1,128], index: 3, kind: input, shape index: {}]   ;;  %s1423_s4 = inlined_call_operand.vmem [shape: bf16[32,128], index: 4, kind: input, shape index: {}]   ;;  %s1424_s5 = inlined_call_operand.vmem [shape: bf16[128,128], index: 5, kind: input, shape index: {}]   ;;  %s1425_s6 = inlined_call_operand.vmem [shape: f32[1,128], index: 6, kind: input, shape index: {}]   ;;  %s1426_s7 = inlined_call_operand.vmem [shape: bf16[32,128], index: 7, kind: output, shape index: {}]  }
   0x1 LB: > { %s907_s25 = sadd.s32 4294967295, %s1187_s24   ;;  %p913_p0 = scmp.ge.s32.totalorder %s1187_s24, 1  ;;  %s1187_s24 = sphi %s1231_s24, %s17_s24  }
   0x2   : > { %p266_p1 = scmp.lt.s32.totalorder %s1187_s24, 3 }
   0x4   : > { %p267_p2 = pnand %p913_p0, %p266_p1 }
   0x5   : > { %v1147_v0 = vld [vmem:[%s1421_s2 + $0x40] sm:$0xff] (!%p267_p2)   ;;  %v1189_v1 = vmov (!%p267_p2), 0.0   ;;  %v1149_v3 = vld [vmem:[%s1421_s2 + $0x48] sm:$0xff] (!%p267_p2)   ;;  %vm1190_vm0 = vmmov (!%p267_p2), 0   ;;  %s1252_s9 = sshll.u32 (!%p267_p2), %s907_s25, 1  ;;  %v1151_v5 = vld [vmem:[%s1421_s2 + $0x50] sm:$0xff] (!%p267_p2)  }
   0x6   : > { %270 = sbr.rel (%p267_p2) target bundleno = 295 (0x127), region = 48  ;;  %1043 = vmatprep.subr.bf16.mxu1 (!%p267_p2), %v1189_v1  ;;  %1083 = vmatprep.subr.bf16.mxu0 (!%p267_p2), %v1189_v1  ;;  %v1148_v2 = vld [vmem:[%s1421_s2 + $0x80] sm:$0xff] (!%p267_p2)   ;;  %v1150_v4 = vld [vmem:[%s1421_s2 + $0x88] sm:$0xff] (!%p267_p2)   ;;  %p310_p3 = scmp.lt.s32.totalorder (!%p267_p2), %s1252_s9, 5  ;;  %v1152_v6 = vld [vmem:[%s1421_s2 + $0x90] sm:$0xff] (!%p267_p2)   ;;  %vm588_vm2 = vcmask (!%p267_p2), 1046528  }
   0x7   : > { %1044 = vmatpush3.bf16.msra.mxu1 (!%p267_p2), %v1147_v0  ;;  %1059 = vmatprep.mubr.msk.bf16.mxu1 (!%p267_p2), %vm1190_vm0, %v1189_v1  ;;  %s999_s12 = sadd.s32 (!%p267_p2), 2, %s1252_s9  ;;  %v1153_v7 = vld [vmem:[%s1421_s2 + $0x58] sm:$0xff] (!%p267_p2)   ;;  %v1155_v9 = vld [vmem:[%s1421_s2 + $0x60] sm:$0xff] (!%p267_p2)   ;;  %v1157_v11 = vld [vmem:[%s1421_s2 + $0x68] sm:$0xff] (!%p267_p2)   ;;  %p324_p5 = scmp.lt.s32.totalorder (!%p267_p2), %s1252_s9, 3 }
   0x8   : > { %1084 = vmatpush3.bf16.msra.mxu0 (!%p267_p2), %v1148_v2  ;;  %1045 = vmatprep.subr.bf16.mxu1 (!%p267_p2), %v1189_v1  ;;  %p317_p4 = scmp.lt.s32.totalorder (!%p267_p2), %s999_s12, 5  ;;  %v1154_v8 = vld [vmem:[%s1421_s2 + $0x98] sm:$0xff] (!%p267_p2)   ;;  %v1156_v10 = vld [vmem:[%s1421_s2 + $0xa0] sm:$0xff] (!%p267_p2)   ;;  %v1158_v14 = vld [vmem:[%s1421_s2 + $0xa8] sm:$0xff] (!%p267_p2)   ;;  %vm378_vm1 = vsmask.f32 (!%p267_p2), 7424 }
   0x9   : > { %1085 = vmatprep.subr.bf16.mxu0 (!%p267_p2), %v1189_v1  ;;  %1099 = vmatprep.mubr.msk.bf16.mxu0 (!%p267_p2), %vm1190_vm0, %v1189_v1  ;;  %v1159_v16 = vld [vmem:[%s1421_s2 + $0x70] sm:$0xff] (!%p267_p2)   ;;  %v1161_v21 = vld [vmem:[%s1421_s2 + $0x78] sm:$0xff] (!%p267_p2)   ;;  %v1164_v28 = vld [vmem:[%s1421_s2] sm:$0xff] (!%p267_p2)  }
   0xa   : > { %v1160_v20 = vld [vmem:[%s1421_s2 + $0xb0] sm:$0xff] (!%p267_p2)   ;;  %v1162_v22 = vld [vmem:[%s1421_s2 + $0xb8] sm:$0xff] (!%p267_p2)   ;;  %v1165_v30 = vld [vmem:[%s1424_s5] sm:$0xff] (!%p267_p2)  }
   0xb   : > { %1046 = vmatpush3.bf16.msra.mxu1 (!%p267_p2), %v1149_v3  ;;  %v1166_v31 = vld [vmem:[%s1421_s2 + $0x8] sm:$0xff] (!%p267_p2)   ;;  %v1168_v33 = vld [vmem:[%s1421_s2 + $0x10] sm:$0xff] (!%p267_p2)   ;;  %v1170_v35 = vld [vmem:[%s1421_s2 + $0x18] sm:$0xff] (!%p267_p2)  }
   0xc   : > { %1086 = vmatpush3.bf16.msra.mxu0 (!%p267_p2), %v1150_v4  ;;  %1047 = vmatprep.subr.bf16.mxu1 (!%p267_p2), %v1189_v1  ;;  %v1167_v32 = vld [vmem:[%s1424_s5 + $0x8] sm:$0xff] (!%p267_p2)   ;;  %v1169_v34 = vld [vmem:[%s1424_s5 + $0x10] sm:$0xff] (!%p267_p2)   ;;  %v1171_v36 = vld [vmem:[%s1424_s5 + $0x18] sm:$0xff] (!%p267_p2)  }
   0xd   : > { %s311_s17 = scalar_select %p310_p3, %s1252_s9, 5  ;;  %1087 = vmatprep.subr.bf16.mxu0 %v1189_v1  ;;  %v1172_v37 = vld [vmem:[%s1421_s2 + $0x20] sm:$0xff]   ;;  %v1174_v39 = vld [vmem:[%s1421_s2 + $0x28] sm:$0xff]   ;;  %v1176_v41 = vld [vmem:[%s1421_s2 + $0x30] sm:$0xff]  }
   0xe   : > { %s1428_s12 = smov (!%p317_p4, %s999_s12), 5  ;;  %s1430_s9 = smov (!%p324_p5, %s1252_s9), 3  ;;  %v1173_v38 = vld [vmem:[%s1424_s5 + $0x20] sm:$0xff]   ;;  %v1175_v40 = vld [vmem:[%s1424_s5 + $0x28] sm:$0xff]   ;;  %v1177_v42 = vld [vmem:[%s1424_s5 + $0x30] sm:$0xff]  }
   0xf   : > { %1048 = vmatpush3.bf16.msra.mxu1 %v1151_v5  ;;  %s915_s22 = sshll.u32 %s311_s17, 2  ;;  %s917_s23 = sshll.u32 %s1428_s12, 2  ;;  %v1178_v43 = vld [vmem:[%s1421_s2 + $0x38] sm:$0xff]   ;;  %v979_v46 = vld [vmem:[%s1422_s3] ss:$0 sm:$0xff] }
  0x10   : > { %1088 = vmatpush3.bf16.msra.mxu0 %v1152_v6  ;;  %1049 = vmatprep.subr.bf16.mxu1 %v1189_v1  ;;  %s313_s29 = scalar_lea.vmem %s1419_s0, %s915_s22  ;;  %s320_s12 = scalar_lea.vmem %s1420_s1, %s917_s23  ;;  %v1179_v44 = vld [vmem:[%s1424_s5 + $0x38] sm:$0xff]   ;;  %v980_v48 = vld [vmem:[%s1425_s6] ss:$0 sm:$0xff] }
  0x11   : > { %1089 = vmatprep.subr.bf16.mxu0 %v1189_v1  ;;  %v1297_v12 = vld [vmem:[%s313_s29] sm:$0xff]   ;;  %s919_s28 = sshll.u32 %s1430_s9, 2 }
  0x12   : > { %v338_v13 = vld [vmem:[%s320_s12] sm:$0xf]  ;;  %v382_v15 = vshll.u32 %v1297_v12, 16  ;;  %v380_v18 = vshrl.u32 %v1297_v12, 16  ;;  %v589_v25 = vrot.slane %v1297_v12, 1  ;;  %s1341_s11 = scalar_lea.vmem %s1423_s4, %s919_s28  ;;  %s333_s27 = scalar_lea.vmem %s1426_s7, %s919_s28 }
  0x13   : > { %1050 = vmatpush3.bf16.msra.mxu1 %v1153_v7  ;;  %v387_v17 = vshll.u32 %v338_v13, 16  ;;  %v590_v26 = vrot.slane %v338_v13, 1  ;;  %v1180_v45 = vld [vmem:[%s1341_s11] sm:$0xff]  }
  0x14   : > { %1090 = vmatpush3.bf16.msra.mxu0 %v1154_v8  ;;  %1051 = vmatprep.subr.bf16.mxu1 %v1189_v1  ;;  %v384_v19 = vrot.slane %v382_v15, 1 }
  0x15   : > { %1091 = vmatprep.subr.bf16.mxu0 %v1189_v1  ;;  %v389_v24 = vrot.slane %v387_v17, 1  ;;  %v591_v29 = vsel %vm588_vm2, %v589_v25, %v590_v26 }
  0x16   : > { %v385_v23 = vor.u32 %v384_v19, %v380_v18 }
  0x17   : > { %1052 = vmatpush3.bf16.msra.mxu1 %v1155_v9 }
  0x18   : > { %1092 = vmatpush3.bf16.msra.mxu0 %v1156_v10  ;;  %1053 = vmatprep.subr.bf16.mxu1 %v1189_v1  ;;  %v390_v27 = vsel %vm378_vm1, %v385_v23, %v389_v24 }
  0x19   : > { %1093 = vmatprep.subr.bf16.mxu0 %v1189_v1 }
  0x1b   : > { %1054 = vmatpush3.bf16.msra.mxu1 %v1157_v11 }
  0x1c   : > { %1094 = vmatpush3.bf16.msra.mxu0 %v1158_v14  ;;  %1055 = vmatprep.subr.bf16.mxu1 %v1189_v1 }
  0x1d   : > { %1095 = vmatprep.subr.bf16.mxu0 %v1189_v1 }
  0x1f   : > { %1056 = vmatpush3.bf16.msra.mxu1 %v1159_v16 }
  0x20   : > { %1096 = vmatpush3.bf16.msra.mxu0 %v1160_v20  ;;  %1057 = vmatprep.subr.bf16.mxu1 %v1189_v1 }
  0x21   : > { %1097 = vmatprep.subr.bf16.mxu0 %v1189_v1 }
  0x23   : > { %1058 = vmatpush3.bf16.msra.mxu1 %v1161_v21 }
  0x24   : > { %1098 = vmatpush3.bf16.msra.mxu0 %v1162_v22  ;;  %1063 = vmatprep.subr.bf16.mxu1 %v1189_v1 }
  0x25   : > { %1103 = vmatprep.subr.bf16.mxu0 %v1189_v1 }
  0x26   : > { %1060 = vmatmul.mubr.bf16.vlgmr.msra.gmra.mrb[0].mxu1 %v390_v27 }
  0x27   : > { %1064 = vmatpush3.bf16.msra.mxu1 %v1164_v28  ;;  %1100 = vmatmul.mubr.bf16.vlgmr.msra.gmra.mrb[0].mxu0 %v591_v29 }
  0x28   : > { %1104 = vmatpush3.bf16.msra.mxu0 %v1165_v30  ;;  %1065 = vmatprep.subr.bf16.mxu1 %v1189_v1 }
  0x29   : > { %1105 = vmatprep.subr.bf16.mxu0 %v1189_v1  ;;  %1079 = vmatprep.mubr.msk.bf16.mxu1 %vm1190_vm0, %v1189_v1 }
  0x2a   : > { %1119 = vmatprep.mubr.msk.bf16.mxu0 %vm1190_vm0, %v1189_v1 }
  0x2b   : > { %1066 = vmatpush3.bf16.msra.mxu1 %v1166_v31 }
  0x2c   : > { %1106 = vmatpush3.bf16.msra.mxu0 %v1167_v32  ;;  %1067 = vmatprep.subr.bf16.mxu1 %v1189_v1 }
  0x2d   : > { %1107 = vmatprep.subr.bf16.mxu0 %v1189_v1 }
  0x2f   : > { %1068 = vmatpush3.bf16.msra.mxu1 %v1168_v33 }
  0x30   : > { %1108 = vmatpush3.bf16.msra.mxu0 %v1169_v34  ;;  %1069 = vmatprep.subr.bf16.mxu1 %v1189_v1 }
  0x31   : > { %1109 = vmatprep.subr.bf16.mxu0 %v1189_v1 }
  0x33   : > { %1070 = vmatpush3.bf16.msra.mxu1 %v1170_v35 }
  0x34   : > { %1110 = vmatpush3.bf16.msra.mxu0 %v1171_v36  ;;  %1071 = vmatprep.subr.bf16.mxu1 %v1189_v1 }
  0x35   : > { %1111 = vmatprep.subr.bf16.mxu0 %v1189_v1 }
  0x37   : > { %1072 = vmatpush3.bf16.msra.mxu1 %v1172_v37 }
  0x38   : > { %1112 = vmatpush3.bf16.msra.mxu0 %v1173_v38  ;;  %1073 = vmatprep.subr.bf16.mxu1 %v1189_v1 }
  0x39   : > { %1113 = vmatprep.subr.bf16.mxu0 %v1189_v1 }
  0x3b   : > { %1074 = vmatpush3.bf16.msra.mxu1 %v1174_v39 }
  0x3c   : > { %1114 = vmatpush3.bf16.msra.mxu0 %v1175_v40  ;;  %1075 = vmatprep.subr.bf16.mxu1 %v1189_v1 }
  0x3d   : > { %1115 = vmatprep.subr.bf16.mxu0 %v1189_v1 }
  0x3f   : > { %1076 = vmatpush3.bf16.msra.mxu1 %v1176_v41 }
  0x40   : > { %1116 = vmatpush3.bf16.msra.mxu0 %v1177_v42  ;;  %1077 = vmatprep.subr.bf16.mxu1 %v1189_v1 }
  0x41   : > { %1117 = vmatprep.subr.bf16.mxu0 %v1189_v1 }
  0x43   : > { %1078 = vmatpush3.bf16.msra.mxu1 %v1178_v43 }
  0x44   : > { %1118 = vmatpush3.bf16.msra.mxu0 %v1179_v44 }
  0x46   : > { %1080 = vmatmul.mubr.bf16.vlgmr.msra.gmra.mrb[0].mxu1 %v1297_v12 }
  0x47   : > { %1120 = vmatmul.mubr.bf16.vlgmr.msra.gmra.mrb[0].mxu0 %v1180_v45 }
 0x119   : > { %v563_v47 = vpop.f32.mrb[0].mxu1 }
 0x11a   : > { %v1123_v49 = vadd.f32 %v979_v46, %v563_v47  ;;  %v806_v50 = vpop.f32.mrb[0].mxu0  ;;  %v1081_v51 = vpop.f32.mrb[1].mxu1 }
 0x11b   : > { %v1121_v52 = vpop.f32.mrb[1].mxu0  ;;  %v566_v53 = vpop.f32.mrb[2].mxu1 }
 0x11c   : > { %v1124_v54 = vadd.f32 %v1123_v49, %v980_v48  ;;  %v1126_v55 = vadd.f32 %v979_v46, %v566_v53  ;;  %v809_v56 = vpop.f32.mrb[2].mxu0  ;;  %v1082_v57 = vpop.f32.mrb[3].mxu1 }
 0x11d   : > { %v1122_v58 = vpop.f32.mrb[3].mxu0 }
 0x11e   : > { %v1125_v59 = vadd.f32 %v1124_v54, %v806_v50  ;;  %v1127_v60 = vadd.f32 %v1126_v55, %v980_v48 }
 0x120   : > { %v1128_v61 = vadd.f32 %v1127_v60, %v809_v56  ;;  %v815_v62 = vmax.f32 %v1125_v59, 0.0 }
 0x122   : > { %v816_v63 = vmax.f32 %v1128_v61, 0.0 }
 0x124   : > { %v1005_v0 = vpack.c.bf16 %v816_v63, %v815_v62 }
 0x126   : > { %1006 = vst [vmem:[%s333_s27] sm:$0xff] %v1005_v0  }
 0x127 PF: > { %s17_s24 = sadd.s32 1, %s1187_s24  }
 0x128   : > { %p14_p6 = scmp.ge.s32.totalorder %s17_s24, 4  }
 0x12a   :  { %16 = sbr.rel (!%p14_p6) target bundleno = 1 (0x1), region = 86 }

// kernel: resnet_forward.17
= control target key start
LH: loop header
LB: loop body
LE: loop exit
PB: predicated region body
PF: predicated region fallthrough
CT: control target
= control target key end

     0   :  { %v558_v1 = vmov 0   ;;  %v67_v57 = vlaneseq  ;;  %s735_s1 = inlined_call_operand.vmem [shape: bf16[384,256], index: 1, kind: input, shape index: {}]   ;;  %s736_s0 = inlined_call_operand.vmem [shape: bf16[8,384], index: 0, kind: input, shape index: {}]   ;;  %s737_s2 = inlined_call_operand.vmem [shape: f32[1,256], index: 2, kind: input, shape index: {}]   ;;  %s738_s3 = inlined_call_operand.vmem [shape: bf16[8,256], index: 3, kind: output, shape index: {}]  }
   0x1   :  { %v483_v0 = vld [vmem:[%s735_s1 + $0x4] ss:$8 sps:$4 sm:$0xff]   ;;  %401 = vmatprep.mubr.bf16.mxu0 %v558_v1  ;;  %v485_v2 = vld [vmem:[%s735_s1] ss:$8 sps:$4 sm:$0xff]   ;;  %v486_v3 = vld [vmem:[%s735_s1 + $0x14] ss:$8 sps:$4 sm:$0xff]  }
   0x2   :  { %328 = vmatprep.subr.bf16.mxu1 %v483_v0  ;;  %v488_v4 = vld [vmem:[%s735_s1 + $0x10] ss:$8 sps:$4 sm:$0xff]   ;;  %v489_v5 = vld [vmem:[%s735_s1 + $0x24] ss:$8 sps:$4 sm:$0xff]   ;;  %v491_v6 = vld [vmem:[%s735_s1 + $0x20] ss:$8 sps:$4 sm:$0xff]  }
   0x3   :  { %329 = vmatpush1.bf16.msra.mxu1 %v485_v2  ;;  %v492_v7 = vld [vmem:[%s735_s1 + $0x34] ss:$8 sps:$4 sm:$0xff]   ;;  %v494_v8 = vld [vmem:[%s735_s1 + $0x30] ss:$8 sps:$4 sm:$0xff]   ;;  %v507_v9 = vld [vmem:[%s735_s1 + $0x104] ss:$8 sps:$4 sm:$0xff]  }
   0x4   :  { %330 = vmatprep.subr.bf16.mxu1 %v486_v3  ;;  %v495_v10 = vld [vmem:[%s735_s1 + $0x44] ss:$8 sps:$4 sm:$0xff]   ;;  %v511_v11 = vld [vmem:[%s735_s1 + $0x100] ss:$8 sps:$4 sm:$0xff]   ;;  %369 = vmatprep.subr.bf16.mxu0 %v507_v9  ;;  %v513_v12 = vld [vmem:[%s735_s1 + $0x114] ss:$8 sps:$4 sm:$0xff]  }
   0x5   :  { %370 = vmatpush1.bf16.msra.mxu0 %v511_v11  ;;  %v497_v13 = vld [vmem:[%s735_s1 + $0x40] ss:$8 sps:$4 sm:$0xff]   ;;  %v498_v14 = vld [vmem:[%s735_s1 + $0x54] ss:$8 sps:$4 sm:$0xff]   ;;  %v517_v15 = vld [vmem:[%s735_s1 + $0x110] ss:$8 sps:$4 sm:$0xff]  }
   0x6   :  { %371 = vmatprep.subr.bf16.mxu0 %v513_v12  ;;  %v519_v16 = vld [vmem:[%s735_s1 + $0x124] ss:$8 sps:$4 sm:$0xff]   ;;  %v500_v17 = vld [vmem:[%s735_s1 + $0x50] ss:$8 sps:$4 sm:$0xff]   ;;  %v523_v18 = vld [vmem:[%s735_s1 + $0x120] ss:$8 sps:$4 sm:$0xff]  }
   0x7   :  { %331 = vmatpush1.bf16.msra.mxu1 %v488_v4  ;;  %v525_v19 = vld [vmem:[%s735_s1 + $0x134] ss:$8 sps:$4 sm:$0xff]   ;;  %v501_v20 = vld [vmem:[%s735_s1 + $0x64] ss:$8 sps:$4 sm:$0xff]   ;;  %v529_v21 = vld [vmem:[%s735_s1 + $0x130] ss:$8 sps:$4 sm:$0xff]  }
   0x8   :  { %332 = vmatprep.subr.bf16.mxu1 %v489_v5  ;;  %v503_v22 = vld [vmem:[%s735_s1 + $0x60] ss:$8 sps:$4 sm:$0xff]   ;;  %v531_v23 = vld [vmem:[%s735_s1 + $0x144] ss:$8 sps:$4 sm:$0xff]   ;;  %v504_v24 = vld [vmem:[%s735_s1 + $0x74] ss:$8 sps:$4 sm:$0xff]  }
   0x9   :  { %372 = vmatpush1.bf16.msra.mxu0 %v517_v15  ;;  %v506_v25 = vld [vmem:[%s735_s1 + $0x70] ss:$8 sps:$4 sm:$0xff]   ;;  %v535_v26 = vld [vmem:[%s735_s1 + $0x140] ss:$8 sps:$4 sm:$0xff]   ;;  %v537_v27 = vld [vmem:[%s735_s1 + $0x154] ss:$8 sps:$4 sm:$0xff]  }
   0xa   :  { %373 = vmatprep.subr.bf16.mxu0 %v519_v16  ;;  %v509_v28 = vld [vmem:[%s735_s1 + $0x84] ss:$8 sps:$4 sm:$0xff]   ;;  %v541_v29 = vld [vmem:[%s735_s1 + $0x150] ss:$8 sps:$4 sm:$0xff]   ;;  %v512_v30 = vld [vmem:[%s735_s1 + $0x80] ss:$8 sps:$4 sm:$0xff]  }
   0xb   :  { %333 = vmatpush1.bf16.msra.mxu1 %v491_v6  ;;  %v543_v31 = vld [vmem:[%s735_s1 + $0x164] ss:$8 sps:$4 sm:$0xff]   ;;  %v515_v32 = vld [vmem:[%s735_s1 + $0x94] ss:$8 sps:$4 sm:$0xff]   ;;  %v547_v35 = vld [vmem:[%s735_s1 + $0x160] ss:$8 sps:$4 sm:$0xff]  }
   0xc   :  { %334 = vmatprep.subr.bf16.mxu1 %v492_v7  ;;  %v15_v33 = vld [vmem:[%s736_s0] sm:$0xff]  ;;  %v518_v36 = vld [vmem:[%s735_s1 + $0x90] ss:$8 sps:$4 sm:$0xff]   ;;  %v549_v37 = vld [vmem:[%s735_s1 + $0x174] ss:$8 sps:$4 sm:$0xff]   ;;  %v68_v58 = vshrl.u32 %v67_v57, 7 }
   0xd   :  { %374 = vmatpush1.bf16.msra.mxu0 %v523_v18  ;;  %v426_v34 = vcombine.high %v15_v33, %v15_v33  ;;  %v521_v38 = vld [vmem:[%s735_s1 + $0xa4] ss:$8 sps:$4 sm:$0xff]   ;;  %v553_v39 = vld [vmem:[%s735_s1 + $0x170] ss:$8 sps:$4 sm:$0xff]   ;;  %v524_v40 = vld [vmem:[%s735_s1 + $0xa0] ss:$8 sps:$4 sm:$0xff]   ;;  %v425_v52 = vcombine.low %v15_v33, %v15_v33 }
   0xe   :  { %375 = vmatprep.subr.bf16.mxu0 %v525_v19  ;;  %v527_v41 = vld [vmem:[%s735_s1 + $0xb4] ss:$8 sps:$4 sm:$0xff]   ;;  %v557_v42 = vld [vmem:[%s736_s0 + $0x8] ss:$0 sps:$4 sm:$0xff]   ;;  %v530_v43 = vld [vmem:[%s735_s1 + $0xb0] ss:$8 sps:$4 sm:$0xff]  }
   0xf   :  { %335 = vmatpush1.bf16.msra.mxu1 %v494_v8  ;;  %360 = vmatprep.mubr.bf16.mxu1 %v426_v34  ;;  %v533_v44 = vld [vmem:[%s735_s1 + $0xc4] ss:$8 sps:$4 sm:$0xff]   ;;  %v536_v45 = vld [vmem:[%s735_s1 + $0xc0] ss:$8 sps:$4 sm:$0xff]   ;;  %v539_v46 = vld [vmem:[%s735_s1 + $0xd4] ss:$8 sps:$4 sm:$0xff]  }
  0x10   :  { %336 = vmatprep.subr.bf16.mxu1 %v495_v10  ;;  %v542_v47 = vld [vmem:[%s735_s1 + $0xd0] ss:$8 sps:$4 sm:$0xff]   ;;  %v545_v48 = vld [vmem:[%s735_s1 + $0xe4] ss:$8 sps:$4 sm:$0xff]   ;;  %v548_v49 = vld [vmem:[%s735_s1 + $0xe0] ss:$8 sps:$4 sm:$0xff]  }
  0x11   :  { %376 = vmatpush1.bf16.msra.mxu0 %v529_v21  ;;  %v551_v50 = vld [vmem:[%s735_s1 + $0xf4] ss:$8 sps:$4 sm:$0xff]   ;;  %v554_v51 = vld [vmem:[%s735_s1 + $0xf0] ss:$8 sps:$4 sm:$0xff]   ;;  %v69_v59 = vsub.s32 0, %v68_v58  ;;  %v73_v61 = vsub.s32 1, %v68_v58 }
  0x12   :  { %377 = vmatprep.subr.bf16.mxu0 %v531_v23  ;;  %v65_v60 = vld [vmem:[%s737_s2] sm:$0x3] }
  0x13   :  { %337 = vmatpush1.bf16.msra.mxu1 %v497_v13  ;;  %v70_v62 = vrot.slane %v65_v60, %v69_v59  ;;  %v74_v63 = vrot.slane %v65_v60, %v73_v61 }
  0x14   :  { %338 = vmatprep.subr.bf16.mxu1 %v498_v14 }
  0x15   :  { %378 = vmatpush1.bf16.msra.mxu0 %v535_v26 }
  0x16   :  { %379 = vmatprep.subr.bf16.mxu0 %v537_v27 }
  0x17   :  { %339 = vmatpush1.bf16.msra.mxu1 %v500_v17 }
  0x18   :  { %340 = vmatprep.subr.bf16.mxu1 %v501_v20 }
  0x19   :  { %380 = vmatpush1.bf16.msra.mxu0 %v541_v29 }
  0x1a   :  { %381 = vmatprep.subr.bf16.mxu0 %v543_v31 }
  0x1b   :  { %341 = vmatpush1.bf16.msra.mxu1 %v503_v22 }
  0x1c   :  { %342 = vmatprep.subr.bf16.mxu1 %v504_v24 }
  0x1d   :  { %382 = vmatpush1.bf16.msra.mxu0 %v547_v35 }
  0x1e   :  { %383 = vmatprep.subr.bf16.mxu0 %v549_v37 }
  0x1f   :  { %343 = vmatpush1.bf16.msra.mxu1 %v506_v25 }
  0x20   :  { %344 = vmatprep.subr.bf16.mxu1 %v509_v28 }
  0x21   :  { %384 = vmatpush1.bf16.msra.mxu0 %v553_v39 }
  0x23   :  { %345 = vmatpush1.bf16.msra.mxu1 %v512_v30 }
  0x24   :  { %346 = vmatprep.subr.bf16.mxu1 %v515_v32  ;;  %402 = vmatmul.mubr.bf16.vlgmr.msra.gmra.mrb[0].mxu0 %v557_v42 }
  0x27   :  { %347 = vmatpush1.bf16.msra.mxu1 %v518_v36 }
  0x28   :  { %348 = vmatprep.subr.bf16.mxu1 %v521_v38 }
  0x2b   :  { %349 = vmatpush1.bf16.msra.mxu1 %v524_v40 }
  0x2c   :  { %350 = vmatprep.subr.bf16.mxu1 %v527_v41 }
  0x2f   :  { %351 = vmatpush1.bf16.msra.mxu1 %v530_v43 }
  0x30   :  { %352 = vmatprep.subr.bf16.mxu1 %v533_v44 }
  0x33   :  { %353 = vmatpush1.bf16.msra.mxu1 %v536_v45 }
  0x34   :  { %354 = vmatprep.subr.bf16.mxu1 %v539_v46 }
  0x37   :  { %355 = vmatpush1.bf16.msra.mxu1 %v542_v47 }
  0x38   :  { %356 = vmatprep.subr.bf16.mxu1 %v545_v48 }
  0x3b   :  { %357 = vmatpush1.bf16.msra.mxu1 %v548_v49 }
  0x3c   :  { %358 = vmatprep.subr.bf16.mxu1 %v551_v50 }
  0x3f   :  { %359 = vmatpush1.bf16.msra.mxu1 %v554_v51 }
  0x42   :  { %361 = vmatmul.mubr.bf16.vlgmr.msra.gmra.mrb[0].mxu1 %v425_v52 }
  0xf7   :  { %v403_v53 = vpop.f32.mrb[0].mxu0 }
  0xf8   :  { %v405_v54 = vpop.f32.mrb[1].mxu0 }
  0xf9   :  { %v407_v55 = vpop.f32.mrb[2].mxu0 }
  0xfa   :  { %v408_v56 = vpop.f32.mrb[3].mxu0 }
 0x115   :  { %v362_v0 = vpop.f32.mrb[0].mxu1 }
 0x116   :  { %v363_v1 = vadd.f32 %v362_v0, %v70_v62  ;;  %v364_v2 = vpop.f32.mrb[1].mxu1 }
 0x117   :  { %v365_v3 = vadd.f32 %v364_v2, %v74_v63  ;;  %v366_v4 = vpop.f32.mrb[2].mxu1 }
 0x118   :  { %v404_v5 = vadd.f32 %v403_v53, %v363_v1  ;;  %v367_v6 = vpop.f32.mrb[3].mxu1 }
 0x119   :  { %v406_v7 = vadd.f32 %v405_v54, %v365_v3 }
 0x11a   :  { %v410_v8 = vmax.f32 %v404_v5, 0.0 }
 0x11b   :  { %v411_v9 = vmax.f32 %v406_v7, 0.0 }
 0x11d   :  { %v477_v10 = vpack.c.bf16 %v411_v9, %v410_v8 }
 0x11f   :  { %420 = vst [vmem:[%s738_s3] sm:$0xff] %v477_v10 }

// kernel: resnet_forward.18
= control target key start
LH: loop header
LB: loop body
LE: loop exit
PB: predicated region body
PF: predicated region fallthrough
CT: control target
= control target key end

     0   :  { %s1767_s24 = smov 0   ;;  %s2151_s0 = inlined_call_operand.vmem [shape: bf16[24,256], index: 0, kind: input, shape index: {}, may-alias: {0,1}]   ;;  %s2152_s1 = inlined_call_operand.vmem [shape: bf16[24,256], index: 1, kind: input, shape index: {}, may-alias: {0,1}]   ;;  %s2153_s2 = inlined_call_operand.vmem [shape: bf16[3,256,256], index: 2, kind: input, shape index: {}]   ;;  %s2154_s3 = inlined_call_operand.vmem [shape: f32[1,256], index: 3, kind: input, shape index: {}]   ;;  %s2155_s4 = inlined_call_operand.vmem [shape: bf16[16,128], index: 4, kind: input, shape index: {}]   ;;  %s2156_s5 = inlined_call_operand.vmem [shape: bf16[128,256], index: 5, kind: input, shape index: {}]   ;;  %s2157_s6 = inlined_call_operand.vmem [shape: f32[1,256], index: 6, kind: input, shape index: {}]   ;;  %s2158_s7 = inlined_call_operand.vmem [shape: bf16[16,256], index: 7, kind: output, shape index: {}]  }
   0x1 LB: > { %s1773_s25 = sadd.s32 4294967295, %s1724_s24   ;;  %p1328_p0 = scmp.ge.s32.totalorder %s1724_s24, 1  ;;  %s1724_s24 = sphi %s1767_s24, %s17_s24  }
   0x2   : > { %p260_p1 = scmp.lt.s32.totalorder %s1724_s24, 3 }
   0x4   : > { %p261_p2 = pnand %p1328_p0, %p260_p1 }
   0x5   : > { %v1546_v0 = vld [vmem:[%s2153_s2 + $0x104] ss:$8 sps:$4 sm:$0xff] (!%p261_p2)   ;;  %v1548_v1 = vld [vmem:[%s2153_s2 + $0x100] ss:$8 sps:$4 sm:$0xff] (!%p261_p2)   ;;  %v1552_v4 = vld [vmem:[%s2153_s2 + $0x114] ss:$8 sps:$4 sm:$0xff] (!%p261_p2)  }
   0x6   : > { %264 = sbr.rel (%p261_p2) target bundleno = 358 (0x166), region = 48  ;;  %584 = vmatprep.subr.bf16.mxu1 (!%p261_p2), %v1546_v0  ;;  %v1549_v2 = vld [vmem:[%s2153_s2 + $0x204] ss:$8 sps:$4 sm:$0xff] (!%p261_p2)   ;;  %v1551_v3 = vld [vmem:[%s2153_s2 + $0x200] ss:$8 sps:$4 sm:$0xff] (!%p261_p2)   ;;  %s307_s21 = sadd.s32 (!%p261_p2), 1, %s1773_s25 }
   0x7   : > { %585 = vmatpush1.bf16.msra.mxu1 (!%p261_p2), %v1548_v1  ;;  %v1554_v5 = vld [vmem:[%s2153_s2 + $0x110] ss:$8 sps:$4 sm:$0xff] (!%p261_p2)   ;;  %1025 = vmatprep.subr.bf16.mxu0 (!%p261_p2), %v1549_v2  ;;  %v1555_v6 = vld [vmem:[%s2153_s2 + $0x214] ss:$8 sps:$4 sm:$0xff] (!%p261_p2)   ;;  %v1558_v8 = vld [vmem:[%s2153_s2 + $0x124] ss:$8 sps:$4 sm:$0xff] (!%p261_p2)  }
   0x8   : > { %1026 = vmatpush1.bf16.msra.mxu0 (!%p261_p2), %v1551_v3  ;;  %586 = vmatprep.subr.bf16.mxu1 (!%p261_p2), %v1552_v4  ;;  %v1557_v7 = vld [vmem:[%s2153_s2 + $0x210] ss:$8 sps:$4 sm:$0xff] (!%p261_p2)   ;;  %v1560_v9 = vld [vmem:[%s2153_s2 + $0x120] ss:$8 sps:$4 sm:$0xff] (!%p261_p2)   ;;  %v1561_v10 = vld [vmem:[%s2153_s2 + $0x224] ss:$8 sps:$4 sm:$0xff] (!%p261_p2)  }
   0x9   : > { %1027 = vmatprep.subr.bf16.mxu0 (!%p261_p2), %v1555_v6  ;;  %v1564_v11 = vld [vmem:[%s2153_s2 + $0x134] ss:$8 sps:$4 sm:$0xff] (!%p261_p2)   ;;  %v1563_v12 = vld [vmem:[%s2153_s2 + $0x220] ss:$8 sps:$4 sm:$0xff] (!%p261_p2)   ;;  %v1566_v14 = vld [vmem:[%s2153_s2 + $0x130] ss:$8 sps:$4 sm:$0xff] (!%p261_p2)  }
   0xa   : > { %v1567_v13 = vld [vmem:[%s2153_s2 + $0x234] ss:$8 sps:$4 sm:$0xff] (!%p261_p2)   ;;  %v1570_v15 = vld [vmem:[%s2153_s2 + $0x144] ss:$8 sps:$4 sm:$0xff] (!%p261_p2)   ;;  %v1569_v16 = vld [vmem:[%s2153_s2 + $0x230] ss:$8 sps:$4 sm:$0xff] (!%p261_p2)  }
   0xb   : > { %587 = vmatpush1.bf16.msra.mxu1 (!%p261_p2), %v1554_v5  ;;  %v1573_v17 = vld [vmem:[%s2153_s2 + $0x244] ss:$8 sps:$4 sm:$0xff] (!%p261_p2)   ;;  %v1572_v18 = vld [vmem:[%s2153_s2 + $0x140] ss:$8 sps:$4 sm:$0xff] (!%p261_p2)   ;;  %v1576_v19 = vld [vmem:[%s2153_s2 + $0x154] ss:$8 sps:$4 sm:$0xff] (!%p261_p2)  }
   0xc   : > { %588 = vmatprep.subr.bf16.mxu1 (!%p261_p2), %v1558_v8  ;;  %1028 = vmatpush1.bf16.msra.mxu0 (!%p261_p2), %v1557_v7  ;;  %v1575_v20 = vld [vmem:[%s2153_s2 + $0x240] ss:$8 sps:$4 sm:$0xff] (!%p261_p2)   ;;  %v1579_v21 = vld [vmem:[%s2153_s2 + $0x254] ss:$8 sps:$4 sm:$0xff] (!%p261_p2)   ;;  %v1578_v22 = vld [vmem:[%s2153_s2 + $0x150] ss:$8 sps:$4 sm:$0xff] (!%p261_p2)  }
   0xd   : > { %1029 = vmatprep.subr.bf16.mxu0 %v1561_v10  ;;  %v1582_v23 = vld [vmem:[%s2153_s2 + $0x164] ss:$8 sps:$4 sm:$0xff]   ;;  %v1581_v24 = vld [vmem:[%s2153_s2 + $0x250] ss:$8 sps:$4 sm:$0xff]   ;;  %v1584_v26 = vld [vmem:[%s2153_s2 + $0x160] ss:$8 sps:$4 sm:$0xff]  }
   0xe   : > { %v1585_v25 = vld [vmem:[%s2153_s2 + $0x264] ss:$8 sps:$4 sm:$0xff]   ;;  %v1588_v27 = vld [vmem:[%s2153_s2 + $0x174] ss:$8 sps:$4 sm:$0xff]   ;;  %v1587_v28 = vld [vmem:[%s2153_s2 + $0x260] ss:$8 sps:$4 sm:$0xff]  }
   0xf   : > { %589 = vmatpush1.bf16.msra.mxu1 %v1560_v9  ;;  %v1591_v29 = vld [vmem:[%s2153_s2 + $0x274] ss:$8 sps:$4 sm:$0xff]   ;;  %v1590_v30 = vld [vmem:[%s2153_s2 + $0x170] ss:$8 sps:$4 sm:$0xff]   ;;  %v1594_v31 = vld [vmem:[%s2153_s2 + $0x184] ss:$8 sps:$4 sm:$0xff]  }
  0x10   : > { %590 = vmatprep.subr.bf16.mxu1 %v1564_v11  ;;  %1030 = vmatpush1.bf16.msra.mxu0 %v1563_v12  ;;  %p302_p3 = scmp.lt.s32.totalorder %s1773_s25, 2  ;;  %v1593_v32 = vld [vmem:[%s2153_s2 + $0x270] ss:$8 sps:$4 sm:$0xff]   ;;  %p308_p4 = scmp.lt.s32.totalorder %s307_s21, 2  ;;  %v1597_v33 = vld [vmem:[%s2153_s2 + $0x284] ss:$8 sps:$4 sm:$0xff]  }
  0x11   : > { %1031 = vmatprep.subr.bf16.mxu0 %v1567_v13  ;;  %v1596_v34 = vld [vmem:[%s2153_s2 + $0x180] ss:$8 sps:$4 sm:$0xff]   ;;  %v1600_v35 = vld [vmem:[%s2153_s2 + $0x194] ss:$8 sps:$4 sm:$0xff]   ;;  %v1602_v38 = vld [vmem:[%s2153_s2 + $0x190] ss:$8 sps:$4 sm:$0xff]  }
  0x12   : > { %s303_s13 = scalar_select %p302_p3, %s1773_s25, 2  ;;  %v1599_v36 = vld [vmem:[%s2153_s2 + $0x280] ss:$8 sps:$4 sm:$0xff]   ;;  %v1603_v37 = vld [vmem:[%s2153_s2 + $0x294] ss:$8 sps:$4 sm:$0xff]   ;;  %vm336_vm0 = vcmask 1043456  }
  0x13   : > { %591 = vmatpush1.bf16.msra.mxu1 %v1566_v14  ;;  %s2160_s21 = smov (!%p308_p4, %s307_s21), 2  ;;  %v1606_v39 = vld [vmem:[%s2153_s2 + $0x1a4] ss:$8 sps:$4 sm:$0xff]   ;;  %v1605_v40 = vld [vmem:[%s2153_s2 + $0x290] ss:$8 sps:$4 sm:$0xff]   ;;  %p314_p5 = scmp.lt.s32.totalorder %s1773_s25, 1 }
  0x14   : > { %592 = vmatprep.subr.bf16.mxu1 %v1570_v15  ;;  %1032 = vmatpush1.bf16.msra.mxu0 %v1569_v16  ;;  %s1519_s23 = sshll.u32 %s303_s13, 3  ;;  %s1520_s28 = sshll.u32 %s2160_s21, 3  ;;  %v1609_v41 = vld [vmem:[%s2153_s2 + $0x2a4] ss:$8 sps:$4 sm:$0xff]   ;;  %v1608_v42 = vld [vmem:[%s2153_s2 + $0x1a0] ss:$8 sps:$4 sm:$0xff]  }
  0x15   : > { %1033 = vmatprep.subr.bf16.mxu0 %v1573_v17  ;;  %s306_s12 = scalar_lea.vmem %s2151_s0, %s1519_s23  ;;  %v1612_v43 = vld [vmem:[%s2153_s2 + $0x1b4] ss:$8 sps:$4 sm:$0xff]   ;;  %s312_s16 = scalar_lea.vmem %s2152_s1, %s1520_s28  ;;  %v1611_v44 = vld [vmem:[%s2153_s2 + $0x2a0] ss:$8 sps:$4 sm:$0xff]   ;;  %v1614_v45 = vld [vmem:[%s2153_s2 + $0x1b0] ss:$8 sps:$4 sm:$0xff]  }
  0x16   : > { %v1615_v46 = vld [vmem:[%s2153_s2 + $0x2b4] ss:$8 sps:$4 sm:$0xff]   ;;  %v324_v47 = vld [vmem:[%s306_s12] sm:$0xff]  ;;  %v1617_v52 = vld [vmem:[%s2153_s2 + $0x2b0] ss:$8 sps:$4 sm:$0xff]   ;;  %s2162_s25 = smov (!%p314_p5, %s1773_s25), 1 }
  0x17   : > { %593 = vmatpush1.bf16.msra.mxu1 %v1572_v18  ;;  %v325_v48 = vld [vmem:[%s312_s16] sm:$0xff]  ;;  %v1337_v49 = vcombine.high %v324_v47, %v324_v47  ;;  %v1336_v56 = vcombine.low %v324_v47, %v324_v47  ;;  %v1624_v60 = vld [vmem:[%s2153_s2 + $0x1d4] ss:$8 sps:$4 sm:$0xff]   ;;  %v1626_v1 = vld [vmem:[%s2153_s2 + $0x1d0] ss:$8 sps:$4 sm:$0xff]   ;;  %s1333_s21 = sshll.u32 %s2162_s25, 2 }
  0x18   : > { %594 = vmatprep.subr.bf16.mxu1 %v1576_v19  ;;  %1034 = vmatpush1.bf16.msra.mxu0 %v1575_v20  ;;  %v1618_v50 = vld [vmem:[%s2153_s2 + $0x1c4] ss:$8 sps:$4 sm:$0xff]   ;;  %v1339_v51 = vcombine.high %v325_v48, %v325_v48  ;;  %v1620_v55 = vld [vmem:[%s2153_s2 + $0x1c0] ss:$8 sps:$4 sm:$0xff]   ;;  %v1338_v57 = vcombine.low %v325_v48, %v325_v48  ;;  %v1627_v0 = vld [vmem:[%s2153_s2 + $0x2d4] ss:$8 sps:$4 sm:$0xff]   ;;  %s317_s22 = scalar_lea.vmem %s2155_s4, %s1333_s21 }
  0x19   : > { %1035 = vmatprep.subr.bf16.mxu0 %v1579_v21  ;;  %v1621_v53 = vld [vmem:[%s2153_s2 + $0x2c4] ss:$8 sps:$4 sm:$0xff]   ;;  %v1623_v62 = vld [vmem:[%s2153_s2 + $0x2c0] ss:$8 sps:$4 sm:$0xff]   ;;  %v1629_v5 = vld [vmem:[%s2153_s2 + $0x2d0] ss:$8 sps:$4 sm:$0xff]  }
  0x1a   : > { %v343_v54 = vsel %vm336_vm0, %v1337_v49, %v1339_v51  ;;  %v1953_v3 = vsel %vm336_vm0, %v1336_v56, %v1338_v57  ;;  %v1630_v4 = vld [vmem:[%s2153_s2 + $0x1e4] ss:$8 sps:$4 sm:$0xff]   ;;  %v1632_v8 = vld [vmem:[%s2153_s2 + $0x1e0] ss:$8 sps:$4 sm:$0xff]   ;;  %v1636_v9 = vld [vmem:[%s2153_s2 + $0x1f4] ss:$8 sps:$4 sm:$0xff]  }
  0x1b   : > { %595 = vmatpush1.bf16.msra.mxu1 %v1578_v22  ;;  %v416_v58 = vshrl.u32 %v343_v54, 16  ;;  %v418_v59 = vshll.u32 %v343_v54, 16  ;;  %v862_v61 = vrot.slane %v343_v54, 1  ;;  %v1633_v6 = vld [vmem:[%s2153_s2 + $0x2e4] ss:$8 sps:$4 sm:$0xff]   ;;  %v412_v7 = vshll.u32 %v1953_v3, 16 }
  0x1c   : > { %596 = vmatprep.subr.bf16.mxu1 %v1582_v23  ;;  %1036 = vmatpush1.bf16.msra.mxu0 %v1581_v24  ;;  %v1635_v10 = vld [vmem:[%s2153_s2 + $0x2e0] ss:$8 sps:$4 sm:$0xff]   ;;  %v1639_v11 = vld [vmem:[%s2153_s2 + $0x2f4] ss:$8 sps:$4 sm:$0xff]   ;;  %v410_v12 = vshrl.u32 %v1953_v3, 16  ;;  %v861_v20 = vrot.slane %v1953_v3, 1 }
  0x1d   : > { %1037 = vmatprep.subr.bf16.mxu0 %v1585_v25  ;;  %v420_v63 = vrot.slane %v418_v59, 1  ;;  %1057 = vmatprep.mubr.bf16.mxu0 %v862_v61  ;;  %v414_v13 = vrot.slane %v412_v7, 1  ;;  %v1638_v14 = vld [vmem:[%s2153_s2 + $0x1f0] ss:$8 sps:$4 sm:$0xff]   ;;  %v1648_v15 = vld [vmem:[%s2153_s2 + $0x4] ss:$8 sps:$4 sm:$0xff]  }
  0x1e   : > { %v1641_v16 = vld [vmem:[%s2153_s2 + $0x2f0] ss:$8 sps:$4 sm:$0xff]   ;;  %v1651_v18 = vld [vmem:[%s2156_s5 + $0x4] ss:$8 sps:$4 sm:$0xff]   ;;  %v1646_v19 = vld [vmem:[%s2153_s2] ss:$8 sps:$4 sm:$0xff]  }
  0x1f   : > { %597 = vmatpush1.bf16.msra.mxu1 %v1584_v26  ;;  %v421_v2 = vor.u32 %v420_v63, %v416_v58  ;;  %v415_v17 = vor.u32 %v414_v13, %v410_v12  ;;  %v1654_v21 = vld [vmem:[%s2153_s2 + $0x14] ss:$8 sps:$4 sm:$0xff]   ;;  %v1649_v22 = vld [vmem:[%s2156_s5] ss:$8 sps:$4 sm:$0xff]   ;;  %v1652_v24 = vld [vmem:[%s2153_s2 + $0x10] ss:$8 sps:$4 sm:$0xff]  }
  0x20   : > { %598 = vmatprep.subr.bf16.mxu1 %v1588_v27  ;;  %1038 = vmatpush1.bf16.msra.mxu0 %v1587_v28  ;;  %v1657_v23 = vld [vmem:[%s2156_s5 + $0x14] ss:$8 sps:$4 sm:$0xff]   ;;  %v1660_v25 = vld [vmem:[%s2153_s2 + $0x24] ss:$8 sps:$4 sm:$0xff]   ;;  %v1655_v26 = vld [vmem:[%s2156_s5 + $0x10] ss:$8 sps:$4 sm:$0xff]  }
  0x21   : > { %1039 = vmatprep.subr.bf16.mxu0 %v1591_v29  ;;  %616 = vmatprep.mubr.bf16.mxu1 %v421_v2  ;;  %v1726_v27 = vmov 0   ;;  %v1663_v28 = vld [vmem:[%s2156_s5 + $0x24] ss:$8 sps:$4 sm:$0xff]   ;;  %v1658_v29 = vld [vmem:[%s2153_s2 + $0x20] ss:$8 sps:$4 sm:$0xff]   ;;  %s1521_s21 = sshll.u32 %s2162_s25, 3 }
  0x22   : > { %v1685_v47 = vld [vmem:[%s2156_s5 + $0x60] ss:$8 sps:$4 sm:$0xff]   ;;  %v1693_v48 = vld [vmem:[%s2156_s5 + $0x74] ss:$8 sps:$4 sm:$0xff]   ;;  %v1688_v49 = vld [vmem:[%s2153_s2 + $0x70] ss:$8 sps:$4 sm:$0xff]   ;;  %s322_s17 = scalar_lea.vmem %s2158_s7, %s1521_s21 }
  0x23   : > { %599 = vmatpush1.bf16.msra.mxu1 %v1590_v30  ;;  %v1666_v30 = vld [vmem:[%s2153_s2 + $0x34] ss:$8 sps:$4 sm:$0xff]   ;;  %v1691_v51 = vld [vmem:[%s2156_s5 + $0x70] ss:$8 sps:$4 sm:$0xff]   ;;  %v1702_v56 = vld [vmem:[%s2153_s2 + $0xa4] ss:$8 sps:$4 sm:$0xff]  }
  0x24   : > { %600 = vmatprep.subr.bf16.mxu1 %v1594_v31  ;;  %1040 = vmatpush1.bf16.msra.mxu0 %v1593_v32  ;;  %v1661_v31 = vld [vmem:[%s2156_s5 + $0x20] ss:$8 sps:$4 sm:$0xff]   ;;  %v1669_v32 = vld [vmem:[%s2156_s5 + $0x34] ss:$8 sps:$4 sm:$0xff]   ;;  %v1703_v59 = vld [vmem:[%s2153_s2 + $0xb0] ss:$8 sps:$4 sm:$0xff]  }
  0x25   : > { %1041 = vmatprep.subr.bf16.mxu0 %v1597_v33  ;;  %v1664_v33 = vld [vmem:[%s2153_s2 + $0x30] ss:$8 sps:$4 sm:$0xff]   ;;  %v1700_v57 = vld [vmem:[%s2153_s2 + $0xa0] ss:$8 sps:$4 sm:$0xff]   ;;  %v1705_v58 = vld [vmem:[%s2153_s2 + $0xb4] ss:$8 sps:$4 sm:$0xff]  }
  0x26   : > { %v1706_v61 = vld [vmem:[%s2153_s2 + $0xc0] ss:$8 sps:$4 sm:$0xff]   ;;  %v1709_v63 = vld [vmem:[%s2153_s2 + $0xd0] ss:$8 sps:$4 sm:$0xff]   ;;  %v1717_v2 = vld [vmem:[%s2153_s2 + $0xf4] ss:$8 sps:$4 sm:$0xff]  }
  0x27   : > { %601 = vmatpush1.bf16.msra.mxu1 %v1596_v34  ;;  %v1672_v34 = vld [vmem:[%s2153_s2 + $0x44] ss:$8 sps:$4 sm:$0xff]   ;;  %v1068_v12 = vld [vmem:[%s2154_s3] sm:$0x3] }
  0x28   : > { %602 = vmatprep.subr.bf16.mxu1 %v1600_v35  ;;  %1042 = vmatpush1.bf16.msra.mxu0 %v1599_v36  ;;  %v1667_v35 = vld [vmem:[%s2156_s5 + $0x30] ss:$8 sps:$4 sm:$0xff]   ;;  %v1675_v36 = vld [vmem:[%s2156_s5 + $0x44] ss:$8 sps:$4 sm:$0xff]  }
  0x29   : > { %1043 = vmatprep.subr.bf16.mxu0 %v1603_v37  ;;  %v1670_v37 = vld [vmem:[%s2153_s2 + $0x40] ss:$8 sps:$4 sm:$0xff]  }
  0x2b   : > { %603 = vmatpush1.bf16.msra.mxu1 %v1602_v38  ;;  %v1678_v38 = vld [vmem:[%s2153_s2 + $0x54] ss:$8 sps:$4 sm:$0xff]  }
  0x2c   : > { %604 = vmatprep.subr.bf16.mxu1 %v1606_v39  ;;  %1044 = vmatpush1.bf16.msra.mxu0 %v1605_v40  ;;  %v1673_v39 = vld [vmem:[%s2156_s5 + $0x40] ss:$8 sps:$4 sm:$0xff]   ;;  %v1681_v40 = vld [vmem:[%s2156_s5 + $0x54] ss:$8 sps:$4 sm:$0xff]  }
  0x2d   : > { %1045 = vmatprep.subr.bf16.mxu0 %v1609_v41  ;;  %v1676_v41 = vld [vmem:[%s2153_s2 + $0x50] ss:$8 sps:$4 sm:$0xff]  }
  0x2f   : > { %605 = vmatpush1.bf16.msra.mxu1 %v1608_v42  ;;  %v1684_v42 = vld [vmem:[%s2153_s2 + $0x64] ss:$8 sps:$4 sm:$0xff]  }
  0x30   : > { %606 = vmatprep.subr.bf16.mxu1 %v1612_v43  ;;  %1046 = vmatpush1.bf16.msra.mxu0 %v1611_v44  ;;  %v1679_v43 = vld [vmem:[%s2156_s5 + $0x50] ss:$8 sps:$4 sm:$0xff]   ;;  %v1687_v44 = vld [vmem:[%s2156_s5 + $0x64] ss:$8 sps:$4 sm:$0xff]  }
  0x31   : > { %1047 = vmatprep.subr.bf16.mxu0 %v1615_v46  ;;  %v1690_v46 = vld [vmem:[%s2153_s2 + $0x74] ss:$8 sps:$4 sm:$0xff]  }
  0x33   : > { %607 = vmatpush1.bf16.msra.mxu1 %v1614_v45  ;;  %v1682_v45 = vld [vmem:[%s2153_s2 + $0x60] ss:$8 sps:$4 sm:$0xff]  }
  0x34   : > { %608 = vmatprep.subr.bf16.mxu1 %v1618_v50  ;;  %1048 = vmatpush1.bf16.msra.mxu0 %v1617_v52  ;;  %v1696_v50 = vld [vmem:[%s2153_s2 + $0x84] ss:$8 sps:$4 sm:$0xff]   ;;  %v1694_v52 = vld [vmem:[%s2153_s2 + $0x80] ss:$8 sps:$4 sm:$0xff]  }
  0x35   : > { %1049 = vmatprep.subr.bf16.mxu0 %v1621_v53  ;;  %v1699_v53 = vld [vmem:[%s2153_s2 + $0x94] ss:$8 sps:$4 sm:$0xff]  }
  0x37   : > { %609 = vmatpush1.bf16.msra.mxu1 %v1620_v55  ;;  %v1697_v55 = vld [vmem:[%s2153_s2 + $0x90] ss:$8 sps:$4 sm:$0xff]  }
  0x38   : > { %610 = vmatprep.subr.bf16.mxu1 %v1624_v60  ;;  %1050 = vmatpush1.bf16.msra.mxu0 %v1623_v62  ;;  %v1708_v60 = vld [vmem:[%s2153_s2 + $0xc4] ss:$8 sps:$4 sm:$0xff]   ;;  %v1711_v62 = vld [vmem:[%s2153_s2 + $0xd4] ss:$8 sps:$4 sm:$0xff]  }
  0x39   : > { %1051 = vmatprep.subr.bf16.mxu0 %v1627_v0  ;;  %v1714_v0 = vld [vmem:[%s2153_s2 + $0xe4] ss:$8 sps:$4 sm:$0xff]  }
  0x3b   : > { %611 = vmatpush1.bf16.msra.mxu1 %v1626_v1  ;;  %v1712_v1 = vld [vmem:[%s2153_s2 + $0xe0] ss:$8 sps:$4 sm:$0xff]  }
  0x3c   : > { %612 = vmatprep.subr.bf16.mxu1 %v1630_v4  ;;  %1052 = vmatpush1.bf16.msra.mxu0 %v1629_v5  ;;  %v1715_v4 = vld [vmem:[%s2153_s2 + $0xf0] ss:$8 sps:$4 sm:$0xff]  }
  0x3d   : > { %1053 = vmatprep.subr.bf16.mxu0 %v1633_v6 }
  0x3f   : > { %613 = vmatpush1.bf16.msra.mxu1 %v1632_v8 }
  0x40   : > { %614 = vmatprep.subr.bf16.mxu1 %v1636_v9  ;;  %1054 = vmatpush1.bf16.msra.mxu0 %v1635_v10  ;;  %v1070_v9 = vlaneseq }
  0x41   : > { %1055 = vmatprep.subr.bf16.mxu0 %v1639_v11 }
  0x42   : > { %v1071_v10 = vshrl.u32 %v1070_v9, 7 }
  0x43   : > { %615 = vmatpush1.bf16.msra.mxu1 %v1638_v14  ;;  %v1099_v14 = vld [vmem:[%s2157_s6] sm:$0x3] }
  0x44   : > { %785 = vmatprep.subr.bf16.mxu1 %v1648_v15  ;;  %1056 = vmatpush1.bf16.msra.mxu0 %v1641_v16  ;;  %v1072_v11 = vsub.s32 0, %v1071_v10  ;;  %v1076_v13 = vsub.s32 1, %v1071_v10 }
  0x45   : > { %1191 = vmatprep.subr.bf16.mxu0 %v1651_v18 }
  0x46   : > { %617 = vmatmul.mubr.bf16.vlgmr.msra.gmra.mrb[0].mxu1 %v415_v17  ;;  %v1073_v15 = vrot.slane %v1068_v12, %v1072_v11  ;;  %v1077_v16 = vrot.slane %v1068_v12, %v1076_v13  ;;  %v1108_v18 = vrot.slane %v1099_v14, %v1076_v13 }
  0x47   : > { %786 = vmatpush1.bf16.msra.mxu1 %v1646_v19  ;;  %817 = vmatprep.mubr.bf16.mxu1 %v343_v54  ;;  %v1082_v54 = vld [vmem:[%s317_s22] sm:$0xf] }
  0x48   : > { %1058 = vmatmul.mubr.bf16.vlgmr.msra.gmra.mrb[0].mxu0 %v861_v20  ;;  %787 = vmatprep.subr.bf16.mxu1 %v1654_v21 }
  0x49   : > { %1192 = vmatpush1.bf16.msra.mxu0 %v1649_v22  ;;  %1223 = vmatprep.mubr.bf16.mxu0 %v1726_v27 }
  0x4a   : > { %1193 = vmatprep.subr.bf16.mxu0 %v1657_v23 }
  0x4b   : > { %788 = vmatpush1.bf16.msra.mxu1 %v1652_v24 }
  0x4c   : > { %789 = vmatprep.subr.bf16.mxu1 %v1660_v25 }
  0x4d   : > { %1194 = vmatpush1.bf16.msra.mxu0 %v1655_v26 }
  0x4e   : > { %1195 = vmatprep.subr.bf16.mxu0 %v1663_v28 }
  0x4f   : > { %790 = vmatpush1.bf16.msra.mxu1 %v1658_v29 }
  0x50   : > { %791 = vmatprep.subr.bf16.mxu1 %v1666_v30 }
  0x51   : > { %1196 = vmatpush1.bf16.msra.mxu0 %v1661_v31 }
  0x52   : > { %1197 = vmatprep.subr.bf16.mxu0 %v1669_v32 }
  0x53   : > { %792 = vmatpush1.bf16.msra.mxu1 %v1664_v33 }
  0x54   : > { %793 = vmatprep.subr.bf16.mxu1 %v1672_v34 }
  0x55   : > { %1198 = vmatpush1.bf16.msra.mxu0 %v1667_v35 }
  0x56   : > { %1199 = vmatprep.subr.bf16.mxu0 %v1675_v36 }
  0x57   : > { %794 = vmatpush1.bf16.msra.mxu1 %v1670_v37 }
  0x58   : > { %795 = vmatprep.subr.bf16.mxu1 %v1678_v38 }
  0x59   : > { %1200 = vmatpush1.bf16.msra.mxu0 %v1673_v39 }
  0x5a   : > { %1201 = vmatprep.subr.bf16.mxu0 %v1681_v40 }
  0x5b   : > { %796 = vmatpush1.bf16.msra.mxu1 %v1676_v41 }
  0x5c   : > { %797 = vmatprep.subr.bf16.mxu1 %v1684_v42 }
  0x5d   : > { %1202 = vmatpush1.bf16.msra.mxu0 %v1679_v43 }
  0x5e   : > { %1203 = vmatprep.subr.bf16.mxu0 %v1687_v44 }
  0x5f   : > { %798 = vmatpush1.bf16.msra.mxu1 %v1682_v45 }
  0x60   : > { %799 = vmatprep.subr.bf16.mxu1 %v1690_v46 }
  0x61   : > { %1204 = vmatpush1.bf16.msra.mxu0 %v1685_v47 }
  0x62   : > { %1205 = vmatprep.subr.bf16.mxu0 %v1693_v48 }
  0x63   : > { %800 = vmatpush1.bf16.msra.mxu1 %v1688_v49 }
  0x64   : > { %801 = vmatprep.subr.bf16.mxu1 %v1696_v50 }
  0x65   : > { %1206 = vmatpush1.bf16.msra.mxu0 %v1691_v51 }
  0x67   : > { %802 = vmatpush1.bf16.msra.mxu1 %v1694_v52 }
  0x68   : > { %1224 = vmatmul.mubr.bf16.vlgmr.msra.gmra.mrb[0].mxu0 %v1082_v54  ;;  %803 = vmatprep.subr.bf16.mxu1 %v1699_v53 }
  0x6b   : > { %804 = vmatpush1.bf16.msra.mxu1 %v1697_v55 }
  0x6c   : > { %805 = vmatprep.subr.bf16.mxu1 %v1702_v56 }
  0x6f   : > { %806 = vmatpush1.bf16.msra.mxu1 %v1700_v57 }
  0x70   : > { %807 = vmatprep.subr.bf16.mxu1 %v1705_v58 }
  0x73   : > { %808 = vmatpush1.bf16.msra.mxu1 %v1703_v59 }
  0x74   : > { %809 = vmatprep.subr.bf16.mxu1 %v1708_v60 }
  0x77   : > { %810 = vmatpush1.bf16.msra.mxu1 %v1706_v61 }
  0x78   : > { %811 = vmatprep.subr.bf16.mxu1 %v1711_v62 }
  0x7b   : > { %812 = vmatpush1.bf16.msra.mxu1 %v1709_v63 }
  0x7c   : > { %813 = vmatprep.subr.bf16.mxu1 %v1714_v0 }
  0x7f   : > { %814 = vmatpush1.bf16.msra.mxu1 %v1712_v1 }
  0x80   : > { %815 = vmatprep.subr.bf16.mxu1 %v1717_v2 }
  0x83   : > { %816 = vmatpush1.bf16.msra.mxu1 %v1715_v4 }
  0x86   : > { %818 = vmatmul.mubr.bf16.vlgmr.msra.gmra.mrb[0].mxu1 %v1953_v3  ;;  %v1104_v3 = vrot.slane %v1099_v14, %v1072_v11 }
 0x13b   : > { %v1225_v5 = vpop.f32.mrb[0].mxu0 }
 0x13c   : > { %v1227_v6 = vpop.f32.mrb[1].mxu0 }
 0x13d   : > { %v1229_v7 = vpop.f32.mrb[2].mxu0 }
 0x13e   : > { %v1230_v8 = vpop.f32.mrb[3].mxu0 }
 0x159   : > { %v819_v17 = vpop.f32.mrb[0].mxu1 }
 0x15a   : > { %v1523_v19 = vadd.f32 %v1073_v15, %v819_v17  ;;  %v821_v20 = vpop.f32.mrb[1].mxu1 }
 0x15b   : > { %v1526_v21 = vadd.f32 %v1077_v16, %v821_v20  ;;  %v823_v22 = vpop.f32.mrb[2].mxu1 }
 0x15c   : > { %v1524_v23 = vadd.f32 %v1523_v19, %v1104_v3  ;;  %v824_v24 = vpop.f32.mrb[3].mxu1 }
 0x15d   : > { %v1527_v25 = vadd.f32 %v1526_v21, %v1108_v18 }
 0x15e   : > { %v1525_v26 = vadd.f32 %v1524_v23, %v1225_v5 }
 0x15f   : > { %v1528_v27 = vadd.f32 %v1527_v25, %v1227_v6 }
 0x160   : > { %v1234_v28 = vmax.f32 %v1525_v26, 0.0 }
 0x161   : > { %v1235_v29 = vmax.f32 %v1528_v27, 0.0 }
 0x163   : > { %v1522_v30 = vpack.c.bf16 %v1235_v29, %v1234_v28 }
 0x165   : > { %1244 = vst [vmem:[%s322_s17] sm:$0xff] %v1522_v30 }
 0x166 PF: > { %s17_s24 = sadd.s32 1, %s1724_s24  }
 0x167   : > { %p14_p6 = scmp.ge.s32.totalorder %s17_s24, 4  }
 0x169   :  { %16 = sbr.rel (!%p14_p6) target bundleno = 1 (0x1), region = 86 }

// kernel: resnet_forward.19
= control target key start
LH: loop header
LB: loop body
LE: loop exit
PB: predicated region body
PF: predicated region fallthrough
CT: control target
= control target key end

     0   :  { %s2626_s1 = inlined_call_operand.vmem [shape: bf16[768,512], index: 1, kind: input, shape index: {}]   ;;  %s2627_s0 = inlined_call_operand.vmem [shape: bf16[8,768], index: 0, kind: input, shape index: {}]   ;;  %s2628_s2 = inlined_call_operand.vmem [shape: f32[1,512], index: 2, kind: input, shape index: {}]   ;;  %s2629_s3 = inlined_call_operand.vmem [shape: bf16[8,512], index: 3, kind: output, shape index: {}]  }
   0x1   :  { %v1706_v0 = vld [vmem:[%s2626_s1 + $0x4] ss:$16 sps:$4 sm:$0xff]   ;;  %v1708_v1 = vld [vmem:[%s2626_s1 + $0xc] ss:$16 sps:$4 sm:$0xff]   ;;  %v1710_v2 = vld [vmem:[%s2626_s1] ss:$16 sps:$4 sm:$0xff]  }
   0x2   :  { %1212 = vmatprep.subr.bf16.mxu0 %v1706_v0  ;;  %v1711_v3 = vld [vmem:[%s2626_s1 + $0x8] ss:$16 sps:$4 sm:$0xff]   ;;  %1335 = vmatprep.subr.bf16.mxu1 %v1708_v1  ;;  %v1712_v4 = vld [vmem:[%s2626_s1 + $0x24] ss:$16 sps:$4 sm:$0xff]   ;;  %v1714_v5 = vld [vmem:[%s2626_s1 + $0x2c] ss:$16 sps:$4 sm:$0xff]  }
   0x3   :  { %1213 = vmatpush1.bf16.msra.mxu0 %v1710_v2  ;;  %1336 = vmatpush1.bf16.msra.mxu1 %v1711_v3  ;;  %v1716_v6 = vld [vmem:[%s2626_s1 + $0x20] ss:$16 sps:$4 sm:$0xff]   ;;  %v1717_v7 = vld [vmem:[%s2626_s1 + $0x28] ss:$16 sps:$4 sm:$0xff]   ;;  %v1718_v8 = vld [vmem:[%s2626_s1 + $0x44] ss:$16 sps:$4 sm:$0xff]  }
   0x4   :  { %1214 = vmatprep.subr.bf16.mxu0 %v1712_v4  ;;  %1337 = vmatprep.subr.bf16.mxu1 %v1714_v5  ;;  %v1720_v9 = vld [vmem:[%s2626_s1 + $0x4c] ss:$16 sps:$4 sm:$0xff]   ;;  %v1722_v10 = vld [vmem:[%s2626_s1 + $0x40] ss:$16 sps:$4 sm:$0xff]   ;;  %v1723_v11 = vld [vmem:[%s2626_s1 + $0x48] ss:$16 sps:$4 sm:$0xff]  }
   0x5   :  { %v1724_v12 = vld [vmem:[%s2626_s1 + $0x64] ss:$16 sps:$4 sm:$0xff]   ;;  %v1726_v13 = vld [vmem:[%s2626_s1 + $0x6c] ss:$16 sps:$4 sm:$0xff]   ;;  %v1728_v14 = vld [vmem:[%s2626_s1 + $0x60] ss:$16 sps:$4 sm:$0xff]  }
   0x6   :  { %v1729_v15 = vld [vmem:[%s2626_s1 + $0x68] ss:$16 sps:$4 sm:$0xff]   ;;  %v1730_v16 = vld [vmem:[%s2626_s1 + $0x84] ss:$16 sps:$4 sm:$0xff]   ;;  %v1732_v17 = vld [vmem:[%s2626_s1 + $0x8c] ss:$16 sps:$4 sm:$0xff]  }
   0x7   :  { %1215 = vmatpush1.bf16.msra.mxu0 %v1716_v6  ;;  %1338 = vmatpush1.bf16.msra.mxu1 %v1717_v7  ;;  %v1734_v18 = vld [vmem:[%s2626_s1 + $0x80] ss:$16 sps:$4 sm:$0xff]   ;;  %v1735_v19 = vld [vmem:[%s2626_s1 + $0x88] ss:$16 sps:$4 sm:$0xff]   ;;  %v1736_v20 = vld [vmem:[%s2626_s1 + $0xa4] ss:$16 sps:$4 sm:$0xff]  }
   0x8   :  { %1216 = vmatprep.subr.bf16.mxu0 %v1718_v8  ;;  %1339 = vmatprep.subr.bf16.mxu1 %v1720_v9  ;;  %v1738_v21 = vld [vmem:[%s2626_s1 + $0xac] ss:$16 sps:$4 sm:$0xff]   ;;  %v1740_v22 = vld [vmem:[%s2626_s1 + $0xa0] ss:$16 sps:$4 sm:$0xff]   ;;  %v1741_v23 = vld [vmem:[%s2626_s1 + $0xa8] ss:$16 sps:$4 sm:$0xff]  }
   0x9   :  { %v1742_v24 = vld [vmem:[%s2626_s1 + $0xc4] ss:$16 sps:$4 sm:$0xff]   ;;  %v1744_v25 = vld [vmem:[%s2626_s1 + $0xcc] ss:$16 sps:$4 sm:$0xff]   ;;  %v1746_v26 = vld [vmem:[%s2626_s1 + $0xc0] ss:$16 sps:$4 sm:$0xff]  }
   0xa   :  { %v1747_v27 = vld [vmem:[%s2626_s1 + $0xc8] ss:$16 sps:$4 sm:$0xff]   ;;  %v1748_v28 = vld [vmem:[%s2626_s1 + $0xe4] ss:$16 sps:$4 sm:$0xff]   ;;  %v1750_v29 = vld [vmem:[%s2626_s1 + $0xec] ss:$16 sps:$4 sm:$0xff]  }
   0xb   :  { %1217 = vmatpush1.bf16.msra.mxu0 %v1722_v10  ;;  %1340 = vmatpush1.bf16.msra.mxu1 %v1723_v11  ;;  %v1752_v30 = vld [vmem:[%s2626_s1 + $0xe0] ss:$16 sps:$4 sm:$0xff]   ;;  %v1753_v31 = vld [vmem:[%s2626_s1 + $0xe8] ss:$16 sps:$4 sm:$0xff]   ;;  %v1754_v32 = vld [vmem:[%s2626_s1 + $0x104] ss:$16 sps:$4 sm:$0xff]  }
   0xc   :  { %1218 = vmatprep.subr.bf16.mxu0 %v1724_v12  ;;  %1341 = vmatprep.subr.bf16.mxu1 %v1726_v13  ;;  %v1756_v33 = vld [vmem:[%s2626_s1 + $0x10c] ss:$16 sps:$4 sm:$0xff]   ;;  %v1758_v34 = vld [vmem:[%s2626_s1 + $0x100] ss:$16 sps:$4 sm:$0xff]   ;;  %v1759_v35 = vld [vmem:[%s2626_s1 + $0x108] ss:$16 sps:$4 sm:$0xff]  }
   0xd   :  { %v1760_v36 = vld [vmem:[%s2626_s1 + $0x124] ss:$16 sps:$4 sm:$0xff]   ;;  %v1762_v37 = vld [vmem:[%s2626_s1 + $0x12c] ss:$16 sps:$4 sm:$0xff]   ;;  %v1764_v38 = vld [vmem:[%s2626_s1 + $0x120] ss:$16 sps:$4 sm:$0xff]  }
   0xe   :  { %v1765_v39 = vld [vmem:[%s2626_s1 + $0x128] ss:$16 sps:$4 sm:$0xff]   ;;  %v1766_v40 = vld [vmem:[%s2626_s1 + $0x144] ss:$16 sps:$4 sm:$0xff]   ;;  %v1768_v41 = vld [vmem:[%s2626_s1 + $0x14c] ss:$16 sps:$4 sm:$0xff]  }
   0xf   :  { %1219 = vmatpush1.bf16.msra.mxu0 %v1728_v14  ;;  %1342 = vmatpush1.bf16.msra.mxu1 %v1729_v15  ;;  %v1770_v42 = vld [vmem:[%s2626_s1 + $0x140] ss:$16 sps:$4 sm:$0xff]   ;;  %v1771_v43 = vld [vmem:[%s2626_s1 + $0x148] ss:$16 sps:$4 sm:$0xff]   ;;  %v1772_v44 = vld [vmem:[%s2626_s1 + $0x164] ss:$16 sps:$4 sm:$0xff]  }
  0x10   :  { %1220 = vmatprep.subr.bf16.mxu0 %v1730_v16  ;;  %1343 = vmatprep.subr.bf16.mxu1 %v1732_v17  ;;  %v1774_v45 = vld [vmem:[%s2626_s1 + $0x16c] ss:$16 sps:$4 sm:$0xff]   ;;  %v14_v46 = vld [vmem:[%s2627_s0] sm:$0xff]  ;;  %v1777_v49 = vld [vmem:[%s2626_s1 + $0x168] ss:$16 sps:$4 sm:$0xff]  }
  0x11   :  { %v1776_v47 = vld [vmem:[%s2626_s1 + $0x160] ss:$16 sps:$4 sm:$0xff]   ;;  %v1485_v48 = vcombine.high %v14_v46, %v14_v46  ;;  %v1778_v50 = vld [vmem:[%s2626_s1 + $0x184] ss:$16 sps:$4 sm:$0xff]   ;;  %v1780_v51 = vld [vmem:[%s2626_s1 + $0x18c] ss:$16 sps:$4 sm:$0xff]   ;;  %v1484_v4 = vcombine.low %v14_v46, %v14_v46 }
  0x12   :  { %v1782_v52 = vld [vmem:[%s2626_s1 + $0x180] ss:$16 sps:$4 sm:$0xff]   ;;  %v1783_v53 = vld [vmem:[%s2626_s1 + $0x188] ss:$16 sps:$4 sm:$0xff]   ;;  %v1784_v54 = vld [vmem:[%s2626_s1 + $0x1a4] ss:$16 sps:$4 sm:$0xff]  }
  0x13   :  { %1221 = vmatpush1.bf16.msra.mxu0 %v1734_v18  ;;  %1344 = vmatpush1.bf16.msra.mxu1 %v1735_v19  ;;  %v1786_v55 = vld [vmem:[%s2626_s1 + $0x1ac] ss:$16 sps:$4 sm:$0xff]   ;;  %v1788_v56 = vld [vmem:[%s2626_s1 + $0x1a0] ss:$16 sps:$4 sm:$0xff]   ;;  %v1789_v57 = vld [vmem:[%s2626_s1 + $0x1a8] ss:$16 sps:$4 sm:$0xff]  }
  0x14   :  { %1222 = vmatprep.subr.bf16.mxu0 %v1736_v20  ;;  %1345 = vmatprep.subr.bf16.mxu1 %v1738_v21  ;;  %v1790_v58 = vld [vmem:[%s2626_s1 + $0x1c4] ss:$16 sps:$4 sm:$0xff]   ;;  %v1792_v59 = vld [vmem:[%s2626_s1 + $0x1cc] ss:$16 sps:$4 sm:$0xff]   ;;  %v1794_v60 = vld [vmem:[%s2626_s1 + $0x1c0] ss:$16 sps:$4 sm:$0xff]  }
  0x15   :  { %1244 = vmatprep.mubr.bf16.mxu0 %v1485_v48  ;;  %1367 = vmatprep.mubr.bf16.mxu1 %v1485_v48  ;;  %v1795_v61 = vld [vmem:[%s2626_s1 + $0x1c8] ss:$16 sps:$4 sm:$0xff]   ;;  %v1796_v62 = vld [vmem:[%s2626_s1 + $0x1e4] ss:$16 sps:$4 sm:$0xff]   ;;  %v1798_v63 = vld [vmem:[%s2626_s1 + $0x1ec] ss:$16 sps:$4 sm:$0xff]  }
  0x16   :  { %v1800_v0 = vld [vmem:[%s2626_s1 + $0x1e0] ss:$16 sps:$4 sm:$0xff]   ;;  %v1801_v1 = vld [vmem:[%s2626_s1 + $0x1e8] ss:$16 sps:$4 sm:$0xff]   ;;  %v1806_v2 = vld [vmem:[%s2626_s1 + $0x204] ss:$16 sps:$4 sm:$0xff]  }
  0x17   :  { %1223 = vmatpush1.bf16.msra.mxu0 %v1740_v22  ;;  %1346 = vmatpush1.bf16.msra.mxu1 %v1741_v23  ;;  %v1809_v3 = vld [vmem:[%s2626_s1 + $0x20c] ss:$16 sps:$4 sm:$0xff]   ;;  %v1804_v5 = vld [vmem:[%s2626_s1 + $0x200] ss:$16 sps:$4 sm:$0xff]   ;;  %v1807_v6 = vld [vmem:[%s2626_s1 + $0x208] ss:$16 sps:$4 sm:$0xff]  }
  0x18   :  { %1224 = vmatprep.subr.bf16.mxu0 %v1742_v24  ;;  %1347 = vmatprep.subr.bf16.mxu1 %v1744_v25  ;;  %v1812_v7 = vld [vmem:[%s2626_s1 + $0x224] ss:$16 sps:$4 sm:$0xff]   ;;  %v1815_v8 = vld [vmem:[%s2626_s1 + $0x22c] ss:$16 sps:$4 sm:$0xff]   ;;  %v1810_v9 = vld [vmem:[%s2626_s1 + $0x220] ss:$16 sps:$4 sm:$0xff]  }
  0x19   :  { %v1813_v10 = vld [vmem:[%s2626_s1 + $0x228] ss:$16 sps:$4 sm:$0xff]   ;;  %v1818_v11 = vld [vmem:[%s2626_s1 + $0x244] ss:$16 sps:$4 sm:$0xff]   ;;  %v1821_v12 = vld [vmem:[%s2626_s1 + $0x24c] ss:$16 sps:$4 sm:$0xff]  }
  0x1a   :  { %v1816_v13 = vld [vmem:[%s2626_s1 + $0x240] ss:$16 sps:$4 sm:$0xff]   ;;  %v1819_v14 = vld [vmem:[%s2626_s1 + $0x248] ss:$16 sps:$4 sm:$0xff]   ;;  %v1824_v15 = vld [vmem:[%s2626_s1 + $0x264] ss:$16 sps:$4 sm:$0xff]  }
  0x1b   :  { %1225 = vmatpush1.bf16.msra.mxu0 %v1746_v26  ;;  %1348 = vmatpush1.bf16.msra.mxu1 %v1747_v27  ;;  %v1827_v16 = vld [vmem:[%s2626_s1 + $0x26c] ss:$16 sps:$4 sm:$0xff]   ;;  %v1822_v17 = vld [vmem:[%s2626_s1 + $0x260] ss:$16 sps:$4 sm:$0xff]   ;;  %v1825_v18 = vld [vmem:[%s2626_s1 + $0x268] ss:$16 sps:$4 sm:$0xff]  }
  0x1c   :  { %1226 = vmatprep.subr.bf16.mxu0 %v1748_v28  ;;  %1349 = vmatprep.subr.bf16.mxu1 %v1750_v29  ;;  %v1830_v19 = vld [vmem:[%s2626_s1 + $0x284] ss:$16 sps:$4 sm:$0xff]   ;;  %v1833_v20 = vld [vmem:[%s2626_s1 + $0x28c] ss:$16 sps:$4 sm:$0xff]   ;;  %v1828_v21 = vld [vmem:[%s2626_s1 + $0x280] ss:$16 sps:$4 sm:$0xff]  }
  0x1d   :  { %v1831_v22 = vld [vmem:[%s2626_s1 + $0x288] ss:$16 sps:$4 sm:$0xff]   ;;  %v1836_v23 = vld [vmem:[%s2626_s1 + $0x2a4] ss:$16 sps:$4 sm:$0xff]   ;;  %v1839_v24 = vld [vmem:[%s2626_s1 + $0x2ac] ss:$16 sps:$4 sm:$0xff]  }
  0x1e   :  { %v1834_v25 = vld [vmem:[%s2626_s1 + $0x2a0] ss:$16 sps:$4 sm:$0xff]   ;;  %v1837_v26 = vld [vmem:[%s2626_s1 + $0x2a8] ss:$16 sps:$4 sm:$0xff]   ;;  %v1842_v27 = vld [vmem:[%s2626_s1 + $0x2c4] ss:$16 sps:$4 sm:$0xff]  }
  0x1f   :  { %1227 = vmatpush1.bf16.msra.mxu0 %v1752_v30  ;;  %1350 = vmatpush1.bf16.msra.mxu1 %v1753_v31  ;;  %v1845_v28 = vld [vmem:[%s2626_s1 + $0x2cc] ss:$16 sps:$4 sm:$0xff]   ;;  %v1840_v31 = vld [vmem:[%s2626_s1 + $0x2c0] ss:$16 sps:$4 sm:$0xff]   ;;  %v1867_v48 = vld [vmem:[%s2626_s1 + $0x348] ss:$16 sps:$4 sm:$0xff]  }
  0x20   :  { %1228 = vmatprep.subr.bf16.mxu0 %v1754_v32  ;;  %1351 = vmatprep.subr.bf16.mxu1 %v1756_v33  ;;  %v2296_v29 = vld [vmem:[%s2627_s0 + $0x8] sm:$0xff]  ;;  %v1848_v33 = vld [vmem:[%s2626_s1 + $0x2e4] ss:$16 sps:$4 sm:$0xff]  }
  0x21   :  { %v1487_v30 = vcombine.high %v2296_v29, %v2296_v29  ;;  %v1843_v32 = vld [vmem:[%s2626_s1 + $0x2c8] ss:$16 sps:$4 sm:$0xff]   ;;  %v1869_v46 = vld [vmem:[%s2626_s1 + $0x34c] ss:$16 sps:$4 sm:$0xff]  }
  0x23   :  { %1229 = vmatpush1.bf16.msra.mxu0 %v1758_v34  ;;  %1352 = vmatpush1.bf16.msra.mxu1 %v1759_v35  ;;  %v1851_v34 = vld [vmem:[%s2626_s1 + $0x2ec] ss:$16 sps:$4 sm:$0xff]   ;;  %v1846_v35 = vld [vmem:[%s2626_s1 + $0x2e0] ss:$16 sps:$4 sm:$0xff]  }
  0x24   :  { %1230 = vmatprep.subr.bf16.mxu0 %v1760_v36  ;;  %1353 = vmatprep.subr.bf16.mxu1 %v1762_v37  ;;  %v1849_v36 = vld [vmem:[%s2626_s1 + $0x2e8] ss:$16 sps:$4 sm:$0xff]   ;;  %v1854_v37 = vld [vmem:[%s2626_s1 + $0x304] ss:$16 sps:$4 sm:$0xff]  }
  0x27   :  { %1231 = vmatpush1.bf16.msra.mxu0 %v1764_v38  ;;  %1354 = vmatpush1.bf16.msra.mxu1 %v1765_v39  ;;  %v1857_v38 = vld [vmem:[%s2626_s1 + $0x30c] ss:$16 sps:$4 sm:$0xff]   ;;  %v1852_v39 = vld [vmem:[%s2626_s1 + $0x300] ss:$16 sps:$4 sm:$0xff]  }
  0x28   :  { %1232 = vmatprep.subr.bf16.mxu0 %v1766_v40  ;;  %1355 = vmatprep.subr.bf16.mxu1 %v1768_v41  ;;  %v1855_v40 = vld [vmem:[%s2626_s1 + $0x308] ss:$16 sps:$4 sm:$0xff]   ;;  %v1860_v41 = vld [vmem:[%s2626_s1 + $0x324] ss:$16 sps:$4 sm:$0xff]  }
  0x2b   :  { %1233 = vmatpush1.bf16.msra.mxu0 %v1770_v42  ;;  %1356 = vmatpush1.bf16.msra.mxu1 %v1771_v43  ;;  %v1863_v42 = vld [vmem:[%s2626_s1 + $0x32c] ss:$16 sps:$4 sm:$0xff]   ;;  %v1858_v43 = vld [vmem:[%s2626_s1 + $0x320] ss:$16 sps:$4 sm:$0xff]  }
  0x2c   :  { %1234 = vmatprep.subr.bf16.mxu0 %v1772_v44  ;;  %1357 = vmatprep.subr.bf16.mxu1 %v1774_v45  ;;  %v1861_v44 = vld [vmem:[%s2626_s1 + $0x328] ss:$16 sps:$4 sm:$0xff]   ;;  %v1866_v45 = vld [vmem:[%s2626_s1 + $0x344] ss:$16 sps:$4 sm:$0xff]  }
  0x2f   :  { %1235 = vmatpush1.bf16.msra.mxu0 %v1776_v47  ;;  %1358 = vmatpush1.bf16.msra.mxu1 %v1777_v49  ;;  %v1864_v47 = vld [vmem:[%s2626_s1 + $0x340] ss:$16 sps:$4 sm:$0xff]   ;;  %v1872_v49 = vld [vmem:[%s2626_s1 + $0x364] ss:$16 sps:$4 sm:$0xff]  }
  0x30   :  { %1236 = vmatprep.subr.bf16.mxu0 %v1778_v50  ;;  %1359 = vmatprep.subr.bf16.mxu1 %v1780_v51  ;;  %v1875_v50 = vld [vmem:[%s2626_s1 + $0x36c] ss:$16 sps:$4 sm:$0xff]   ;;  %v1870_v51 = vld [vmem:[%s2626_s1 + $0x360] ss:$16 sps:$4 sm:$0xff]  }
  0x33   :  { %1237 = vmatpush1.bf16.msra.mxu0 %v1782_v52  ;;  %1360 = vmatpush1.bf16.msra.mxu1 %v1783_v53  ;;  %v1873_v52 = vld [vmem:[%s2626_s1 + $0x368] ss:$16 sps:$4 sm:$0xff]   ;;  %v1878_v53 = vld [vmem:[%s2626_s1 + $0x384] ss:$16 sps:$4 sm:$0xff]  }
  0x34   :  { %1238 = vmatprep.subr.bf16.mxu0 %v1784_v54  ;;  %1361 = vmatprep.subr.bf16.mxu1 %v1786_v55  ;;  %v1881_v54 = vld [vmem:[%s2626_s1 + $0x38c] ss:$16 sps:$4 sm:$0xff]   ;;  %v1876_v55 = vld [vmem:[%s2626_s1 + $0x380] ss:$16 sps:$4 sm:$0xff]  }
  0x37   :  { %1239 = vmatpush1.bf16.msra.mxu0 %v1788_v56  ;;  %1362 = vmatpush1.bf16.msra.mxu1 %v1789_v57  ;;  %v1879_v56 = vld [vmem:[%s2626_s1 + $0x388] ss:$16 sps:$4 sm:$0xff]   ;;  %v1884_v57 = vld [vmem:[%s2626_s1 + $0x3a4] ss:$16 sps:$4 sm:$0xff]  }
  0x38   :  { %1240 = vmatprep.subr.bf16.mxu0 %v1790_v58  ;;  %1363 = vmatprep.subr.bf16.mxu1 %v1792_v59  ;;  %v1887_v58 = vld [vmem:[%s2626_s1 + $0x3ac] ss:$16 sps:$4 sm:$0xff]   ;;  %v1882_v59 = vld [vmem:[%s2626_s1 + $0x3a0] ss:$16 sps:$4 sm:$0xff]  }
  0x3b   :  { %1241 = vmatpush1.bf16.msra.mxu0 %v1794_v60  ;;  %1364 = vmatpush1.bf16.msra.mxu1 %v1795_v61  ;;  %v1885_v60 = vld [vmem:[%s2626_s1 + $0x3a8] ss:$16 sps:$4 sm:$0xff]   ;;  %v1890_v61 = vld [vmem:[%s2626_s1 + $0x3c4] ss:$16 sps:$4 sm:$0xff]  }
  0x3c   :  { %1242 = vmatprep.subr.bf16.mxu0 %v1796_v62  ;;  %1365 = vmatprep.subr.bf16.mxu1 %v1798_v63  ;;  %v1893_v62 = vld [vmem:[%s2626_s1 + $0x3cc] ss:$16 sps:$4 sm:$0xff]   ;;  %v1888_v63 = vld [vmem:[%s2626_s1 + $0x3c0] ss:$16 sps:$4 sm:$0xff]  }
  0x3f   :  { %1243 = vmatpush1.bf16.msra.mxu0 %v1800_v0  ;;  %1366 = vmatpush1.bf16.msra.mxu1 %v1801_v1  ;;  %v1891_v0 = vld [vmem:[%s2626_s1 + $0x3c8] ss:$16 sps:$4 sm:$0xff]   ;;  %v1896_v1 = vld [vmem:[%s2626_s1 + $0x3e4] ss:$16 sps:$4 sm:$0xff]  }
  0x40   :  { %1253 = vmatprep.subr.bf16.mxu0 %v1806_v2  ;;  %1376 = vmatprep.subr.bf16.mxu1 %v1809_v3  ;;  %v1899_v2 = vld [vmem:[%s2626_s1 + $0x3ec] ss:$16 sps:$4 sm:$0xff]   ;;  %v1894_v3 = vld [vmem:[%s2626_s1 + $0x3e0] ss:$16 sps:$4 sm:$0xff]  }
  0x42   :  { %1245 = vmatmul.mubr.bf16.vlgmr.msra.gmra.mrb[0].mxu0 %v1484_v4  ;;  %1368 = vmatmul.mubr.bf16.vlgmr.msra.gmra.mrb[0].mxu1 %v1484_v4  ;;  %v1897_v4 = vld [vmem:[%s2626_s1 + $0x3e8] ss:$16 sps:$4 sm:$0xff]  }
  0x43   :  { %1254 = vmatpush1.bf16.msra.mxu0 %v1804_v5  ;;  %1377 = vmatpush1.bf16.msra.mxu1 %v1807_v6  ;;  %v1904_v5 = vld [vmem:[%s2626_s1 + $0x404] ss:$16 sps:$4 sm:$0xff]   ;;  %v1907_v6 = vld [vmem:[%s2626_s1 + $0x40c] ss:$16 sps:$4 sm:$0xff]  }
  0x44   :  { %1255 = vmatprep.subr.bf16.mxu0 %v1812_v7  ;;  %1378 = vmatprep.subr.bf16.mxu1 %v1815_v8  ;;  %v1486_v7 = vcombine.low %v2296_v29, %v2296_v29  ;;  %v1902_v8 = vld [vmem:[%s2626_s1 + $0x400] ss:$16 sps:$4 sm:$0xff]   ;;  %v1937_v29 = vld [vmem:[%s2626_s1 + $0x4ac] ss:$16 sps:$4 sm:$0xff]  }
  0x45   :  { %1285 = vmatprep.mubr.bf16.mxu0 %v1487_v30  ;;  %1408 = vmatprep.mubr.bf16.mxu1 %v1487_v30  ;;  %v1932_v30 = vld [vmem:[%s2626_s1 + $0x4a0] ss:$16 sps:$4 sm:$0xff]  }
  0x47   :  { %1256 = vmatpush1.bf16.msra.mxu0 %v1810_v9  ;;  %1379 = vmatpush1.bf16.msra.mxu1 %v1813_v10  ;;  %v1905_v9 = vld [vmem:[%s2626_s1 + $0x408] ss:$16 sps:$4 sm:$0xff]   ;;  %v2431_v10 = vld [vmem:[%s2627_s0 + $0x10] sm:$0xff] }
  0x48   :  { %1257 = vmatprep.subr.bf16.mxu0 %v1818_v11  ;;  %1380 = vmatprep.subr.bf16.mxu1 %v1821_v12  ;;  %v1910_v11 = vld [vmem:[%s2626_s1 + $0x424] ss:$16 sps:$4 sm:$0xff]   ;;  %v1913_v12 = vld [vmem:[%s2626_s1 + $0x42c] ss:$16 sps:$4 sm:$0xff]  }
  0x4b   :  { %1258 = vmatpush1.bf16.msra.mxu0 %v1816_v13  ;;  %1381 = vmatpush1.bf16.msra.mxu1 %v1819_v14  ;;  %v1489_v13 = vcombine.high %v2431_v10, %v2431_v10  ;;  %v1908_v14 = vld [vmem:[%s2626_s1 + $0x420] ss:$16 sps:$4 sm:$0xff]  }
  0x4c   :  { %1259 = vmatprep.subr.bf16.mxu0 %v1824_v15  ;;  %1382 = vmatprep.subr.bf16.mxu1 %v1827_v16  ;;  %v1911_v15 = vld [vmem:[%s2626_s1 + $0x428] ss:$16 sps:$4 sm:$0xff]   ;;  %v1916_v16 = vld [vmem:[%s2626_s1 + $0x444] ss:$16 sps:$4 sm:$0xff]  }
  0x4f   :  { %1260 = vmatpush1.bf16.msra.mxu0 %v1822_v17  ;;  %1383 = vmatpush1.bf16.msra.mxu1 %v1825_v18  ;;  %v1919_v17 = vld [vmem:[%s2626_s1 + $0x44c] ss:$16 sps:$4 sm:$0xff]   ;;  %v1914_v18 = vld [vmem:[%s2626_s1 + $0x440] ss:$16 sps:$4 sm:$0xff]  }
  0x50   :  { %1261 = vmatprep.subr.bf16.mxu0 %v1830_v19  ;;  %1384 = vmatprep.subr.bf16.mxu1 %v1833_v20  ;;  %v1917_v19 = vld [vmem:[%s2626_s1 + $0x448] ss:$16 sps:$4 sm:$0xff]   ;;  %v1922_v20 = vld [vmem:[%s2626_s1 + $0x464] ss:$16 sps:$4 sm:$0xff]  }
  0x53   :  { %1262 = vmatpush1.bf16.msra.mxu0 %v1828_v21  ;;  %1385 = vmatpush1.bf16.msra.mxu1 %v1831_v22  ;;  %v1925_v21 = vld [vmem:[%s2626_s1 + $0x46c] ss:$16 sps:$4 sm:$0xff]   ;;  %v1920_v22 = vld [vmem:[%s2626_s1 + $0x460] ss:$16 sps:$4 sm:$0xff]  }
  0x54   :  { %1263 = vmatprep.subr.bf16.mxu0 %v1836_v23  ;;  %1386 = vmatprep.subr.bf16.mxu1 %v1839_v24  ;;  %v1923_v23 = vld [vmem:[%s2626_s1 + $0x468] ss:$16 sps:$4 sm:$0xff]   ;;  %v1928_v24 = vld [vmem:[%s2626_s1 + $0x484] ss:$16 sps:$4 sm:$0xff]  }
  0x57   :  { %1264 = vmatpush1.bf16.msra.mxu0 %v1834_v25  ;;  %1387 = vmatpush1.bf16.msra.mxu1 %v1837_v26  ;;  %v1931_v25 = vld [vmem:[%s2626_s1 + $0x48c] ss:$16 sps:$4 sm:$0xff]   ;;  %v1926_v26 = vld [vmem:[%s2626_s1 + $0x480] ss:$16 sps:$4 sm:$0xff]  }
  0x58   :  { %1265 = vmatprep.subr.bf16.mxu0 %v1842_v27  ;;  %1388 = vmatprep.subr.bf16.mxu1 %v1845_v28  ;;  %v1929_v27 = vld [vmem:[%s2626_s1 + $0x488] ss:$16 sps:$4 sm:$0xff]   ;;  %v1934_v28 = vld [vmem:[%s2626_s1 + $0x4a4] ss:$16 sps:$4 sm:$0xff]  }
  0x5b   :  { %1266 = vmatpush1.bf16.msra.mxu0 %v1840_v31  ;;  %1389 = vmatpush1.bf16.msra.mxu1 %v1843_v32  ;;  %v1935_v31 = vld [vmem:[%s2626_s1 + $0x4a8] ss:$16 sps:$4 sm:$0xff]   ;;  %v1940_v32 = vld [vmem:[%s2626_s1 + $0x4c4] ss:$16 sps:$4 sm:$0xff]  }
  0x5c   :  { %1267 = vmatprep.subr.bf16.mxu0 %v1848_v33  ;;  %1390 = vmatprep.subr.bf16.mxu1 %v1851_v34  ;;  %v1943_v33 = vld [vmem:[%s2626_s1 + $0x4cc] ss:$16 sps:$4 sm:$0xff]   ;;  %v1938_v34 = vld [vmem:[%s2626_s1 + $0x4c0] ss:$16 sps:$4 sm:$0xff]  }
  0x5f   :  { %1268 = vmatpush1.bf16.msra.mxu0 %v1846_v35  ;;  %1391 = vmatpush1.bf16.msra.mxu1 %v1849_v36  ;;  %v1941_v35 = vld [vmem:[%s2626_s1 + $0x4c8] ss:$16 sps:$4 sm:$0xff]   ;;  %v1946_v36 = vld [vmem:[%s2626_s1 + $0x4e4] ss:$16 sps:$4 sm:$0xff]  }
  0x60   :  { %1269 = vmatprep.subr.bf16.mxu0 %v1854_v37  ;;  %1392 = vmatprep.subr.bf16.mxu1 %v1857_v38  ;;  %v1949_v37 = vld [vmem:[%s2626_s1 + $0x4ec] ss:$16 sps:$4 sm:$0xff]   ;;  %v1944_v38 = vld [vmem:[%s2626_s1 + $0x4e0] ss:$16 sps:$4 sm:$0xff]  }
  0x63   :  { %1270 = vmatpush1.bf16.msra.mxu0 %v1852_v39  ;;  %1393 = vmatpush1.bf16.msra.mxu1 %v1855_v40  ;;  %v1947_v39 = vld [vmem:[%s2626_s1 + $0x4e8] ss:$16 sps:$4 sm:$0xff]   ;;  %v1952_v40 = vld [vmem:[%s2626_s1 + $0x504] ss:$16 sps:$4 sm:$0xff]  }
  0x64   :  { %1271 = vmatprep.subr.bf16.mxu0 %v1860_v41  ;;  %1394 = vmatprep.subr.bf16.mxu1 %v1863_v42  ;;  %v1955_v41 = vld [vmem:[%s2626_s1 + $0x50c] ss:$16 sps:$4 sm:$0xff]   ;;  %v1950_v42 = vld [vmem:[%s2626_s1 + $0x500] ss:$16 sps:$4 sm:$0xff]  }
  0x67   :  { %1272 = vmatpush1.bf16.msra.mxu0 %v1858_v43  ;;  %1395 = vmatpush1.bf16.msra.mxu1 %v1861_v44  ;;  %v1953_v43 = vld [vmem:[%s2626_s1 + $0x508] ss:$16 sps:$4 sm:$0xff]   ;;  %v1958_v44 = vld [vmem:[%s2626_s1 + $0x524] ss:$16 sps:$4 sm:$0xff]  }
  0x68   :  { %1273 = vmatprep.subr.bf16.mxu0 %v1866_v45  ;;  %1396 = vmatprep.subr.bf16.mxu1 %v1869_v46  ;;  %v1961_v45 = vld [vmem:[%s2626_s1 + $0x52c] ss:$16 sps:$4 sm:$0xff]   ;;  %v1956_v46 = vld [vmem:[%s2626_s1 + $0x520] ss:$16 sps:$4 sm:$0xff]  }
  0x6b   :  { %1274 = vmatpush1.bf16.msra.mxu0 %v1864_v47  ;;  %1397 = vmatpush1.bf16.msra.mxu1 %v1867_v48  ;;  %v1959_v47 = vld [vmem:[%s2626_s1 + $0x528] ss:$16 sps:$4 sm:$0xff]   ;;  %v1964_v48 = vld [vmem:[%s2626_s1 + $0x544] ss:$16 sps:$4 sm:$0xff]  }
  0x6c   :  { %1275 = vmatprep.subr.bf16.mxu0 %v1872_v49  ;;  %1398 = vmatprep.subr.bf16.mxu1 %v1875_v50  ;;  %v1967_v49 = vld [vmem:[%s2626_s1 + $0x54c] ss:$16 sps:$4 sm:$0xff]   ;;  %v1962_v50 = vld [vmem:[%s2626_s1 + $0x540] ss:$16 sps:$4 sm:$0xff]  }
  0x6f   :  { %1276 = vmatpush1.bf16.msra.mxu0 %v1870_v51  ;;  %1399 = vmatpush1.bf16.msra.mxu1 %v1873_v52  ;;  %v1965_v51 = vld [vmem:[%s2626_s1 + $0x548] ss:$16 sps:$4 sm:$0xff]   ;;  %v1970_v52 = vld [vmem:[%s2626_s1 + $0x564] ss:$16 sps:$4 sm:$0xff]  }
  0x70   :  { %1277 = vmatprep.subr.bf16.mxu0 %v1878_v53  ;;  %1400 = vmatprep.subr.bf16.mxu1 %v1881_v54  ;;  %v1973_v53 = vld [vmem:[%s2626_s1 + $0x56c] ss:$16 sps:$4 sm:$0xff]   ;;  %v1968_v54 = vld [vmem:[%s2626_s1 + $0x560] ss:$16 sps:$4 sm:$0xff]  }
  0x73   :  { %1278 = vmatpush1.bf16.msra.mxu0 %v1876_v55  ;;  %1401 = vmatpush1.bf16.msra.mxu1 %v1879_v56  ;;  %v1971_v55 = vld [vmem:[%s2626_s1 + $0x568] ss:$16 sps:$4 sm:$0xff]   ;;  %v1976_v56 = vld [vmem:[%s2626_s1 + $0x584] ss:$16 sps:$4 sm:$0xff]  }
  0x74   :  { %1279 = vmatprep.subr.bf16.mxu0 %v1884_v57  ;;  %1402 = vmatprep.subr.bf16.mxu1 %v1887_v58  ;;  %v1979_v57 = vld [vmem:[%s2626_s1 + $0x58c] ss:$16 sps:$4 sm:$0xff]   ;;  %v1974_v58 = vld [vmem:[%s2626_s1 + $0x580] ss:$16 sps:$4 sm:$0xff]  }
  0x77   :  { %1280 = vmatpush1.bf16.msra.mxu0 %v1882_v59  ;;  %1403 = vmatpush1.bf16.msra.mxu1 %v1885_v60  ;;  %v1977_v59 = vld [vmem:[%s2626_s1 + $0x588] ss:$16 sps:$4 sm:$0xff]   ;;  %v1982_v60 = vld [vmem:[%s2626_s1 + $0x5a4] ss:$16 sps:$4 sm:$0xff]  }
  0x78   :  { %1281 = vmatprep.subr.bf16.mxu0 %v1890_v61  ;;  %1404 = vmatprep.subr.bf16.mxu1 %v1893_v62  ;;  %v1985_v61 = vld [vmem:[%s2626_s1 + $0x5ac] ss:$16 sps:$4 sm:$0xff]   ;;  %v1980_v62 = vld [vmem:[%s2626_s1 + $0x5a0] ss:$16 sps:$4 sm:$0xff]  }
  0x7b   :  { %1282 = vmatpush1.bf16.msra.mxu0 %v1888_v63  ;;  %1405 = vmatpush1.bf16.msra.mxu1 %v1891_v0  ;;  %v1983_v63 = vld [vmem:[%s2626_s1 + $0x5a8] ss:$16 sps:$4 sm:$0xff]   ;;  %v1988_v0 = vld [vmem:[%s2626_s1 + $0x5c4] ss:$16 sps:$4 sm:$0xff]  }
  0x7c   :  { %1283 = vmatprep.subr.bf16.mxu0 %v1896_v1  ;;  %1406 = vmatprep.subr.bf16.mxu1 %v1899_v2  ;;  %v1991_v1 = vld [vmem:[%s2626_s1 + $0x5cc] ss:$16 sps:$4 sm:$0xff]   ;;  %v1986_v2 = vld [vmem:[%s2626_s1 + $0x5c0] ss:$16 sps:$4 sm:$0xff]  }
  0x7f   :  { %1284 = vmatpush1.bf16.msra.mxu0 %v1894_v3  ;;  %1407 = vmatpush1.bf16.msra.mxu1 %v1897_v4  ;;  %v1989_v3 = vld [vmem:[%s2626_s1 + $0x5c8] ss:$16 sps:$4 sm:$0xff]   ;;  %v1994_v4 = vld [vmem:[%s2626_s1 + $0x5e4] ss:$16 sps:$4 sm:$0xff]  }
  0x80   :  { %1294 = vmatprep.subr.bf16.mxu0 %v1904_v5  ;;  %1417 = vmatprep.subr.bf16.mxu1 %v1907_v6  ;;  %v1997_v5 = vld [vmem:[%s2626_s1 + $0x5ec] ss:$16 sps:$4 sm:$0xff]   ;;  %v1992_v6 = vld [vmem:[%s2626_s1 + $0x5e0] ss:$16 sps:$4 sm:$0xff]  }
  0x82   :  { %1286 = vmatmul.mubr.bf16.vlgmr.msra.gmra.mrb[0].mxu0 %v1486_v7  ;;  %1409 = vmatmul.mubr.bf16.vlgmr.msra.gmra.mrb[0].mxu1 %v1486_v7  ;;  %v1995_v7 = vld [vmem:[%s2626_s1 + $0x5e8] ss:$16 sps:$4 sm:$0xff]  }
  0x83   :  { %1295 = vmatpush1.bf16.msra.mxu0 %v1902_v8  ;;  %1418 = vmatpush1.bf16.msra.mxu1 %v1905_v9  ;;  %v1488_v8 = vcombine.low %v2431_v10, %v2431_v10  ;;  %v211_v9 = vlaneseq }
  0x84   :  { %1296 = vmatprep.subr.bf16.mxu0 %v1910_v11  ;;  %1419 = vmatprep.subr.bf16.mxu1 %v1913_v12 }
  0x85   :  { %1326 = vmatprep.mubr.bf16.mxu0 %v1489_v13  ;;  %1449 = vmatprep.mubr.bf16.mxu1 %v1489_v13  ;;  %v212_v11 = vshrl.u32 %v211_v9, 7 }
  0x87   :  { %1297 = vmatpush1.bf16.msra.mxu0 %v1908_v14  ;;  %1420 = vmatpush1.bf16.msra.mxu1 %v1911_v15  ;;  %v213_v12 = vsub.s32 0, %v212_v11  ;;  %v221_v13 = vsub.s32 2, %v212_v11  ;;  %v209_v14 = vld [vmem:[%s2628_s2] sm:$0xf]  ;;  %v217_v15 = vsub.s32 1, %v212_v11 }
  0x88   :  { %1298 = vmatprep.subr.bf16.mxu0 %v1916_v16  ;;  %1421 = vmatprep.subr.bf16.mxu1 %v1919_v17  ;;  %v225_v16 = vsub.s32 3, %v212_v11 }
  0x89   :  { %v214_v17 = vrot.slane %v209_v14, %v213_v12 }
  0x8b   :  { %1299 = vmatpush1.bf16.msra.mxu0 %v1914_v18  ;;  %1422 = vmatpush1.bf16.msra.mxu1 %v1917_v19  ;;  %v222_v18 = vrot.slane %v209_v14, %v221_v13  ;;  %v218_v19 = vrot.slane %v209_v14, %v217_v15 }
  0x8c   :  { %1300 = vmatprep.subr.bf16.mxu0 %v1922_v20  ;;  %1423 = vmatprep.subr.bf16.mxu1 %v1925_v21  ;;  %v226_v20 = vrot.slane %v209_v14, %v225_v16 }
  0x8f   :  { %1301 = vmatpush1.bf16.msra.mxu0 %v1920_v22  ;;  %1424 = vmatpush1.bf16.msra.mxu1 %v1923_v23 }
  0x90   :  { %1302 = vmatprep.subr.bf16.mxu0 %v1928_v24  ;;  %1425 = vmatprep.subr.bf16.mxu1 %v1931_v25 }
  0x93   :  { %1303 = vmatpush1.bf16.msra.mxu0 %v1926_v26  ;;  %1426 = vmatpush1.bf16.msra.mxu1 %v1929_v27 }
  0x94   :  { %1304 = vmatprep.subr.bf16.mxu0 %v1934_v28  ;;  %1427 = vmatprep.subr.bf16.mxu1 %v1937_v29 }
  0x97   :  { %1305 = vmatpush1.bf16.msra.mxu0 %v1932_v30  ;;  %1428 = vmatpush1.bf16.msra.mxu1 %v1935_v31 }
  0x98   :  { %1306 = vmatprep.subr.bf16.mxu0 %v1940_v32  ;;  %1429 = vmatprep.subr.bf16.mxu1 %v1943_v33 }
  0x9b   :  { %1307 = vmatpush1.bf16.msra.mxu0 %v1938_v34  ;;  %1430 = vmatpush1.bf16.msra.mxu1 %v1941_v35 }
  0x9c   :  { %1308 = vmatprep.subr.bf16.mxu0 %v1946_v36  ;;  %1431 = vmatprep.subr.bf16.mxu1 %v1949_v37 }
  0x9f   :  { %1309 = vmatpush1.bf16.msra.mxu0 %v1944_v38  ;;  %1432 = vmatpush1.bf16.msra.mxu1 %v1947_v39 }
  0xa0   :  { %1310 = vmatprep.subr.bf16.mxu0 %v1952_v40  ;;  %1433 = vmatprep.subr.bf16.mxu1 %v1955_v41 }
  0xa3   :  { %1311 = vmatpush1.bf16.msra.mxu0 %v1950_v42  ;;  %1434 = vmatpush1.bf16.msra.mxu1 %v1953_v43 }
  0xa4   :  { %1312 = vmatprep.subr.bf16.mxu0 %v1958_v44  ;;  %1435 = vmatprep.subr.bf16.mxu1 %v1961_v45 }
  0xa7   :  { %1313 = vmatpush1.bf16.msra.mxu0 %v1956_v46  ;;  %1436 = vmatpush1.bf16.msra.mxu1 %v1959_v47 }
  0xa8   :  { %1314 = vmatprep.subr.bf16.mxu0 %v1964_v48  ;;  %1437 = vmatprep.subr.bf16.mxu1 %v1967_v49 }
  0xab   :  { %1315 = vmatpush1.bf16.msra.mxu0 %v1962_v50  ;;  %1438 = vmatpush1.bf16.msra.mxu1 %v1965_v51 }
  0xac   :  { %1316 = vmatprep.subr.bf16.mxu0 %v1970_v52  ;;  %1439 = vmatprep.subr.bf16.mxu1 %v1973_v53 }
  0xaf   :  { %1317 = vmatpush1.bf16.msra.mxu0 %v1968_v54  ;;  %1440 = vmatpush1.bf16.msra.mxu1 %v1971_v55 }
  0xb0   :  { %1318 = vmatprep.subr.bf16.mxu0 %v1976_v56  ;;  %1441 = vmatprep.subr.bf16.mxu1 %v1979_v57 }
  0xb3   :  { %1319 = vmatpush1.bf16.msra.mxu0 %v1974_v58  ;;  %1442 = vmatpush1.bf16.msra.mxu1 %v1977_v59 }
  0xb4   :  { %1320 = vmatprep.subr.bf16.mxu0 %v1982_v60  ;;  %1443 = vmatprep.subr.bf16.mxu1 %v1985_v61 }
  0xb7   :  { %1321 = vmatpush1.bf16.msra.mxu0 %v1980_v62  ;;  %1444 = vmatpush1.bf16.msra.mxu1 %v1983_v63 }
  0xb8   :  { %1322 = vmatprep.subr.bf16.mxu0 %v1988_v0  ;;  %1445 = vmatprep.subr.bf16.mxu1 %v1991_v1 }
  0xbb   :  { %1323 = vmatpush1.bf16.msra.mxu0 %v1986_v2  ;;  %1446 = vmatpush1.bf16.msra.mxu1 %v1989_v3 }
  0xbc   :  { %1324 = vmatprep.subr.bf16.mxu0 %v1994_v4  ;;  %1447 = vmatprep.subr.bf16.mxu1 %v1997_v5 }
  0xbf   :  { %1325 = vmatpush1.bf16.msra.mxu0 %v1992_v6  ;;  %1448 = vmatpush1.bf16.msra.mxu1 %v1995_v7 }
  0xc2   :  { %1327 = vmatmul.mubr.bf16.vlgmr.msra.gmra.mrb[0].mxu0 %v1488_v8  ;;  %1450 = vmatmul.mubr.bf16.vlgmr.msra.gmra.mrb[0].mxu1 %v1488_v8 }
 0x195   :  { %v1328_v21 = vpop.f32.mrb[0].mxu0  ;;  %v1451_v10 = vpop.f32.mrb[0].mxu1 }
 0x196   :  { %v1686_v22 = vadd.f32 %v1328_v21, %v214_v17  ;;  %v1688_v23 = vadd.f32 %v1451_v10, %v222_v18  ;;  %v1330_v24 = vpop.f32.mrb[1].mxu0  ;;  %v1453_v25 = vpop.f32.mrb[1].mxu1 }
 0x197   :  { %v1687_v26 = vadd.f32 %v1330_v24, %v218_v19  ;;  %v1689_v27 = vadd.f32 %v1453_v25, %v226_v20  ;;  %v1332_v28 = vpop.f32.mrb[2].mxu0  ;;  %v1455_v29 = vpop.f32.mrb[2].mxu1 }
 0x198   :  { %v1458_v30 = vmax.f32 %v1686_v22, 0.0  ;;  %v1460_v31 = vmax.f32 %v1688_v23, 0.0  ;;  %v1333_v32 = vpop.f32.mrb[3].mxu0  ;;  %v1456_v33 = vpop.f32.mrb[3].mxu1 }
 0x199   :  { %v1459_v34 = vmax.f32 %v1687_v26, 0.0  ;;  %v1461_v35 = vmax.f32 %v1689_v27, 0.0 }
 0x19b   :  { %v1684_v36 = vpack.c.bf16 %v1459_v34, %v1458_v30  ;;  %v1685_v37 = vpack.c.bf16 %v1461_v35, %v1460_v31 }
 0x19d   :  { %1478 = vst [vmem:[%s2629_s3] sm:$0xff] %v1684_v36  ;;  %1479 = vst [vmem:[%s2629_s3 + $0x8] sm:$0xff] %v1685_v37 }

// kernel: resnet_forward.21
= control target key start
LH: loop header
LB: loop body
LE: loop exit
PB: predicated region body
PF: predicated region fallthrough
CT: control target
= control target key end

     0   :  { %v26_v30 = vlaneseq  ;;  %s812_s0 = inlined_call_operand.vmem [shape: bf16[2,2,512], index: 0, kind: input, shape index: {}]   ;;  %s813_s1 = inlined_call_operand.vmem [shape: bf16[512,128], index: 1, kind: input, shape index: {}]   ;;  %s814_s2 = inlined_call_operand.vmem [shape: f32[1,128], index: 2, kind: input, shape index: {}]   ;;  %s815_s3 = inlined_call_operand.hbm [shape: f32[2,128], index: 3, kind: output, shape index: {}]  }
   0x1   :  { %v608_v0 = vld [vmem:[%s813_s1 + $0x40] sm:$0xff]   ;;  %v612_v4 = vld [vmem:[%s813_s1 + $0x48] sm:$0xff]   ;;  %v616_v8 = vld [vmem:[%s813_s1 + $0x50] sm:$0xff]  }
   0x2   :  { %v609_v1 = vld [vmem:[%s813_s1 + $0xc0] sm:$0xff]   ;;  %562 = vmatprep.subr.bf16.mxu0 %v608_v0  ;;  %v613_v5 = vld [vmem:[%s813_s1 + $0xc8] sm:$0xff]   ;;  %v617_v9 = vld [vmem:[%s813_s1 + $0xd0] sm:$0xff]  }
   0x3   :  { %v610_v2 = vld [vmem:[%s813_s1] sm:$0xff]   ;;  %584 = vmatprep.subr.bf16.mxu1 %v609_v1  ;;  %v614_v6 = vld [vmem:[%s813_s1 + $0x8] sm:$0xff]   ;;  %v618_v10 = vld [vmem:[%s813_s1 + $0x10] sm:$0xff]  }
   0x4   :  { %v611_v3 = vld [vmem:[%s813_s1 + $0x80] sm:$0xff]   ;;  %563 = vmatpush3.bf16.msra.mxu0 %v610_v2  ;;  %v615_v7 = vld [vmem:[%s813_s1 + $0x88] sm:$0xff]   ;;  %v619_v11 = vld [vmem:[%s813_s1 + $0x90] sm:$0xff]  }
   0x5   :  { %585 = vmatpush3.bf16.msra.mxu1 %v611_v3  ;;  %564 = vmatprep.subr.bf16.mxu0 %v612_v4  ;;  %v620_v12 = vld [vmem:[%s813_s1 + $0x58] sm:$0xff]   ;;  %v624_v16 = vld [vmem:[%s813_s1 + $0x60] sm:$0xff]   ;;  %v628_v20 = vld [vmem:[%s813_s1 + $0x68] sm:$0xff]  }
   0x6   :  { %586 = vmatprep.subr.bf16.mxu1 %v613_v5  ;;  %v621_v13 = vld [vmem:[%s813_s1 + $0xd8] sm:$0xff]   ;;  %v625_v17 = vld [vmem:[%s813_s1 + $0xe0] sm:$0xff]   ;;  %v629_v21 = vld [vmem:[%s813_s1 + $0xe8] sm:$0xff]  }
   0x7   :  { %v622_v14 = vld [vmem:[%s813_s1 + $0x18] sm:$0xff]   ;;  %v626_v18 = vld [vmem:[%s813_s1 + $0x20] sm:$0xff]   ;;  %v630_v22 = vld [vmem:[%s813_s1 + $0x28] sm:$0xff]  }
   0x8   :  { %565 = vmatpush3.bf16.msra.mxu0 %v614_v6  ;;  %v623_v15 = vld [vmem:[%s813_s1 + $0x98] sm:$0xff]   ;;  %v627_v19 = vld [vmem:[%s813_s1 + $0xa0] sm:$0xff]   ;;  %v631_v23 = vld [vmem:[%s813_s1 + $0xa8] sm:$0xff]  }
   0x9   :  { %587 = vmatpush3.bf16.msra.mxu1 %v615_v7  ;;  %566 = vmatprep.subr.bf16.mxu0 %v616_v8  ;;  %v632_v24 = vld [vmem:[%s813_s1 + $0x70] sm:$0xff]   ;;  %v636_v28 = vld [vmem:[%s813_s1 + $0x78] sm:$0xff]   ;;  %v559_v33 = vld [vmem:[%s812_s0] sm:$0xff]  }
   0xa   :  { %588 = vmatprep.subr.bf16.mxu1 %v617_v9  ;;  %v633_v25 = vld [vmem:[%s813_s1 + $0xf0] sm:$0xff]   ;;  %v637_v29 = vld [vmem:[%s813_s1 + $0xf8] sm:$0xff]  }
   0xb   :  { %v634_v26 = vld [vmem:[%s813_s1 + $0x30] sm:$0xff]   ;;  %v638_v31 = vld [vmem:[%s813_s1 + $0x38] sm:$0xff]  }
   0xc   :  { %567 = vmatpush3.bf16.msra.mxu0 %v618_v10  ;;  %v635_v27 = vld [vmem:[%s813_s1 + $0xb0] sm:$0xff]   ;;  %v639_v32 = vld [vmem:[%s813_s1 + $0xb8] sm:$0xff]  }
   0xd   :  { %589 = vmatpush3.bf16.msra.mxu1 %v619_v11  ;;  %568 = vmatprep.subr.bf16.mxu0 %v620_v12 }
   0xe   :  { %590 = vmatprep.subr.bf16.mxu1 %v621_v13 }
  0x10   :  { %569 = vmatpush3.bf16.msra.mxu0 %v622_v14 }
  0x11   :  { %591 = vmatpush3.bf16.msra.mxu1 %v623_v15  ;;  %570 = vmatprep.subr.bf16.mxu0 %v624_v16 }
  0x12   :  { %592 = vmatprep.subr.bf16.mxu1 %v625_v17 }
  0x14   :  { %571 = vmatpush3.bf16.msra.mxu0 %v626_v18 }
  0x15   :  { %593 = vmatpush3.bf16.msra.mxu1 %v627_v19  ;;  %572 = vmatprep.subr.bf16.mxu0 %v628_v20 }
  0x16   :  { %594 = vmatprep.subr.bf16.mxu1 %v629_v21 }
  0x18   :  { %573 = vmatpush3.bf16.msra.mxu0 %v630_v22 }
  0x19   :  { %595 = vmatpush3.bf16.msra.mxu1 %v631_v23  ;;  %574 = vmatprep.subr.bf16.mxu0 %v632_v24 }
  0x1a   :  { %596 = vmatprep.subr.bf16.mxu1 %v633_v25 }
  0x1c   :  { %575 = vmatpush3.bf16.msra.mxu0 %v634_v26 }
  0x1d   :  { %597 = vmatpush3.bf16.msra.mxu1 %v635_v27  ;;  %576 = vmatprep.subr.bf16.mxu0 %v636_v28 }
  0x1e   :  { %598 = vmatprep.subr.bf16.mxu1 %v637_v29 }
  0x20   :  { %577 = vmatpush3.bf16.msra.mxu0 %v638_v31 }
  0x21   :  { %8 = vsyncpa [#allocation3], 0  ;;  %599 = vmatpush3.bf16.msra.mxu1 %v639_v32  ;;  %v560_v34 = vunpack.c.l.bf16 %v559_v33  ;;  %v561_v35 = vunpack.c.h.bf16 %v559_v33  ;;  %v664_v36 = vmov 1983009808   ;;  %v27_v38 = vshrl.u32 %v26_v30, 7  ;;  %s665_s24 = smov [#allocation2]  }
  0x22   :  { %v24_v37 = vunpack.c.l.s4 %v664_v36  ;;  %vm64_vm0 = vcmask 1041408   ;;  %vm225_vm1 = vcmask 1041409   ;;  %s517_s25 = sshll.u32 %s665_s24, 4  ;;  %s518_s25 = int_to_ptr.vmem [resolvable:$true] %s517_s25 }
  0x23   :  { %v22_v40 = vcombine.high %v560_v34, %v560_v34  ;;  %v39_v41 = vcombine.high %v561_v35, %v561_v35  ;;  %s640_s26 = scalar_lea.vmem %s518_s25, 32  ;;  %p645_p1 = scmp.lt.s32.totalorder %s518_s25, %s518_s25 }
  0x24   :  { %v25_v39 = vunpack.c.0.s8 %v24_v37  ;;  %p641_p0 = scmp.ne.s32.totalorder %s518_s25, %s640_s26  ;;  %p646_p2 = scmp.lt.s32.totalorder %s640_s26, %s640_s26 }
  0x26   :  { %v28_v42 = vsub.s32 %v25_v39, %v27_v38  ;;  %p647_p3 = por %p646_p2, %p645_p1 }
  0x28   :  { %v29_v43 = vrot.slane %v560_v34, %v28_v42  ;;  %v46_v44 = vrot.slane %v561_v35, %v28_v42  ;;  %v36_v45 = vrot.slane %v22_v40, %v28_v42  ;;  %v53_v46 = vrot.slane %v39_v41, %v28_v42  ;;  %p648_p4 = pnand %p647_p3, %p641_p0 }
  0x2a   :  { %v37_v47 = vcombine.high %v29_v43, %v29_v43  ;;  %v54_v48 = vcombine.high %v46_v44, %v46_v44  ;;  %v38_v49 = vcombine.high %v36_v45, %v36_v45  ;;  %v55_v50 = vcombine.high %v53_v46, %v53_v46 }
  0x2b   :  { %v65_v51 = vsel %vm64_vm0, %v29_v43, 0.0  ;;  %v93_v52 = vsel %vm64_vm0, %v46_v44, 0.0  ;;  %v79_v53 = vsel %vm64_vm0, %v36_v45, 0.0  ;;  %v107_v54 = vsel %vm64_vm0, %v53_v46, 0.0 }
  0x2c   :  { %v72_v55 = vsel %vm64_vm0, %v37_v47, 0.0  ;;  %v100_v56 = vsel %vm64_vm0, %v54_v48, 0.0  ;;  %v86_v57 = vsel %vm64_vm0, %v38_v49, 0.0  ;;  %v114_v58 = vsel %vm64_vm0, %v55_v50, 0.0 }
  0x2d   :  { %v73_v59 = vrot.slane %v72_v55, 4  ;;  %v101_v60 = vrot.slane %v100_v56, 4  ;;  %v87_v61 = vrot.slane %v86_v57, 4  ;;  %v115_v62 = vrot.slane %v114_v58, 4 }
  0x2e   :  { %v66_v63 = vrot.slane %v65_v51, 4  ;;  %v94_v0 = vrot.slane %v93_v52, 4  ;;  %v80_v1 = vrot.slane %v79_v53, 4  ;;  %v108_v2 = vrot.slane %v107_v54, 4 }
  0x2f   :  { %v74_v3 = vadd.f32 %v73_v59, %v72_v55  ;;  %v102_v4 = vadd.f32 %v101_v60, %v100_v56  ;;  %v88_v5 = vadd.f32 %v87_v61, %v86_v57  ;;  %v116_v6 = vadd.f32 %v115_v62, %v114_v58 }
  0x30   :  { %v67_v7 = vadd.f32 %v66_v63, %v65_v51  ;;  %v95_v8 = vadd.f32 %v94_v0, %v93_v52  ;;  %v81_v9 = vadd.f32 %v80_v1, %v79_v53  ;;  %v109_v10 = vadd.f32 %v108_v2, %v107_v54 }
  0x31   :  { %v75_v11 = vrot.slane %v74_v3, 2  ;;  %v103_v12 = vrot.slane %v102_v4, 2  ;;  %v89_v13 = vrot.slane %v88_v5, 2  ;;  %v117_v14 = vrot.slane %v116_v6, 2 }
  0x32   :  { %v68_v15 = vrot.slane %v67_v7, 2  ;;  %v96_v16 = vrot.slane %v95_v8, 2  ;;  %v82_v17 = vrot.slane %v81_v9, 2  ;;  %v110_v18 = vrot.slane %v109_v10, 2 }
  0x33   :  { %v76_v19 = vadd.f32 %v75_v11, %v74_v3  ;;  %v104_v20 = vadd.f32 %v103_v12, %v102_v4  ;;  %v90_v21 = vadd.f32 %v89_v13, %v88_v5  ;;  %v118_v22 = vadd.f32 %v117_v14, %v116_v6  ;;  %v525_v13 = vld [vmem:[%s814_s2] ss:$0 sm:$0xff] }
  0x34   :  { %v69_v23 = vadd.f32 %v68_v15, %v67_v7  ;;  %v97_v24 = vadd.f32 %v96_v16, %v95_v8  ;;  %v83_v25 = vadd.f32 %v82_v17, %v81_v9  ;;  %v111_v26 = vadd.f32 %v110_v18, %v109_v10 }
  0x35   :  { %v77_v27 = vrot.slane %v76_v19, 1  ;;  %v105_v28 = vrot.slane %v104_v20, 1  ;;  %v91_v29 = vrot.slane %v90_v21, 1  ;;  %v119_v30 = vrot.slane %v118_v22, 1 }
  0x36   :  { %v70_v31 = vrot.slane %v69_v23, 1  ;;  %v98_v32 = vrot.slane %v97_v24, 1  ;;  %v84_v33 = vrot.slane %v83_v25, 1  ;;  %v112_v34 = vrot.slane %v111_v26, 1 }
  0x37   :  { %v78_v35 = vadd.f32 %v77_v27, %v76_v19  ;;  %v106_v36 = vadd.f32 %v105_v28, %v104_v20  ;;  %v92_v37 = vadd.f32 %v91_v29, %v90_v21  ;;  %v120_v38 = vadd.f32 %v119_v30, %v118_v22 }
  0x38   :  { %v71_v39 = vadd.f32 %v70_v31, %v69_v23  ;;  %v99_v40 = vadd.f32 %v98_v32, %v97_v24  ;;  %v85_v41 = vadd.f32 %v84_v33, %v83_v25  ;;  %v113_v42 = vadd.f32 %v112_v34, %v111_v26 }
  0x39   :  { %v123_v43 = vmul.f32 0.5, %v78_v35  ;;  %v127_v44 = vmul.f32 0.5, %v106_v36  ;;  %v125_v45 = vmul.f32 0.5, %v92_v37  ;;  %v129_v46 = vmul.f32 0.5, %v120_v38 }
  0x3a   :  { %v122_v47 = vmul.f32 0.5, %v71_v39  ;;  %v126_v48 = vmul.f32 0.5, %v99_v40  ;;  %v124_v49 = vmul.f32 0.5, %v85_v41  ;;  %v128_v50 = vmul.f32 0.5, %v113_v42 }
  0x3b   :  { %v131_v51 = vpack.c.bf16 %v123_v43, %v123_v43  ;;  %v135_v52 = vpack.c.bf16 %v127_v44, %v127_v44  ;;  %v133_v53 = vpack.c.bf16 %v125_v45, %v125_v45  ;;  %v137_v54 = vpack.c.bf16 %v129_v46, %v129_v46 }
  0x3c   :  { %v130_v55 = vpack.c.bf16 %v122_v47, %v122_v47  ;;  %v134_v56 = vpack.c.bf16 %v126_v48, %v126_v48  ;;  %v132_v57 = vpack.c.bf16 %v124_v49, %v124_v49  ;;  %v136_v58 = vpack.c.bf16 %v128_v50, %v128_v50 }
  0x3d   :  { %v218_v59 = vunpack.c.l.b16 %v131_v51  ;;  %v222_v60 = vunpack.c.l.b16 %v135_v52  ;;  %v220_v61 = vunpack.c.l.b16 %v133_v53  ;;  %v224_v62 = vunpack.c.l.b16 %v137_v54 }
  0x3e   :  { %v217_v63 = vunpack.c.l.b16 %v130_v55  ;;  %v221_v0 = vunpack.c.l.b16 %v134_v56  ;;  %v219_v1 = vunpack.c.l.b16 %v132_v57  ;;  %v223_v2 = vunpack.c.l.b16 %v136_v58 }
  0x3f   :  { %v227_v3 = vsel %vm225_vm1, %v222_v60, %v218_v59  ;;  %v229_v4 = vsel %vm225_vm1, %v224_v62, %v220_v61 }
  0x40   :  { %v231_v5 = vpack.c.b16 %v227_v3, %v227_v3  ;;  %v233_v6 = vpack.c.b16 %v229_v4, %v229_v4  ;;  %v226_v7 = vsel %vm225_vm1, %v221_v0, %v217_v63  ;;  %v228_v8 = vsel %vm225_vm1, %v223_v2, %v219_v1 }
  0x41   :  { %v230_v9 = vpack.c.b16 %v226_v7, %v226_v7  ;;  %v232_v10 = vpack.c.b16 %v228_v8, %v228_v8 }
  0x42   :  { %462 = vmatprep.mubr.bf16.mxu0 %v231_v5  ;;  %502 = vmatprep.mubr.bf16.mxu1 %v233_v6 }
  0x43   :  { %463 = vmatmul.mubr.bf16.vlgmr.msra.gmra.mrb[0].mxu0 %v230_v9  ;;  %503 = vmatmul.mubr.bf16.vlgmr.msra.gmra.mrb[0].mxu1 %v232_v10 }
 0x116   :  { %v578_v11 = vpop.f32.mrb[0].mxu0  ;;  %v600_v12 = vpop.f32.mrb[0].mxu1 }
 0x117   :  { %v579_v14 = vpop.f32.mrb[1].mxu0  ;;  %v601_v15 = vpop.f32.mrb[1].mxu1 }
 0x118   :  { %v580_v16 = vadd.f32 %v579_v14, %v578_v11  ;;  %v602_v17 = vadd.f32 %v601_v15, %v600_v12  ;;  %v581_v18 = vpop.f32.mrb[2].mxu0  ;;  %v603_v19 = vpop.f32.mrb[2].mxu1 }
 0x119   :  { %v582_v20 = vpop.f32.mrb[3].mxu0  ;;  %v604_v21 = vpop.f32.mrb[3].mxu1 }
 0x11a   :  { %v465_v22 = vadd.f32 %v580_v16, %v525_v13 }
 0x11c   :  { %v505_v23 = vadd.f32 %v602_v17, %v465_v22 }
 0x11e   :  { %510 = vst [vmem:[#allocation2] sm:$0x3] %v505_v23 }
 0x11f   :  { %651 = shalt.err (!%p648_p4)
}
 0x120   :  { %s652_s28 = scalar_lea.hbm %s815_s3, 32 }
 0x121   :  { %p653_p5 = scmp.ne.s32.totalorder %s815_s3, %s652_s28  ;;  %p656_p6 = scmp.lt.u32.totalorder %s652_s28, %s815_s3 }
 0x123   :  { %p658_p7 = pnand %p656_p6, %p653_p5 }
 0x125   :  { %661 = shalt.err (!%p658_p7)
}
 0x126   :  { %520 = dma.vmem_to_hbm [thread:$0]  %s518_s25, 32, %s815_s3, [#allocation3]  }
 0x127   :  { %662 = dma.done.wait [#allocation3], 32  }
 0x128   :  { %663 = vsyncadd [#allocation3], 4294967264 }
 0x129   :  { %524 = vsyncpa [#allocation3], 1 }

// kernel: resnet_forward.20
= control target key start
LH: loop header
LB: loop body
LE: loop exit
PB: predicated region body
PF: predicated region fallthrough
CT: control target
= control target key end

     0   :  { %vm70_vm0 = vcmask 1043456   ;;  %s6406_s2 = inlined_call_operand.vmem [shape: bf16[3,512,512], index: 2, kind: input, shape index: {}]   ;;  %s6407_s0 = inlined_call_operand.vmem [shape: bf16[16,512], index: 0, kind: input, shape index: {}, may-alias: {0,1}]   ;;  %s6408_s1 = inlined_call_operand.vmem [shape: bf16[16,512], index: 1, kind: input, shape index: {}, may-alias: {0,1}]   ;;  %s6409_s5 = inlined_call_operand.vmem [shape: bf16[256,512], index: 5, kind: input, shape index: {}]   ;;  %s6410_s4 = inlined_call_operand.vmem [shape: bf16[8,256], index: 4, kind: input, shape index: {}]   ;;  %s6411_s3 = inlined_call_operand.vmem [shape: f32[1,512], index: 3, kind: input, shape index: {}]   ;;  %s6412_s6 = inlined_call_operand.vmem [shape: f32[1,512], index: 6, kind: input, shape index: {}]   ;;  %s6413_s7 = inlined_call_operand.vmem [shape: bf16[8,512], index: 7, kind: output, shape index: {}]  }
   0x1   :  { %v4263_v0 = vld [vmem:[%s6406_s2 + $0x404] ss:$16 sps:$4 sm:$0xff]   ;;  %v4265_v1 = vld [vmem:[%s6406_s2 + $0x40c] ss:$16 sps:$4 sm:$0xff]   ;;  %v4267_v2 = vld [vmem:[%s6406_s2 + $0x400] ss:$16 sps:$4 sm:$0xff]  }
   0x2   :  { %1012 = vmatprep.subr.bf16.mxu0 %v4263_v0  ;;  %v4268_v3 = vld [vmem:[%s6406_s2 + $0x408] ss:$16 sps:$4 sm:$0xff]   ;;  %1094 = vmatprep.subr.bf16.mxu1 %v4265_v1  ;;  %v4269_v4 = vld [vmem:[%s6406_s2 + $0x424] ss:$16 sps:$4 sm:$0xff]   ;;  %v4271_v5 = vld [vmem:[%s6406_s2 + $0x42c] ss:$16 sps:$4 sm:$0xff]  }
   0x3   :  { %1013 = vmatpush1.bf16.msra.mxu0 %v4267_v2  ;;  %1095 = vmatpush1.bf16.msra.mxu1 %v4268_v3  ;;  %v4273_v6 = vld [vmem:[%s6406_s2 + $0x420] ss:$16 sps:$4 sm:$0xff]   ;;  %v4274_v7 = vld [vmem:[%s6406_s2 + $0x428] ss:$16 sps:$4 sm:$0xff]   ;;  %v4275_v8 = vld [vmem:[%s6406_s2 + $0x444] ss:$16 sps:$4 sm:$0xff]  }
   0x4   :  { %1014 = vmatprep.subr.bf16.mxu0 %v4269_v4  ;;  %1096 = vmatprep.subr.bf16.mxu1 %v4271_v5  ;;  %v4277_v9 = vld [vmem:[%s6406_s2 + $0x44c] ss:$16 sps:$4 sm:$0xff]   ;;  %v4279_v10 = vld [vmem:[%s6406_s2 + $0x440] ss:$16 sps:$4 sm:$0xff]   ;;  %v4280_v11 = vld [vmem:[%s6406_s2 + $0x448] ss:$16 sps:$4 sm:$0xff]  }
   0x5   :  { %v4281_v12 = vld [vmem:[%s6406_s2 + $0x464] ss:$16 sps:$4 sm:$0xff]   ;;  %v4283_v13 = vld [vmem:[%s6406_s2 + $0x46c] ss:$16 sps:$4 sm:$0xff]   ;;  %v4285_v14 = vld [vmem:[%s6406_s2 + $0x460] ss:$16 sps:$4 sm:$0xff]  }
   0x6   :  { %v4286_v15 = vld [vmem:[%s6406_s2 + $0x468] ss:$16 sps:$4 sm:$0xff]   ;;  %v4287_v16 = vld [vmem:[%s6406_s2 + $0x484] ss:$16 sps:$4 sm:$0xff]   ;;  %v4289_v17 = vld [vmem:[%s6406_s2 + $0x48c] ss:$16 sps:$4 sm:$0xff]  }
   0x7   :  { %1015 = vmatpush1.bf16.msra.mxu0 %v4273_v6  ;;  %1097 = vmatpush1.bf16.msra.mxu1 %v4274_v7  ;;  %v4291_v18 = vld [vmem:[%s6406_s2 + $0x480] ss:$16 sps:$4 sm:$0xff]   ;;  %v4292_v19 = vld [vmem:[%s6406_s2 + $0x488] ss:$16 sps:$4 sm:$0xff]   ;;  %v4293_v20 = vld [vmem:[%s6406_s2 + $0x4a4] ss:$16 sps:$4 sm:$0xff]  }
   0x8   :  { %1016 = vmatprep.subr.bf16.mxu0 %v4275_v8  ;;  %1098 = vmatprep.subr.bf16.mxu1 %v4277_v9  ;;  %v4295_v21 = vld [vmem:[%s6406_s2 + $0x4ac] ss:$16 sps:$4 sm:$0xff]   ;;  %v4297_v22 = vld [vmem:[%s6406_s2 + $0x4a0] ss:$16 sps:$4 sm:$0xff]   ;;  %v4298_v23 = vld [vmem:[%s6406_s2 + $0x4a8] ss:$16 sps:$4 sm:$0xff]  }
   0x9   :  { %v4299_v24 = vld [vmem:[%s6406_s2 + $0x4c4] ss:$16 sps:$4 sm:$0xff]   ;;  %v4301_v25 = vld [vmem:[%s6406_s2 + $0x4cc] ss:$16 sps:$4 sm:$0xff]   ;;  %v4303_v26 = vld [vmem:[%s6406_s2 + $0x4c0] ss:$16 sps:$4 sm:$0xff]  }
   0xa   :  { %v4304_v27 = vld [vmem:[%s6406_s2 + $0x4c8] ss:$16 sps:$4 sm:$0xff]   ;;  %v4305_v28 = vld [vmem:[%s6406_s2 + $0x4e4] ss:$16 sps:$4 sm:$0xff]   ;;  %v4307_v29 = vld [vmem:[%s6406_s2 + $0x4ec] ss:$16 sps:$4 sm:$0xff]  }
   0xb   :  { %1017 = vmatpush1.bf16.msra.mxu0 %v4279_v10  ;;  %1099 = vmatpush1.bf16.msra.mxu1 %v4280_v11  ;;  %v4309_v30 = vld [vmem:[%s6406_s2 + $0x4e0] ss:$16 sps:$4 sm:$0xff]   ;;  %v4310_v31 = vld [vmem:[%s6406_s2 + $0x4e8] ss:$16 sps:$4 sm:$0xff]   ;;  %v4311_v32 = vld [vmem:[%s6406_s2 + $0x504] ss:$16 sps:$4 sm:$0xff]  }
   0xc   :  { %1018 = vmatprep.subr.bf16.mxu0 %v4281_v12  ;;  %1100 = vmatprep.subr.bf16.mxu1 %v4283_v13  ;;  %v4313_v33 = vld [vmem:[%s6406_s2 + $0x50c] ss:$16 sps:$4 sm:$0xff]   ;;  %v4315_v34 = vld [vmem:[%s6406_s2 + $0x500] ss:$16 sps:$4 sm:$0xff]   ;;  %v4316_v35 = vld [vmem:[%s6406_s2 + $0x508] ss:$16 sps:$4 sm:$0xff]  }
   0xd   :  { %v4317_v36 = vld [vmem:[%s6406_s2 + $0x524] ss:$16 sps:$4 sm:$0xff]   ;;  %v4319_v37 = vld [vmem:[%s6406_s2 + $0x52c] ss:$16 sps:$4 sm:$0xff]   ;;  %v4321_v38 = vld [vmem:[%s6406_s2 + $0x520] ss:$16 sps:$4 sm:$0xff]  }
   0xe   :  { %v4322_v39 = vld [vmem:[%s6406_s2 + $0x528] ss:$16 sps:$4 sm:$0xff]   ;;  %v4323_v40 = vld [vmem:[%s6406_s2 + $0x544] ss:$16 sps:$4 sm:$0xff]   ;;  %v4325_v41 = vld [vmem:[%s6406_s2 + $0x54c] ss:$16 sps:$4 sm:$0xff]  }
   0xf   :  { %1019 = vmatpush1.bf16.msra.mxu0 %v4285_v14  ;;  %1101 = vmatpush1.bf16.msra.mxu1 %v4286_v15  ;;  %v4327_v42 = vld [vmem:[%s6406_s2 + $0x540] ss:$16 sps:$4 sm:$0xff]   ;;  %v4328_v43 = vld [vmem:[%s6406_s2 + $0x548] ss:$16 sps:$4 sm:$0xff]   ;;  %v4329_v44 = vld [vmem:[%s6406_s2 + $0x564] ss:$16 sps:$4 sm:$0xff]  }
  0x10   :  { %1020 = vmatprep.subr.bf16.mxu0 %v4287_v16  ;;  %1102 = vmatprep.subr.bf16.mxu1 %v4289_v17  ;;  %v4331_v45 = vld [vmem:[%s6406_s2 + $0x56c] ss:$16 sps:$4 sm:$0xff]   ;;  %v46_v46 = vld [vmem:[%s6407_s0] sm:$0xff]  ;;  %v4334_v48 = vld [vmem:[%s6406_s2 + $0x568] ss:$16 sps:$4 sm:$0xff]  }
  0x11   :  { %v4333_v47 = vld [vmem:[%s6406_s2 + $0x560] ss:$16 sps:$4 sm:$0xff]   ;;  %v3490_v50 = vcombine.high %v46_v46, %v46_v46  ;;  %v4335_v51 = vld [vmem:[%s6406_s2 + $0x584] ss:$16 sps:$4 sm:$0xff]   ;;  %v4337_v53 = vld [vmem:[%s6406_s2 + $0x58c] ss:$16 sps:$4 sm:$0xff]   ;;  %v3489_v61 = vcombine.low %v46_v46, %v46_v46 }
  0x12   :  { %v3487_v49 = vld [vmem:[%s6408_s1 + $0x10] sm:$0xff]  ;;  %v4340_v56 = vld [vmem:[%s6406_s2 + $0x588] ss:$16 sps:$4 sm:$0xff]   ;;  %v4343_v0 = vld [vmem:[%s6406_s2 + $0x5ac] ss:$16 sps:$4 sm:$0xff]  }
  0x13   :  { %1021 = vmatpush1.bf16.msra.mxu0 %v4291_v18  ;;  %1103 = vmatpush1.bf16.msra.mxu1 %v4292_v19  ;;  %v3494_v52 = vcombine.high %v3487_v49, %v3487_v49  ;;  %v4339_v54 = vld [vmem:[%s6406_s2 + $0x580] ss:$16 sps:$4 sm:$0xff]   ;;  %v5155_v59 = vld [vmem:[%s6407_s0 + $0x8] sm:$0xff]  ;;  %v5160_v60 = vld [vmem:[%s6408_s1 + $0x18] sm:$0xff]  ;;  %v3493_v62 = vcombine.low %v3487_v49, %v3487_v49 }
  0x14   :  { %1022 = vmatprep.subr.bf16.mxu0 %v4293_v20  ;;  %1104 = vmatprep.subr.bf16.mxu1 %v4295_v21  ;;  %v4341_v63 = vld [vmem:[%s6406_s2 + $0x5a4] ss:$16 sps:$4 sm:$0xff]   ;;  %v3492_v3 = vcombine.high %v5155_v59, %v5155_v59  ;;  %v3496_v4 = vcombine.high %v5160_v60, %v5160_v60  ;;  %v4345_v5 = vld [vmem:[%s6406_s2 + $0x5a0] ss:$16 sps:$4 sm:$0xff]   ;;  %v4346_v6 = vld [vmem:[%s6406_s2 + $0x5a8] ss:$16 sps:$4 sm:$0xff]  }
  0x15   :  { %v5145_v55 = vsel %vm70_vm0, %v3490_v50, %v3494_v52  ;;  %v5179_v7 = vsel %vm70_vm0, %v3489_v61, %v3493_v62  ;;  %v4347_v8 = vld [vmem:[%s6406_s2 + $0x5c4] ss:$16 sps:$4 sm:$0xff]   ;;  %v4349_v9 = vld [vmem:[%s6406_s2 + $0x5cc] ss:$16 sps:$4 sm:$0xff]   ;;  %v4351_v12 = vld [vmem:[%s6406_s2 + $0x5c0] ss:$16 sps:$4 sm:$0xff]  }
  0x16   :  { %v350_v57 = vshrl.u32 %v5145_v55, 16  ;;  %v352_v58 = vshll.u32 %v5145_v55, 16  ;;  %v346_v10 = vshll.u32 %v5179_v7, 16  ;;  %v5189_v11 = vsel %vm70_vm0, %v3492_v3, %v3496_v4  ;;  %v4352_v13 = vld [vmem:[%s6406_s2 + $0x5c8] ss:$16 sps:$4 sm:$0xff]  }
  0x17   :  { %1023 = vmatpush1.bf16.msra.mxu0 %v4297_v22  ;;  %1105 = vmatpush1.bf16.msra.mxu1 %v4298_v23  ;;  %v4353_v14 = vld [vmem:[%s6406_s2 + $0x5e4] ss:$16 sps:$4 sm:$0xff]   ;;  %v4355_v15 = vld [vmem:[%s6406_s2 + $0x5ec] ss:$16 sps:$4 sm:$0xff]   ;;  %v364_v16 = vshll.u32 %v5189_v11, 16  ;;  %v344_v17 = vshrl.u32 %v5179_v7, 16 }
  0x18   :  { %1024 = vmatprep.subr.bf16.mxu0 %v4299_v24  ;;  %1106 = vmatprep.subr.bf16.mxu1 %v4301_v25  ;;  %v354_v1 = vrot.slane %v352_v58, 1  ;;  %v348_v18 = vrot.slane %v346_v10, 1  ;;  %v4357_v19 = vld [vmem:[%s6406_s2 + $0x5e0] ss:$16 sps:$4 sm:$0xff]   ;;  %v4358_v20 = vld [vmem:[%s6406_s2 + $0x5e8] ss:$16 sps:$4 sm:$0xff]  }
  0x19   :  { %v4367_v21 = vld [vmem:[%s6406_s2 + $0x604] ss:$16 sps:$4 sm:$0xff]   ;;  %v4370_v22 = vld [vmem:[%s6406_s2 + $0x60c] ss:$16 sps:$4 sm:$0xff]   ;;  %v362_v23 = vshrl.u32 %v5189_v11, 16  ;;  %v366_v24 = vrot.slane %v364_v16, 1  ;;  %v3491_v16 = vcombine.low %v5155_v59, %v5155_v59 }
  0x1a   :  { %v355_v2 = vor.u32 %v354_v1, %v350_v57  ;;  %v349_v25 = vor.u32 %v348_v18, %v344_v17  ;;  %v4400_v46 = vld [vmem:[%s6406_s2 + $0x6ac] ss:$16 sps:$4 sm:$0xff]   ;;  %v4403_v49 = vld [vmem:[%s6406_s2 + $0x6c4] ss:$16 sps:$4 sm:$0xff]   ;;  %v4404_v52 = vld [vmem:[%s6406_s2 + $0x6c8] ss:$16 sps:$4 sm:$0xff]   ;;  %v3495_v17 = vcombine.low %v5160_v60, %v5160_v60 }
  0x1b   :  { %1025 = vmatpush1.bf16.msra.mxu0 %v4303_v26  ;;  %1107 = vmatpush1.bf16.msra.mxu1 %v4304_v27  ;;  %v4365_v26 = vld [vmem:[%s6406_s2 + $0x600] ss:$16 sps:$4 sm:$0xff]   ;;  %v4368_v27 = vld [vmem:[%s6406_s2 + $0x608] ss:$16 sps:$4 sm:$0xff]   ;;  %v4406_v50 = vld [vmem:[%s6406_s2 + $0x6cc] ss:$16 sps:$4 sm:$0xff]  }
  0x1c   :  { %1026 = vmatprep.subr.bf16.mxu0 %v4305_v28  ;;  %1108 = vmatprep.subr.bf16.mxu1 %v4307_v29  ;;  %v4373_v28 = vld [vmem:[%s6406_s2 + $0x624] ss:$16 sps:$4 sm:$0xff]   ;;  %v4376_v29 = vld [vmem:[%s6406_s2 + $0x62c] ss:$16 sps:$4 sm:$0xff]   ;;  %v4410_v57 = vld [vmem:[%s6406_s2 + $0x6e8] ss:$16 sps:$4 sm:$0xff]  }
  0x1d   :  { %1044 = vmatprep.mubr.bf16.mxu0 %v355_v2  ;;  %1126 = vmatprep.mubr.bf16.mxu1 %v355_v2  ;;  %v4415_v58 = vld [vmem:[%s6406_s2 + $0x704] ss:$16 sps:$4 sm:$0xff]   ;;  %v4418_v61 = vld [vmem:[%s6406_s2 + $0x70c] ss:$16 sps:$4 sm:$0xff]   ;;  %v4413_v62 = vld [vmem:[%s6406_s2 + $0x700] ss:$16 sps:$4 sm:$0xff]  }
  0x1e   :  { %v4424_v1 = vld [vmem:[%s6406_s2 + $0x72c] ss:$16 sps:$4 sm:$0xff]   ;;  %v4419_v2 = vld [vmem:[%s6406_s2 + $0x720] ss:$16 sps:$4 sm:$0xff]   ;;  %v4422_v3 = vld [vmem:[%s6406_s2 + $0x728] ss:$16 sps:$4 sm:$0xff]  }
  0x1f   :  { %1027 = vmatpush1.bf16.msra.mxu0 %v4309_v30  ;;  %1109 = vmatpush1.bf16.msra.mxu1 %v4310_v31  ;;  %v367_v30 = vor.u32 %v366_v24, %v362_v23  ;;  %v4371_v31 = vld [vmem:[%s6406_s2 + $0x620] ss:$16 sps:$4 sm:$0xff]   ;;  %v4427_v4 = vld [vmem:[%s6406_s2 + $0x744] ss:$16 sps:$4 sm:$0xff]   ;;  %v4436_v10 = vld [vmem:[%s6406_s2 + $0x76c] ss:$16 sps:$4 sm:$0xff]  }
  0x20   :  { %1028 = vmatprep.subr.bf16.mxu0 %v4311_v32  ;;  %1110 = vmatprep.subr.bf16.mxu1 %v4313_v33  ;;  %v4374_v32 = vld [vmem:[%s6406_s2 + $0x628] ss:$16 sps:$4 sm:$0xff]   ;;  %v4379_v33 = vld [vmem:[%s6406_s2 + $0x644] ss:$16 sps:$4 sm:$0xff]   ;;  %v4437_v18 = vld [vmem:[%s6406_s2 + $0x780] ss:$16 sps:$4 sm:$0xff]  }
  0x21   :  { %v4448_v59 = vld [vmem:[%s6406_s2 + $0x7ac] ss:$16 sps:$4 sm:$0xff]   ;;  %v4443_v60 = vld [vmem:[%s6406_s2 + $0x7a0] ss:$16 sps:$4 sm:$0xff]   ;;  %v4451_v23 = vld [vmem:[%s6406_s2 + $0x7c4] ss:$16 sps:$4 sm:$0xff]  }
  0x22   :  { %v4454_v24 = vld [vmem:[%s6406_s2 + $0x7cc] ss:$16 sps:$4 sm:$0xff]  }
  0x23   :  { %1029 = vmatpush1.bf16.msra.mxu0 %v4315_v34  ;;  %1111 = vmatpush1.bf16.msra.mxu1 %v4316_v35  ;;  %v4382_v34 = vld [vmem:[%s6406_s2 + $0x64c] ss:$16 sps:$4 sm:$0xff]   ;;  %v4377_v35 = vld [vmem:[%s6406_s2 + $0x640] ss:$16 sps:$4 sm:$0xff]  }
  0x24   :  { %1030 = vmatprep.subr.bf16.mxu0 %v4317_v36  ;;  %1112 = vmatprep.subr.bf16.mxu1 %v4319_v37  ;;  %v4380_v36 = vld [vmem:[%s6406_s2 + $0x648] ss:$16 sps:$4 sm:$0xff]   ;;  %v4385_v37 = vld [vmem:[%s6406_s2 + $0x664] ss:$16 sps:$4 sm:$0xff]  }
  0x27   :  { %1031 = vmatpush1.bf16.msra.mxu0 %v4321_v38  ;;  %1113 = vmatpush1.bf16.msra.mxu1 %v4322_v39  ;;  %v4388_v38 = vld [vmem:[%s6406_s2 + $0x66c] ss:$16 sps:$4 sm:$0xff]   ;;  %v4383_v39 = vld [vmem:[%s6406_s2 + $0x660] ss:$16 sps:$4 sm:$0xff]  }
  0x28   :  { %1032 = vmatprep.subr.bf16.mxu0 %v4323_v40  ;;  %1114 = vmatprep.subr.bf16.mxu1 %v4325_v41  ;;  %v4386_v40 = vld [vmem:[%s6406_s2 + $0x668] ss:$16 sps:$4 sm:$0xff]   ;;  %v4391_v41 = vld [vmem:[%s6406_s2 + $0x684] ss:$16 sps:$4 sm:$0xff]  }
  0x2b   :  { %1033 = vmatpush1.bf16.msra.mxu0 %v4327_v42  ;;  %1115 = vmatpush1.bf16.msra.mxu1 %v4328_v43  ;;  %v4394_v42 = vld [vmem:[%s6406_s2 + $0x68c] ss:$16 sps:$4 sm:$0xff]   ;;  %v4389_v43 = vld [vmem:[%s6406_s2 + $0x680] ss:$16 sps:$4 sm:$0xff]  }
  0x2c   :  { %1034 = vmatprep.subr.bf16.mxu0 %v4329_v44  ;;  %1116 = vmatprep.subr.bf16.mxu1 %v4331_v45  ;;  %v4392_v44 = vld [vmem:[%s6406_s2 + $0x688] ss:$16 sps:$4 sm:$0xff]   ;;  %v4397_v45 = vld [vmem:[%s6406_s2 + $0x6a4] ss:$16 sps:$4 sm:$0xff]  }
  0x2f   :  { %1035 = vmatpush1.bf16.msra.mxu0 %v4333_v47  ;;  %1117 = vmatpush1.bf16.msra.mxu1 %v4334_v48  ;;  %v4395_v47 = vld [vmem:[%s6406_s2 + $0x6a0] ss:$16 sps:$4 sm:$0xff]   ;;  %v4398_v48 = vld [vmem:[%s6406_s2 + $0x6a8] ss:$16 sps:$4 sm:$0xff]  }
  0x30   :  { %1036 = vmatprep.subr.bf16.mxu0 %v4335_v51  ;;  %1118 = vmatprep.subr.bf16.mxu1 %v4337_v53  ;;  %v4401_v51 = vld [vmem:[%s6406_s2 + $0x6c0] ss:$16 sps:$4 sm:$0xff]   ;;  %v4409_v53 = vld [vmem:[%s6406_s2 + $0x6e4] ss:$16 sps:$4 sm:$0xff]  }
  0x33   :  { %1037 = vmatpush1.bf16.msra.mxu0 %v4339_v54  ;;  %1119 = vmatpush1.bf16.msra.mxu1 %v4340_v56  ;;  %v4412_v54 = vld [vmem:[%s6406_s2 + $0x6ec] ss:$16 sps:$4 sm:$0xff]   ;;  %v4407_v56 = vld [vmem:[%s6406_s2 + $0x6e0] ss:$16 sps:$4 sm:$0xff]  }
  0x34   :  { %1038 = vmatprep.subr.bf16.mxu0 %v4341_v63  ;;  %1120 = vmatprep.subr.bf16.mxu1 %v4343_v0  ;;  %v4416_v63 = vld [vmem:[%s6406_s2 + $0x708] ss:$16 sps:$4 sm:$0xff]   ;;  %v4421_v0 = vld [vmem:[%s6406_s2 + $0x724] ss:$16 sps:$4 sm:$0xff]  }
  0x37   :  { %1039 = vmatpush1.bf16.msra.mxu0 %v4345_v5  ;;  %1121 = vmatpush1.bf16.msra.mxu1 %v4346_v6  ;;  %v4430_v5 = vld [vmem:[%s6406_s2 + $0x74c] ss:$16 sps:$4 sm:$0xff]   ;;  %v4425_v6 = vld [vmem:[%s6406_s2 + $0x740] ss:$16 sps:$4 sm:$0xff]  }
  0x38   :  { %1040 = vmatprep.subr.bf16.mxu0 %v4347_v8  ;;  %1122 = vmatprep.subr.bf16.mxu1 %v4349_v9  ;;  %v4428_v8 = vld [vmem:[%s6406_s2 + $0x748] ss:$16 sps:$4 sm:$0xff]   ;;  %v4433_v9 = vld [vmem:[%s6406_s2 + $0x764] ss:$16 sps:$4 sm:$0xff]  }
  0x3b   :  { %1041 = vmatpush1.bf16.msra.mxu0 %v4351_v12  ;;  %1123 = vmatpush1.bf16.msra.mxu1 %v4352_v13  ;;  %v4431_v12 = vld [vmem:[%s6406_s2 + $0x760] ss:$16 sps:$4 sm:$0xff]   ;;  %v4434_v13 = vld [vmem:[%s6406_s2 + $0x768] ss:$16 sps:$4 sm:$0xff]  }
  0x3c   :  { %1042 = vmatprep.subr.bf16.mxu0 %v4353_v14  ;;  %1124 = vmatprep.subr.bf16.mxu1 %v4355_v15  ;;  %v4439_v14 = vld [vmem:[%s6406_s2 + $0x784] ss:$16 sps:$4 sm:$0xff]   ;;  %v4442_v15 = vld [vmem:[%s6406_s2 + $0x78c] ss:$16 sps:$4 sm:$0xff]  }
  0x3f   :  { %1043 = vmatpush1.bf16.msra.mxu0 %v4357_v19  ;;  %1125 = vmatpush1.bf16.msra.mxu1 %v4358_v20  ;;  %v4440_v19 = vld [vmem:[%s6406_s2 + $0x788] ss:$16 sps:$4 sm:$0xff]   ;;  %v4445_v20 = vld [vmem:[%s6406_s2 + $0x7a4] ss:$16 sps:$4 sm:$0xff]  }
  0x40   :  { %1053 = vmatprep.subr.bf16.mxu0 %v4367_v21  ;;  %1135 = vmatprep.subr.bf16.mxu1 %v4370_v22  ;;  %v4446_v21 = vld [vmem:[%s6406_s2 + $0x7a8] ss:$16 sps:$4 sm:$0xff]   ;;  %v5385_v22 = vsel %vm70_vm0, %v3491_v16, %v3495_v17  ;;  %v4525_v16 = vld [vmem:[%s6406_s2 + $0x144] ss:$16 sps:$4 sm:$0xff]   ;;  %v4528_v17 = vld [vmem:[%s6406_s2 + $0x14c] ss:$16 sps:$4 sm:$0xff]  }
  0x42   :  { %1045 = vmatmul.mubr.bf16.vlgmr.msra.gmra.mrb[0].mxu0 %v349_v25  ;;  %1127 = vmatmul.mubr.bf16.vlgmr.msra.gmra.mrb[0].mxu1 %v349_v25  ;;  %v358_v25 = vshll.u32 %v5385_v22, 16 }
  0x43   :  { %1054 = vmatpush1.bf16.msra.mxu0 %v4365_v26  ;;  %1136 = vmatpush1.bf16.msra.mxu1 %v4368_v27  ;;  %v4449_v26 = vld [vmem:[%s6406_s2 + $0x7c0] ss:$16 sps:$4 sm:$0xff]   ;;  %v4452_v27 = vld [vmem:[%s6406_s2 + $0x7c8] ss:$16 sps:$4 sm:$0xff]  }
  0x44   :  { %1055 = vmatprep.subr.bf16.mxu0 %v4373_v28  ;;  %1137 = vmatprep.subr.bf16.mxu1 %v4376_v29  ;;  %v4457_v28 = vld [vmem:[%s6406_s2 + $0x7e4] ss:$16 sps:$4 sm:$0xff]   ;;  %v4460_v29 = vld [vmem:[%s6406_s2 + $0x7ec] ss:$16 sps:$4 sm:$0xff]  }
  0x45   :  { %1085 = vmatprep.mubr.bf16.mxu0 %v367_v30  ;;  %1167 = vmatprep.mubr.bf16.mxu1 %v367_v30  ;;  %v356_v30 = vshrl.u32 %v5385_v22, 16 }
  0x47   :  { %1056 = vmatpush1.bf16.msra.mxu0 %v4371_v31  ;;  %1138 = vmatpush1.bf16.msra.mxu1 %v4374_v32  ;;  %v360_v31 = vrot.slane %v358_v25, 1  ;;  %v4455_v32 = vld [vmem:[%s6406_s2 + $0x7e0] ss:$16 sps:$4 sm:$0xff]  }
  0x48   :  { %1057 = vmatprep.subr.bf16.mxu0 %v4379_v33  ;;  %1139 = vmatprep.subr.bf16.mxu1 %v4382_v34  ;;  %v4458_v33 = vld [vmem:[%s6406_s2 + $0x7e8] ss:$16 sps:$4 sm:$0xff]   ;;  %v4465_v34 = vld [vmem:[%s6406_s2 + $0x4] ss:$16 sps:$4 sm:$0xff]   ;;  %v4535_v25 = vld [vmem:[%s6406_s2 + $0x180] ss:$16 sps:$4 sm:$0xff]  }
  0x4b   :  { %1058 = vmatpush1.bf16.msra.mxu0 %v4377_v35  ;;  %1140 = vmatpush1.bf16.msra.mxu1 %v4380_v36  ;;  %v4468_v35 = vld [vmem:[%s6406_s2 + $0xc] ss:$16 sps:$4 sm:$0xff]   ;;  %v361_v36 = vor.u32 %v360_v31, %v356_v30  ;;  %v4544_v30 = vld [vmem:[%s6406_s2 + $0x1a8] ss:$16 sps:$4 sm:$0xff]   ;;  %v4549_v31 = vld [vmem:[%s6406_s2 + $0x1c4] ss:$16 sps:$4 sm:$0xff]  }
  0x4c   :  { %1059 = vmatprep.subr.bf16.mxu0 %v4385_v37  ;;  %1141 = vmatprep.subr.bf16.mxu1 %v4388_v38  ;;  %v4463_v37 = vld [vmem:[%s6406_s2] ss:$16 sps:$4 sm:$0xff]   ;;  %v4466_v38 = vld [vmem:[%s6406_s2 + $0x8] ss:$16 sps:$4 sm:$0xff]  }
  0x4f   :  { %1060 = vmatpush1.bf16.msra.mxu0 %v4383_v39  ;;  %1142 = vmatpush1.bf16.msra.mxu1 %v4386_v40  ;;  %v4471_v39 = vld [vmem:[%s6406_s2 + $0x24] ss:$16 sps:$4 sm:$0xff]   ;;  %v4474_v40 = vld [vmem:[%s6406_s2 + $0x2c] ss:$16 sps:$4 sm:$0xff]  }
  0x50   :  { %1061 = vmatprep.subr.bf16.mxu0 %v4391_v41  ;;  %1143 = vmatprep.subr.bf16.mxu1 %v4394_v42  ;;  %v4469_v41 = vld [vmem:[%s6406_s2 + $0x20] ss:$16 sps:$4 sm:$0xff]   ;;  %v4472_v42 = vld [vmem:[%s6406_s2 + $0x28] ss:$16 sps:$4 sm:$0xff]  }
  0x53   :  { %1062 = vmatpush1.bf16.msra.mxu0 %v4389_v43  ;;  %1144 = vmatpush1.bf16.msra.mxu1 %v4392_v44  ;;  %v4477_v43 = vld [vmem:[%s6406_s2 + $0x44] ss:$16 sps:$4 sm:$0xff]   ;;  %v4480_v44 = vld [vmem:[%s6406_s2 + $0x4c] ss:$16 sps:$4 sm:$0xff]  }
  0x54   :  { %1063 = vmatprep.subr.bf16.mxu0 %v4397_v45  ;;  %1145 = vmatprep.subr.bf16.mxu1 %v4400_v46  ;;  %v4475_v45 = vld [vmem:[%s6406_s2 + $0x40] ss:$16 sps:$4 sm:$0xff]   ;;  %v4478_v46 = vld [vmem:[%s6406_s2 + $0x48] ss:$16 sps:$4 sm:$0xff]  }
  0x57   :  { %1064 = vmatpush1.bf16.msra.mxu0 %v4395_v47  ;;  %1146 = vmatpush1.bf16.msra.mxu1 %v4398_v48  ;;  %v4483_v47 = vld [vmem:[%s6406_s2 + $0x64] ss:$16 sps:$4 sm:$0xff]   ;;  %v4486_v48 = vld [vmem:[%s6406_s2 + $0x6c] ss:$16 sps:$4 sm:$0xff]  }
  0x58   :  { %1065 = vmatprep.subr.bf16.mxu0 %v4403_v49  ;;  %1147 = vmatprep.subr.bf16.mxu1 %v4406_v50  ;;  %v4481_v49 = vld [vmem:[%s6406_s2 + $0x60] ss:$16 sps:$4 sm:$0xff]   ;;  %v4484_v50 = vld [vmem:[%s6406_s2 + $0x68] ss:$16 sps:$4 sm:$0xff]  }
  0x5b   :  { %1066 = vmatpush1.bf16.msra.mxu0 %v4401_v51  ;;  %1148 = vmatpush1.bf16.msra.mxu1 %v4404_v52  ;;  %v4489_v51 = vld [vmem:[%s6406_s2 + $0x84] ss:$16 sps:$4 sm:$0xff]   ;;  %v4492_v52 = vld [vmem:[%s6406_s2 + $0x8c] ss:$16 sps:$4 sm:$0xff]  }
  0x5c   :  { %1067 = vmatprep.subr.bf16.mxu0 %v4409_v53  ;;  %1149 = vmatprep.subr.bf16.mxu1 %v4412_v54  ;;  %v4487_v53 = vld [vmem:[%s6406_s2 + $0x80] ss:$16 sps:$4 sm:$0xff]   ;;  %v4490_v54 = vld [vmem:[%s6406_s2 + $0x88] ss:$16 sps:$4 sm:$0xff]  }
  0x5f   :  { %1068 = vmatpush1.bf16.msra.mxu0 %v4407_v56  ;;  %1150 = vmatpush1.bf16.msra.mxu1 %v4410_v57  ;;  %v4495_v56 = vld [vmem:[%s6406_s2 + $0xa4] ss:$16 sps:$4 sm:$0xff]   ;;  %v4498_v57 = vld [vmem:[%s6406_s2 + $0xac] ss:$16 sps:$4 sm:$0xff]  }
  0x60   :  { %1069 = vmatprep.subr.bf16.mxu0 %v4415_v58  ;;  %1151 = vmatprep.subr.bf16.mxu1 %v4418_v61  ;;  %v4493_v58 = vld [vmem:[%s6406_s2 + $0xa0] ss:$16 sps:$4 sm:$0xff]   ;;  %v4496_v61 = vld [vmem:[%s6406_s2 + $0xa8] ss:$16 sps:$4 sm:$0xff]  }
  0x63   :  { %1070 = vmatpush1.bf16.msra.mxu0 %v4413_v62  ;;  %1152 = vmatpush1.bf16.msra.mxu1 %v4416_v63  ;;  %v4501_v62 = vld [vmem:[%s6406_s2 + $0xc4] ss:$16 sps:$4 sm:$0xff]   ;;  %v4504_v63 = vld [vmem:[%s6406_s2 + $0xcc] ss:$16 sps:$4 sm:$0xff]  }
  0x64   :  { %1071 = vmatprep.subr.bf16.mxu0 %v4421_v0  ;;  %1153 = vmatprep.subr.bf16.mxu1 %v4424_v1  ;;  %v4499_v0 = vld [vmem:[%s6406_s2 + $0xc0] ss:$16 sps:$4 sm:$0xff]   ;;  %v4502_v1 = vld [vmem:[%s6406_s2 + $0xc8] ss:$16 sps:$4 sm:$0xff]  }
  0x67   :  { %1072 = vmatpush1.bf16.msra.mxu0 %v4419_v2  ;;  %1154 = vmatpush1.bf16.msra.mxu1 %v4422_v3  ;;  %v4507_v2 = vld [vmem:[%s6406_s2 + $0xe4] ss:$16 sps:$4 sm:$0xff]   ;;  %v4510_v3 = vld [vmem:[%s6406_s2 + $0xec] ss:$16 sps:$4 sm:$0xff]  }
  0x68   :  { %1073 = vmatprep.subr.bf16.mxu0 %v4427_v4  ;;  %1155 = vmatprep.subr.bf16.mxu1 %v4430_v5  ;;  %v4505_v4 = vld [vmem:[%s6406_s2 + $0xe0] ss:$16 sps:$4 sm:$0xff]   ;;  %v4508_v5 = vld [vmem:[%s6406_s2 + $0xe8] ss:$16 sps:$4 sm:$0xff]  }
  0x6b   :  { %1074 = vmatpush1.bf16.msra.mxu0 %v4425_v6  ;;  %1156 = vmatpush1.bf16.msra.mxu1 %v4428_v8  ;;  %v4513_v6 = vld [vmem:[%s6406_s2 + $0x104] ss:$16 sps:$4 sm:$0xff]   ;;  %v4516_v8 = vld [vmem:[%s6406_s2 + $0x10c] ss:$16 sps:$4 sm:$0xff]  }
  0x6c   :  { %1075 = vmatprep.subr.bf16.mxu0 %v4433_v9  ;;  %1157 = vmatprep.subr.bf16.mxu1 %v4436_v10  ;;  %v4511_v9 = vld [vmem:[%s6406_s2 + $0x100] ss:$16 sps:$4 sm:$0xff]   ;;  %v4514_v10 = vld [vmem:[%s6406_s2 + $0x108] ss:$16 sps:$4 sm:$0xff]  }
  0x6f   :  { %1076 = vmatpush1.bf16.msra.mxu0 %v4431_v12  ;;  %1158 = vmatpush1.bf16.msra.mxu1 %v4434_v13  ;;  %v4519_v12 = vld [vmem:[%s6406_s2 + $0x124] ss:$16 sps:$4 sm:$0xff]   ;;  %v4522_v13 = vld [vmem:[%s6406_s2 + $0x12c] ss:$16 sps:$4 sm:$0xff]  }
  0x70   :  { %1077 = vmatprep.subr.bf16.mxu0 %v4439_v14  ;;  %1159 = vmatprep.subr.bf16.mxu1 %v4442_v15  ;;  %v4517_v14 = vld [vmem:[%s6406_s2 + $0x120] ss:$16 sps:$4 sm:$0xff]   ;;  %v4520_v15 = vld [vmem:[%s6406_s2 + $0x128] ss:$16 sps:$4 sm:$0xff]  }
  0x73   :  { %1078 = vmatpush1.bf16.msra.mxu0 %v4437_v18  ;;  %1160 = vmatpush1.bf16.msra.mxu1 %v4440_v19  ;;  %v4523_v18 = vld [vmem:[%s6406_s2 + $0x140] ss:$16 sps:$4 sm:$0xff]   ;;  %v4526_v19 = vld [vmem:[%s6406_s2 + $0x148] ss:$16 sps:$4 sm:$0xff]  }
  0x74   :  { %1079 = vmatprep.subr.bf16.mxu0 %v4445_v20  ;;  %1161 = vmatprep.subr.bf16.mxu1 %v4448_v59  ;;  %v4531_v20 = vld [vmem:[%s6406_s2 + $0x164] ss:$16 sps:$4 sm:$0xff]   ;;  %v4534_v59 = vld [vmem:[%s6406_s2 + $0x16c] ss:$16 sps:$4 sm:$0xff]  }
  0x77   :  { %1080 = vmatpush1.bf16.msra.mxu0 %v4443_v60  ;;  %1162 = vmatpush1.bf16.msra.mxu1 %v4446_v21  ;;  %v4529_v60 = vld [vmem:[%s6406_s2 + $0x160] ss:$16 sps:$4 sm:$0xff]   ;;  %v4532_v21 = vld [vmem:[%s6406_s2 + $0x168] ss:$16 sps:$4 sm:$0xff]  }
  0x78   :  { %1081 = vmatprep.subr.bf16.mxu0 %v4451_v23  ;;  %1163 = vmatprep.subr.bf16.mxu1 %v4454_v24  ;;  %v4537_v23 = vld [vmem:[%s6406_s2 + $0x184] ss:$16 sps:$4 sm:$0xff]   ;;  %v4540_v24 = vld [vmem:[%s6406_s2 + $0x18c] ss:$16 sps:$4 sm:$0xff]  }
  0x7b   :  { %1082 = vmatpush1.bf16.msra.mxu0 %v4449_v26  ;;  %1164 = vmatpush1.bf16.msra.mxu1 %v4452_v27  ;;  %v4538_v26 = vld [vmem:[%s6406_s2 + $0x188] ss:$16 sps:$4 sm:$0xff]   ;;  %v4543_v27 = vld [vmem:[%s6406_s2 + $0x1a4] ss:$16 sps:$4 sm:$0xff]  }
  0x7c   :  { %1083 = vmatprep.subr.bf16.mxu0 %v4457_v28  ;;  %1165 = vmatprep.subr.bf16.mxu1 %v4460_v29  ;;  %v4546_v28 = vld [vmem:[%s6406_s2 + $0x1ac] ss:$16 sps:$4 sm:$0xff]   ;;  %v4541_v29 = vld [vmem:[%s6406_s2 + $0x1a0] ss:$16 sps:$4 sm:$0xff]  }
  0x7f   :  { %1084 = vmatpush1.bf16.msra.mxu0 %v4455_v32  ;;  %1166 = vmatpush1.bf16.msra.mxu1 %v4458_v33  ;;  %v4552_v32 = vld [vmem:[%s6406_s2 + $0x1cc] ss:$16 sps:$4 sm:$0xff]   ;;  %v4547_v33 = vld [vmem:[%s6406_s2 + $0x1c0] ss:$16 sps:$4 sm:$0xff]  }
  0x80   :  { %1816 = vmatprep.subr.bf16.mxu0 %v4465_v34  ;;  %1898 = vmatprep.subr.bf16.mxu1 %v4468_v35  ;;  %v4550_v34 = vld [vmem:[%s6406_s2 + $0x1c8] ss:$16 sps:$4 sm:$0xff]   ;;  %v4555_v35 = vld [vmem:[%s6406_s2 + $0x1e4] ss:$16 sps:$4 sm:$0xff]  }
  0x82   :  { %1086 = vmatmul.mubr.bf16.vlgmr.msra.gmra.mrb[0].mxu0 %v361_v36  ;;  %1168 = vmatmul.mubr.bf16.vlgmr.msra.gmra.mrb[0].mxu1 %v361_v36  ;;  %v4558_v36 = vld [vmem:[%s6406_s2 + $0x1ec] ss:$16 sps:$4 sm:$0xff]  }
  0x83   :  { %1817 = vmatpush1.bf16.msra.mxu0 %v4463_v37  ;;  %1899 = vmatpush1.bf16.msra.mxu1 %v4466_v38  ;;  %v4553_v37 = vld [vmem:[%s6406_s2 + $0x1e0] ss:$16 sps:$4 sm:$0xff]   ;;  %v4556_v38 = vld [vmem:[%s6406_s2 + $0x1e8] ss:$16 sps:$4 sm:$0xff]  }
  0x84   :  { %1818 = vmatprep.subr.bf16.mxu0 %v4471_v39  ;;  %1900 = vmatprep.subr.bf16.mxu1 %v4474_v40  ;;  %v4561_v39 = vld [vmem:[%s6406_s2 + $0x204] ss:$16 sps:$4 sm:$0xff]   ;;  %v4564_v40 = vld [vmem:[%s6406_s2 + $0x20c] ss:$16 sps:$4 sm:$0xff]  }
  0x85   :  { %1848 = vmatprep.mubr.bf16.mxu0 %v5145_v55  ;;  %1930 = vmatprep.mubr.bf16.mxu1 %v5145_v55 }
  0x87   :  { %1819 = vmatpush1.bf16.msra.mxu0 %v4469_v41  ;;  %1901 = vmatpush1.bf16.msra.mxu1 %v4472_v42  ;;  %v4559_v41 = vld [vmem:[%s6406_s2 + $0x200] ss:$16 sps:$4 sm:$0xff]   ;;  %v4562_v42 = vld [vmem:[%s6406_s2 + $0x208] ss:$16 sps:$4 sm:$0xff]  }
  0x88   :  { %1820 = vmatprep.subr.bf16.mxu0 %v4477_v43  ;;  %1902 = vmatprep.subr.bf16.mxu1 %v4480_v44  ;;  %v4567_v43 = vld [vmem:[%s6406_s2 + $0x224] ss:$16 sps:$4 sm:$0xff]   ;;  %v4570_v44 = vld [vmem:[%s6406_s2 + $0x22c] ss:$16 sps:$4 sm:$0xff]  }
  0x8b   :  { %1821 = vmatpush1.bf16.msra.mxu0 %v4475_v45  ;;  %1903 = vmatpush1.bf16.msra.mxu1 %v4478_v46  ;;  %v4565_v45 = vld [vmem:[%s6406_s2 + $0x220] ss:$16 sps:$4 sm:$0xff]   ;;  %v4568_v46 = vld [vmem:[%s6406_s2 + $0x228] ss:$16 sps:$4 sm:$0xff]  }
  0x8c   :  { %1822 = vmatprep.subr.bf16.mxu0 %v4483_v47  ;;  %1904 = vmatprep.subr.bf16.mxu1 %v4486_v48  ;;  %v4573_v47 = vld [vmem:[%s6406_s2 + $0x244] ss:$16 sps:$4 sm:$0xff]   ;;  %v4576_v48 = vld [vmem:[%s6406_s2 + $0x24c] ss:$16 sps:$4 sm:$0xff]  }
  0x8f   :  { %1823 = vmatpush1.bf16.msra.mxu0 %v4481_v49  ;;  %1905 = vmatpush1.bf16.msra.mxu1 %v4484_v50  ;;  %v4571_v49 = vld [vmem:[%s6406_s2 + $0x240] ss:$16 sps:$4 sm:$0xff]   ;;  %v4574_v50 = vld [vmem:[%s6406_s2 + $0x248] ss:$16 sps:$4 sm:$0xff]  }
  0x90   :  { %1824 = vmatprep.subr.bf16.mxu0 %v4489_v51  ;;  %1906 = vmatprep.subr.bf16.mxu1 %v4492_v52  ;;  %v4579_v51 = vld [vmem:[%s6406_s2 + $0x264] ss:$16 sps:$4 sm:$0xff]   ;;  %v4582_v52 = vld [vmem:[%s6406_s2 + $0x26c] ss:$16 sps:$4 sm:$0xff]  }
  0x93   :  { %1825 = vmatpush1.bf16.msra.mxu0 %v4487_v53  ;;  %1907 = vmatpush1.bf16.msra.mxu1 %v4490_v54  ;;  %v4577_v53 = vld [vmem:[%s6406_s2 + $0x260] ss:$16 sps:$4 sm:$0xff]   ;;  %v4580_v54 = vld [vmem:[%s6406_s2 + $0x268] ss:$16 sps:$4 sm:$0xff]  }
  0x94   :  { %1826 = vmatprep.subr.bf16.mxu0 %v4495_v56  ;;  %1908 = vmatprep.subr.bf16.mxu1 %v4498_v57  ;;  %v4585_v56 = vld [vmem:[%s6406_s2 + $0x284] ss:$16 sps:$4 sm:$0xff]   ;;  %v4588_v57 = vld [vmem:[%s6406_s2 + $0x28c] ss:$16 sps:$4 sm:$0xff]  }
  0x97   :  { %1827 = vmatpush1.bf16.msra.mxu0 %v4493_v58  ;;  %1909 = vmatpush1.bf16.msra.mxu1 %v4496_v61  ;;  %v4583_v58 = vld [vmem:[%s6406_s2 + $0x280] ss:$16 sps:$4 sm:$0xff]   ;;  %v4586_v61 = vld [vmem:[%s6406_s2 + $0x288] ss:$16 sps:$4 sm:$0xff]  }
  0x98   :  { %1828 = vmatprep.subr.bf16.mxu0 %v4501_v62  ;;  %1910 = vmatprep.subr.bf16.mxu1 %v4504_v63  ;;  %v4591_v62 = vld [vmem:[%s6406_s2 + $0x2a4] ss:$16 sps:$4 sm:$0xff]   ;;  %v4594_v63 = vld [vmem:[%s6406_s2 + $0x2ac] ss:$16 sps:$4 sm:$0xff]  }
  0x9b   :  { %1829 = vmatpush1.bf16.msra.mxu0 %v4499_v0  ;;  %1911 = vmatpush1.bf16.msra.mxu1 %v4502_v1  ;;  %v4589_v0 = vld [vmem:[%s6406_s2 + $0x2a0] ss:$16 sps:$4 sm:$0xff]   ;;  %v4592_v1 = vld [vmem:[%s6406_s2 + $0x2a8] ss:$16 sps:$4 sm:$0xff]  }
  0x9c   :  { %1830 = vmatprep.subr.bf16.mxu0 %v4507_v2  ;;  %1912 = vmatprep.subr.bf16.mxu1 %v4510_v3  ;;  %v4597_v2 = vld [vmem:[%s6406_s2 + $0x2c4] ss:$16 sps:$4 sm:$0xff]   ;;  %v4600_v3 = vld [vmem:[%s6406_s2 + $0x2cc] ss:$16 sps:$4 sm:$0xff]  }
  0x9f   :  { %1831 = vmatpush1.bf16.msra.mxu0 %v4505_v4  ;;  %1913 = vmatpush1.bf16.msra.mxu1 %v4508_v5  ;;  %v4595_v4 = vld [vmem:[%s6406_s2 + $0x2c0] ss:$16 sps:$4 sm:$0xff]   ;;  %v4598_v5 = vld [vmem:[%s6406_s2 + $0x2c8] ss:$16 sps:$4 sm:$0xff]  }
  0xa0   :  { %1832 = vmatprep.subr.bf16.mxu0 %v4513_v6  ;;  %1914 = vmatprep.subr.bf16.mxu1 %v4516_v8  ;;  %v4603_v6 = vld [vmem:[%s6406_s2 + $0x2e4] ss:$16 sps:$4 sm:$0xff]   ;;  %v4606_v8 = vld [vmem:[%s6406_s2 + $0x2ec] ss:$16 sps:$4 sm:$0xff]  }
  0xa3   :  { %1833 = vmatpush1.bf16.msra.mxu0 %v4511_v9  ;;  %1915 = vmatpush1.bf16.msra.mxu1 %v4514_v10  ;;  %v4601_v9 = vld [vmem:[%s6406_s2 + $0x2e0] ss:$16 sps:$4 sm:$0xff]   ;;  %v4604_v10 = vld [vmem:[%s6406_s2 + $0x2e8] ss:$16 sps:$4 sm:$0xff]  }
  0xa4   :  { %1834 = vmatprep.subr.bf16.mxu0 %v4519_v12  ;;  %1916 = vmatprep.subr.bf16.mxu1 %v4522_v13  ;;  %v4609_v12 = vld [vmem:[%s6406_s2 + $0x304] ss:$16 sps:$4 sm:$0xff]   ;;  %v4612_v13 = vld [vmem:[%s6406_s2 + $0x30c] ss:$16 sps:$4 sm:$0xff]  }
  0xa7   :  { %1835 = vmatpush1.bf16.msra.mxu0 %v4517_v14  ;;  %1917 = vmatpush1.bf16.msra.mxu1 %v4520_v15  ;;  %v4607_v14 = vld [vmem:[%s6406_s2 + $0x300] ss:$16 sps:$4 sm:$0xff]   ;;  %v4610_v15 = vld [vmem:[%s6406_s2 + $0x308] ss:$16 sps:$4 sm:$0xff]  }
  0xa8   :  { %1836 = vmatprep.subr.bf16.mxu0 %v4525_v16  ;;  %1918 = vmatprep.subr.bf16.mxu1 %v4528_v17  ;;  %v4615_v16 = vld [vmem:[%s6406_s2 + $0x324] ss:$16 sps:$4 sm:$0xff]   ;;  %v4618_v17 = vld [vmem:[%s6406_s2 + $0x32c] ss:$16 sps:$4 sm:$0xff]  }
  0xab   :  { %1837 = vmatpush1.bf16.msra.mxu0 %v4523_v18  ;;  %1919 = vmatpush1.bf16.msra.mxu1 %v4526_v19  ;;  %v4613_v18 = vld [vmem:[%s6406_s2 + $0x320] ss:$16 sps:$4 sm:$0xff]   ;;  %v4616_v19 = vld [vmem:[%s6406_s2 + $0x328] ss:$16 sps:$4 sm:$0xff]  }
  0xac   :  { %1838 = vmatprep.subr.bf16.mxu0 %v4531_v20  ;;  %1920 = vmatprep.subr.bf16.mxu1 %v4534_v59  ;;  %v4621_v20 = vld [vmem:[%s6406_s2 + $0x344] ss:$16 sps:$4 sm:$0xff]   ;;  %v4624_v59 = vld [vmem:[%s6406_s2 + $0x34c] ss:$16 sps:$4 sm:$0xff]  }
  0xaf   :  { %1839 = vmatpush1.bf16.msra.mxu0 %v4529_v60  ;;  %1921 = vmatpush1.bf16.msra.mxu1 %v4532_v21  ;;  %v4619_v60 = vld [vmem:[%s6406_s2 + $0x340] ss:$16 sps:$4 sm:$0xff]   ;;  %v4622_v21 = vld [vmem:[%s6406_s2 + $0x348] ss:$16 sps:$4 sm:$0xff]  }
  0xb0   :  { %1840 = vmatprep.subr.bf16.mxu0 %v4537_v23  ;;  %1922 = vmatprep.subr.bf16.mxu1 %v4540_v24  ;;  %v4627_v23 = vld [vmem:[%s6406_s2 + $0x364] ss:$16 sps:$4 sm:$0xff]   ;;  %v4630_v24 = vld [vmem:[%s6406_s2 + $0x36c] ss:$16 sps:$4 sm:$0xff]  }
  0xb3   :  { %1841 = vmatpush1.bf16.msra.mxu0 %v4535_v25  ;;  %1923 = vmatpush1.bf16.msra.mxu1 %v4538_v26  ;;  %v4625_v25 = vld [vmem:[%s6406_s2 + $0x360] ss:$16 sps:$4 sm:$0xff]   ;;  %v4628_v26 = vld [vmem:[%s6406_s2 + $0x368] ss:$16 sps:$4 sm:$0xff]  }
  0xb4   :  { %1842 = vmatprep.subr.bf16.mxu0 %v4543_v27  ;;  %1924 = vmatprep.subr.bf16.mxu1 %v4546_v28  ;;  %v4633_v27 = vld [vmem:[%s6406_s2 + $0x384] ss:$16 sps:$4 sm:$0xff]   ;;  %v4636_v28 = vld [vmem:[%s6406_s2 + $0x38c] ss:$16 sps:$4 sm:$0xff]  }
  0xb7   :  { %1843 = vmatpush1.bf16.msra.mxu0 %v4541_v29  ;;  %1925 = vmatpush1.bf16.msra.mxu1 %v4544_v30  ;;  %v4631_v29 = vld [vmem:[%s6406_s2 + $0x380] ss:$16 sps:$4 sm:$0xff]   ;;  %v4634_v30 = vld [vmem:[%s6406_s2 + $0x388] ss:$16 sps:$4 sm:$0xff]  }
  0xb8   :  { %1844 = vmatprep.subr.bf16.mxu0 %v4549_v31  ;;  %1926 = vmatprep.subr.bf16.mxu1 %v4552_v32  ;;  %v4639_v31 = vld [vmem:[%s6406_s2 + $0x3a4] ss:$16 sps:$4 sm:$0xff]   ;;  %v4642_v32 = vld [vmem:[%s6406_s2 + $0x3ac] ss:$16 sps:$4 sm:$0xff]  }
  0xbb   :  { %1845 = vmatpush1.bf16.msra.mxu0 %v4547_v33  ;;  %1927 = vmatpush1.bf16.msra.mxu1 %v4550_v34  ;;  %v4637_v33 = vld [vmem:[%s6406_s2 + $0x3a0] ss:$16 sps:$4 sm:$0xff]   ;;  %v4640_v34 = vld [vmem:[%s6406_s2 + $0x3a8] ss:$16 sps:$4 sm:$0xff]  }
  0xbc   :  { %1846 = vmatprep.subr.bf16.mxu0 %v4555_v35  ;;  %1928 = vmatprep.subr.bf16.mxu1 %v4558_v36  ;;  %v4645_v35 = vld [vmem:[%s6406_s2 + $0x3c4] ss:$16 sps:$4 sm:$0xff]   ;;  %v4648_v36 = vld [vmem:[%s6406_s2 + $0x3cc] ss:$16 sps:$4 sm:$0xff]  }
  0xbf   :  { %1847 = vmatpush1.bf16.msra.mxu0 %v4553_v37  ;;  %1929 = vmatpush1.bf16.msra.mxu1 %v4556_v38  ;;  %v4643_v37 = vld [vmem:[%s6406_s2 + $0x3c0] ss:$16 sps:$4 sm:$0xff]   ;;  %v4646_v38 = vld [vmem:[%s6406_s2 + $0x3c8] ss:$16 sps:$4 sm:$0xff]  }
  0xc0   :  { %1857 = vmatprep.subr.bf16.mxu0 %v4561_v39  ;;  %1939 = vmatprep.subr.bf16.mxu1 %v4564_v40  ;;  %v4651_v39 = vld [vmem:[%s6406_s2 + $0x3e4] ss:$16 sps:$4 sm:$0xff]   ;;  %v4654_v40 = vld [vmem:[%s6406_s2 + $0x3ec] ss:$16 sps:$4 sm:$0xff]  }
  0xc2   :  { %1849 = vmatmul.mubr.bf16.vlgmr.msra.gmra.mrb[0].mxu0 %v5179_v7  ;;  %1931 = vmatmul.mubr.bf16.vlgmr.msra.gmra.mrb[0].mxu1 %v5179_v7 }
  0xc3   :  { %1858 = vmatpush1.bf16.msra.mxu0 %v4559_v41  ;;  %1940 = vmatpush1.bf16.msra.mxu1 %v4562_v42  ;;  %v4649_v41 = vld [vmem:[%s6406_s2 + $0x3e0] ss:$16 sps:$4 sm:$0xff]   ;;  %v4652_v42 = vld [vmem:[%s6406_s2 + $0x3e8] ss:$16 sps:$4 sm:$0xff]  }
  0xc4   :  { %1859 = vmatprep.subr.bf16.mxu0 %v4567_v43  ;;  %1941 = vmatprep.subr.bf16.mxu1 %v4570_v44  ;;  %v4657_v43 = vld [vmem:[%s6406_s2 + $0x804] ss:$16 sps:$4 sm:$0xff]   ;;  %v4660_v44 = vld [vmem:[%s6406_s2 + $0x80c] ss:$16 sps:$4 sm:$0xff]  }
  0xc5   :  { %1889 = vmatprep.mubr.bf16.mxu0 %v5189_v11  ;;  %1971 = vmatprep.mubr.bf16.mxu1 %v5189_v11 }
  0xc7   :  { %1860 = vmatpush1.bf16.msra.mxu0 %v4565_v45  ;;  %1942 = vmatpush1.bf16.msra.mxu1 %v4568_v46  ;;  %v4655_v45 = vld [vmem:[%s6406_s2 + $0x800] ss:$16 sps:$4 sm:$0xff]   ;;  %v4658_v46 = vld [vmem:[%s6406_s2 + $0x808] ss:$16 sps:$4 sm:$0xff]  }
  0xc8   :  { %1861 = vmatprep.subr.bf16.mxu0 %v4573_v47  ;;  %1943 = vmatprep.subr.bf16.mxu1 %v4576_v48  ;;  %v4663_v47 = vld [vmem:[%s6406_s2 + $0x824] ss:$16 sps:$4 sm:$0xff]   ;;  %v4666_v48 = vld [vmem:[%s6406_s2 + $0x82c] ss:$16 sps:$4 sm:$0xff]  }
  0xcb   :  { %1862 = vmatpush1.bf16.msra.mxu0 %v4571_v49  ;;  %1944 = vmatpush1.bf16.msra.mxu1 %v4574_v50  ;;  %v2114_v49 = vrot.slane %v5145_v55, 1  ;;  %v4661_v50 = vld [vmem:[%s6406_s2 + $0x820] ss:$16 sps:$4 sm:$0xff]   ;;  %v4669_v55 = vld [vmem:[%s6406_s2 + $0x844] ss:$16 sps:$4 sm:$0xff]  }
  0xcc   :  { %1863 = vmatprep.subr.bf16.mxu0 %v4579_v51  ;;  %1945 = vmatprep.subr.bf16.mxu1 %v4582_v52  ;;  %v4664_v51 = vld [vmem:[%s6406_s2 + $0x828] ss:$16 sps:$4 sm:$0xff]   ;;  %v4672_v52 = vld [vmem:[%s6406_s2 + $0x84c] ss:$16 sps:$4 sm:$0xff]  }
  0xcf   :  { %1864 = vmatpush1.bf16.msra.mxu0 %v4577_v53  ;;  %1946 = vmatpush1.bf16.msra.mxu1 %v4580_v54  ;;  %v4667_v53 = vld [vmem:[%s6406_s2 + $0x840] ss:$16 sps:$4 sm:$0xff]   ;;  %v4670_v54 = vld [vmem:[%s6406_s2 + $0x848] ss:$16 sps:$4 sm:$0xff]  }
  0xd0   :  { %1865 = vmatprep.subr.bf16.mxu0 %v4585_v56  ;;  %1947 = vmatprep.subr.bf16.mxu1 %v4588_v57  ;;  %v4675_v56 = vld [vmem:[%s6406_s2 + $0x864] ss:$16 sps:$4 sm:$0xff]   ;;  %v4678_v57 = vld [vmem:[%s6406_s2 + $0x86c] ss:$16 sps:$4 sm:$0xff]  }
  0xd3   :  { %1866 = vmatpush1.bf16.msra.mxu0 %v4583_v58  ;;  %1948 = vmatpush1.bf16.msra.mxu1 %v4586_v61  ;;  %v4673_v58 = vld [vmem:[%s6406_s2 + $0x860] ss:$16 sps:$4 sm:$0xff]   ;;  %v4676_v61 = vld [vmem:[%s6406_s2 + $0x868] ss:$16 sps:$4 sm:$0xff]  }
  0xd4   :  { %1867 = vmatprep.subr.bf16.mxu0 %v4591_v62  ;;  %1949 = vmatprep.subr.bf16.mxu1 %v4594_v63  ;;  %v4681_v62 = vld [vmem:[%s6406_s2 + $0x884] ss:$16 sps:$4 sm:$0xff]   ;;  %v4684_v63 = vld [vmem:[%s6406_s2 + $0x88c] ss:$16 sps:$4 sm:$0xff]  }
  0xd7   :  { %1868 = vmatpush1.bf16.msra.mxu0 %v4589_v0  ;;  %1950 = vmatpush1.bf16.msra.mxu1 %v4592_v1  ;;  %v4679_v0 = vld [vmem:[%s6406_s2 + $0x880] ss:$16 sps:$4 sm:$0xff]   ;;  %v4682_v1 = vld [vmem:[%s6406_s2 + $0x888] ss:$16 sps:$4 sm:$0xff]  }
  0xd8   :  { %1869 = vmatprep.subr.bf16.mxu0 %v4597_v2  ;;  %1951 = vmatprep.subr.bf16.mxu1 %v4600_v3  ;;  %v4687_v2 = vld [vmem:[%s6406_s2 + $0x8a4] ss:$16 sps:$4 sm:$0xff]   ;;  %v4690_v3 = vld [vmem:[%s6406_s2 + $0x8ac] ss:$16 sps:$4 sm:$0xff]  }
  0xdb   :  { %1870 = vmatpush1.bf16.msra.mxu0 %v4595_v4  ;;  %1952 = vmatpush1.bf16.msra.mxu1 %v4598_v5  ;;  %v4685_v4 = vld [vmem:[%s6406_s2 + $0x8a0] ss:$16 sps:$4 sm:$0xff]   ;;  %v4688_v5 = vld [vmem:[%s6406_s2 + $0x8a8] ss:$16 sps:$4 sm:$0xff]  }
  0xdc   :  { %1871 = vmatprep.subr.bf16.mxu0 %v4603_v6  ;;  %1953 = vmatprep.subr.bf16.mxu1 %v4606_v8  ;;  %v4693_v6 = vld [vmem:[%s6406_s2 + $0x8c4] ss:$16 sps:$4 sm:$0xff]   ;;  %v4696_v8 = vld [vmem:[%s6406_s2 + $0x8cc] ss:$16 sps:$4 sm:$0xff]  }
  0xdf   :  { %1872 = vmatpush1.bf16.msra.mxu0 %v4601_v9  ;;  %1954 = vmatpush1.bf16.msra.mxu1 %v4604_v10  ;;  %v4691_v9 = vld [vmem:[%s6406_s2 + $0x8c0] ss:$16 sps:$4 sm:$0xff]   ;;  %v4694_v10 = vld [vmem:[%s6406_s2 + $0x8c8] ss:$16 sps:$4 sm:$0xff]  }
  0xe0   :  { %1873 = vmatprep.subr.bf16.mxu0 %v4609_v12  ;;  %1955 = vmatprep.subr.bf16.mxu1 %v4612_v13  ;;  %v4699_v12 = vld [vmem:[%s6406_s2 + $0x8e4] ss:$16 sps:$4 sm:$0xff]   ;;  %v4702_v13 = vld [vmem:[%s6406_s2 + $0x8ec] ss:$16 sps:$4 sm:$0xff]  }
  0xe3   :  { %1874 = vmatpush1.bf16.msra.mxu0 %v4607_v14  ;;  %1956 = vmatpush1.bf16.msra.mxu1 %v4610_v15  ;;  %v4697_v14 = vld [vmem:[%s6406_s2 + $0x8e0] ss:$16 sps:$4 sm:$0xff]   ;;  %v4700_v15 = vld [vmem:[%s6406_s2 + $0x8e8] ss:$16 sps:$4 sm:$0xff]  }
  0xe4   :  { %1875 = vmatprep.subr.bf16.mxu0 %v4615_v16  ;;  %1957 = vmatprep.subr.bf16.mxu1 %v4618_v17  ;;  %v4705_v16 = vld [vmem:[%s6406_s2 + $0x904] ss:$16 sps:$4 sm:$0xff]   ;;  %v4708_v17 = vld [vmem:[%s6406_s2 + $0x90c] ss:$16 sps:$4 sm:$0xff]  }
  0xe7   :  { %1876 = vmatpush1.bf16.msra.mxu0 %v4613_v18  ;;  %1958 = vmatpush1.bf16.msra.mxu1 %v4616_v19  ;;  %v4703_v18 = vld [vmem:[%s6406_s2 + $0x900] ss:$16 sps:$4 sm:$0xff]   ;;  %v4706_v19 = vld [vmem:[%s6406_s2 + $0x908] ss:$16 sps:$4 sm:$0xff]  }
  0xe8   :  { %1877 = vmatprep.subr.bf16.mxu0 %v4621_v20  ;;  %1959 = vmatprep.subr.bf16.mxu1 %v4624_v59  ;;  %v4711_v20 = vld [vmem:[%s6406_s2 + $0x924] ss:$16 sps:$4 sm:$0xff]   ;;  %v4714_v59 = vld [vmem:[%s6406_s2 + $0x92c] ss:$16 sps:$4 sm:$0xff]  }
  0xeb   :  { %1878 = vmatpush1.bf16.msra.mxu0 %v4619_v60  ;;  %1960 = vmatpush1.bf16.msra.mxu1 %v4622_v21  ;;  %v4709_v60 = vld [vmem:[%s6406_s2 + $0x920] ss:$16 sps:$4 sm:$0xff]   ;;  %v4712_v21 = vld [vmem:[%s6406_s2 + $0x928] ss:$16 sps:$4 sm:$0xff]  }
  0xec   :  { %1879 = vmatprep.subr.bf16.mxu0 %v4627_v23  ;;  %1961 = vmatprep.subr.bf16.mxu1 %v4630_v24  ;;  %v4717_v23 = vld [vmem:[%s6406_s2 + $0x944] ss:$16 sps:$4 sm:$0xff]   ;;  %v4720_v24 = vld [vmem:[%s6406_s2 + $0x94c] ss:$16 sps:$4 sm:$0xff]  }
  0xef   :  { %1880 = vmatpush1.bf16.msra.mxu0 %v4625_v25  ;;  %1962 = vmatpush1.bf16.msra.mxu1 %v4628_v26  ;;  %v4715_v25 = vld [vmem:[%s6406_s2 + $0x940] ss:$16 sps:$4 sm:$0xff]   ;;  %v4718_v26 = vld [vmem:[%s6406_s2 + $0x948] ss:$16 sps:$4 sm:$0xff]  }
  0xf0   :  { %1881 = vmatprep.subr.bf16.mxu0 %v4633_v27  ;;  %1963 = vmatprep.subr.bf16.mxu1 %v4636_v28  ;;  %v4723_v27 = vld [vmem:[%s6406_s2 + $0x964] ss:$16 sps:$4 sm:$0xff]   ;;  %v4726_v28 = vld [vmem:[%s6406_s2 + $0x96c] ss:$16 sps:$4 sm:$0xff]  }
  0xf3   :  { %1882 = vmatpush1.bf16.msra.mxu0 %v4631_v29  ;;  %1964 = vmatpush1.bf16.msra.mxu1 %v4634_v30  ;;  %v4721_v29 = vld [vmem:[%s6406_s2 + $0x960] ss:$16 sps:$4 sm:$0xff]   ;;  %v4724_v30 = vld [vmem:[%s6406_s2 + $0x968] ss:$16 sps:$4 sm:$0xff]  }
  0xf4   :  { %1883 = vmatprep.subr.bf16.mxu0 %v4639_v31  ;;  %1965 = vmatprep.subr.bf16.mxu1 %v4642_v32  ;;  %v4729_v31 = vld [vmem:[%s6406_s2 + $0x984] ss:$16 sps:$4 sm:$0xff]   ;;  %v4732_v32 = vld [vmem:[%s6406_s2 + $0x98c] ss:$16 sps:$4 sm:$0xff]  }
  0xf7   :  { %1884 = vmatpush1.bf16.msra.mxu0 %v4637_v33  ;;  %1966 = vmatpush1.bf16.msra.mxu1 %v4640_v34  ;;  %v4727_v33 = vld [vmem:[%s6406_s2 + $0x980] ss:$16 sps:$4 sm:$0xff]   ;;  %v4730_v34 = vld [vmem:[%s6406_s2 + $0x988] ss:$16 sps:$4 sm:$0xff]  }
  0xf8   :  { %1885 = vmatprep.subr.bf16.mxu0 %v4645_v35  ;;  %1967 = vmatprep.subr.bf16.mxu1 %v4648_v36  ;;  %v4735_v35 = vld [vmem:[%s6406_s2 + $0x9a4] ss:$16 sps:$4 sm:$0xff]   ;;  %v4738_v36 = vld [vmem:[%s6406_s2 + $0x9ac] ss:$16 sps:$4 sm:$0xff]  }
  0xfb   :  { %1886 = vmatpush1.bf16.msra.mxu0 %v4643_v37  ;;  %1968 = vmatpush1.bf16.msra.mxu1 %v4646_v38  ;;  %v4733_v37 = vld [vmem:[%s6406_s2 + $0x9a0] ss:$16 sps:$4 sm:$0xff]   ;;  %v4736_v38 = vld [vmem:[%s6406_s2 + $0x9a8] ss:$16 sps:$4 sm:$0xff]  }
  0xfc   :  { %1887 = vmatprep.subr.bf16.mxu0 %v4651_v39  ;;  %1969 = vmatprep.subr.bf16.mxu1 %v4654_v40  ;;  %v4741_v39 = vld [vmem:[%s6406_s2 + $0x9c4] ss:$16 sps:$4 sm:$0xff]   ;;  %v4744_v40 = vld [vmem:[%s6406_s2 + $0x9cc] ss:$16 sps:$4 sm:$0xff]  }
  0xff   :  { %1888 = vmatpush1.bf16.msra.mxu0 %v4649_v41  ;;  %1970 = vmatpush1.bf16.msra.mxu1 %v4652_v42  ;;  %v4739_v41 = vld [vmem:[%s6406_s2 + $0x9c0] ss:$16 sps:$4 sm:$0xff]   ;;  %v4742_v42 = vld [vmem:[%s6406_s2 + $0x9c8] ss:$16 sps:$4 sm:$0xff]  }
 0x100   :  { %2761 = vmatprep.subr.bf16.mxu0 %v4657_v43  ;;  %2843 = vmatprep.subr.bf16.mxu1 %v4660_v44  ;;  %v4747_v43 = vld [vmem:[%s6406_s2 + $0x9e4] ss:$16 sps:$4 sm:$0xff]   ;;  %v4750_v44 = vld [vmem:[%s6406_s2 + $0x9ec] ss:$16 sps:$4 sm:$0xff]  }
 0x102   :  { %1890 = vmatmul.mubr.bf16.vlgmr.msra.gmra.mrb[0].mxu0 %v5385_v22  ;;  %1972 = vmatmul.mubr.bf16.vlgmr.msra.gmra.mrb[0].mxu1 %v5385_v22 }
 0x103   :  { %2762 = vmatpush1.bf16.msra.mxu0 %v4655_v45  ;;  %2844 = vmatpush1.bf16.msra.mxu1 %v4658_v46  ;;  %v4745_v45 = vld [vmem:[%s6406_s2 + $0x9e0] ss:$16 sps:$4 sm:$0xff]   ;;  %v4748_v46 = vld [vmem:[%s6406_s2 + $0x9e8] ss:$16 sps:$4 sm:$0xff]  }
 0x104   :  { %2763 = vmatprep.subr.bf16.mxu0 %v4663_v47  ;;  %2845 = vmatprep.subr.bf16.mxu1 %v4666_v48  ;;  %v4753_v47 = vld [vmem:[%s6406_s2 + $0xa04] ss:$16 sps:$4 sm:$0xff]   ;;  %v4756_v48 = vld [vmem:[%s6406_s2 + $0xa0c] ss:$16 sps:$4 sm:$0xff]  }
 0x105   :  { %2793 = vmatprep.mubr.bf16.mxu0 %v2114_v49  ;;  %2875 = vmatprep.mubr.bf16.mxu1 %v2114_v49  ;;  %v2113_v49 = vrot.slane %v5179_v7, 1  ;;  %v4762_v7 = vld [vmem:[%s6406_s2 + $0xa2c] ss:$16 sps:$4 sm:$0xff]  }
 0x107   :  { %2764 = vmatpush1.bf16.msra.mxu0 %v4661_v50  ;;  %2846 = vmatpush1.bf16.msra.mxu1 %v4664_v51  ;;  %v4751_v50 = vld [vmem:[%s6406_s2 + $0xa00] ss:$16 sps:$4 sm:$0xff]   ;;  %v4754_v51 = vld [vmem:[%s6406_s2 + $0xa08] ss:$16 sps:$4 sm:$0xff]  }
 0x108   :  { %2765 = vmatprep.subr.bf16.mxu0 %v4669_v55  ;;  %2847 = vmatprep.subr.bf16.mxu1 %v4672_v52  ;;  %v4759_v55 = vld [vmem:[%s6406_s2 + $0xa24] ss:$16 sps:$4 sm:$0xff]   ;;  %v2116_v52 = vrot.slane %v5189_v11, 1  ;;  %v4768_v11 = vld [vmem:[%s6406_s2 + $0xa4c] ss:$16 sps:$4 sm:$0xff]  }
 0x10b   :  { %2766 = vmatpush1.bf16.msra.mxu0 %v4667_v53  ;;  %2848 = vmatpush1.bf16.msra.mxu1 %v4670_v54  ;;  %v4757_v53 = vld [vmem:[%s6406_s2 + $0xa20] ss:$16 sps:$4 sm:$0xff]   ;;  %v4760_v54 = vld [vmem:[%s6406_s2 + $0xa28] ss:$16 sps:$4 sm:$0xff]  }
 0x10c   :  { %2767 = vmatprep.subr.bf16.mxu0 %v4675_v56  ;;  %2849 = vmatprep.subr.bf16.mxu1 %v4678_v57  ;;  %v4765_v56 = vld [vmem:[%s6406_s2 + $0xa44] ss:$16 sps:$4 sm:$0xff]   ;;  %v4763_v57 = vld [vmem:[%s6406_s2 + $0xa40] ss:$16 sps:$4 sm:$0xff]  }
 0x10f   :  { %2768 = vmatpush1.bf16.msra.mxu0 %v4673_v58  ;;  %2850 = vmatpush1.bf16.msra.mxu1 %v4676_v61  ;;  %v4766_v58 = vld [vmem:[%s6406_s2 + $0xa48] ss:$16 sps:$4 sm:$0xff]   ;;  %v4771_v61 = vld [vmem:[%s6406_s2 + $0xa64] ss:$16 sps:$4 sm:$0xff]  }
 0x110   :  { %2769 = vmatprep.subr.bf16.mxu0 %v4681_v62  ;;  %2851 = vmatprep.subr.bf16.mxu1 %v4684_v63  ;;  %v4774_v62 = vld [vmem:[%s6406_s2 + $0xa6c] ss:$16 sps:$4 sm:$0xff]   ;;  %v4769_v63 = vld [vmem:[%s6406_s2 + $0xa60] ss:$16 sps:$4 sm:$0xff]  }
 0x113   :  { %2770 = vmatpush1.bf16.msra.mxu0 %v4679_v0  ;;  %2852 = vmatpush1.bf16.msra.mxu1 %v4682_v1  ;;  %v4772_v0 = vld [vmem:[%s6406_s2 + $0xa68] ss:$16 sps:$4 sm:$0xff]   ;;  %v4777_v1 = vld [vmem:[%s6406_s2 + $0xa84] ss:$16 sps:$4 sm:$0xff]  }
 0x114   :  { %2771 = vmatprep.subr.bf16.mxu0 %v4687_v2  ;;  %2853 = vmatprep.subr.bf16.mxu1 %v4690_v3  ;;  %v4780_v2 = vld [vmem:[%s6406_s2 + $0xa8c] ss:$16 sps:$4 sm:$0xff]   ;;  %v4775_v3 = vld [vmem:[%s6406_s2 + $0xa80] ss:$16 sps:$4 sm:$0xff]  }
 0x117   :  { %2772 = vmatpush1.bf16.msra.mxu0 %v4685_v4  ;;  %2854 = vmatpush1.bf16.msra.mxu1 %v4688_v5  ;;  %v4778_v4 = vld [vmem:[%s6406_s2 + $0xa88] ss:$16 sps:$4 sm:$0xff]   ;;  %v4783_v5 = vld [vmem:[%s6406_s2 + $0xaa4] ss:$16 sps:$4 sm:$0xff]  }
 0x118   :  { %2773 = vmatprep.subr.bf16.mxu0 %v4693_v6  ;;  %2855 = vmatprep.subr.bf16.mxu1 %v4696_v8  ;;  %v4786_v6 = vld [vmem:[%s6406_s2 + $0xaac] ss:$16 sps:$4 sm:$0xff]   ;;  %v4781_v8 = vld [vmem:[%s6406_s2 + $0xaa0] ss:$16 sps:$4 sm:$0xff]  }
 0x11b   :  { %2774 = vmatpush1.bf16.msra.mxu0 %v4691_v9  ;;  %2856 = vmatpush1.bf16.msra.mxu1 %v4694_v10  ;;  %v4784_v9 = vld [vmem:[%s6406_s2 + $0xaa8] ss:$16 sps:$4 sm:$0xff]   ;;  %v4789_v10 = vld [vmem:[%s6406_s2 + $0xac4] ss:$16 sps:$4 sm:$0xff]  }
 0x11c   :  { %2775 = vmatprep.subr.bf16.mxu0 %v4699_v12  ;;  %2857 = vmatprep.subr.bf16.mxu1 %v4702_v13  ;;  %v4792_v12 = vld [vmem:[%s6406_s2 + $0xacc] ss:$16 sps:$4 sm:$0xff]   ;;  %v4787_v13 = vld [vmem:[%s6406_s2 + $0xac0] ss:$16 sps:$4 sm:$0xff]  }
 0x11f   :  { %2776 = vmatpush1.bf16.msra.mxu0 %v4697_v14  ;;  %2858 = vmatpush1.bf16.msra.mxu1 %v4700_v15  ;;  %v4790_v14 = vld [vmem:[%s6406_s2 + $0xac8] ss:$16 sps:$4 sm:$0xff]   ;;  %v4795_v15 = vld [vmem:[%s6406_s2 + $0xae4] ss:$16 sps:$4 sm:$0xff]  }
 0x120   :  { %2777 = vmatprep.subr.bf16.mxu0 %v4705_v16  ;;  %2859 = vmatprep.subr.bf16.mxu1 %v4708_v17  ;;  %v4798_v16 = vld [vmem:[%s6406_s2 + $0xaec] ss:$16 sps:$4 sm:$0xff]   ;;  %v4793_v17 = vld [vmem:[%s6406_s2 + $0xae0] ss:$16 sps:$4 sm:$0xff]  }
 0x123   :  { %2778 = vmatpush1.bf16.msra.mxu0 %v4703_v18  ;;  %2860 = vmatpush1.bf16.msra.mxu1 %v4706_v19  ;;  %v4796_v18 = vld [vmem:[%s6406_s2 + $0xae8] ss:$16 sps:$4 sm:$0xff]   ;;  %v4801_v19 = vld [vmem:[%s6406_s2 + $0xb04] ss:$16 sps:$4 sm:$0xff]  }
 0x124   :  { %2779 = vmatprep.subr.bf16.mxu0 %v4711_v20  ;;  %2861 = vmatprep.subr.bf16.mxu1 %v4714_v59  ;;  %v4804_v20 = vld [vmem:[%s6406_s2 + $0xb0c] ss:$16 sps:$4 sm:$0xff]   ;;  %v4799_v59 = vld [vmem:[%s6406_s2 + $0xb00] ss:$16 sps:$4 sm:$0xff]  }
 0x127   :  { %2780 = vmatpush1.bf16.msra.mxu0 %v4709_v60  ;;  %2862 = vmatpush1.bf16.msra.mxu1 %v4712_v21  ;;  %v4802_v60 = vld [vmem:[%s6406_s2 + $0xb08] ss:$16 sps:$4 sm:$0xff]   ;;  %v4807_v21 = vld [vmem:[%s6406_s2 + $0xb24] ss:$16 sps:$4 sm:$0xff]  }
 0x128   :  { %2781 = vmatprep.subr.bf16.mxu0 %v4717_v23  ;;  %2863 = vmatprep.subr.bf16.mxu1 %v4720_v24  ;;  %v4810_v23 = vld [vmem:[%s6406_s2 + $0xb2c] ss:$16 sps:$4 sm:$0xff]   ;;  %v4805_v24 = vld [vmem:[%s6406_s2 + $0xb20] ss:$16 sps:$4 sm:$0xff]  }
 0x12b   :  { %2782 = vmatpush1.bf16.msra.mxu0 %v4715_v25  ;;  %2864 = vmatpush1.bf16.msra.mxu1 %v4718_v26  ;;  %v4808_v25 = vld [vmem:[%s6406_s2 + $0xb28] ss:$16 sps:$4 sm:$0xff]   ;;  %v4813_v26 = vld [vmem:[%s6406_s2 + $0xb44] ss:$16 sps:$4 sm:$0xff]  }
 0x12c   :  { %2783 = vmatprep.subr.bf16.mxu0 %v4723_v27  ;;  %2865 = vmatprep.subr.bf16.mxu1 %v4726_v28  ;;  %v4816_v27 = vld [vmem:[%s6406_s2 + $0xb4c] ss:$16 sps:$4 sm:$0xff]   ;;  %v4811_v28 = vld [vmem:[%s6406_s2 + $0xb40] ss:$16 sps:$4 sm:$0xff]  }
 0x12f   :  { %2784 = vmatpush1.bf16.msra.mxu0 %v4721_v29  ;;  %2866 = vmatpush1.bf16.msra.mxu1 %v4724_v30  ;;  %v4814_v29 = vld [vmem:[%s6406_s2 + $0xb48] ss:$16 sps:$4 sm:$0xff]   ;;  %v4819_v30 = vld [vmem:[%s6406_s2 + $0xb64] ss:$16 sps:$4 sm:$0xff]  }
 0x130   :  { %2785 = vmatprep.subr.bf16.mxu0 %v4729_v31  ;;  %2867 = vmatprep.subr.bf16.mxu1 %v4732_v32  ;;  %v4822_v31 = vld [vmem:[%s6406_s2 + $0xb6c] ss:$16 sps:$4 sm:$0xff]   ;;  %v4817_v32 = vld [vmem:[%s6406_s2 + $0xb60] ss:$16 sps:$4 sm:$0xff]  }
 0x133   :  { %2786 = vmatpush1.bf16.msra.mxu0 %v4727_v33  ;;  %2868 = vmatpush1.bf16.msra.mxu1 %v4730_v34  ;;  %v4820_v33 = vld [vmem:[%s6406_s2 + $0xb68] ss:$16 sps:$4 sm:$0xff]   ;;  %v4825_v34 = vld [vmem:[%s6406_s2 + $0xb84] ss:$16 sps:$4 sm:$0xff]  }
 0x134   :  { %2787 = vmatprep.subr.bf16.mxu0 %v4735_v35  ;;  %2869 = vmatprep.subr.bf16.mxu1 %v4738_v36  ;;  %v4828_v35 = vld [vmem:[%s6406_s2 + $0xb8c] ss:$16 sps:$4 sm:$0xff]   ;;  %v4823_v36 = vld [vmem:[%s6406_s2 + $0xb80] ss:$16 sps:$4 sm:$0xff]  }
 0x137   :  { %2788 = vmatpush1.bf16.msra.mxu0 %v4733_v37  ;;  %2870 = vmatpush1.bf16.msra.mxu1 %v4736_v38  ;;  %v4826_v37 = vld [vmem:[%s6406_s2 + $0xb88] ss:$16 sps:$4 sm:$0xff]   ;;  %v4831_v38 = vld [vmem:[%s6406_s2 + $0xba4] ss:$16 sps:$4 sm:$0xff]  }
 0x138   :  { %2789 = vmatprep.subr.bf16.mxu0 %v4741_v39  ;;  %2871 = vmatprep.subr.bf16.mxu1 %v4744_v40  ;;  %v4834_v39 = vld [vmem:[%s6406_s2 + $0xbac] ss:$16 sps:$4 sm:$0xff]   ;;  %v4829_v40 = vld [vmem:[%s6406_s2 + $0xba0] ss:$16 sps:$4 sm:$0xff]  }
 0x13b   :  { %2790 = vmatpush1.bf16.msra.mxu0 %v4739_v41  ;;  %2872 = vmatpush1.bf16.msra.mxu1 %v4742_v42  ;;  %v4832_v41 = vld [vmem:[%s6406_s2 + $0xba8] ss:$16 sps:$4 sm:$0xff]   ;;  %v4837_v42 = vld [vmem:[%s6406_s2 + $0xbc4] ss:$16 sps:$4 sm:$0xff]  }
 0x13c   :  { %2791 = vmatprep.subr.bf16.mxu0 %v4747_v43  ;;  %2873 = vmatprep.subr.bf16.mxu1 %v4750_v44  ;;  %v4840_v43 = vld [vmem:[%s6406_s2 + $0xbcc] ss:$16 sps:$4 sm:$0xff]   ;;  %v4835_v44 = vld [vmem:[%s6406_s2 + $0xbc0] ss:$16 sps:$4 sm:$0xff]  }
 0x13f   :  { %2792 = vmatpush1.bf16.msra.mxu0 %v4745_v45  ;;  %2874 = vmatpush1.bf16.msra.mxu1 %v4748_v46  ;;  %v4838_v45 = vld [vmem:[%s6406_s2 + $0xbc8] ss:$16 sps:$4 sm:$0xff]   ;;  %v4843_v46 = vld [vmem:[%s6406_s2 + $0xbe4] ss:$16 sps:$4 sm:$0xff]  }
 0x140   :  { %2802 = vmatprep.subr.bf16.mxu0 %v4753_v47  ;;  %2884 = vmatprep.subr.bf16.mxu1 %v4756_v48  ;;  %v4846_v47 = vld [vmem:[%s6406_s2 + $0xbec] ss:$16 sps:$4 sm:$0xff]   ;;  %v4841_v48 = vld [vmem:[%s6406_s2 + $0xbe0] ss:$16 sps:$4 sm:$0xff]  }
 0x142   :  { %2794 = vmatmul.mubr.bf16.vlgmr.msra.gmra.mrb[0].mxu0 %v2113_v49  ;;  %2876 = vmatmul.mubr.bf16.vlgmr.msra.gmra.mrb[0].mxu1 %v2113_v49  ;;  %v4844_v49 = vld [vmem:[%s6406_s2 + $0xbe8] ss:$16 sps:$4 sm:$0xff]  }
 0x143   :  { %2803 = vmatpush1.bf16.msra.mxu0 %v4751_v50  ;;  %2885 = vmatpush1.bf16.msra.mxu1 %v4754_v51  ;;  %v4849_v50 = vld [vmem:[%s6409_s5 + $0x4] ss:$16 sps:$4 sm:$0xff]   ;;  %v4852_v51 = vld [vmem:[%s6409_s5 + $0xc] ss:$16 sps:$4 sm:$0xff]  }
 0x144   :  { %2804 = vmatprep.subr.bf16.mxu0 %v4759_v55  ;;  %2886 = vmatprep.subr.bf16.mxu1 %v4762_v7  ;;  %v2115_v55 = vrot.slane %v5385_v22, 1  ;;  %v6202_v7 = vld [vmem:[%s6410_s4] sm:$0xff] }
 0x145   :  { %2834 = vmatprep.mubr.bf16.mxu0 %v2116_v52  ;;  %2916 = vmatprep.mubr.bf16.mxu1 %v2116_v52  ;;  %v4847_v52 = vld [vmem:[%s6409_s5] ss:$16 sps:$4 sm:$0xff]   ;;  %v4855_v22 = vld [vmem:[%s6409_s5 + $0x24] ss:$16 sps:$4 sm:$0xff]  }
 0x147   :  { %2805 = vmatpush1.bf16.msra.mxu0 %v4757_v53  ;;  %2887 = vmatpush1.bf16.msra.mxu1 %v4760_v54  ;;  %v4850_v53 = vld [vmem:[%s6409_s5 + $0x8] ss:$16 sps:$4 sm:$0xff]   ;;  %v4858_v54 = vld [vmem:[%s6409_s5 + $0x2c] ss:$16 sps:$4 sm:$0xff]  }
 0x148   :  { %2806 = vmatprep.subr.bf16.mxu0 %v4765_v56  ;;  %2888 = vmatprep.subr.bf16.mxu1 %v4768_v11  ;;  %v4138_v56 = vcombine.high %v6202_v7, %v6202_v7  ;;  %v4853_v11 = vld [vmem:[%s6409_s5 + $0x20] ss:$16 sps:$4 sm:$0xff]  }
 0x14b   :  { %2807 = vmatpush1.bf16.msra.mxu0 %v4763_v57  ;;  %2889 = vmatpush1.bf16.msra.mxu1 %v4766_v58  ;;  %v4856_v57 = vld [vmem:[%s6409_s5 + $0x28] ss:$16 sps:$4 sm:$0xff]   ;;  %v4861_v58 = vld [vmem:[%s6409_s5 + $0x44] ss:$16 sps:$4 sm:$0xff]  }
 0x14c   :  { %2808 = vmatprep.subr.bf16.mxu0 %v4771_v61  ;;  %2890 = vmatprep.subr.bf16.mxu1 %v4774_v62  ;;  %v4864_v61 = vld [vmem:[%s6409_s5 + $0x4c] ss:$16 sps:$4 sm:$0xff]   ;;  %v4859_v62 = vld [vmem:[%s6409_s5 + $0x40] ss:$16 sps:$4 sm:$0xff]  }
 0x14f   :  { %2809 = vmatpush1.bf16.msra.mxu0 %v4769_v63  ;;  %2891 = vmatpush1.bf16.msra.mxu1 %v4772_v0  ;;  %v4862_v63 = vld [vmem:[%s6409_s5 + $0x48] ss:$16 sps:$4 sm:$0xff]   ;;  %v4867_v0 = vld [vmem:[%s6409_s5 + $0x64] ss:$16 sps:$4 sm:$0xff]  }
 0x150   :  { %2810 = vmatprep.subr.bf16.mxu0 %v4777_v1  ;;  %2892 = vmatprep.subr.bf16.mxu1 %v4780_v2  ;;  %v4870_v1 = vld [vmem:[%s6409_s5 + $0x6c] ss:$16 sps:$4 sm:$0xff]   ;;  %v4865_v2 = vld [vmem:[%s6409_s5 + $0x60] ss:$16 sps:$4 sm:$0xff]  }
 0x153   :  { %2811 = vmatpush1.bf16.msra.mxu0 %v4775_v3  ;;  %2893 = vmatpush1.bf16.msra.mxu1 %v4778_v4  ;;  %v4868_v3 = vld [vmem:[%s6409_s5 + $0x68] ss:$16 sps:$4 sm:$0xff]   ;;  %v4873_v4 = vld [vmem:[%s6409_s5 + $0x84] ss:$16 sps:$4 sm:$0xff]  }
 0x154   :  { %2812 = vmatprep.subr.bf16.mxu0 %v4783_v5  ;;  %2894 = vmatprep.subr.bf16.mxu1 %v4786_v6  ;;  %v4876_v5 = vld [vmem:[%s6409_s5 + $0x8c] ss:$16 sps:$4 sm:$0xff]   ;;  %v4871_v6 = vld [vmem:[%s6409_s5 + $0x80] ss:$16 sps:$4 sm:$0xff]  }
 0x157   :  { %2813 = vmatpush1.bf16.msra.mxu0 %v4781_v8  ;;  %2895 = vmatpush1.bf16.msra.mxu1 %v4784_v9  ;;  %v4874_v8 = vld [vmem:[%s6409_s5 + $0x88] ss:$16 sps:$4 sm:$0xff]   ;;  %v4879_v9 = vld [vmem:[%s6409_s5 + $0xa4] ss:$16 sps:$4 sm:$0xff]  }
 0x158   :  { %2814 = vmatprep.subr.bf16.mxu0 %v4789_v10  ;;  %2896 = vmatprep.subr.bf16.mxu1 %v4792_v12  ;;  %v4882_v10 = vld [vmem:[%s6409_s5 + $0xac] ss:$16 sps:$4 sm:$0xff]   ;;  %v4877_v12 = vld [vmem:[%s6409_s5 + $0xa0] ss:$16 sps:$4 sm:$0xff]  }
 0x15b   :  { %2815 = vmatpush1.bf16.msra.mxu0 %v4787_v13  ;;  %2897 = vmatpush1.bf16.msra.mxu1 %v4790_v14  ;;  %v4880_v13 = vld [vmem:[%s6409_s5 + $0xa8] ss:$16 sps:$4 sm:$0xff]   ;;  %v4885_v14 = vld [vmem:[%s6409_s5 + $0xc4] ss:$16 sps:$4 sm:$0xff]  }
 0x15c   :  { %2816 = vmatprep.subr.bf16.mxu0 %v4795_v15  ;;  %2898 = vmatprep.subr.bf16.mxu1 %v4798_v16  ;;  %v4888_v15 = vld [vmem:[%s6409_s5 + $0xcc] ss:$16 sps:$4 sm:$0xff]   ;;  %v4883_v16 = vld [vmem:[%s6409_s5 + $0xc0] ss:$16 sps:$4 sm:$0xff]  }
 0x15f   :  { %2817 = vmatpush1.bf16.msra.mxu0 %v4793_v17  ;;  %2899 = vmatpush1.bf16.msra.mxu1 %v4796_v18  ;;  %v4886_v17 = vld [vmem:[%s6409_s5 + $0xc8] ss:$16 sps:$4 sm:$0xff]   ;;  %v4891_v18 = vld [vmem:[%s6409_s5 + $0xe4] ss:$16 sps:$4 sm:$0xff]  }
 0x160   :  { %2818 = vmatprep.subr.bf16.mxu0 %v4801_v19  ;;  %2900 = vmatprep.subr.bf16.mxu1 %v4804_v20  ;;  %v4894_v19 = vld [vmem:[%s6409_s5 + $0xec] ss:$16 sps:$4 sm:$0xff]   ;;  %v4889_v20 = vld [vmem:[%s6409_s5 + $0xe0] ss:$16 sps:$4 sm:$0xff]  }
 0x163   :  { %2819 = vmatpush1.bf16.msra.mxu0 %v4799_v59  ;;  %2901 = vmatpush1.bf16.msra.mxu1 %v4802_v60  ;;  %v4892_v59 = vld [vmem:[%s6409_s5 + $0xe8] ss:$16 sps:$4 sm:$0xff]   ;;  %v4897_v60 = vld [vmem:[%s6409_s5 + $0x104] ss:$16 sps:$4 sm:$0xff]  }
 0x164   :  { %2820 = vmatprep.subr.bf16.mxu0 %v4807_v21  ;;  %2902 = vmatprep.subr.bf16.mxu1 %v4810_v23  ;;  %v4900_v21 = vld [vmem:[%s6409_s5 + $0x10c] ss:$16 sps:$4 sm:$0xff]   ;;  %v4895_v23 = vld [vmem:[%s6409_s5 + $0x100] ss:$16 sps:$4 sm:$0xff]  }
 0x167   :  { %2821 = vmatpush1.bf16.msra.mxu0 %v4805_v24  ;;  %2903 = vmatpush1.bf16.msra.mxu1 %v4808_v25  ;;  %v4898_v24 = vld [vmem:[%s6409_s5 + $0x108] ss:$16 sps:$4 sm:$0xff]   ;;  %v4903_v25 = vld [vmem:[%s6409_s5 + $0x124] ss:$16 sps:$4 sm:$0xff]  }
 0x168   :  { %2822 = vmatprep.subr.bf16.mxu0 %v4813_v26  ;;  %2904 = vmatprep.subr.bf16.mxu1 %v4816_v27  ;;  %v4906_v26 = vld [vmem:[%s6409_s5 + $0x12c] ss:$16 sps:$4 sm:$0xff]   ;;  %v4901_v27 = vld [vmem:[%s6409_s5 + $0x120] ss:$16 sps:$4 sm:$0xff]  }
 0x16b   :  { %2823 = vmatpush1.bf16.msra.mxu0 %v4811_v28  ;;  %2905 = vmatpush1.bf16.msra.mxu1 %v4814_v29  ;;  %v4904_v28 = vld [vmem:[%s6409_s5 + $0x128] ss:$16 sps:$4 sm:$0xff]   ;;  %v4909_v29 = vld [vmem:[%s6409_s5 + $0x144] ss:$16 sps:$4 sm:$0xff]  }
 0x16c   :  { %2824 = vmatprep.subr.bf16.mxu0 %v4819_v30  ;;  %2906 = vmatprep.subr.bf16.mxu1 %v4822_v31  ;;  %v4912_v30 = vld [vmem:[%s6409_s5 + $0x14c] ss:$16 sps:$4 sm:$0xff]   ;;  %v4907_v31 = vld [vmem:[%s6409_s5 + $0x140] ss:$16 sps:$4 sm:$0xff]  }
 0x16f   :  { %2825 = vmatpush1.bf16.msra.mxu0 %v4817_v32  ;;  %2907 = vmatpush1.bf16.msra.mxu1 %v4820_v33  ;;  %v4910_v32 = vld [vmem:[%s6409_s5 + $0x148] ss:$16 sps:$4 sm:$0xff]   ;;  %v4915_v33 = vld [vmem:[%s6409_s5 + $0x164] ss:$16 sps:$4 sm:$0xff]  }
 0x170   :  { %2826 = vmatprep.subr.bf16.mxu0 %v4825_v34  ;;  %2908 = vmatprep.subr.bf16.mxu1 %v4828_v35  ;;  %v4918_v34 = vld [vmem:[%s6409_s5 + $0x16c] ss:$16 sps:$4 sm:$0xff]   ;;  %v4913_v35 = vld [vmem:[%s6409_s5 + $0x160] ss:$16 sps:$4 sm:$0xff]  }
 0x173   :  { %2827 = vmatpush1.bf16.msra.mxu0 %v4823_v36  ;;  %2909 = vmatpush1.bf16.msra.mxu1 %v4826_v37  ;;  %v4916_v36 = vld [vmem:[%s6409_s5 + $0x168] ss:$16 sps:$4 sm:$0xff]   ;;  %v4921_v37 = vld [vmem:[%s6409_s5 + $0x184] ss:$16 sps:$4 sm:$0xff]  }
 0x174   :  { %2828 = vmatprep.subr.bf16.mxu0 %v4831_v38  ;;  %2910 = vmatprep.subr.bf16.mxu1 %v4834_v39  ;;  %v4924_v38 = vld [vmem:[%s6409_s5 + $0x18c] ss:$16 sps:$4 sm:$0xff]   ;;  %v4919_v39 = vld [vmem:[%s6409_s5 + $0x180] ss:$16 sps:$4 sm:$0xff]  }
 0x177   :  { %2829 = vmatpush1.bf16.msra.mxu0 %v4829_v40  ;;  %2911 = vmatpush1.bf16.msra.mxu1 %v4832_v41  ;;  %v4922_v40 = vld [vmem:[%s6409_s5 + $0x188] ss:$16 sps:$4 sm:$0xff]   ;;  %v4927_v41 = vld [vmem:[%s6409_s5 + $0x1a4] ss:$16 sps:$4 sm:$0xff]  }
 0x178   :  { %2830 = vmatprep.subr.bf16.mxu0 %v4837_v42  ;;  %2912 = vmatprep.subr.bf16.mxu1 %v4840_v43  ;;  %v4930_v42 = vld [vmem:[%s6409_s5 + $0x1ac] ss:$16 sps:$4 sm:$0xff]   ;;  %v4925_v43 = vld [vmem:[%s6409_s5 + $0x1a0] ss:$16 sps:$4 sm:$0xff]  }
 0x17b   :  { %2831 = vmatpush1.bf16.msra.mxu0 %v4835_v44  ;;  %2913 = vmatpush1.bf16.msra.mxu1 %v4838_v45  ;;  %v4928_v44 = vld [vmem:[%s6409_s5 + $0x1a8] ss:$16 sps:$4 sm:$0xff]   ;;  %v4933_v45 = vld [vmem:[%s6409_s5 + $0x1c4] ss:$16 sps:$4 sm:$0xff]  }
 0x17c   :  { %2832 = vmatprep.subr.bf16.mxu0 %v4843_v46  ;;  %2914 = vmatprep.subr.bf16.mxu1 %v4846_v47  ;;  %v4936_v46 = vld [vmem:[%s6409_s5 + $0x1cc] ss:$16 sps:$4 sm:$0xff]   ;;  %v4931_v47 = vld [vmem:[%s6409_s5 + $0x1c0] ss:$16 sps:$4 sm:$0xff]  }
 0x17f   :  { %2833 = vmatpush1.bf16.msra.mxu0 %v4841_v48  ;;  %2915 = vmatpush1.bf16.msra.mxu1 %v4844_v49  ;;  %v4934_v48 = vld [vmem:[%s6409_s5 + $0x1c8] ss:$16 sps:$4 sm:$0xff]   ;;  %v4939_v49 = vld [vmem:[%s6409_s5 + $0x1e4] ss:$16 sps:$4 sm:$0xff]  }
 0x180   :  { %3369 = vmatprep.subr.bf16.mxu0 %v4849_v50  ;;  %3410 = vmatprep.subr.bf16.mxu1 %v4852_v51  ;;  %v4942_v50 = vld [vmem:[%s6409_s5 + $0x1ec] ss:$16 sps:$4 sm:$0xff]   ;;  %v4937_v51 = vld [vmem:[%s6409_s5 + $0x1e0] ss:$16 sps:$4 sm:$0xff]  }
 0x182   :  { %2835 = vmatmul.mubr.bf16.vlgmr.msra.gmra.mrb[0].mxu0 %v2115_v55  ;;  %2917 = vmatmul.mubr.bf16.vlgmr.msra.gmra.mrb[0].mxu1 %v2115_v55  ;;  %v4940_v55 = vld [vmem:[%s6409_s5 + $0x1e8] ss:$16 sps:$4 sm:$0xff]  }
 0x183   :  { %3370 = vmatpush1.bf16.msra.mxu0 %v4847_v52  ;;  %3411 = vmatpush1.bf16.msra.mxu1 %v4850_v53  ;;  %v4137_v52 = vcombine.low %v6202_v7, %v6202_v7  ;;  %v2931_v53 = vlaneseq }
 0x184   :  { %3371 = vmatprep.subr.bf16.mxu0 %v4855_v22  ;;  %3412 = vmatprep.subr.bf16.mxu1 %v4858_v54 }
 0x185   :  { %3401 = vmatprep.mubr.bf16.mxu0 %v4138_v56  ;;  %3442 = vmatprep.mubr.bf16.mxu1 %v4138_v56  ;;  %v2932_v22 = vshrl.u32 %v2931_v53, 7 }
 0x187   :  { %3372 = vmatpush1.bf16.msra.mxu0 %v4853_v11  ;;  %3413 = vmatpush1.bf16.msra.mxu1 %v4856_v57  ;;  %v2933_v54 = vsub.s32 0, %v2932_v22  ;;  %v2941_v56 = vsub.s32 2, %v2932_v22  ;;  %v2929_v11 = vld [vmem:[%s6411_s3] sm:$0xf] }
 0x188   :  { %3373 = vmatprep.subr.bf16.mxu0 %v4861_v58  ;;  %3414 = vmatprep.subr.bf16.mxu1 %v4864_v61  ;;  %v3020_v57 = vld [vmem:[%s6412_s6] sm:$0xf]  ;;  %v2937_v58 = vsub.s32 1, %v2932_v22  ;;  %v2945_v61 = vsub.s32 3, %v2932_v22 }
 0x189   :  { %v3025_v7 = vrot.slane %v3020_v57, %v2933_v54 }
 0x18b   :  { %3374 = vmatpush1.bf16.msra.mxu0 %v4859_v62  ;;  %3415 = vmatpush1.bf16.msra.mxu1 %v4862_v63  ;;  %v2934_v62 = vrot.slane %v2929_v11, %v2933_v54  ;;  %v2942_v63 = vrot.slane %v2929_v11, %v2941_v56 }
 0x18c   :  { %3375 = vmatprep.subr.bf16.mxu0 %v4867_v0  ;;  %3416 = vmatprep.subr.bf16.mxu1 %v4870_v1  ;;  %v3033_v0 = vrot.slane %v3020_v57, %v2941_v56  ;;  %v2938_v1 = vrot.slane %v2929_v11, %v2937_v58 }
 0x18f   :  { %3376 = vmatpush1.bf16.msra.mxu0 %v4865_v2  ;;  %3417 = vmatpush1.bf16.msra.mxu1 %v4868_v3  ;;  %v3029_v2 = vrot.slane %v3020_v57, %v2937_v58  ;;  %v2946_v3 = vrot.slane %v2929_v11, %v2945_v61 }
 0x190   :  { %3377 = vmatprep.subr.bf16.mxu0 %v4873_v4  ;;  %3418 = vmatprep.subr.bf16.mxu1 %v4876_v5  ;;  %v3037_v4 = vrot.slane %v3020_v57, %v2945_v61  ;;  %v4207_v5 = vadd.f32 %v3025_v7, %v2934_v62 }
 0x193   :  { %3378 = vmatpush1.bf16.msra.mxu0 %v4871_v6  ;;  %3419 = vmatpush1.bf16.msra.mxu1 %v4874_v8  ;;  %v4211_v6 = vadd.f32 %v3033_v0, %v2942_v63  ;;  %v4209_v8 = vadd.f32 %v3029_v2, %v2938_v1 }
 0x194   :  { %3379 = vmatprep.subr.bf16.mxu0 %v4879_v9  ;;  %3420 = vmatprep.subr.bf16.mxu1 %v4882_v10  ;;  %v4213_v9 = vadd.f32 %v3037_v4, %v2946_v3 }
 0x197   :  { %3380 = vmatpush1.bf16.msra.mxu0 %v4877_v12  ;;  %3421 = vmatpush1.bf16.msra.mxu1 %v4880_v13 }
 0x198   :  { %3381 = vmatprep.subr.bf16.mxu0 %v4885_v14  ;;  %3422 = vmatprep.subr.bf16.mxu1 %v4888_v15 }
 0x19b   :  { %3382 = vmatpush1.bf16.msra.mxu0 %v4883_v16  ;;  %3423 = vmatpush1.bf16.msra.mxu1 %v4886_v17 }
 0x19c   :  { %3383 = vmatprep.subr.bf16.mxu0 %v4891_v18  ;;  %3424 = vmatprep.subr.bf16.mxu1 %v4894_v19 }
 0x19f   :  { %3384 = vmatpush1.bf16.msra.mxu0 %v4889_v20  ;;  %3425 = vmatpush1.bf16.msra.mxu1 %v4892_v59 }
 0x1a0   :  { %3385 = vmatprep.subr.bf16.mxu0 %v4897_v60  ;;  %3426 = vmatprep.subr.bf16.mxu1 %v4900_v21 }
 0x1a3   :  { %3386 = vmatpush1.bf16.msra.mxu0 %v4895_v23  ;;  %3427 = vmatpush1.bf16.msra.mxu1 %v4898_v24 }
 0x1a4   :  { %3387 = vmatprep.subr.bf16.mxu0 %v4903_v25  ;;  %3428 = vmatprep.subr.bf16.mxu1 %v4906_v26 }
 0x1a7   :  { %3388 = vmatpush1.bf16.msra.mxu0 %v4901_v27  ;;  %3429 = vmatpush1.bf16.msra.mxu1 %v4904_v28 }
 0x1a8   :  { %3389 = vmatprep.subr.bf16.mxu0 %v4909_v29  ;;  %3430 = vmatprep.subr.bf16.mxu1 %v4912_v30 }
 0x1ab   :  { %3390 = vmatpush1.bf16.msra.mxu0 %v4907_v31  ;;  %3431 = vmatpush1.bf16.msra.mxu1 %v4910_v32 }
 0x1ac   :  { %3391 = vmatprep.subr.bf16.mxu0 %v4915_v33  ;;  %3432 = vmatprep.subr.bf16.mxu1 %v4918_v34 }
 0x1af   :  { %3392 = vmatpush1.bf16.msra.mxu0 %v4913_v35  ;;  %3433 = vmatpush1.bf16.msra.mxu1 %v4916_v36 }
 0x1b0   :  { %3393 = vmatprep.subr.bf16.mxu0 %v4921_v37  ;;  %3434 = vmatprep.subr.bf16.mxu1 %v4924_v38 }
 0x1b3   :  { %3394 = vmatpush1.bf16.msra.mxu0 %v4919_v39  ;;  %3435 = vmatpush1.bf16.msra.mxu1 %v4922_v40 }
 0x1b4   :  { %3395 = vmatprep.subr.bf16.mxu0 %v4927_v41  ;;  %3436 = vmatprep.subr.bf16.mxu1 %v4930_v42 }
 0x1b7   :  { %3396 = vmatpush1.bf16.msra.mxu0 %v4925_v43  ;;  %3437 = vmatpush1.bf16.msra.mxu1 %v4928_v44 }
 0x1b8   :  { %3397 = vmatprep.subr.bf16.mxu0 %v4933_v45  ;;  %3438 = vmatprep.subr.bf16.mxu1 %v4936_v46 }
 0x1bb   :  { %3398 = vmatpush1.bf16.msra.mxu0 %v4931_v47  ;;  %3439 = vmatpush1.bf16.msra.mxu1 %v4934_v48 }
 0x1bc   :  { %3399 = vmatprep.subr.bf16.mxu0 %v4939_v49  ;;  %3440 = vmatprep.subr.bf16.mxu1 %v4942_v50 }
 0x1bf   :  { %3400 = vmatpush1.bf16.msra.mxu0 %v4937_v51  ;;  %3441 = vmatpush1.bf16.msra.mxu1 %v4940_v55 }
 0x1c2   :  { %3402 = vmatmul.mubr.bf16.vlgmr.msra.gmra.mrb[0].mxu0 %v4137_v52  ;;  %3443 = vmatmul.mubr.bf16.vlgmr.msra.gmra.mrb[0].mxu1 %v4137_v52 }
 0x295   :  { %v3403_v10 = vpop.f32.mrb[0].mxu0  ;;  %v3444_v12 = vpop.f32.mrb[0].mxu1 }
 0x296   :  { %v4208_v13 = vadd.f32 %v4207_v5, %v3403_v10  ;;  %v4212_v14 = vadd.f32 %v4211_v6, %v3444_v12  ;;  %v3405_v15 = vpop.f32.mrb[1].mxu0  ;;  %v3446_v16 = vpop.f32.mrb[1].mxu1 }
 0x297   :  { %v4210_v17 = vadd.f32 %v4209_v8, %v3405_v15  ;;  %v4214_v18 = vadd.f32 %v4213_v9, %v3446_v16  ;;  %v3407_v19 = vpop.f32.mrb[2].mxu0  ;;  %v3448_v20 = vpop.f32.mrb[2].mxu1 }
 0x298   :  { %v3455_v59 = vmax.f32 %v4208_v13, 0.0  ;;  %v3457_v60 = vmax.f32 %v4212_v14, 0.0  ;;  %v3408_v21 = vpop.f32.mrb[3].mxu0  ;;  %v3449_v23 = vpop.f32.mrb[3].mxu1 }
 0x299   :  { %v3456_v24 = vmax.f32 %v4210_v17, 0.0  ;;  %v3458_v25 = vmax.f32 %v4214_v18, 0.0 }
 0x29b   :  { %v4205_v26 = vpack.c.bf16 %v3456_v24, %v3455_v59  ;;  %v4206_v27 = vpack.c.bf16 %v3458_v25, %v3457_v60 }
 0x29d   :  { %3475 = vst [vmem:[%s6413_s7] sm:$0xff] %v4205_v26  ;;  %3476 = vst [vmem:[%s6413_s7 + $0x8] sm:$0xff] %v4206_v27 }

</bundles_post_ra>
